<compile_context>
chip_gen: v5e
topology: v5e:2x2
jax: 0.10.0
libtpu: 0.0.40
codegen_flags: <defaults>
</compile_context>

<pallas_src>
import jax
import jax.numpy as jnp
from jax.experimental import pallas as pl
from jax.experimental.pallas import tpu as pltpu


# ------------------------------- helpers ------------------------------------ #

def _pick_tile(total, target, multiple):
    """Largest tile <= target that evenly divides `total` and is a multiple of
    `multiple`; falls back to the full extent (always a legal block)."""
    if total <= target:
        return total
    for t in range(target, 0, -1):
        if total % t == 0 and t % multiple == 0:
            return t
    return total


# ----------------------- fused conv1/conv2/maxpool kernel -------------------- #

def _conv_pool_kernel(p1_ref, w1_ref, b1_ref, w2_ref, b2_ref, s_ref, o_ref,
                      h1_scr, acc_scr, m_scr):
    """One image: conv1 -> conv2 -> 2x2 maxpool, fully VMEM-resident.

    p1_ref : (1, 676, 9)  f32  conv1 im2col patches, rows = h*26+w, cols = kh*3+kw
    w1_ref : (9, 32)      f32
    b1_ref : (1, 32)      f32
    w2_ref : (288, 64)    f32  rows = kh*96 + kw*32 + cin
    b2_ref : (1, 64)      f32
    s_ref  : (144, 597)   f32  0/1 pool-window selection matrix
    o_ref  : (1, 72, 128) bf16 pooled output; lanes = [pos i ch | pos i+72 ch]
    h1_scr : (680, 32)    f32  conv1 activation (676 rows + 4 zeroed pad rows)
    acc_scr: (624, 64)    f32  conv2 pre-activation over 24x26 full-width rows
    m_scr  : (597, 64)    f32  2x2 window max at every anchor row
    """
    # ---- conv1: (676, 9) @ (9, 32) + bias, ReLU (f32) ----
    h1 = jnp.dot(p1_ref[0], w1_ref[...], preferred_element_type=jnp.float32)
    h1_scr[0:676, :] = jnp.maximum(h1 + b1_ref[...], 0.0)
    # Zero the pad rows: the out-of-image taps below only feed never-selected
    # columns, but they must stay finite (0 * NaN would poison S @ M).
    h1_scr[676:680, :] = jnp.zeros((4, 32), jnp.float32)

    # ---- conv2 as 9 shifted tap matmuls over full-width rows ----
    # Output row p = r*26 + s (r in 0..23, s in 0..25; s = 24, 25 are harmless
    # garbage).  Tap (kh, kw) reads h1 rows p + kh*26 + kw.
    for kh in range(3):
        for kw in range(3):
            t = kh * 3 + kw
            start = kh * 26 + kw
            part = jnp.dot(h1_scr[start:start + 624, :],
                           w2_ref[t * 32:(t + 1) * 32, :],
                           preferred_element_type=jnp.float32)
            if t == 0:
                acc_scr[...] = part
            else:
                acc_scr[...] += part

    # ---- 2x2 max pool (bias + ReLU commute with max -> applied after) ----
    m_scr[...] = jnp.maximum(
        jnp.maximum(acc_scr[0:597, :], acc_scr[1:598, :]),
        jnp.maximum(acc_scr[26:623, :], acc_scr[27:624, :]))
    pooled = jnp.dot(s_ref[...], m_scr[...],
                     preferred_element_type=jnp.float32)            # (144, 64)
    h2 = jnp.maximum(pooled + b2_ref[...], 0.0)
    # Lane-dense (72, 128) output block: row i packs pooled positions i, i+72.
    o_ref[0, :, 0:64] = h2[0:72, :].astype(o_ref.dtype)
    o_ref[0, :, 64:128] = h2[72:144, :].astype(o_ref.dtype)


def conv_pool_fused(p1, w1, b1, w2, b2, sel):
    n = p1.shape[0]
    cost = pl.CostEstimate(
        flops=n * 2 * (676 * 9 * 32 + 624 * 288 * 64 + 144 * 597 * 64),
        transcendentals=0,
        bytes_accessed=4 * (p1.size + w1.size + w2.size + sel.size) + 2 * n * 9216)
    return pl.pallas_call(
        _conv_pool_kernel,
        out_shape=jax.ShapeDtypeStruct((n, 72, 128), jnp.bfloat16),
        grid=(n,),
        in_specs=[
            pl.BlockSpec((1, 676, 9), lambda i: (i, 0, 0)),
            pl.BlockSpec((9, 32), lambda i: (0, 0)),
            pl.BlockSpec((1, 32), lambda i: (0, 0)),
            pl.BlockSpec((288, 64), lambda i: (0, 0)),
            pl.BlockSpec((1, 64), lambda i: (0, 0)),
            pl.BlockSpec((144, 597), lambda i: (0, 0)),
        ],
        out_specs=pl.BlockSpec((1, 72, 128), lambda i: (i, 0, 0)),
        scratch_shapes=[
            pltpu.VMEM((680, 32), jnp.float32),
            pltpu.VMEM((624, 64), jnp.float32),
            pltpu.VMEM((597, 64), jnp.float32),
        ],
        compiler_params=pltpu.CompilerParams(dimension_semantics=("parallel",)),
        cost_estimate=cost,
    )(p1, w1, b1, w2, b2, sel)


# ------------------------------- fc1 + fc2 kernel ---------------------------- #

def _fc_fused_kernel(x_ref, w1_ref, b1_ref, w2_ref, b2_ref, o_ref, acc_ref):
    # K-tiled fc1 with f32 accumulator; fc2 fused into the final K step.
    k = pl.program_id(0)

    @pl.when(k == 0)
    def _():
        acc_ref[...] = jnp.zeros_like(acc_ref)

    acc_ref[...] += jnp.dot(x_ref[...], w1_ref[...],
                            preferred_element_type=jnp.float32)

    @pl.when(k == pl.num_programs(0) - 1)
    def _():
        h = jnp.maximum(acc_ref[...] + b1_ref[...], 0.0)           # fc1 + ReLU (f32)
        logits = jnp.dot(h, w2_ref[...],
                         preferred_element_type=jnp.float32) + b2_ref[...]
        o_ref[...] = logits.astype(o_ref.dtype)


def fc_fused(x, w1, b1, w2, b2, tk_target=1152):
    """x: (B, 9216) bf16; w1: (9216, 128) bf16; w2: (128, 10) f32 -> (B, 10) f32."""
    m, k = x.shape
    h = w1.shape[1]
    c = w2.shape[1]
    tk = _pick_tile(k, tk_target, 128)
    cost = pl.CostEstimate(
        flops=2 * m * k * h + 2 * m * h * c, transcendentals=0,
        bytes_accessed=2 * (x.size + w1.size) + 4 * (w2.size + b1.size + b2.size + m * c))
    return pl.pallas_call(
        _fc_fused_kernel,
        out_shape=jax.ShapeDtypeStruct((m, c), jnp.float32),
        grid=(k // tk,),
        in_specs=[pl.BlockSpec((m, tk), lambda kk: (0, kk)),
                  pl.BlockSpec((tk, h), lambda kk: (kk, 0)),
                  pl.BlockSpec((1, h), lambda kk: (0, 0)),
                  pl.BlockSpec((h, c), lambda kk: (0, 0)),
                  pl.BlockSpec((1, c), lambda kk: (0, 0))],
        out_specs=pl.BlockSpec((m, c), lambda kk: (0, 0)),
        scratch_shapes=[pltpu.VMEM((m, h), jnp.float32)],
        compiler_params=pltpu.CompilerParams(dimension_semantics=("arbitrary",)),
        cost_estimate=cost,
    )(x, w1, b1, w2, b2)


# -------------------------------- JAX glue ----------------------------------- #

def im2col_3x3(x):
    """(N,H,W,C) -> (N, (H-2)*(W-2), 9*C); columns ordered (kh, kw, c)."""
    n, hgt, wid, c = x.shape
    oh, ow = hgt - 2, wid - 2
    cols = [x[:, i:i + oh, j:j + ow, :] for i in range(3) for j in range(3)]
    patches = jnp.concatenate(cols, axis=-1)          # (N, OH, OW, 9*C)
    return patches.reshape(n, oh * ow, 9 * c)


def prepare_params(p):
    """One-time permutation/casting of PyTorch-layout params into kernel-friendly
    layouts, including the max-pool selection matrix and the fc1 weight-row
    permutation that matches the fused kernel's flattened pooled layout."""
    def conv_w(w):
        cout, cin, kh, kw = w.shape
        return jnp.transpose(w, (2, 3, 1, 0)).reshape(kh * kw * cin, cout) \
                  .astype(jnp.float32)

    # Pool-window selection: row q = h2*12 + w2 picks the 2x2 window anchored
    # at conv2 full-width row 52*h2 + 2*w2.
    q = jnp.arange(144)
    anchors = 52 * (q // 12) + 2 * (q % 12)
    sel = jnp.zeros((144, 597), jnp.float32).at[q, anchors].set(1.0)

    # fc1 weight: torch columns are c*144 + q (NCHW flatten).  Kernel flat
    # index f = i*128 + j maps to (q, c) = (i, j) for j < 64 and
    # (i + 72, j - 64) for j >= 64.
    w1 = p['fc1_w'].reshape(128, 64, 144)              # [out, c, q]
    w1 = jnp.transpose(w1, (2, 1, 0))                  # [q, c, out]
    w1 = jnp.concatenate([w1[:72], w1[72:]], axis=1)   # (72, 128, 128)
    w1 = w1.reshape(9216, 128)

    return {
        'c1w': conv_w(p['conv1_w']),
        'c1b': p['conv1_b'].reshape(1, -1).astype(jnp.float32),
        'c2w': conv_w(p['conv2_w']),
        'c2b': p['conv2_b'].reshape(1, -1).astype(jnp.float32),
        'pool_sel': sel,
        'fc1w': w1.astype(jnp.bfloat16),
        'fc1b': p['fc1_b'].reshape(1, -1).astype(jnp.float32),
        'fc2w': p['fc2_w'].T.astype(jnp.float32),
        'fc2b': p['fc2_b'].reshape(1, -1).astype(jnp.float32),
    }


def simple_cnn_forward(x_nchw, kp):
    n = x_nchw.shape[0]
    x = jnp.transpose(x_nchw, (0, 2, 3, 1)).astype(jnp.float32)     # (N, 28, 28, 1)
    p1 = im2col_3x3(x)                                              # (N, 676, 9)
    pooled = conv_pool_fused(p1, kp['c1w'], kp['c1b'],
                             kp['c2w'], kp['c2b'], kp['pool_sel'])  # (N, 72, 128)
    flat = pooled.reshape(n, 9216)                                  # free reshape
    return fc_fused(flat, kp['fc1w'], kp['fc1b'], kp['fc2w'], kp['fc2b'])


def init_params(key):
    """Deterministic PyTorch-style uniform(-1/sqrt(fan_in), 1/sqrt(fan_in)) init."""
    def uinit(k, shape, fan_in):
        bound = 1.0 / (fan_in ** 0.5)
        return jax.random.uniform(k, shape, jnp.float32, -bound, bound)

    ks = jax.random.split(key, 8)
    return {
        'conv1_w': uinit(ks[0], (32, 1, 3, 3), 1 * 3 * 3),
        'conv1_b': uinit(ks[1], (32,), 1 * 3 * 3),
        'conv2_w': uinit(ks[2], (64, 32, 3, 3), 32 * 3 * 3),
        'conv2_b': uinit(ks[3], (64,), 32 * 3 * 3),
        'fc1_w':   uinit(ks[4], (128, 9216), 9216),
        'fc1_b':   uinit(ks[5], (128,), 9216),
        'fc2_w':   uinit(ks[6], (10, 128), 128),
        'fc2_b':   uinit(ks[7], (10,), 128),
    }


def reference_forward(x, p):
    """Pure-JAX f32 reference mirroring the PyTorch forward exactly."""
    dn = ('NCHW', 'OIHW', 'NCHW')
    y = jax.lax.conv_general_dilated(x, p['conv1_w'], (1, 1), 'VALID',
                                     dimension_numbers=dn)
    y = jax.nn.relu(y + p['conv1_b'][None, :, None, None])
    y = jax.lax.conv_general_dilated(y, p['conv2_w'], (1, 1), 'VALID',
                                     dimension_numbers=dn)
    y = jax.nn.relu(y + p['conv2_b'][None, :, None, None])
    y = jax.lax.reduce_window(y, -jnp.inf, jax.lax.max,
                              (1, 1, 2, 2), (1, 1, 2, 2), 'VALID')
    y = y.reshape(y.shape[0], -1)
    y = jax.nn.relu(y @ p['fc1_w'].T + p['fc1_b'])
    return y @ p['fc2_w'].T + p['fc2_b']


if __name__ == "__main__":
    key = jax.random.PRNGKey(0)
    pkey, xkey = jax.random.split(key)
    params = init_params(pkey)
    kparams = prepare_params(params)
    # fc1 expects 9216 = 64*12*12 features, which pins the spatial size at 28x28.
    x = jax.random.normal(xkey, (2, 1, 28, 28), dtype=jnp.float32)

    fwd = jax.jit(simple_cnn_forward)
    out = jax.block_until_ready(fwd(x, kparams))
    ref = jax.block_until_ready(reference_forward(x, params))

    assert out.shape == (2, 10)
    # bf16 only on the pooled activation / fc1 weight; f32 conv path.
    assert jnp.allclose(out, ref, atol=2e-2, rtol=2e-2), "mismatch vs reference"

    print("KERNEL_OK")
</pallas_src>

<mosaic_0001>
module attributes {stable_mosaic.version = 11 : i64} {
  func.func @_conv_pool_kernel(%arg0: i32, %arg1: memref<1x676x9xf32, #tpu.memory_space<vmem>>, %arg2: memref<9x32xf32, #tpu.memory_space<vmem>>, %arg3: memref<1x32xf32, #tpu.memory_space<vmem>>, %arg4: memref<288x64xf32, #tpu.memory_space<vmem>>, %arg5: memref<1x64xf32, #tpu.memory_space<vmem>>, %arg6: memref<144x597xf32, #tpu.memory_space<vmem>>, %arg7: memref<1x72x128xbf16, #tpu.memory_space<vmem>>, %arg8: memref<680x32xf32, #tpu.memory_space<vmem>>, %arg9: memref<624x64xf32, #tpu.memory_space<vmem>>, %arg10: memref<597x64xf32, #tpu.memory_space<vmem>>) attributes {dimension_semantics = [#tpu.dimension_semantics<parallel>], iteration_bounds = array<i64: 2>, scalar_prefetch = 0 : i64, scratch_operands = 3 : i64, tpu.core_type = #tpu.core_type<tc>, window_params = [{transform_indices = @transform_0, window_bounds = array<i64: 1, 676, 9>}, {pipeline_mode = #tpu.pipeline_mode<synchronous>, transform_indices = @transform_1, window_bounds = array<i64: 9, 32>}, {pipeline_mode = #tpu.pipeline_mode<synchronous>, transform_indices = @transform_2, window_bounds = array<i64: 1, 32>}, {pipeline_mode = #tpu.pipeline_mode<synchronous>, transform_indices = @transform_3, window_bounds = array<i64: 288, 64>}, {pipeline_mode = #tpu.pipeline_mode<synchronous>, transform_indices = @transform_4, window_bounds = array<i64: 1, 64>}, {pipeline_mode = #tpu.pipeline_mode<synchronous>, transform_indices = @transform_5, window_bounds = array<i64: 144, 597>}, {transform_indices = @transform_6, window_bounds = array<i64: 1, 72, 128>}]} {
    %c0 = arith.constant 0 : index
    %c0_0 = arith.constant 0 : index
    %c0_1 = arith.constant 0 : index
    %0 = vector.load %arg1[%c0, %c0_0, %c0_1] : memref<1x676x9xf32, #tpu.memory_space<vmem>>, vector<1x676x9xf32>
    %1 = vector.shape_cast %0 : vector<1x676x9xf32> to vector<676x9xf32>
    %c0_2 = arith.constant 0 : index
    %c0_3 = arith.constant 0 : index
    %2 = vector.load %arg2[%c0_2, %c0_3] : memref<9x32xf32, #tpu.memory_space<vmem>>, vector<9x32xf32>
    %cst = arith.constant dense<0.000000e+00> : vector<676x32xf32>
    %3 = tpu.matmul %1, %2, %cst {dimension_numbers = #tpu.dot_dimension_numbers<[1], [0], [0], [1], [0, 0, 1, 1], [], []>} : vector<676x9xf32>, vector<9x32xf32>, vector<676x32xf32> -> vector<676x32xf32>
    %c0_4 = arith.constant 0 : index
    %c0_5 = arith.constant 0 : index
    %4 = vector.load %arg3[%c0_4, %c0_5] : memref<1x32xf32, #tpu.memory_space<vmem>>, vector<1x32xf32>
    %5 = vector.broadcast %4 : vector<1x32xf32> to vector<676x32xf32>
    %6 = arith.addf %3, %5 : vector<676x32xf32>
    %cst_6 = arith.constant 0.000000e+00 : f32
    %7 = vector.broadcast %cst_6 : f32 to vector<676x32xf32>
    %8 = arith.maximumf %6, %7 : vector<676x32xf32>
    %c0_7 = arith.constant 0 : index
    %c0_8 = arith.constant 0 : index
    %9 = vector.load %arg8[%c0_7, %c0_8] : memref<680x32xf32, #tpu.memory_space<vmem>>, vector<676x32xf32>
    tpu.vector_store %arg8[%c0_7, %c0_8], %8 {strides = array<i32>} : memref<680x32xf32, #tpu.memory_space<vmem>>, vector<676x32xf32>,
    %cst_9 = arith.constant 0.000000e+00 : f32
    %10 = vector.broadcast %cst_9 : f32 to vector<4x32xf32>
    %c676 = arith.constant 676 : index
    %c0_10 = arith.constant 0 : index
    %11 = vector.load %arg8[%c676, %c0_10] : memref<680x32xf32, #tpu.memory_space<vmem>>, vector<4x32xf32>
    tpu.vector_store %arg8[%c676, %c0_10], %10 {strides = array<i32>} : memref<680x32xf32, #tpu.memory_space<vmem>>, vector<4x32xf32>,
    %c0_11 = arith.constant 0 : index
    %c0_12 = arith.constant 0 : index
    %12 = vector.load %arg8[%c0_11, %c0_12] : memref<680x32xf32, #tpu.memory_space<vmem>>, vector<624x32xf32>
    %c0_13 = arith.constant 0 : index
    %c0_14 = arith.constant 0 : index
    %13 = vector.load %arg4[%c0_13, %c0_14] : memref<288x64xf32, #tpu.memory_space<vmem>>, vector<32x64xf32>
    %cst_15 = arith.constant dense<0.000000e+00> : vector<624x64xf32>
    %14 = tpu.matmul %12, %13, %cst_15 {dimension_numbers = #tpu.dot_dimension_numbers<[1], [0], [0], [1], [0, 0, 1, 1], [], []>} : vector<624x32xf32>, vector<32x64xf32>, vector<624x64xf32> -> vector<624x64xf32>
    %c0_16 = arith.constant 0 : index
    %c0_17 = arith.constant 0 : index
    %15 = vector.load %arg9[%c0_16, %c0_17] : memref<624x64xf32, #tpu.memory_space<vmem>>, vector<624x64xf32>
    tpu.vector_store %arg9[%c0_16, %c0_17], %14 {strides = array<i32>} : memref<624x64xf32, #tpu.memory_space<vmem>>, vector<624x64xf32>,
    %c1 = arith.constant 1 : index
    %c0_18 = arith.constant 0 : index
    %16 = vector.load %arg8[%c1, %c0_18] : memref<680x32xf32, #tpu.memory_space<vmem>>, vector<624x32xf32>
    %c32 = arith.constant 32 : index
    %c0_19 = arith.constant 0 : index
    %17 = vector.load %arg4[%c32, %c0_19] : memref<288x64xf32, #tpu.memory_space<vmem>>, vector<32x64xf32>
    %cst_20 = arith.constant dense<0.000000e+00> : vector<624x64xf32>
    %18 = tpu.matmul %16, %17, %cst_20 {dimension_numbers = #tpu.dot_dimension_numbers<[1], [0], [0], [1], [0, 0, 1, 1], [], []>} : vector<624x32xf32>, vector<32x64xf32>, vector<624x64xf32> -> vector<624x64xf32>
    %c0_21 = arith.constant 0 : index
    %c0_22 = arith.constant 0 : index
    %19 = vector.load %arg9[%c0_21, %c0_22] : memref<624x64xf32, #tpu.memory_space<vmem>>, vector<624x64xf32>
    %20 = arith.addf %19, %18 : vector<624x64xf32>
    %c0_23 = arith.constant 0 : index
    %c0_24 = arith.constant 0 : index
    %21 = vector.load %arg9[%c0_23, %c0_24] : memref<624x64xf32, #tpu.memory_space<vmem>>, vector<624x64xf32>
    tpu.vector_store %arg9[%c0_23, %c0_24], %20 {strides = array<i32>} : memref<624x64xf32, #tpu.memory_space<vmem>>, vector<624x64xf32>,
    %c2 = arith.constant 2 : index
    %c0_25 = arith.constant 0 : index
    %22 = vector.load %arg8[%c2, %c0_25] : memref<680x32xf32, #tpu.memory_space<vmem>>, vector<624x32xf32>
    %c64 = arith.constant 64 : index
    %c0_26 = arith.constant 0 : index
    %23 = vector.load %arg4[%c64, %c0_26] : memref<288x64xf32, #tpu.memory_space<vmem>>, vector<32x64xf32>
    %cst_27 = arith.constant dense<0.000000e+00> : vector<624x64xf32>
    %24 = tpu.matmul %22, %23, %cst_27 {dimension_numbers = #tpu.dot_dimension_numbers<[1], [0], [0], [1], [0, 0, 1, 1], [], []>} : vector<624x32xf32>, vector<32x64xf32>, vector<624x64xf32> -> vector<624x64xf32>
    %c0_28 = arith.constant 0 : index
    %c0_29 = arith.constant 0 : index
    %25 = vector.load %arg9[%c0_28, %c0_29] : memref<624x64xf32, #tpu.memory_space<vmem>>, vector<624x64xf32>
    %26 = arith.addf %25, %24 : vector<624x64xf32>
    %c0_30 = arith.constant 0 : index
    %c0_31 = arith.constant 0 : index
    %27 = vector.load %arg9[%c0_30, %c0_31] : memref<624x64xf32, #tpu.memory_space<vmem>>, vector<624x64xf32>
    tpu.vector_store %arg9[%c0_30, %c0_31], %26 {strides = array<i32>} : memref<624x64xf32, #tpu.memory_space<vmem>>, vector<624x64xf32>,
    %c26 = arith.constant 26 : index
    %c0_32 = arith.constant 0 : index
    %28 = vector.load %arg8[%c26, %c0_32] : memref<680x32xf32, #tpu.memory_space<vmem>>, vector<624x32xf32>
    %c96 = arith.constant 96 : index
    %c0_33 = arith.constant 0 : index
    %29 = vector.load %arg4[%c96, %c0_33] : memref<288x64xf32, #tpu.memory_space<vmem>>, vector<32x64xf32>
    %cst_34 = arith.constant dense<0.000000e+00> : vector<624x64xf32>
    %30 = tpu.matmul %28, %29, %cst_34 {dimension_numbers = #tpu.dot_dimension_numbers<[1], [0], [0], [1], [0, 0, 1, 1], [], []>} : vector<624x32xf32>, vector<32x64xf32>, vector<624x64xf32> -> vector<624x64xf32>
    %c0_35 = arith.constant 0 : index
    %c0_36 = arith.constant 0 : index
    %31 = vector.load %arg9[%c0_35, %c0_36] : memref<624x64xf32, #tpu.memory_space<vmem>>, vector<624x64xf32>
    %32 = arith.addf %31, %30 : vector<624x64xf32>
    %c0_37 = arith.constant 0 : index
    %c0_38 = arith.constant 0 : index
    %33 = vector.load %arg9[%c0_37, %c0_38] : memref<624x64xf32, #tpu.memory_space<vmem>>, vector<624x64xf32>
    tpu.vector_store %arg9[%c0_37, %c0_38], %32 {strides = array<i32>} : memref<624x64xf32, #tpu.memory_space<vmem>>, vector<624x64xf32>,
    %c27 = arith.constant 27 : index
    %c0_39 = arith.constant 0 : index
    %34 = vector.load %arg8[%c27, %c0_39] : memref<680x32xf32, #tpu.memory_space<vmem>>, vector<624x32xf32>
    %c128 = arith.constant 128 : index
    %c0_40 = arith.constant 0 : index
    %35 = vector.load %arg4[%c128, %c0_40] : memref<288x64xf32, #tpu.memory_space<vmem>>, vector<32x64xf32>
    %cst_41 = arith.constant dense<0.000000e+00> : vector<624x64xf32>
    %36 = tpu.matmul %34, %35, %cst_41 {dimension_numbers = #tpu.dot_dimension_numbers<[1], [0], [0], [1], [0, 0, 1, 1], [], []>} : vector<624x32xf32>, vector<32x64xf32>, vector<624x64xf32> -> vector<624x64xf32>
    %c0_42 = arith.constant 0 : index
    %c0_43 = arith.constant 0 : index
    %37 = vector.load %arg9[%c0_42, %c0_43] : memref<624x64xf32, #tpu.memory_space<vmem>>, vector<624x64xf32>
    %38 = arith.addf %37, %36 : vector<624x64xf32>
    %c0_44 = arith.constant 0 : index
    %c0_45 = arith.constant 0 : index
    %39 = vector.load %arg9[%c0_44, %c0_45] : memref<624x64xf32, #tpu.memory_space<vmem>>, vector<624x64xf32>
    tpu.vector_store %arg9[%c0_44, %c0_45], %38 {strides = array<i32>} : memref<624x64xf32, #tpu.memory_space<vmem>>, vector<624x64xf32>,
    %c28 = arith.constant 28 : index
    %c0_46 = arith.constant 0 : index
    %40 = vector.load %arg8[%c28, %c0_46] : memref<680x32xf32, #tpu.memory_space<vmem>>, vector<624x32xf32>
    %c160 = arith.constant 160 : index
    %c0_47 = arith.constant 0 : index
    %41 = vector.load %arg4[%c160, %c0_47] : memref<288x64xf32, #tpu.memory_space<vmem>>, vector<32x64xf32>
    %cst_48 = arith.constant dense<0.000000e+00> : vector<624x64xf32>
    %42 = tpu.matmul %40, %41, %cst_48 {dimension_numbers = #tpu.dot_dimension_numbers<[1], [0], [0], [1], [0, 0, 1, 1], [], []>} : vector<624x32xf32>, vector<32x64xf32>, vector<624x64xf32> -> vector<624x64xf32>
    %c0_49 = arith.constant 0 : index
    %c0_50 = arith.constant 0 : index
    %43 = vector.load %arg9[%c0_49, %c0_50] : memref<624x64xf32, #tpu.memory_space<vmem>>, vector<624x64xf32>
    %44 = arith.addf %43, %42 : vector<624x64xf32>
    %c0_51 = arith.constant 0 : index
    %c0_52 = arith.constant 0 : index
    %45 = vector.load %arg9[%c0_51, %c0_52] : memref<624x64xf32, #tpu.memory_space<vmem>>, vector<624x64xf32>
    tpu.vector_store %arg9[%c0_51, %c0_52], %44 {strides = array<i32>} : memref<624x64xf32, #tpu.memory_space<vmem>>, vector<624x64xf32>,
    %c52 = arith.constant 52 : index
    %c0_53 = arith.constant 0 : index
    %46 = vector.load %arg8[%c52, %c0_53] : memref<680x32xf32, #tpu.memory_space<vmem>>, vector<624x32xf32>
    %c192 = arith.constant 192 : index
    %c0_54 = arith.constant 0 : index
    %47 = vector.load %arg4[%c192, %c0_54] : memref<288x64xf32, #tpu.memory_space<vmem>>, vector<32x64xf32>
    %cst_55 = arith.constant dense<0.000000e+00> : vector<624x64xf32>
    %48 = tpu.matmul %46, %47, %cst_55 {dimension_numbers = #tpu.dot_dimension_numbers<[1], [0], [0], [1], [0, 0, 1, 1], [], []>} : vector<624x32xf32>, vector<32x64xf32>, vector<624x64xf32> -> vector<624x64xf32>
    %c0_56 = arith.constant 0 : index
    %c0_57 = arith.constant 0 : index
    %49 = vector.load %arg9[%c0_56, %c0_57] : memref<624x64xf32, #tpu.memory_space<vmem>>, vector<624x64xf32>
    %50 = arith.addf %49, %48 : vector<624x64xf32>
    %c0_58 = arith.constant 0 : index
    %c0_59 = arith.constant 0 : index
    %51 = vector.load %arg9[%c0_58, %c0_59] : memref<624x64xf32, #tpu.memory_space<vmem>>, vector<624x64xf32>
    tpu.vector_store %arg9[%c0_58, %c0_59], %50 {strides = array<i32>} : memref<624x64xf32, #tpu.memory_space<vmem>>, vector<624x64xf32>,
    %c53 = arith.constant 53 : index
    %c0_60 = arith.constant 0 : index
    %52 = vector.load %arg8[%c53, %c0_60] : memref<680x32xf32, #tpu.memory_space<vmem>>, vector<624x32xf32>
    %c224 = arith.constant 224 : index
    %c0_61 = arith.constant 0 : index
    %53 = vector.load %arg4[%c224, %c0_61] : memref<288x64xf32, #tpu.memory_space<vmem>>, vector<32x64xf32>
    %cst_62 = arith.constant dense<0.000000e+00> : vector<624x64xf32>
    %54 = tpu.matmul %52, %53, %cst_62 {dimension_numbers = #tpu.dot_dimension_numbers<[1], [0], [0], [1], [0, 0, 1, 1], [], []>} : vector<624x32xf32>, vector<32x64xf32>, vector<624x64xf32> -> vector<624x64xf32>
    %c0_63 = arith.constant 0 : index
    %c0_64 = arith.constant 0 : index
    %55 = vector.load %arg9[%c0_63, %c0_64] : memref<624x64xf32, #tpu.memory_space<vmem>>, vector<624x64xf32>
    %56 = arith.addf %55, %54 : vector<624x64xf32>
    %c0_65 = arith.constant 0 : index
    %c0_66 = arith.constant 0 : index
    %57 = vector.load %arg9[%c0_65, %c0_66] : memref<624x64xf32, #tpu.memory_space<vmem>>, vector<624x64xf32>
    tpu.vector_store %arg9[%c0_65, %c0_66], %56 {strides = array<i32>} : memref<624x64xf32, #tpu.memory_space<vmem>>, vector<624x64xf32>,
    %c54 = arith.constant 54 : index
    %c0_67 = arith.constant 0 : index
    %58 = vector.load %arg8[%c54, %c0_67] : memref<680x32xf32, #tpu.memory_space<vmem>>, vector<624x32xf32>
    %c256 = arith.constant 256 : index
    %c0_68 = arith.constant 0 : index
    %59 = vector.load %arg4[%c256, %c0_68] : memref<288x64xf32, #tpu.memory_space<vmem>>, vector<32x64xf32>
    %cst_69 = arith.constant dense<0.000000e+00> : vector<624x64xf32>
    %60 = tpu.matmul %58, %59, %cst_69 {dimension_numbers = #tpu.dot_dimension_numbers<[1], [0], [0], [1], [0, 0, 1, 1], [], []>} : vector<624x32xf32>, vector<32x64xf32>, vector<624x64xf32> -> vector<624x64xf32>
    %c0_70 = arith.constant 0 : index
    %c0_71 = arith.constant 0 : index
    %61 = vector.load %arg9[%c0_70, %c0_71] : memref<624x64xf32, #tpu.memory_space<vmem>>, vector<624x64xf32>
    %62 = arith.addf %61, %60 : vector<624x64xf32>
    %c0_72 = arith.constant 0 : index
    %c0_73 = arith.constant 0 : index
    %63 = vector.load %arg9[%c0_72, %c0_73] : memref<624x64xf32, #tpu.memory_space<vmem>>, vector<624x64xf32>
    tpu.vector_store %arg9[%c0_72, %c0_73], %62 {strides = array<i32>} : memref<624x64xf32, #tpu.memory_space<vmem>>, vector<624x64xf32>,
    %c0_74 = arith.constant 0 : index
    %c0_75 = arith.constant 0 : index
    %64 = vector.load %arg9[%c0_74, %c0_75] : memref<624x64xf32, #tpu.memory_space<vmem>>, vector<597x64xf32>
    %c1_76 = arith.constant 1 : index
    %c0_77 = arith.constant 0 : index
    %65 = vector.load %arg9[%c1_76, %c0_77] : memref<624x64xf32, #tpu.memory_space<vmem>>, vector<597x64xf32>
    %66 = arith.maximumf %64, %65 : vector<597x64xf32>
    %c26_78 = arith.constant 26 : index
    %c0_79 = arith.constant 0 : index
    %67 = vector.load %arg9[%c26_78, %c0_79] : memref<624x64xf32, #tpu.memory_space<vmem>>, vector<597x64xf32>
    %c27_80 = arith.constant 27 : index
    %c0_81 = arith.constant 0 : index
    %68 = vector.load %arg9[%c27_80, %c0_81] : memref<624x64xf32, #tpu.memory_space<vmem>>, vector<597x64xf32>
    %69 = arith.maximumf %67, %68 : vector<597x64xf32>
    %70 = arith.maximumf %66, %69 : vector<597x64xf32>
    %c0_82 = arith.constant 0 : index
    %c0_83 = arith.constant 0 : index
    %71 = vector.load %arg10[%c0_82, %c0_83] : memref<597x64xf32, #tpu.memory_space<vmem>>, vector<597x64xf32>
    tpu.vector_store %arg10[%c0_82, %c0_83], %70 {strides = array<i32>} : memref<597x64xf32, #tpu.memory_space<vmem>>, vector<597x64xf32>,
    %c0_84 = arith.constant 0 : index
    %c0_85 = arith.constant 0 : index
    %72 = vector.load %arg6[%c0_84, %c0_85] : memref<144x597xf32, #tpu.memory_space<vmem>>, vector<144x597xf32>
    %c0_86 = arith.constant 0 : index
    %c0_87 = arith.constant 0 : index
    %73 = vector.load %arg10[%c0_86, %c0_87] : memref<597x64xf32, #tpu.memory_space<vmem>>, vector<597x64xf32>
    %cst_88 = arith.constant dense<0.000000e+00> : vector<144x64xf32>
    %74 = tpu.matmul %72, %73, %cst_88 {dimension_numbers = #tpu.dot_dimension_numbers<[1], [0], [0], [1], [0, 0, 1, 1], [], []>} : vector<144x597xf32>, vector<597x64xf32>, vector<144x64xf32> -> vector<144x64xf32>
    %c0_89 = arith.constant 0 : index
    %c0_90 = arith.constant 0 : index
    %75 = vector.load %arg5[%c0_89, %c0_90] : memref<1x64xf32, #tpu.memory_space<vmem>>, vector<1x64xf32>
    %76 = vector.broadcast %75 : vector<1x64xf32> to vector<144x64xf32>
    %77 = arith.addf %74, %76 : vector<144x64xf32>
    %cst_91 = arith.constant 0.000000e+00 : f32
    %78 = vector.broadcast %cst_91 : f32 to vector<144x64xf32>
    %79 = arith.maximumf %77, %78 : vector<144x64xf32>
    %80 = vector.extract_strided_slice %79 {offsets = [0, 0], sizes = [72, 64], strides = [1, 1]} : vector<144x64xf32> to vector<72x64xf32>
    %81 = arith.truncf %80 : vector<72x64xf32> to vector<72x64xbf16>
    %c0_92 = arith.constant 0 : index
    %c0_93 = arith.constant 0 : index
    %c0_94 = arith.constant 0 : index
    %82 = vector.load %arg7[%c0_92, %c0_93, %c0_94] : memref<1x72x128xbf16, #tpu.memory_space<vmem>>, vector<1x72x64xbf16>
    %83 = vector.shape_cast %82 : vector<1x72x64xbf16> to vector<72x64xbf16>
    %84 = vector.shape_cast %81 : vector<72x64xbf16> to vector<1x72x64xbf16>
    tpu.vector_store %arg7[%c0_92, %c0_93, %c0_94], %84 {strides = array<i32>} : memref<1x72x128xbf16, #tpu.memory_space<vmem>>, vector<1x72x64xbf16>,
    %85 = vector.extract_strided_slice %79 {offsets = [72, 0], sizes = [72, 64], strides = [1, 1]} : vector<144x64xf32> to vector<72x64xf32>
    %86 = arith.truncf %85 : vector<72x64xf32> to vector<72x64xbf16>
    %c0_95 = arith.constant 0 : index
    %c0_96 = arith.constant 0 : index
    %c64_97 = arith.constant 64 : index
    %87 = vector.load %arg7[%c0_95, %c0_96, %c64_97] : memref<1x72x128xbf16, #tpu.memory_space<vmem>>, vector<1x72x64xbf16>
    %88 = vector.shape_cast %87 : vector<1x72x64xbf16> to vector<72x64xbf16>
    %89 = vector.shape_cast %86 : vector<72x64xbf16> to vector<1x72x64xbf16>
    tpu.vector_store %arg7[%c0_95, %c0_96, %c64_97], %89 {strides = array<i32>} : memref<1x72x128xbf16, #tpu.memory_space<vmem>>, vector<1x72x64xbf16>,
    return
  }
  func.func @transform_0(%arg0: i32) -> (i32, i32, i32) {
    %c0_i32 = arith.constant 0 : i32
    %c0_i32_0 = arith.constant 0 : i32
    %c0_i32_1 = arith.constant 0 : i32
    return %arg0, %c0_i32, %c0_i32_0 : i32, i32, i32
  }
  func.func @transform_1(%arg0: i32) -> (i32, i32) {
    %c0_i32 = arith.constant 0 : i32
    %c0_i32_0 = arith.constant 0 : i32
    %c0_i32_1 = arith.constant 0 : i32
    return %c0_i32, %c0_i32_0 : i32, i32
  }
  func.func @transform_2(%arg0: i32) -> (i32, i32) {
    %c0_i32 = arith.constant 0 : i32
    %c0_i32_0 = arith.constant 0 : i32
    %c0_i32_1 = arith.constant 0 : i32
    return %c0_i32, %c0_i32_0 : i32, i32
  }
  func.func @transform_3(%arg0: i32) -> (i32, i32) {
    %c0_i32 = arith.constant 0 : i32
    %c0_i32_0 = arith.constant 0 : i32
    %c0_i32_1 = arith.constant 0 : i32
    return %c0_i32, %c0_i32_0 : i32, i32
  }
  func.func @transform_4(%arg0: i32) -> (i32, i32) {
    %c0_i32 = arith.constant 0 : i32
    %c0_i32_0 = arith.constant 0 : i32
    %c0_i32_1 = arith.constant 0 : i32
    return %c0_i32, %c0_i32_0 : i32, i32
  }
  func.func @transform_5(%arg0: i32) -> (i32, i32) {
    %c0_i32 = arith.constant 0 : i32
    %c0_i32_0 = arith.constant 0 : i32
    %c0_i32_1 = arith.constant 0 : i32
    return %c0_i32, %c0_i32_0 : i32, i32
  }
  func.func @transform_6(%arg0: i32) -> (i32, i32, i32) {
    %c0_i32 = arith.constant 0 : i32
    %c0_i32_0 = arith.constant 0 : i32
    %c0_i32_1 = arith.constant 0 : i32
    return %arg0, %c0_i32, %c0_i32_0 : i32, i32, i32
  }
}

module attributes {stable_mosaic.version = 11 : i64} {
  func.func @_fc_fused_kernel(%arg0: i32, %arg1: memref<2x1152xbf16, #tpu.memory_space<vmem>>, %arg2: memref<1152x128xbf16, #tpu.memory_space<vmem>>, %arg3: memref<1x128xf32, #tpu.memory_space<vmem>>, %arg4: memref<128x10xf32, #tpu.memory_space<vmem>>, %arg5: memref<1x10xf32, #tpu.memory_space<vmem>>, %arg6: memref<2x10xf32, #tpu.memory_space<vmem>>, %arg7: memref<2x128xf32, #tpu.memory_space<vmem>>) attributes {dimension_semantics = [#tpu.dimension_semantics<arbitrary>], iteration_bounds = array<i64: 8>, scalar_prefetch = 0 : i64, scratch_operands = 1 : i64, tpu.core_type = #tpu.core_type<tc>, window_params = [{transform_indices = @transform_0, window_bounds = array<i64: 2, 1152>}, {transform_indices = @transform_1, window_bounds = array<i64: 1152, 128>}, {pipeline_mode = #tpu.pipeline_mode<synchronous>, transform_indices = @transform_2, window_bounds = array<i64: 1, 128>}, {pipeline_mode = #tpu.pipeline_mode<synchronous>, transform_indices = @transform_3, window_bounds = array<i64: 128, 10>}, {pipeline_mode = #tpu.pipeline_mode<synchronous>, transform_indices = @transform_4, window_bounds = array<i64: 1, 10>}, {pipeline_mode = #tpu.pipeline_mode<synchronous>, transform_indices = @transform_5, window_bounds = array<i64: 2, 10>}]} {
    %c0_i32 = arith.constant 0 : i32
    %0 = arith.cmpi eq, %arg0, %c0_i32 : i32
    %1 = arith.extui %0 : i1 to i32
    %c0_i32_0 = arith.constant 0 : i32
    %2 = arith.cmpi ne, %1, %c0_i32_0 : i32
    scf.if %2 {
      %cst_9 = arith.constant 0.000000e+00 : f32
      %12 = vector.broadcast %cst_9 : f32 to vector<2x128xf32>
      %c0_10 = arith.constant 0 : index
      %c0_11 = arith.constant 0 : index
      %13 = vector.load %arg7[%c0_10, %c0_11] : memref<2x128xf32, #tpu.memory_space<vmem>>, vector<2x128xf32>
      tpu.vector_store %arg7[%c0_10, %c0_11], %12 {strides = array<i32>} : memref<2x128xf32, #tpu.memory_space<vmem>>, vector<2x128xf32>,
    } else {
    }
    %c0 = arith.constant 0 : index
    %c0_1 = arith.constant 0 : index
    %3 = vector.load %arg7[%c0, %c0_1] : memref<2x128xf32, #tpu.memory_space<vmem>>, vector<2x128xf32>
    %c0_2 = arith.constant 0 : index
    %c0_3 = arith.constant 0 : index
    %4 = vector.load %arg1[%c0_2, %c0_3] : memref<2x1152xbf16, #tpu.memory_space<vmem>>, vector<2x1152xbf16>
    %c0_4 = arith.constant 0 : index
    %c0_5 = arith.constant 0 : index
    %5 = vector.load %arg2[%c0_4, %c0_5] : memref<1152x128xbf16, #tpu.memory_space<vmem>>, vector<1152x128xbf16>
    %cst = arith.constant dense<0.000000e+00> : vector<2x128xf32>
    %6 = tpu.matmul %4, %5, %cst {dimension_numbers = #tpu.dot_dimension_numbers<[1], [0], [0], [1], [0, 0, 1, 1], [], []>} : vector<2x1152xbf16>, vector<1152x128xbf16>, vector<2x128xf32> -> vector<2x128xf32>
    %7 = arith.addf %3, %6 : vector<2x128xf32>
    %c0_6 = arith.constant 0 : index
    %c0_7 = arith.constant 0 : index
    %8 = vector.load %arg7[%c0_6, %c0_7] : memref<2x128xf32, #tpu.memory_space<vmem>>, vector<2x128xf32>
    tpu.vector_store %arg7[%c0_6, %c0_7], %7 {strides = array<i32>} : memref<2x128xf32, #tpu.memory_space<vmem>>, vector<2x128xf32>,
    %c7_i32 = arith.constant 7 : i32
    %9 = arith.cmpi eq, %arg0, %c7_i32 : i32
    %10 = arith.extui %9 : i1 to i32
    %c0_i32_8 = arith.constant 0 : i32
    %11 = arith.cmpi ne, %10, %c0_i32_8 : i32
    scf.if %11 {
      %c0_9 = arith.constant 0 : index
      %c0_10 = arith.constant 0 : index
      %12 = vector.load %arg7[%c0_9, %c0_10] : memref<2x128xf32, #tpu.memory_space<vmem>>, vector<2x128xf32>
      %c0_11 = arith.constant 0 : index
      %c0_12 = arith.constant 0 : index
      %13 = vector.load %arg3[%c0_11, %c0_12] : memref<1x128xf32, #tpu.memory_space<vmem>>, vector<1x128xf32>
      %14 = vector.broadcast %13 : vector<1x128xf32> to vector<2x128xf32>
      %15 = arith.addf %12, %14 : vector<2x128xf32>
      %cst_13 = arith.constant 0.000000e+00 : f32
      %16 = vector.broadcast %cst_13 : f32 to vector<2x128xf32>
      %17 = arith.maximumf %15, %16 : vector<2x128xf32>
      %c0_14 = arith.constant 0 : index
      %c0_15 = arith.constant 0 : index
      %18 = vector.load %arg4[%c0_14, %c0_15] : memref<128x10xf32, #tpu.memory_space<vmem>>, vector<128x10xf32>
      %cst_16 = arith.constant dense<0.000000e+00> : vector<2x10xf32>
      %19 = tpu.matmul %17, %18, %cst_16 {dimension_numbers = #tpu.dot_dimension_numbers<[1], [0], [0], [1], [0, 0, 1, 1], [], []>} : vector<2x128xf32>, vector<128x10xf32>, vector<2x10xf32> -> vector<2x10xf32>
      %c0_17 = arith.constant 0 : index
      %c0_18 = arith.constant 0 : index
      %20 = vector.load %arg5[%c0_17, %c0_18] : memref<1x10xf32, #tpu.memory_space<vmem>>, vector<1x10xf32>
      %21 = vector.broadcast %20 : vector<1x10xf32> to vector<2x10xf32>
      %22 = arith.addf %19, %21 : vector<2x10xf32>
      %c0_19 = arith.constant 0 : index
      %c0_20 = arith.constant 0 : index
      %23 = vector.load %arg6[%c0_19, %c0_20] : memref<2x10xf32, #tpu.memory_space<vmem>>, vector<2x10xf32>
      tpu.vector_store %arg6[%c0_19, %c0_20], %22 {strides = array<i32>} : memref<2x10xf32, #tpu.memory_space<vmem>>, vector<2x10xf32>,
    } else {
    }
    return
  }
  func.func @transform_0(%arg0: i32) -> (i32, i32) {
    %c0_i32 = arith.constant 0 : i32
    %c0_i32_0 = arith.constant 0 : i32
    return %c0_i32, %arg0 : i32, i32
  }
  func.func @transform_1(%arg0: i32) -> (i32, i32) {
    %c0_i32 = arith.constant 0 : i32
    %c0_i32_0 = arith.constant 0 : i32
    return %arg0, %c0_i32 : i32, i32
  }
  func.func @transform_2(%arg0: i32) -> (i32, i32) {
    %c0_i32 = arith.constant 0 : i32
    %c0_i32_0 = arith.constant 0 : i32
    %c0_i32_1 = arith.constant 0 : i32
    return %c0_i32, %c0_i32_0 : i32, i32
  }
  func.func @transform_3(%arg0: i32) -> (i32, i32) {
    %c0_i32 = arith.constant 0 : i32
    %c0_i32_0 = arith.constant 0 : i32
    %c0_i32_1 = arith.constant 0 : i32
    return %c0_i32, %c0_i32_0 : i32, i32
  }
  func.func @transform_4(%arg0: i32) -> (i32, i32) {
    %c0_i32 = arith.constant 0 : i32
    %c0_i32_0 = arith.constant 0 : i32
    %c0_i32_1 = arith.constant 0 : i32
    return %c0_i32, %c0_i32_0 : i32, i32
  }
  func.func @transform_5(%arg0: i32) -> (i32, i32) {
    %c0_i32 = arith.constant 0 : i32
    %c0_i32_0 = arith.constant 0 : i32
    %c0_i32_1 = arith.constant 0 : i32
    return %c0_i32, %c0_i32_0 : i32, i32
  }
}

</mosaic_0001>

<bundles_post_ra>
// kernel: simple_cnn_forward.3
= control target key start
LH: loop header
LB: loop body
LE: loop exit
PB: predicated region body
PF: predicated region fallthrough
CT: control target
= control target key end

     0   :  { %10 = vsyncpa [#allocation4], 0  ;;  %s1528_s18 = smov 0   ;;  %s1699_s0 = inlined_call_operand.vmem [shape: bf16[2,9216], index: 0, kind: input, shape index: {}]   ;;  %s1700_s1 = inlined_call_operand.vmem [shape: bf16[9216,128], index: 1, kind: input, shape index: {}]   ;;  %s1701_s2 = inlined_call_operand.vmem [shape: f32[1,128], index: 2, kind: input, shape index: {}]   ;;  %s1702_s3 = inlined_call_operand.vmem [shape: f32[128,10], index: 3, kind: input, shape index: {}]   ;;  %s1703_s4 = inlined_call_operand.vmem [shape: f32[1,10], index: 4, kind: input, shape index: {}]   ;;  %s1704_s5 = inlined_call_operand.hbm [shape: f32[2,10], index: 5, kind: output, shape index: {}]  }
   0x1 LB: > { %s1534_s19 = sadd.s32 4294967295, %s1494_s18   ;;  %p1070_p0 = scmp.ge.s32.totalorder %s1494_s18, 1  ;;  %s1494_s18 = sphi %s1528_s18, %s16_s18  }
   0x2   : > { %p194_p1 = scmp.lt.s32.totalorder %s1494_s18, 9 }
   0x4   : > { %p195_p2 = pnand %p1070_p0, %p194_p1 }
   0x5   : > { %s221_s20 = smul.u32 (!%p195_p2), 9, %s1534_s19  ;;  %p1072_p5 = scmp.ne.s32.totalorder (!%p195_p2), %s1534_s19, 0 }
   0x6   : > { %198 = sbr.rel (%p195_p2) target bundleno = 416 (0x1a0), region = 40 }
   0x7   : > { %s226_s21 = smul.u32 (!%p195_p2), 144, %s1534_s19  ;;  %p222_p3 = scmp.lt.s32.totalorder (!%p195_p2), %s221_s20, 71 }
   0x9   : > { %p227_p4 = scmp.lt.s32.totalorder (!%p195_p2), %s226_s21, 1151 }
   0xb   : > { %s1706_s20 = smov (!%p222_p3, %s221_s20), 71  ;;  %s1708_s21 = smov (!%p227_p4, %s226_s21), 1151 }
   0xc   : > { %s1543_s24 = scalar_lea.vmem %s1699_s0, %s1706_s20  ;;  %s1071_s25 = sshll.u32 %s1708_s21, 2 }
   0xd   : > { %s1548_s28 = scalar_lea.vmem %s1700_s1, %s1071_s25  ;;  %235 = sbr.rel (%p1072_p5) target bundleno = 20 (0x14), region = 44 }
  0x12   : > { %v1496_v0 = vmov 0.0  }
  0x13   : > { %236 = vst [vmem:[#allocation2] sm:$0x3] %v1496_v0 }
  0x14 PF: > { %v1373_v1 = vld [vmem:[%s1548_s28 + $0x38] sm:$0xff]  ;;  %v1372_v5 = vld [vmem:[%s1548_s28 + $0x30] sm:$0xff]  ;;  %v1371_v9 = vld [vmem:[%s1548_s28 + $0x28] sm:$0xff]  ;;  %p1361_p6 = scmp.ne.s32.totalorder %s1534_s19, 7 }
  0x15   : > { %v1389_v2 = vld [vmem:[%s1548_s28 + $0xb8] sm:$0xff]  ;;  %838 = vmatpush.bf16.msra.mxu0 %v1373_v1  ;;  %v1388_v6 = vld [vmem:[%s1548_s28 + $0xb0] sm:$0xff]  ;;  %v1387_v10 = vld [vmem:[%s1548_s28 + $0xa8] sm:$0xff] }
  0x16   : > { %v1397_v3 = vld [vmem:[%s1548_s28 + $0xf8] sm:$0xff]  ;;  %864 = vmatpush.bf16.msra.mxu2 %v1389_v2  ;;  %v1396_v7 = vld [vmem:[%s1548_s28 + $0xf0] sm:$0xff]  ;;  %v1395_v11 = vld [vmem:[%s1548_s28 + $0xe8] sm:$0xff] }
  0x17   : > { %v1381_v4 = vld [vmem:[%s1548_s28 + $0x78] sm:$0xff]  ;;  %877 = vmatpush.bf16.msra.mxu3 %v1397_v3  ;;  %v1380_v8 = vld [vmem:[%s1548_s28 + $0x70] sm:$0xff]  ;;  %v1379_v12 = vld [vmem:[%s1548_s28 + $0x68] sm:$0xff] }
  0x18   : > { %851 = vmatpush.bf16.msra.mxu1 %v1381_v4  ;;  %v1370_v13 = vld [vmem:[%s1548_s28 + $0x20] sm:$0xff]  ;;  %v1369_v17 = vld [vmem:[%s1548_s28 + $0x18] sm:$0xff]  ;;  %v1368_v22 = vld [vmem:[%s1548_s28 + $0x10] sm:$0xff] }
  0x19   : > { %839 = vmatpush.bf16.msra.mxu0 %v1372_v5  ;;  %v1386_v14 = vld [vmem:[%s1548_s28 + $0xa0] sm:$0xff]  ;;  %v1385_v18 = vld [vmem:[%s1548_s28 + $0x98] sm:$0xff]  ;;  %v1384_v23 = vld [vmem:[%s1548_s28 + $0x90] sm:$0xff] }
  0x1a   : > { %865 = vmatpush.bf16.msra.mxu2 %v1388_v6  ;;  %v1394_v15 = vld [vmem:[%s1548_s28 + $0xe0] sm:$0xff]  ;;  %v1393_v19 = vld [vmem:[%s1548_s28 + $0xd8] sm:$0xff]  ;;  %v1392_v24 = vld [vmem:[%s1548_s28 + $0xd0] sm:$0xff] }
  0x1b   : > { %878 = vmatpush.bf16.msra.mxu3 %v1396_v7  ;;  %v1378_v16 = vld [vmem:[%s1548_s28 + $0x60] sm:$0xff]  ;;  %v1377_v20 = vld [vmem:[%s1548_s28 + $0x58] sm:$0xff]  ;;  %v1376_v25 = vld [vmem:[%s1548_s28 + $0x50] sm:$0xff] }
  0x1c   : > { %852 = vmatpush.bf16.msra.mxu1 %v1380_v8  ;;  %v238_v21 = vld [vmem:[%s1543_s24] sm:$0xff]  ;;  %v1367_v26 = vld [vmem:[%s1548_s28 + $0x8] sm:$0xff]  ;;  %v1405_v32 = vld [vmem:[%s1548_s28 + $0x138] sm:$0xff] }
  0x1d   : > { %840 = vmatpush.bf16.msra.mxu0 %v1371_v9  ;;  %385 = vst [vmem:[#allocation1] ss:$9 sm:$0xff] %v238_v21  ;;  %v1383_v27 = vld [vmem:[%s1548_s28 + $0x88] sm:$0xff]  ;;  %v1366_v30 = vld [vmem:[%s1548_s28] sm:$0xff]  ;;  %v1421_v33 = vld [vmem:[%s1548_s28 + $0x1b8] sm:$0xff] }
  0x1e   : > { %866 = vmatpush.bf16.msra.mxu2 %v1387_v10  ;;  %v1391_v28 = vld [vmem:[%s1548_s28 + $0xc8] sm:$0xff]  ;;  %v1382_v31 = vld [vmem:[%s1548_s28 + $0x80] sm:$0xff]  ;;  %v1429_v36 = vld [vmem:[%s1548_s28 + $0x1f8] sm:$0xff] }
  0x1f   : > { %879 = vmatpush.bf16.msra.mxu3 %v1395_v11  ;;  %v1375_v29 = vld [vmem:[%s1548_s28 + $0x48] sm:$0xff]  ;;  %v1390_v34 = vld [vmem:[%s1548_s28 + $0xc0] sm:$0xff]  ;;  %v1413_v37 = vld [vmem:[%s1548_s28 + $0x178] sm:$0xff] }
  0x20   : > { %853 = vmatpush.bf16.msra.mxu1 %v1379_v12  ;;  %v1374_v35 = vld [vmem:[%s1548_s28 + $0x40] sm:$0xff]  ;;  %v1404_v38 = vld [vmem:[%s1548_s28 + $0x130] sm:$0xff]  ;;  %v239_v47 = vld [vmem:[%s1543_s24 + $0x8] sm:$0x1] }
  0x21   : > { %841 = vmatpush.bf16.msra.mxu0 %v1370_v13  ;;  %v1420_v39 = vld [vmem:[%s1548_s28 + $0x1b0] sm:$0xff]  ;;  %v1403_v51 = vld [vmem:[%s1548_s28 + $0x128] sm:$0xff]  ;;  %v1402_v55 = vld [vmem:[%s1548_s28 + $0x120] sm:$0xff] }
  0x22   : > { %867 = vmatpush.bf16.msra.mxu2 %v1386_v14  ;;  %v1428_v40 = vld [vmem:[%s1548_s28 + $0x1f0] sm:$0xff]  ;;  %v1419_v52 = vld [vmem:[%s1548_s28 + $0x1a8] sm:$0xff]  ;;  %v1418_v56 = vld [vmem:[%s1548_s28 + $0x1a0] sm:$0xff] }
  0x23   : > { %880 = vmatpush.bf16.msra.mxu3 %v1394_v15  ;;  %v1412_v41 = vld [vmem:[%s1548_s28 + $0x170] sm:$0xff]  ;;  %v1427_v53 = vld [vmem:[%s1548_s28 + $0x1e8] sm:$0xff]  ;;  %v1426_v57 = vld [vmem:[%s1548_s28 + $0x1e0] sm:$0xff] }
  0x24   : > { %854 = vmatpush.bf16.msra.mxu1 %v1378_v16  ;;  %v388_v42 = vld [vmem:[#allocation1 + $0x12] sm:$0xff]  ;;  %v386_v43 = vld [vmem:[#allocation1] sm:$0xff]  ;;  %v387_v45 = vld [vmem:[#allocation1 + $0x9] sm:$0xff] }
  0x25   : > { %842 = vmatpush.bf16.msra.mxu0 %v1369_v17  ;;  %v389_v44 = vld [vmem:[#allocation1 + $0x1b] sm:$0xff]  ;;  %v1595_v48 = vld [vmem:[#allocation1 + $0x24] sm:$0xff]  ;;  %v1599_v50 = vld [vmem:[#allocation1 + $0x2d] sm:$0xff] }
  0x26   : > { %868 = vmatpush.bf16.msra.mxu2 %v1385_v18  ;;  %v1592_v46 = vld [vmem:[#allocation1 + $0x36] sm:$0xff]  ;;  %v1597_v49 = vld [vmem:[#allocation1 + $0x3f] sm:$0xff]  ;;  %v1411_v54 = vld [vmem:[%s1548_s28 + $0x168] sm:$0xff] }
  0x27   : > { %881 = vmatpush.bf16.msra.mxu3 %v1393_v19  ;;  %395 = vst [vmem:[#allocation1] ss:$9 sm:$0xff] %v239_v47  ;;  %v1410_v58 = vld [vmem:[%s1548_s28 + $0x160] sm:$0xff]  ;;  %v1401_v59 = vld [vmem:[%s1548_s28 + $0x118] sm:$0xff]  ;;  %v1400_v63 = vld [vmem:[%s1548_s28 + $0x110] sm:$0xff] }
  0x28   : > { %855 = vmatpush.bf16.msra.mxu1 %v1377_v20  ;;  %v1417_v60 = vld [vmem:[%s1548_s28 + $0x198] sm:$0xff]  ;;  %v1416_v0 = vld [vmem:[%s1548_s28 + $0x190] sm:$0xff]  ;;  %v1399_v3 = vld [vmem:[%s1548_s28 + $0x108] sm:$0xff] }
  0x29   : > { %843 = vmatpush.bf16.msra.mxu0 %v1368_v22  ;;  %v1425_v61 = vld [vmem:[%s1548_s28 + $0x1d8] sm:$0xff]  ;;  %v1424_v1 = vld [vmem:[%s1548_s28 + $0x1d0] sm:$0xff]  ;;  %v1415_v4 = vld [vmem:[%s1548_s28 + $0x188] sm:$0xff] }
  0x2a   : > { %869 = vmatpush.bf16.msra.mxu2 %v1384_v23  ;;  %v1409_v62 = vld [vmem:[%s1548_s28 + $0x158] sm:$0xff]  ;;  %v1408_v2 = vld [vmem:[%s1548_s28 + $0x150] sm:$0xff]  ;;  %v1423_v5 = vld [vmem:[%s1548_s28 + $0x1c8] sm:$0xff] }
  0x2b   : > { %882 = vmatpush.bf16.msra.mxu3 %v1392_v24  ;;  %v1407_v6 = vld [vmem:[%s1548_s28 + $0x148] sm:$0xff]  ;;  %v1398_v7 = vld [vmem:[%s1548_s28 + $0x100] sm:$0xff]  ;;  %v1437_v9 = vld [vmem:[%s1548_s28 + $0x238] sm:$0xff] }
  0x2c   : > { %856 = vmatpush.bf16.msra.mxu1 %v1376_v25  ;;  %v1414_v8 = vld [vmem:[%s1548_s28 + $0x180] sm:$0xff]  ;;  %v1436_v12 = vld [vmem:[%s1548_s28 + $0x230] sm:$0xff]  ;;  %v1435_v13 = vld [vmem:[%s1548_s28 + $0x228] sm:$0xff] }
  0x2d   : > { %844 = vmatpush.bf16.msra.mxu0 %v1367_v26  ;;  %v1422_v10 = vld [vmem:[%s1548_s28 + $0x1c0] sm:$0xff]  ;;  %v1433_v15 = vld [vmem:[%s1548_s28 + $0x218] sm:$0xff]  ;;  %v1432_v16 = vld [vmem:[%s1548_s28 + $0x210] sm:$0xff] }
  0x2e   : > { %870 = vmatpush.bf16.msra.mxu2 %v1383_v27  ;;  %v1406_v11 = vld [vmem:[%s1548_s28 + $0x140] sm:$0xff]  ;;  %v1431_v17 = vld [vmem:[%s1548_s28 + $0x208] sm:$0xff] }
  0x2f   : > { %883 = vmatpush.bf16.msra.mxu3 %v1391_v28  ;;  %v1434_v14 = vld [vmem:[%s1548_s28 + $0x220] sm:$0xff] }
  0x30   : > { %857 = vmatpush.bf16.msra.mxu1 %v1375_v29  ;;  %v1430_v18 = vld [vmem:[%s1548_s28 + $0x200] sm:$0xff] }
  0x31   : > { %845 = vmatpush.bf16.msra.mxu0 %v1366_v30  ;;  %v396_v19 = vld [vmem:[#allocation1] sm:$0xff] }
  0x32   : > { %871 = vmatpush.bf16.msra.mxu2 %v1382_v31 }
  0x33   : > { %884 = vmatpush.bf16.msra.mxu3 %v1390_v34 }
  0x34   : > { %858 = vmatpush.bf16.msra.mxu1 %v1374_v35  ;;  %846 = vmatmul.bf16.vlgmr.msra.gmra.mxu0 %v386_v43  ;;  %v237_v43 = vld [vmem:[#allocation2] sm:$0x3] }
  0x35   : > { %890 = vmatpush.bf16.msrb.mxu0 %v1405_v32  ;;  %872 = vmatmul.bf16.vlgmr.msra.gmra.mxu2 %v388_v42 }
  0x36   : > { %916 = vmatpush.bf16.msrb.mxu2 %v1421_v33  ;;  %885 = vmatmul.bf16.vlgmr.msra.gmra.mxu3 %v389_v44 }
  0x37   : > { %929 = vmatpush.bf16.msrb.mxu3 %v1429_v36  ;;  %859 = vmatmul.bf16.vlgmr.msra.gmra.mxu1 %v387_v45 }
  0x38   : > { %903 = vmatpush.bf16.msrb.mxu1 %v1413_v37 }
  0x39   : > { %891 = vmatpush.bf16.msrb.mxu0 %v1404_v38 }
  0x3a   : > { %917 = vmatpush.bf16.msrb.mxu2 %v1420_v39 }
  0x3b   : > { %930 = vmatpush.bf16.msrb.mxu3 %v1428_v40 }
  0x3c   : > { %904 = vmatpush.bf16.msrb.mxu1 %v1412_v41 }
  0x3d   : > { %892 = vmatpush.bf16.msrb.mxu0 %v1403_v51 }
  0x3e   : > { %918 = vmatpush.bf16.msrb.mxu2 %v1419_v52 }
  0x3f   : > { %931 = vmatpush.bf16.msrb.mxu3 %v1427_v53 }
  0x40   : > { %905 = vmatpush.bf16.msrb.mxu1 %v1411_v54 }
  0x41   : > { %893 = vmatpush.bf16.msrb.mxu0 %v1402_v55 }
  0x42   : > { %919 = vmatpush.bf16.msrb.mxu2 %v1418_v56 }
  0x43   : > { %932 = vmatpush.bf16.msrb.mxu3 %v1426_v57 }
  0x44   : > { %906 = vmatpush.bf16.msrb.mxu1 %v1410_v58 }
  0x45   : > { %894 = vmatpush.bf16.msrb.mxu0 %v1401_v59 }
  0x46   : > { %920 = vmatpush.bf16.msrb.mxu2 %v1417_v60 }
  0x47   : > { %933 = vmatpush.bf16.msrb.mxu3 %v1425_v61 }
  0x48   : > { %907 = vmatpush.bf16.msrb.mxu1 %v1409_v62 }
  0x49   : > { %895 = vmatpush.bf16.msrb.mxu0 %v1400_v63 }
  0x4a   : > { %921 = vmatpush.bf16.msrb.mxu2 %v1416_v0 }
  0x4b   : > { %934 = vmatpush.bf16.msrb.mxu3 %v1424_v1 }
  0x4c   : > { %908 = vmatpush.bf16.msrb.mxu1 %v1408_v2 }
  0x4d   : > { %896 = vmatpush.bf16.msrb.mxu0 %v1399_v3 }
  0x4e   : > { %922 = vmatpush.bf16.msrb.mxu2 %v1415_v4 }
  0x4f   : > { %935 = vmatpush.bf16.msrb.mxu3 %v1423_v5 }
  0x50   : > { %909 = vmatpush.bf16.msrb.mxu1 %v1407_v6 }
  0x51   : > { %897 = vmatpush.bf16.msrb.mxu0 %v1398_v7 }
  0x52   : > { %923 = vmatpush.bf16.msrb.mxu2 %v1414_v8 }
  0x53   : > { %936 = vmatpush.bf16.msrb.mxu3 %v1422_v10 }
  0x54   : > { %910 = vmatpush.bf16.msrb.mxu1 %v1406_v11  ;;  %898 = vmatmul.bf16.vlgmr.msrb.gmra.mxu0 %v1595_v48 }
  0x55   : > { %942 = vmatpush.bf16.msra.mxu0 %v1437_v9  ;;  %924 = vmatmul.bf16.vlgmr.msrb.gmra.mxu2 %v1592_v46 }
  0x56   : > { %937 = vmatmul.bf16.vlgmr.msrb.gmra.mxu3 %v1597_v49 }
  0x57   : > { %911 = vmatmul.bf16.vlgmr.msrb.gmra.mxu1 %v1599_v50 }
  0x59   : > { %943 = vmatpush.bf16.msra.mxu0 %v1436_v12 }
  0x5d   : > { %944 = vmatpush.bf16.msra.mxu0 %v1435_v13 }
  0x61   : > { %945 = vmatpush.bf16.msra.mxu0 %v1434_v14 }
  0x65   : > { %946 = vmatpush.bf16.msra.mxu0 %v1433_v15 }
  0x69   : > { %947 = vmatpush.bf16.msra.mxu0 %v1432_v16 }
  0x6d   : > { %948 = vmatpush.bf16.msra.mxu0 %v1431_v17 }
  0x71   : > { %949 = vmatpush.bf16.msra.mxu0 %v1430_v18 }
  0x74   : > { %950 = vmatmul.bf16.vlgmr.msra.gmra.mxu0 %v396_v19 }
  0xb1   : > { %v847_v20 = vpop.f32.mrf.mxu0 }
  0xb4   : > { %v860_v21 = vpop.f32.mrf.mxu1 }
  0xb5   : > { %v861_v30 = vadd.f32 %v860_v21, %v847_v20 }
  0xb8   : > { %v873_v22 = vpop.f32.mrf.mxu2 }
  0xb9   : > { %v886_v23 = vpop.f32.mrf.mxu3  ;;  %v849_v24 = vpop.f32.mrf.mxu0  ;;  %v874_v32 = vadd.f32 %v873_v22, %v861_v30 }
  0xbb   : > { %v887_v36 = vadd.f32 %v886_v23, %v874_v32 }
  0xbc   : > { %v862_v25 = vpop.f32.mrf.mxu1 }
  0xc0   : > { %v875_v26 = vpop.f32.mrf.mxu2 }
  0xc1   : > { %v888_v27 = vpop.f32.mrf.mxu3 }
  0xd1   : > { %v899_v28 = vpop.f32.mrf.mxu0 }
  0xd2   : > { %v900_v38 = vadd.f32 %v899_v28, %v887_v36 }
  0xd4   : > { %v912_v29 = vpop.f32.mrf.mxu1 }
  0xd5   : > { %v913_v40 = vadd.f32 %v912_v29, %v900_v38 }
  0xd8   : > { %v925_v31 = vpop.f32.mrf.mxu2 }
  0xd9   : > { %v938_v33 = vpop.f32.mrf.mxu3  ;;  %v901_v34 = vpop.f32.mrf.mxu0  ;;  %v926_v41 = vadd.f32 %v925_v31, %v913_v40 }
  0xdb   : > { %v939_v42 = vadd.f32 %v938_v33, %v926_v41 }
  0xdc   : > { %v914_v35 = vpop.f32.mrf.mxu1 }
  0xe0   : > { %v927_v37 = vpop.f32.mrf.mxu2 }
  0xe1   : > { %v940_v39 = vpop.f32.mrf.mxu3 }
  0xf1   : > { %v951_v44 = vpop.f32.mrf.mxu0 }
  0xf2   : > { %v952_v45 = vadd.f32 %v951_v44, %v939_v42 }
  0xf4   : > { %v955_v46 = vadd.f32 %v952_v45, %v237_v43 }
  0xf5   : > { %960 = sbr.rel (%p1361_p6) target bundleno = 411 (0x19b), region = 48 }
  0xf6   : > { %956 = vst [vmem:[#allocation2] sm:$0x3] %v955_v46 }
  0xf9   : > { %v953_v47 = vpop.f32.mrf.mxu0 }
  0xfa   : > { %v983_v48 = vld [vmem:[%s1702_s3 + $0x78] sm:$0xff]  ;;  %v982_v49 = vld [vmem:[%s1702_s3 + $0x70] sm:$0xff]  ;;  %v981_v50 = vld [vmem:[%s1702_s3 + $0x68] sm:$0xff]  ;;  %vm1008_vm0 = vcmask 74752  }
  0xfb   : > { %988 = vmatpush.msra.mxu0 %v983_v48  ;;  %v980_v51 = vld [vmem:[%s1702_s3 + $0x60] sm:$0xff]  ;;  %v979_v52 = vld [vmem:[%s1702_s3 + $0x58] sm:$0xff]  ;;  %v978_v53 = vld [vmem:[%s1702_s3 + $0x50] sm:$0xff] }
  0xfc   : > { %v977_v54 = vld [vmem:[%s1702_s3 + $0x48] sm:$0xff]  ;;  %v976_v55 = vld [vmem:[%s1702_s3 + $0x40] sm:$0xff]  ;;  %v975_v56 = vld [vmem:[%s1702_s3 + $0x38] sm:$0xff] }
  0xfd   : > { %989 = vmatpush.msra.mxu0 %v982_v49  ;;  %v974_v57 = vld [vmem:[%s1702_s3 + $0x30] sm:$0xff]  ;;  %v973_v58 = vld [vmem:[%s1702_s3 + $0x28] sm:$0xff]  ;;  %v972_v59 = vld [vmem:[%s1702_s3 + $0x20] sm:$0xff] }
  0xfe   : > { %v1454_v60 = vld [vmem:[%s1701_s2] ss:$0 sm:$0xff]  ;;  %v961_v61 = vld [vmem:[#allocation2] sm:$0x3]  ;;  %v971_v62 = vld [vmem:[%s1702_s3 + $0x18] sm:$0xff] }
  0xff   : > { %990 = vmatpush.msra.mxu0 %v981_v50  ;;  %v970_v63 = vld [vmem:[%s1702_s3 + $0x10] sm:$0xff]  ;;  %v966_v0 = vadd.f32 %v1454_v60, %v961_v61  ;;  %v969_v1 = vld [vmem:[%s1702_s3 + $0x8] sm:$0xff]  ;;  %v968_v2 = vld [vmem:[%s1702_s3] sm:$0xff] }
 0x100   : > { %v1455_v4 = vld [vmem:[%s1703_s4] ss:$0 sm:$0xff] }
 0x101   : > { %991 = vmatpush.msra.mxu0 %v980_v51  ;;  %v967_v3 = vmax.f32 %v966_v0, 0.0 }
 0x103   : > { %992 = vmatpush.msra.mxu0 %v979_v52 }
 0x105   : > { %993 = vmatpush.msra.mxu0 %v978_v53 }
 0x107   : > { %994 = vmatpush.msra.mxu0 %v977_v54 }
 0x109   : > { %995 = vmatpush.msra.mxu0 %v976_v55 }
 0x10b   : > { %996 = vmatpush.msra.mxu0 %v975_v56 }
 0x10d   : > { %997 = vmatpush.msra.mxu0 %v974_v57 }
 0x10f   : > { %998 = vmatpush.msra.mxu0 %v973_v58 }
 0x111   : > { %999 = vmatpush.msra.mxu0 %v972_v59 }
 0x113   : > { %1000 = vmatpush.msra.mxu0 %v971_v62 }
 0x115   : > { %1001 = vmatpush.msra.mxu0 %v970_v63 }
 0x117   : > { %1002 = vmatpush.msra.mxu0 %v969_v1 }
 0x119   : > { %1003 = vmatpush.msra.mxu0 %v968_v2 }
 0x11a   : > { %1004 = vmatmul.f32.vlgmr.msra.gmra.mxu0 %v967_v3 }
 0x197   : > { %v1005_v5 = vpop.f32.mrf.mxu0 }
 0x198   : > { %v1006_v6 = vadd.f32 %v1455_v4, %v1005_v5 }
 0x19a   : > { %1009 = vst.msk [vmem:[#allocation3] sm:$0x3] %vm1008_vm0, %v1006_v6 }
 0x19b PF: > { %p1442_p7 = scmp.eq.s32.totalorder %s1534_s19, 7  ;;  %s1497_s17 = smov [#allocation3]  }
 0x19c   : > { %s1016_s20 = sshll.u32 %s1497_s17, 4  ;;  %s1018_s23 = sshll.u32 %s1704_s5, 4  ;;  %s1017_s20 = int_to_ptr.vmem [resolvable:$true] %s1016_s20  ;;  %s1019_s23 = int_to_ptr.hbm [resolvable:$true] %s1018_s23 }
 0x19d   : > { %1439 = dma.vmem_to_hbm [thread:$0]  (%p1442_p7), %s1017_s20, 32, %s1019_s23, [#allocation4]  }
 0x19e   : > { %1489 = dma.done.wait (%p1442_p7), [#allocation4], 32  }
 0x19f   : > { %1491 = vsyncadd (%p1442_p7), [#allocation4], 4294967264 }
 0x1a0 PF: > { %s16_s18 = sadd.s32 1, %s1494_s18  }
 0x1a1   : > { %p13_p8 = scmp.ge.s32.totalorder %s16_s18, 10  }
 0x1a3   :  { %15 = sbr.rel (!%p13_p8) target bundleno = 1 (0x1), region = 78 }
 0x1a8   :  { %1032 = vsyncpa [#allocation4], 1 }
 0x1a9   :  { %1034 = vsyncpa [#allocation4 + $0x1], 1 }

// kernel: simple_cnn_forward.2
= control target key start
LH: loop header
LB: loop body
LE: loop exit
PB: predicated region body
PF: predicated region fallthrough
CT: control target
= control target key end

     0   :  { %s10322_s21 = smov 0   ;;  %s14117_s0 = inlined_call_operand.vmem [shape: f32[2,676,9], index: 0, kind: input, shape index: {}]   ;;  %s14118_s1 = inlined_call_operand.vmem [shape: f32[9,32], index: 1, kind: input, shape index: {}]   ;;  %s14119_s2 = inlined_call_operand.vmem [shape: f32[1,32], index: 2, kind: input, shape index: {}]   ;;  %s14120_s3 = inlined_call_operand.vmem [shape: f32[288,64], index: 3, kind: input, shape index: {}]   ;;  %s14121_s4 = inlined_call_operand.vmem [shape: f32[1,64], index: 4, kind: input, shape index: {}]   ;;  %s14122_s5 = inlined_call_operand.vmem [shape: f32[144,597], index: 5, kind: input, shape index: {}]   ;;  %s14123_s6 = inlined_call_operand.vmem [shape: bf16[2,72,128], index: 6, kind: output, shape index: {}]  }
   0x1 LB: > { %s9433_s22 = sadd.s32 4294967295, %s10283_s21   ;;  %p9437_p0 = scmp.ge.s32.totalorder %s10283_s21, 1  ;;  %s10283_s21 = sphi %s10322_s21, %s16_s21  }
   0x2   : > { %p212_p1 = scmp.lt.s32.totalorder %s10283_s21, 3 }
   0x4   : > { %p213_p2 = pnand %p9437_p0, %p212_p1 }
   0x6   : > { %216 = sbr.rel (%p213_p2) target bundleno = 2707 (0xa93), region = 44 }
   0xb   : > { %v338_v0 = vld [vmem:[%s14118_s1 + $0x8] sm:$0x1]  ;;  %vm599_vm0 = vcmask 1040384   ;;  %v337_v1 = vld [vmem:[%s14118_s1] sm:$0xff]  ;;  %p242_p3 = scmp.lt.s32.totalorder %s9433_s22, 1  ;;  %vm343_vm1 = vcmask 72704  }
   0xc   : > { %9440 = vmatpush.msk.msra.mxu0 %vm599_vm0, %v338_v0  ;;  %v10379_v18 = vld [vmem:[%s14119_s2] ss:$0 sm:$0xff]  ;;  %vm960_vm2 = vcmask 261120   ;;  %v10392_v27 = vld [vmem:[%s14120_s3 + $0x38] sm:$0xff]  ;;  %v10399_v28 = vld [vmem:[%s14120_s3 + $0x30] sm:$0xff]  ;;  %vm1615_vm3 = vcmask 523264  }
   0xd   : > { %s14163_s22 = smov (!%p242_p3, %s9433_s22), 1  ;;  %10253 = vmatpush.msra.mxu2 %v10392_v27  ;;  %10254 = vmatpush.msra.mxu3 %v10392_v27  ;;  %v10408_v32 = vld [vmem:[%s14120_s3 + $0x28] sm:$0xff]  ;;  %v10416_v34 = vld [vmem:[%s14120_s3 + $0x20] sm:$0xff]  ;;  %vm1045_vm4 = vcmask 257024   ;;  %vm8701_vm5 = vcmask 520192   ;;  %vm8927_vm6 = vcmask 1044480  }
   0xe   : > { %618 = vmatpush.msra.mxu0 %v337_v1  ;;  %s10261_s27 = smul.u32 680, %s14163_s22  ;;  %vm8872_vm7 = vcmask 695296   ;;  %vm9313_vm8 = vcmask 519168   ;;  %vm9368_vm9 = vcmask 1043968  }
   0xf   : > { %10255 = vmatpush.msra.mxu2 %v10399_v28  ;;  %10256 = vmatpush.msra.mxu3 %v10399_v28  ;;  %s10262_s25 = smul.u32 36, %s14163_s22  ;;  %s10286_s22 = smov 64  }
  0x10   : > { %s10342_s30 = scalar_lea.vmem %s14117_s0, %s10261_s27 }
  0x11   : > { %v252_v2 = vld [vmem:[%s10342_s30] sm:$0xff]  ;;  %v253_v3 = vld [vmem:[%s10342_s30 + $0x8] sm:$0xff]  ;;  %v254_v4 = vld [vmem:[%s10342_s30 + $0x10] sm:$0xff]  ;;  %10257 = vmatpush.msra.mxu2 %v10408_v32  ;;  %10258 = vmatpush.msra.mxu3 %v10408_v32  ;;  %s14049_s7 = scalar_lea.vmem %s14123_s6, %s10262_s25 }
  0x12   : > { %9441 = vmatmul.msk.f32.vlgmr.msra.gmra.mxu0 %vm343_vm1, %v252_v2  ;;  %v255_v5 = vld [vmem:[%s10342_s30 + $0x18] sm:$0xff]  ;;  %v256_v6 = vld [vmem:[%s10342_s30 + $0x20] sm:$0xff]  ;;  %v257_v7 = vld [vmem:[%s10342_s30 + $0x28] sm:$0xff] }
  0x13   : > { %v258_v8 = vld [vmem:[%s10342_s30 + $0x30] sm:$0xff]  ;;  %v259_v9 = vld [vmem:[%s10342_s30 + $0x38] sm:$0xff]  ;;  %v260_v10 = vld [vmem:[%s10342_s30 + $0x40] sm:$0xff]  ;;  %10259 = vmatpush.msra.mxu2 %v10416_v34  ;;  %10260 = vmatpush.msra.mxu3 %v10416_v34 }
  0x14   : > { %v261_v11 = vld [vmem:[%s10342_s30 + $0x48] sm:$0xff]  ;;  %v262_v12 = vld [vmem:[%s10342_s30 + $0x50] sm:$0xff]  ;;  %v263_v13 = vld [vmem:[%s10342_s30 + $0x58] sm:$0xff] }
  0x15   : > { %v264_v14 = vld [vmem:[%s10342_s30 + $0x60] sm:$0xff]  ;;  %v265_v15 = vld [vmem:[%s10342_s30 + $0x68] sm:$0xff]  ;;  %v266_v16 = vld [vmem:[%s10342_s30 + $0x70] sm:$0xff] }
  0x16   : > { %v267_v17 = vld [vmem:[%s10342_s30 + $0x78] sm:$0xff]  ;;  %v268_v20 = vld [vmem:[%s10342_s30 + $0x80] sm:$0xff]  ;;  %v269_v24 = vld [vmem:[%s10342_s30 + $0x88] sm:$0xff] }
  0x17   : > { %v270_v30 = vld [vmem:[%s10342_s30 + $0x90] sm:$0xff]  ;;  %v271_v36 = vld [vmem:[%s10342_s30 + $0x98] sm:$0xff]  ;;  %v272_v40 = vld [vmem:[%s10342_s30 + $0xa0] sm:$0xff] }
  0x18   : > { %v273_v44 = vld [vmem:[%s10342_s30 + $0xa8] sm:$0xff]  ;;  %v274_v48 = vld [vmem:[%s10342_s30 + $0xb0] sm:$0xff]  ;;  %v275_v53 = vld [vmem:[%s10342_s30 + $0xb8] sm:$0xff] }
  0x19   : > { %v276_v58 = vld [vmem:[%s10342_s30 + $0xc0] sm:$0xff]  ;;  %v277_v63 = vld [vmem:[%s10342_s30 + $0xc8] sm:$0xff] }
  0x1a   : > { %9442 = vmatmul.msk.f32.gmra.mxu0 %vm343_vm1, %v253_v3 }
  0x22   : > { %9443 = vmatmul.msk.f32.gmra.mxu0 %vm343_vm1, %v254_v4  ;;  %v278_v4 = vld [vmem:[%s10342_s30 + $0xd0] sm:$0xff] }
  0x2a   : > { %9444 = vmatmul.msk.f32.gmra.mxu0 %vm343_vm1, %v255_v5 }
  0x32   : > { %9445 = vmatmul.msk.f32.gmra.mxu0 %vm343_vm1, %v256_v6 }
  0x3a   : > { %9446 = vmatmul.msk.f32.gmra.mxu0 %vm343_vm1, %v257_v7 }
  0x42   : > { %9447 = vmatmul.msk.f32.gmra.mxu0 %vm343_vm1, %v258_v8  ;;  %v1129_v8 = vld [vmem:[%s14120_s3 + $0x18] sm:$0xff] }
  0x43   : > { %10249 = vmatpush.msra.mxu1 %v1129_v8  ;;  %1376 = vmatpush.msrb.mxu0 %v1129_v8 }
  0x4a   : > { %9448 = vmatmul.msk.f32.gmra.mxu0 %vm343_vm1, %v259_v9  ;;  %v1128_v9 = vld [vmem:[%s14120_s3 + $0x10] sm:$0xff] }
  0x4b   : > { %10250 = vmatpush.msra.mxu1 %v1128_v9  ;;  %1377 = vmatpush.msrb.mxu0 %v1128_v9 }
  0x52   : > { %9449 = vmatmul.msk.f32.gmra.mxu0 %vm343_vm1, %v260_v10 }
  0x5a   : > { %9450 = vmatmul.msk.f32.gmra.mxu0 %vm343_vm1, %v261_v11  ;;  %v279_v11 = vld [vmem:[%s10342_s30 + $0xd8] sm:$0xff] }
  0x62   : > { %9451 = vmatmul.msk.f32.gmra.mxu0 %vm343_vm1, %v262_v12 }
  0x6a   : > { %9452 = vmatmul.msk.f32.gmra.mxu0 %vm343_vm1, %v263_v13  ;;  %v1127_v13 = vld [vmem:[%s14120_s3 + $0x8] sm:$0xff] }
  0x6b   : > { %10251 = vmatpush.msra.mxu1 %v1127_v13  ;;  %1378 = vmatpush.msrb.mxu0 %v1127_v13 }
  0x72   : > { %9453 = vmatmul.msk.f32.gmra.mxu0 %vm343_vm1, %v264_v14 }
  0x7a   : > { %9454 = vmatmul.msk.f32.gmra.mxu0 %vm343_vm1, %v265_v15  ;;  %v1126_v15 = vld [vmem:[%s14120_s3] sm:$0xff] }
  0x7b   : > { %10252 = vmatpush.msra.mxu1 %v1126_v15  ;;  %1379 = vmatpush.msrb.mxu0 %v1126_v15 }
  0x7d   : > { %2022 = vmatpush.msra.mxu0 %v10392_v27 }
  0x7f   : > { %2023 = vmatpush.msra.mxu0 %v10399_v28 }
  0x81   : > { %2024 = vmatpush.msra.mxu0 %v10408_v32 }
  0x82   : > { %9455 = vmatmul.msk.f32.gmra.mxu0 %vm343_vm1, %v266_v16 }
  0x83   : > { %2025 = vmatpush.msra.mxu0 %v10416_v34  ;;  %v283_v34 = vld [vmem:[%s10342_s30 + $0xf8] sm:$0xff] }
  0x8a   : > { %9456 = vmatmul.msk.f32.gmra.mxu0 %vm343_vm1, %v267_v17 }
  0x8f   : > { %v620_v19 = vpop.f32.mrf.mxu0 }
  0x90   : > { %v621_v21 = vadd.f32 %v10379_v18, %v620_v19  ;;  %v280_v19 = vld [vmem:[%s10342_s30 + $0xe0] sm:$0xff] }
  0x92   : > { %v875_v22 = vmax.f32 %v621_v21, 0.0  ;;  %9457 = vmatmul.msk.f32.gmra.mxu0 %vm343_vm1, %v268_v20 }
  0x94   : > { %961 = vst.msk [vmem:[#allocation2] sm:$0xff] %vm960_vm2, %v875_v22 }
  0x97   : > { %v623_v23 = vpop.f32.mrf.mxu0 }
  0x98   : > { %v624_v25 = vadd.f32 %v10379_v18, %v623_v23 }
  0x9a   : > { %v876_v26 = vmax.f32 %v624_v25, 0.0  ;;  %9458 = vmatmul.msk.f32.gmra.mxu0 %vm343_vm1, %v269_v24  ;;  %v281_v24 = vld [vmem:[%s10342_s30 + $0xe8] sm:$0xff] }
  0x9c   : > { %962 = vst.msk [vmem:[#allocation2 + $0x8] sm:$0xff] %vm960_vm2, %v876_v26 }
  0x9f   : > { %v626_v29 = vpop.f32.mrf.mxu0 }
  0xa0   : > { %v627_v31 = vadd.f32 %v10379_v18, %v626_v29  ;;  %v282_v29 = vld [vmem:[%s10342_s30 + $0xf0] sm:$0xff] }
  0xa2   : > { %v877_v33 = vmax.f32 %v627_v31, 0.0  ;;  %9459 = vmatmul.msk.f32.gmra.mxu0 %vm343_vm1, %v270_v30 }
  0xa4   : > { %963 = vst.msk [vmem:[#allocation2 + $0x10] sm:$0xff] %vm960_vm2, %v877_v33 }
  0xa7   : > { %v629_v35 = vpop.f32.mrf.mxu0 }
  0xa8   : > { %v630_v37 = vadd.f32 %v10379_v18, %v629_v35 }
  0xaa   : > { %v878_v38 = vmax.f32 %v630_v37, 0.0  ;;  %9460 = vmatmul.msk.f32.gmra.mxu0 %vm343_vm1, %v271_v36 }
  0xac   : > { %964 = vst.msk [vmem:[#allocation2 + $0x18] sm:$0xff] %vm960_vm2, %v878_v38 }
  0xaf   : > { %v632_v39 = vpop.f32.mrf.mxu0 }
  0xb0   : > { %v633_v41 = vadd.f32 %v10379_v18, %v632_v39 }
  0xb2   : > { %v879_v42 = vmax.f32 %v633_v41, 0.0  ;;  %9461 = vmatmul.msk.f32.gmra.mxu0 %vm343_vm1, %v272_v40  ;;  %v284_v40 = vld [vmem:[%s10342_s30 + $0x100] sm:$0xff] }
  0xb4   : > { %965 = vst.msk [vmem:[#allocation2 + $0x20] sm:$0xff] %vm960_vm2, %v879_v42 }
  0xb7   : > { %v635_v43 = vpop.f32.mrf.mxu0 }
  0xb8   : > { %v636_v45 = vadd.f32 %v10379_v18, %v635_v43 }
  0xba   : > { %v880_v46 = vmax.f32 %v636_v45, 0.0  ;;  %9462 = vmatmul.msk.f32.gmra.mxu0 %vm343_vm1, %v273_v44 }
  0xbc   : > { %966 = vst.msk [vmem:[#allocation2 + $0x28] sm:$0xff] %vm960_vm2, %v880_v46  ;;  %v285_v46 = vld [vmem:[%s10342_s30 + $0x108] sm:$0xff] }
  0xbf   : > { %v638_v47 = vpop.f32.mrf.mxu0 }
  0xc0   : > { %v639_v49 = vadd.f32 %v10379_v18, %v638_v47 }
  0xc2   : > { %v881_v50 = vmax.f32 %v639_v49, 0.0  ;;  %9463 = vmatmul.msk.f32.gmra.mxu0 %vm343_vm1, %v274_v48 }
  0xc3   : > { %v1698_v51 = vld [vmem:[#allocation2 + $0x21] sm:$0xff] }
  0xc4   : > { %967 = vst.msk [vmem:[#allocation2 + $0x30] sm:$0xff] %vm960_vm2, %v881_v50  ;;  %9608 = vmatmul.msk.f32.vlgmr.msra.gmra.mxu2 %vm960_vm2, %v1698_v51 }
  0xc7   : > { %v641_v52 = vpop.f32.mrf.mxu0 }
  0xc8   : > { %v642_v54 = vadd.f32 %v10379_v18, %v641_v52  ;;  %v286_v52 = vld [vmem:[%s10342_s30 + $0x110] sm:$0xff] }
  0xca   : > { %v882_v55 = vmax.f32 %v642_v54, 0.0  ;;  %9464 = vmatmul.msk.f32.gmra.mxu0 %vm343_vm1, %v275_v53 }
  0xcb   : > { %v1699_v56 = vld [vmem:[#allocation2 + $0x29] sm:$0xff] }
  0xcc   : > { %968 = vst.msk [vmem:[#allocation2 + $0x38] sm:$0xff] %vm960_vm2, %v882_v55  ;;  %9609 = vmatmul.msk.f32.gmra.mxu2 %vm960_vm2, %v1699_v56 }
  0xcf   : > { %v644_v57 = vpop.f32.mrf.mxu0 }
  0xd0   : > { %v645_v59 = vadd.f32 %v10379_v18, %v644_v57 }
  0xd2   : > { %v883_v60 = vmax.f32 %v645_v59, 0.0  ;;  %9465 = vmatmul.msk.f32.gmra.mxu0 %vm343_vm1, %v276_v58  ;;  %v287_v58 = vld [vmem:[%s10342_s30 + $0x118] sm:$0xff] }
  0xd3   : > { %v1700_v61 = vld [vmem:[#allocation2 + $0x31] sm:$0xff] }
  0xd4   : > { %969 = vst.msk [vmem:[#allocation2 + $0x40] sm:$0xff] %vm960_vm2, %v883_v60  ;;  %9610 = vmatmul.msk.f32.gmra.mxu2 %vm960_vm2, %v1700_v61 }
  0xd7   : > { %v647_v62 = vpop.f32.mrf.mxu0 }
  0xd8   : > { %v648_v0 = vadd.f32 %v10379_v18, %v647_v62 }
  0xda   : > { %v884_v1 = vmax.f32 %v648_v0, 0.0  ;;  %9466 = vmatmul.msk.f32.gmra.mxu0 %vm343_vm1, %v277_v63  ;;  %v288_v0 = vld [vmem:[%s10342_s30 + $0x120] sm:$0xff] }
  0xdb   : > { %v1701_v2 = vld [vmem:[#allocation2 + $0x39] sm:$0xff] }
  0xdc   : > { %970 = vst.msk [vmem:[#allocation2 + $0x48] sm:$0xff] %vm960_vm2, %v884_v1  ;;  %9611 = vmatmul.msk.f32.gmra.mxu2 %vm960_vm2, %v1701_v2 }
  0xdf   : > { %v650_v3 = vpop.f32.mrf.mxu0 }
  0xe0   : > { %v651_v5 = vadd.f32 %v10379_v18, %v650_v3 }
  0xe2   : > { %v885_v6 = vmax.f32 %v651_v5, 0.0  ;;  %9467 = vmatmul.msk.f32.gmra.mxu0 %vm343_vm1, %v278_v4 }
  0xe3   : > { %v1702_v7 = vld [vmem:[#allocation2 + $0x41] sm:$0xff] }
  0xe4   : > { %971 = vst.msk [vmem:[#allocation2 + $0x50] sm:$0xff] %vm960_vm2, %v885_v6  ;;  %9612 = vmatmul.msk.f32.gmra.mxu2 %vm960_vm2, %v1702_v7  ;;  %v289_v6 = vld [vmem:[%s10342_s30 + $0x128] sm:$0xff] }
  0xe7   : > { %v653_v10 = vpop.f32.mrf.mxu0 }
  0xe8   : > { %v654_v12 = vadd.f32 %v10379_v18, %v653_v10 }
  0xea   : > { %v886_v14 = vmax.f32 %v654_v12, 0.0  ;;  %9468 = vmatmul.msk.f32.gmra.mxu0 %vm343_vm1, %v279_v11  ;;  %v290_v12 = vld [vmem:[%s10342_s30 + $0x130] sm:$0xff] }
  0xeb   : > { %v1703_v16 = vld [vmem:[#allocation2 + $0x49] sm:$0xff] }
  0xec   : > { %972 = vst.msk [vmem:[#allocation2 + $0x58] sm:$0xff] %vm960_vm2, %v886_v14  ;;  %9613 = vmatmul.msk.f32.gmra.mxu2 %vm960_vm2, %v1703_v16 }
  0xef   : > { %v656_v17 = vpop.f32.mrf.mxu0 }
  0xf0   : > { %v657_v20 = vadd.f32 %v10379_v18, %v656_v17 }
  0xf2   : > { %v887_v21 = vmax.f32 %v657_v20, 0.0  ;;  %9469 = vmatmul.msk.f32.gmra.mxu0 %vm343_vm1, %v280_v19  ;;  %v291_v20 = vld [vmem:[%s10342_s30 + $0x138] sm:$0xff] }
  0xf3   : > { %v1704_v22 = vld [vmem:[#allocation2 + $0x51] sm:$0xff] }
  0xf4   : > { %973 = vst.msk [vmem:[#allocation2 + $0x60] sm:$0xff] %vm960_vm2, %v887_v21  ;;  %9614 = vmatmul.msk.f32.gmra.mxu2 %vm960_vm2, %v1704_v22 }
  0xf7   : > { %v659_v23 = vpop.f32.mrf.mxu0 }
  0xf8   : > { %v660_v25 = vadd.f32 %v10379_v18, %v659_v23 }
  0xfa   : > { %v888_v26 = vmax.f32 %v660_v25, 0.0  ;;  %9470 = vmatmul.msk.f32.gmra.mxu0 %vm343_vm1, %v281_v24 }
  0xfb   : > { %v1705_v27 = vld [vmem:[#allocation2 + $0x59] sm:$0xff] }
  0xfc   : > { %974 = vst.msk [vmem:[#allocation2 + $0x68] sm:$0xff] %vm960_vm2, %v888_v26  ;;  %9615 = vmatmul.msk.f32.gmra.mxu2 %vm960_vm2, %v1705_v27  ;;  %v292_v27 = vld [vmem:[%s10342_s30 + $0x140] sm:$0xff] }
  0xff   : > { %v662_v28 = vpop.f32.mrf.mxu0 }
 0x100   : > { %v663_v30 = vadd.f32 %v10379_v18, %v662_v28 }
 0x102   : > { %v889_v31 = vmax.f32 %v663_v30, 0.0  ;;  %9471 = vmatmul.msk.f32.gmra.mxu0 %vm343_vm1, %v282_v29 }
 0x103   : > { %v1706_v32 = vld [vmem:[#allocation2 + $0x61] sm:$0xff] }
 0x104   : > { %975 = vst.msk [vmem:[#allocation2 + $0x70] sm:$0xff] %vm960_vm2, %v889_v31  ;;  %9616 = vmatmul.msk.f32.gmra.mxu2 %vm960_vm2, %v1706_v32 }
 0x107   : > { %v665_v33 = vpop.f32.mrf.mxu0 }
 0x108   : > { %v666_v35 = vadd.f32 %v10379_v18, %v665_v33 }
 0x10a   : > { %v890_v36 = vmax.f32 %v666_v35, 0.0  ;;  %9472 = vmatmul.msk.f32.gmra.mxu0 %vm343_vm1, %v283_v34  ;;  %v293_v34 = vld [vmem:[%s10342_s30 + $0x148] sm:$0xff] }
 0x10b   : > { %v1062_v37 = vld [vmem:[#allocation2 + $0x70] sm:$0xff] }
 0x10c   : > { %v1707_v38 = vld [vmem:[#allocation2 + $0x69] sm:$0xff]  ;;  %976 = vst.msk [vmem:[#allocation2 + $0x78] sm:$0xff] %vm960_vm2, %v890_v36  ;;  %9540 = vmatmul.msk.f32.vlgmr.msra.gmra.mxu1 %vm960_vm2, %v1062_v37 }
 0x10d   : > { %9617 = vmatmul.msk.f32.gmra.mxu2 %vm960_vm2, %v1707_v38 }
 0x10f   : > { %v668_v39 = vpop.f32.mrf.mxu0 }
 0x110   : > { %v669_v41 = vadd.f32 %v10379_v18, %v668_v39 }
 0x112   : > { %v891_v42 = vmax.f32 %v669_v41, 0.0  ;;  %9473 = vmatmul.msk.f32.gmra.mxu0 %vm343_vm1, %v284_v40  ;;  %v294_v41 = vld [vmem:[%s10342_s30 + $0x150] sm:$0xff] }
 0x113   : > { %v1063_v43 = vld [vmem:[#allocation2 + $0x78] sm:$0xff] }
 0x114   : > { %v1708_v44 = vld [vmem:[#allocation2 + $0x71] sm:$0xff]  ;;  %977 = vst.msk [vmem:[#allocation2 + $0x80] sm:$0xff] %vm960_vm2, %v891_v42  ;;  %9541 = vmatmul.msk.f32.gmra.mxu1 %vm960_vm2, %v1063_v43 }
 0x115   : > { %9618 = vmatmul.msk.f32.gmra.mxu2 %vm960_vm2, %v1708_v44 }
 0x117   : > { %v671_v45 = vpop.f32.mrf.mxu0 }
 0x118   : > { %v672_v47 = vadd.f32 %v10379_v18, %v671_v45 }
 0x11a   : > { %v892_v48 = vmax.f32 %v672_v47, 0.0  ;;  %9474 = vmatmul.msk.f32.gmra.mxu0 %vm343_vm1, %v285_v46 }
 0x11b   : > { %v1064_v49 = vld [vmem:[#allocation2 + $0x80] sm:$0xff] }
 0x11c   : > { %v1709_v50 = vld [vmem:[#allocation2 + $0x79] sm:$0xff]  ;;  %978 = vst.msk [vmem:[#allocation2 + $0x88] sm:$0xff] %vm960_vm2, %v892_v48  ;;  %9542 = vmatmul.msk.f32.gmra.mxu1 %vm960_vm2, %v1064_v49 }
 0x11d   : > { %9619 = vmatmul.msk.f32.gmra.mxu2 %vm960_vm2, %v1709_v50  ;;  %v295_v48 = vld [vmem:[%s10342_s30 + $0x158] sm:$0xff] }
 0x11f   : > { %v674_v51 = vpop.f32.mrf.mxu0 }
 0x120   : > { %v675_v53 = vadd.f32 %v10379_v18, %v674_v51 }
 0x122   : > { %v893_v54 = vmax.f32 %v675_v53, 0.0  ;;  %9475 = vmatmul.msk.f32.gmra.mxu0 %vm343_vm1, %v286_v52 }
 0x123   : > { %v1065_v55 = vld [vmem:[#allocation2 + $0x88] sm:$0xff] }
 0x124   : > { %v1710_v56 = vld [vmem:[#allocation2 + $0x81] sm:$0xff]  ;;  %979 = vst.msk [vmem:[#allocation2 + $0x90] sm:$0xff] %vm960_vm2, %v893_v54  ;;  %9543 = vmatmul.msk.f32.gmra.mxu1 %vm960_vm2, %v1065_v55 }
 0x125   : > { %9620 = vmatmul.msk.f32.gmra.mxu2 %vm960_vm2, %v1710_v56  ;;  %v296_v55 = vld [vmem:[%s10342_s30 + $0x160] sm:$0xff] }
 0x127   : > { %v677_v57 = vpop.f32.mrf.mxu0 }
 0x128   : > { %v678_v59 = vadd.f32 %v10379_v18, %v677_v57 }
 0x12a   : > { %v894_v60 = vmax.f32 %v678_v59, 0.0  ;;  %9476 = vmatmul.msk.f32.gmra.mxu0 %vm343_vm1, %v287_v58 }
 0x12b   : > { %v1066_v61 = vld [vmem:[#allocation2 + $0x90] sm:$0xff] }
 0x12c   : > { %v1711_v62 = vld [vmem:[#allocation2 + $0x89] sm:$0xff]  ;;  %980 = vst.msk [vmem:[#allocation2 + $0x98] sm:$0xff] %vm960_vm2, %v894_v60  ;;  %9544 = vmatmul.msk.f32.gmra.mxu1 %vm960_vm2, %v1066_v61 }
 0x12d   : > { %9621 = vmatmul.msk.f32.gmra.mxu2 %vm960_vm2, %v1711_v62  ;;  %v297_v62 = vld [vmem:[%s10342_s30 + $0x168] sm:$0xff] }
 0x12f   : > { %v680_v63 = vpop.f32.mrf.mxu0 }
 0x130   : > { %v681_v1 = vadd.f32 %v10379_v18, %v680_v63 }
 0x132   : > { %v895_v2 = vmax.f32 %v681_v1, 0.0  ;;  %9477 = vmatmul.msk.f32.gmra.mxu0 %vm343_vm1, %v288_v0 }
 0x133   : > { %v1067_v3 = vld [vmem:[#allocation2 + $0x98] sm:$0xff] }
 0x134   : > { %v1712_v4 = vld [vmem:[#allocation2 + $0x91] sm:$0xff]  ;;  %981 = vst.msk [vmem:[#allocation2 + $0xa0] sm:$0xff] %vm960_vm2, %v895_v2  ;;  %9545 = vmatmul.msk.f32.gmra.mxu1 %vm960_vm2, %v1067_v3 }
 0x135   : > { %9622 = vmatmul.msk.f32.gmra.mxu2 %vm960_vm2, %v1712_v4 }
 0x137   : > { %v683_v5 = vpop.f32.mrf.mxu0 }
 0x138   : > { %v684_v7 = vadd.f32 %v10379_v18, %v683_v5  ;;  %v298_v5 = vld [vmem:[%s10342_s30 + $0x170] sm:$0xff] }
 0x13a   : > { %v896_v8 = vmax.f32 %v684_v7, 0.0  ;;  %9478 = vmatmul.msk.f32.gmra.mxu0 %vm343_vm1, %v289_v6 }
 0x13b   : > { %v1068_v9 = vld [vmem:[#allocation2 + $0xa0] sm:$0xff] }
 0x13c   : > { %v1713_v10 = vld [vmem:[#allocation2 + $0x99] sm:$0xff]  ;;  %982 = vst.msk [vmem:[#allocation2 + $0xa8] sm:$0xff] %vm960_vm2, %v896_v8  ;;  %9546 = vmatmul.msk.f32.gmra.mxu1 %vm960_vm2, %v1068_v9 }
 0x13d   : > { %9623 = vmatmul.msk.f32.gmra.mxu2 %vm960_vm2, %v1713_v10 }
 0x13f   : > { %v686_v11 = vpop.f32.mrf.mxu0 }
 0x140   : > { %v687_v13 = vadd.f32 %v10379_v18, %v686_v11 }
 0x142   : > { %v897_v14 = vmax.f32 %v687_v13, 0.0  ;;  %9479 = vmatmul.msk.f32.gmra.mxu0 %vm343_vm1, %v290_v12  ;;  %v299_v12 = vld [vmem:[%s10342_s30 + $0x178] sm:$0xff] }
 0x143   : > { %v1069_v15 = vld [vmem:[#allocation2 + $0xa8] sm:$0xff] }
 0x144   : > { %v1714_v16 = vld [vmem:[#allocation2 + $0xa1] sm:$0xff]  ;;  %983 = vst.msk [vmem:[#allocation2 + $0xb0] sm:$0xff] %vm960_vm2, %v897_v14  ;;  %9547 = vmatmul.msk.f32.gmra.mxu1 %vm960_vm2, %v1069_v15 }
 0x145   : > { %9624 = vmatmul.msk.f32.gmra.mxu2 %vm960_vm2, %v1714_v16 }
 0x147   : > { %v689_v17 = vpop.f32.mrf.mxu0  ;;  %v10542_v19 = vpop.f32.mrf.mxu2 }
 0x148   : > { %v690_v21 = vadd.f32 %v10379_v18, %v689_v17 }
 0x14a   : > { %v898_v22 = vmax.f32 %v690_v21, 0.0  ;;  %9480 = vmatmul.msk.f32.gmra.mxu0 %vm343_vm1, %v291_v20 }
 0x14b   : > { %v1070_v23 = vld [vmem:[#allocation2 + $0xb0] sm:$0xff] }
 0x14c   : > { %v1715_v24 = vld [vmem:[#allocation2 + $0xa9] sm:$0xff]  ;;  %984 = vst.msk [vmem:[#allocation2 + $0xb8] sm:$0xff] %vm960_vm2, %v898_v22  ;;  %9548 = vmatmul.msk.f32.gmra.mxu1 %vm960_vm2, %v1070_v23  ;;  %v300_v22 = vld [vmem:[%s10342_s30 + $0x180] sm:$0xff] }
 0x14d   : > { %9625 = vmatmul.msk.f32.gmra.mxu2 %vm960_vm2, %v1715_v24 }
 0x14f   : > { %v692_v25 = vpop.f32.mrf.mxu0  ;;  %v10550_v26 = vpop.f32.mrf.mxu2 }
 0x150   : > { %v693_v28 = vadd.f32 %v10379_v18, %v692_v25 }
 0x152   : > { %v899_v29 = vmax.f32 %v693_v28, 0.0  ;;  %9481 = vmatmul.msk.f32.gmra.mxu0 %vm343_vm1, %v292_v27 }
 0x153   : > { %v1071_v30 = vld [vmem:[#allocation2 + $0xb8] sm:$0xff] }
 0x154   : > { %v1716_v31 = vld [vmem:[#allocation2 + $0xb1] sm:$0xff]  ;;  %985 = vst.msk [vmem:[#allocation2 + $0xc0] sm:$0xff] %vm960_vm2, %v899_v29  ;;  %9549 = vmatmul.msk.f32.gmra.mxu1 %vm960_vm2, %v1071_v30 }
 0x155   : > { %9626 = vmatmul.msk.f32.gmra.mxu2 %vm960_vm2, %v1716_v31 }
 0x157   : > { %v695_v32 = vpop.f32.mrf.mxu0  ;;  %v10558_v33 = vpop.f32.mrf.mxu2 }
 0x158   : > { %v696_v35 = vadd.f32 %v10379_v18, %v695_v32  ;;  %v301_v32 = vld [vmem:[%s10342_s30 + $0x188] sm:$0xff] }
 0x15a   : > { %v900_v36 = vmax.f32 %v696_v35, 0.0  ;;  %9482 = vmatmul.msk.f32.gmra.mxu0 %vm343_vm1, %v293_v34 }
 0x15b   : > { %v1072_v37 = vld [vmem:[#allocation2 + $0xc0] sm:$0xff] }
 0x15c   : > { %v1717_v38 = vld [vmem:[#allocation2 + $0xb9] sm:$0xff]  ;;  %986 = vst.msk [vmem:[#allocation2 + $0xc8] sm:$0xff] %vm960_vm2, %v900_v36  ;;  %9550 = vmatmul.msk.f32.gmra.mxu1 %vm960_vm2, %v1072_v37 }
 0x15d   : > { %9627 = vmatmul.msk.f32.gmra.mxu2 %vm960_vm2, %v1717_v38 }
 0x15f   : > { %v698_v39 = vpop.f32.mrf.mxu0  ;;  %v10566_v40 = vpop.f32.mrf.mxu2 }
 0x160   : > { %v699_v42 = vadd.f32 %v10379_v18, %v698_v39 }
 0x162   : > { %v901_v43 = vmax.f32 %v699_v42, 0.0  ;;  %9483 = vmatmul.msk.f32.gmra.mxu0 %vm343_vm1, %v294_v41 }
 0x163   : > { %v1073_v44 = vld [vmem:[#allocation2 + $0xc8] sm:$0xff] }
 0x164   : > { %v1718_v45 = vld [vmem:[#allocation2 + $0xc1] sm:$0xff]  ;;  %987 = vst.msk [vmem:[#allocation2 + $0xd0] sm:$0xff] %vm960_vm2, %v901_v43  ;;  %9551 = vmatmul.msk.f32.gmra.mxu1 %vm960_vm2, %v1073_v44  ;;  %v302_v44 = vld [vmem:[%s10342_s30 + $0x190] sm:$0xff] }
 0x165   : > { %9628 = vmatmul.msk.f32.gmra.mxu2 %vm960_vm2, %v1718_v45 }
 0x167   : > { %v701_v46 = vpop.f32.mrf.mxu0  ;;  %v10574_v47 = vpop.f32.mrf.mxu2 }
 0x168   : > { %v702_v49 = vadd.f32 %v10379_v18, %v701_v46 }
 0x16a   : > { %v902_v50 = vmax.f32 %v702_v49, 0.0  ;;  %9484 = vmatmul.msk.f32.gmra.mxu0 %vm343_vm1, %v295_v48 }
 0x16b   : > { %v1074_v51 = vld [vmem:[#allocation2 + $0xd0] sm:$0xff] }
 0x16c   : > { %v1719_v52 = vld [vmem:[#allocation2 + $0xc9] sm:$0xff]  ;;  %988 = vst.msk [vmem:[#allocation2 + $0xd8] sm:$0xff] %vm960_vm2, %v902_v50  ;;  %9552 = vmatmul.msk.f32.gmra.mxu1 %vm960_vm2, %v1074_v51 }
 0x16d   : > { %9629 = vmatmul.msk.f32.gmra.mxu2 %vm960_vm2, %v1719_v52 }
 0x16f   : > { %v704_v53 = vpop.f32.mrf.mxu0  ;;  %v10582_v54 = vpop.f32.mrf.mxu2 }
 0x170   : > { %v705_v56 = vadd.f32 %v10379_v18, %v704_v53 }
 0x172   : > { %v903_v57 = vmax.f32 %v705_v56, 0.0  ;;  %9485 = vmatmul.msk.f32.gmra.mxu0 %vm343_vm1, %v296_v55  ;;  %v303_v56 = vld [vmem:[%s10342_s30 + $0x198] sm:$0xff] }
 0x173   : > { %v1075_v58 = vld [vmem:[#allocation2 + $0xd8] sm:$0xff] }
 0x174   : > { %v1720_v59 = vld [vmem:[#allocation2 + $0xd1] sm:$0xff]  ;;  %989 = vst.msk [vmem:[#allocation2 + $0xe0] sm:$0xff] %vm960_vm2, %v903_v57  ;;  %9553 = vmatmul.msk.f32.gmra.mxu1 %vm960_vm2, %v1075_v58 }
 0x175   : > { %9630 = vmatmul.msk.f32.gmra.mxu2 %vm960_vm2, %v1720_v59 }
 0x177   : > { %v707_v60 = vpop.f32.mrf.mxu0  ;;  %v10590_v61 = vpop.f32.mrf.mxu2 }
 0x178   : > { %v708_v63 = vadd.f32 %v10379_v18, %v707_v60 }
 0x17a   : > { %v904_v0 = vmax.f32 %v708_v63, 0.0  ;;  %9486 = vmatmul.msk.f32.gmra.mxu0 %vm343_vm1, %v297_v62 }
 0x17b   : > { %v1076_v1 = vld [vmem:[#allocation2 + $0xe0] sm:$0xff] }
 0x17c   : > { %v1721_v2 = vld [vmem:[#allocation2 + $0xd9] sm:$0xff]  ;;  %990 = vst.msk [vmem:[#allocation2 + $0xe8] sm:$0xff] %vm960_vm2, %v904_v0  ;;  %9554 = vmatmul.msk.f32.gmra.mxu1 %vm960_vm2, %v1076_v1 }
 0x17d   : > { %9631 = vmatmul.msk.f32.gmra.mxu2 %vm960_vm2, %v1721_v2 }
 0x17f   : > { %v710_v3 = vpop.f32.mrf.mxu0  ;;  %v10598_v4 = vpop.f32.mrf.mxu2 }
 0x180   : > { %v711_v6 = vadd.f32 %v10379_v18, %v710_v3  ;;  %v304_v3 = vld [vmem:[%s10342_s30 + $0x1a0] sm:$0xff] }
 0x182   : > { %v905_v7 = vmax.f32 %v711_v6, 0.0  ;;  %9487 = vmatmul.msk.f32.gmra.mxu0 %vm343_vm1, %v298_v5 }
 0x183   : > { %v1077_v8 = vld [vmem:[#allocation2 + $0xe8] sm:$0xff] }
 0x184   : > { %v1722_v9 = vld [vmem:[#allocation2 + $0xe1] sm:$0xff]  ;;  %991 = vst.msk [vmem:[#allocation2 + $0xf0] sm:$0xff] %vm960_vm2, %v905_v7  ;;  %9555 = vmatmul.msk.f32.gmra.mxu1 %vm960_vm2, %v1077_v8 }
 0x185   : > { %9632 = vmatmul.msk.f32.gmra.mxu2 %vm960_vm2, %v1722_v9 }
 0x187   : > { %v713_v10 = vpop.f32.mrf.mxu0  ;;  %v10606_v11 = vpop.f32.mrf.mxu2 }
 0x188   : > { %v714_v13 = vadd.f32 %v10379_v18, %v713_v10 }
 0x189   : > { %v1423_v14 = vpop.f32.mrf.mxu1 }
 0x18a   : > { %v906_v15 = vmax.f32 %v714_v13, 0.0  ;;  %1630 = vst.msk [vmem:[#allocation3 + $0x70] sm:$0xff] %vm1615_vm3, %v1423_v14  ;;  %9488 = vmatmul.msk.f32.gmra.mxu0 %vm343_vm1, %v299_v12 }
 0x18b   : > { %v1078_v16 = vld [vmem:[#allocation2 + $0xf0] sm:$0xff] }
 0x18c   : > { %v1723_v17 = vld [vmem:[#allocation2 + $0xe9] sm:$0xff]  ;;  %992 = vst.msk [vmem:[#allocation2 + $0xf8] sm:$0xff] %vm960_vm2, %v906_v15  ;;  %9556 = vmatmul.msk.f32.gmra.mxu1 %vm960_vm2, %v1078_v16 }
 0x18d   : > { %9633 = vmatmul.msk.f32.gmra.mxu2 %vm960_vm2, %v1723_v17  ;;  %v305_v15 = vld [vmem:[%s10342_s30 + $0x1a8] sm:$0xff] }
 0x18f   : > { %v716_v20 = vpop.f32.mrf.mxu0 }
 0x190   : > { %v10615_v21 = vpop.f32.mrf.mxu2  ;;  %v717_v23 = vadd.f32 %v10379_v18, %v716_v20 }
 0x191   : > { %v1426_v24 = vpop.f32.mrf.mxu1  ;;  %v2275_v31 = vld [vmem:[#allocation3 + $0x70] sm:$0xff] }
 0x192   : > { %v907_v25 = vmax.f32 %v717_v23, 0.0  ;;  %1631 = vst.msk [vmem:[#allocation3 + $0x78] sm:$0xff] %vm1615_vm3, %v1426_v24  ;;  %9489 = vmatmul.msk.f32.gmra.mxu0 %vm343_vm1, %v300_v22 }
 0x193   : > { %v1079_v27 = vld [vmem:[#allocation2 + $0xf8] sm:$0xff] }
 0x194   : > { %v1724_v28 = vld [vmem:[#allocation2 + $0xf1] sm:$0xff]  ;;  %993 = vst.msk [vmem:[#allocation2 + $0x100] sm:$0xff] %vm960_vm2, %v907_v25  ;;  %9557 = vmatmul.msk.f32.gmra.mxu1 %vm960_vm2, %v1079_v27 }
 0x195   : > { %9634 = vmatmul.msk.f32.gmra.mxu2 %vm960_vm2, %v1724_v28 }
 0x197   : > { %v719_v29 = vpop.f32.mrf.mxu0 }
 0x198   : > { %v2069_v30 = vpop.f32.mrf.mxu2  ;;  %v720_v34 = vadd.f32 %v10379_v18, %v719_v29  ;;  %v306_v29 = vld [vmem:[%s10342_s30 + $0x1b0] sm:$0xff] }
 0x199   : > { %v2353_v35 = vadd.f32 %v2275_v31, %v2069_v30  ;;  %v1429_v36 = vpop.f32.mrf.mxu1  ;;  %v2276_v43 = vld [vmem:[#allocation3 + $0x78] sm:$0xff] }
 0x19a   : > { %v908_v37 = vmax.f32 %v720_v34, 0.0  ;;  %9490 = vmatmul.msk.f32.gmra.mxu0 %vm343_vm1, %v301_v32  ;;  %1632 = vst.msk [vmem:[#allocation3 + $0x80] sm:$0xff] %vm1615_vm3, %v1429_v36 }
 0x19b   : > { %2431 = vst.msk [vmem:[#allocation3 + $0x70] sm:$0xff] %vm1615_vm3, %v2353_v35  ;;  %v1080_v38 = vld [vmem:[#allocation2 + $0x100] sm:$0xff] }
 0x19c   : > { %v1725_v39 = vld [vmem:[#allocation2 + $0xf9] sm:$0xff]  ;;  %994 = vst.msk [vmem:[#allocation2 + $0x108] sm:$0xff] %vm960_vm2, %v908_v37  ;;  %9558 = vmatmul.msk.f32.gmra.mxu1 %vm960_vm2, %v1080_v38 }
 0x19d   : > { %9635 = vmatmul.msk.f32.gmra.mxu2 %vm960_vm2, %v1725_v39 }
 0x19f   : > { %v722_v41 = vpop.f32.mrf.mxu0 }
 0x1a0   : > { %v2072_v42 = vpop.f32.mrf.mxu2  ;;  %v723_v45 = vadd.f32 %v10379_v18, %v722_v41  ;;  %v307_v41 = vld [vmem:[%s10342_s30 + $0x1b8] sm:$0xff] }
 0x1a1   : > { %v2354_v46 = vadd.f32 %v2276_v43, %v2072_v42  ;;  %v1432_v48 = vpop.f32.mrf.mxu1  ;;  %v2277_v55 = vld [vmem:[#allocation3 + $0x80] sm:$0xff] }
 0x1a2   : > { %v909_v49 = vmax.f32 %v723_v45, 0.0  ;;  %9491 = vmatmul.msk.f32.gmra.mxu0 %vm343_vm1, %v302_v44  ;;  %1633 = vst.msk [vmem:[#allocation3 + $0x88] sm:$0xff] %vm1615_vm3, %v1432_v48 }
 0x1a3   : > { %2432 = vst.msk [vmem:[#allocation3 + $0x78] sm:$0xff] %vm1615_vm3, %v2354_v46  ;;  %v1081_v50 = vld [vmem:[#allocation2 + $0x108] sm:$0xff] }
 0x1a4   : > { %v1726_v51 = vld [vmem:[#allocation2 + $0x101] sm:$0xff]  ;;  %995 = vst.msk [vmem:[#allocation2 + $0x110] sm:$0xff] %vm960_vm2, %v909_v49  ;;  %9559 = vmatmul.msk.f32.gmra.mxu1 %vm960_vm2, %v1081_v50 }
 0x1a5   : > { %9636 = vmatmul.msk.f32.gmra.mxu2 %vm960_vm2, %v1726_v51 }
 0x1a7   : > { %v725_v52 = vpop.f32.mrf.mxu0 }
 0x1a8   : > { %v2075_v53 = vpop.f32.mrf.mxu2  ;;  %v726_v57 = vadd.f32 %v10379_v18, %v725_v52  ;;  %v308_v52 = vld [vmem:[%s10342_s30 + $0x1c0] sm:$0xff] }
 0x1a9   : > { %v2355_v58 = vadd.f32 %v2277_v55, %v2075_v53  ;;  %v1435_v59 = vpop.f32.mrf.mxu1  ;;  %v2278_v2 = vld [vmem:[#allocation3 + $0x88] sm:$0xff] }
 0x1aa   : > { %v910_v60 = vmax.f32 %v726_v57, 0.0  ;;  %9492 = vmatmul.msk.f32.gmra.mxu0 %vm343_vm1, %v303_v56  ;;  %1634 = vst.msk [vmem:[#allocation3 + $0x90] sm:$0xff] %vm1615_vm3, %v1435_v59 }
 0x1ab   : > { %2433 = vst.msk [vmem:[#allocation3 + $0x80] sm:$0xff] %vm1615_vm3, %v2355_v58  ;;  %v1082_v62 = vld [vmem:[#allocation2 + $0x110] sm:$0xff] }
 0x1ac   : > { %v1727_v63 = vld [vmem:[#allocation2 + $0x109] sm:$0xff]  ;;  %996 = vst.msk [vmem:[#allocation2 + $0x118] sm:$0xff] %vm960_vm2, %v910_v60  ;;  %9560 = vmatmul.msk.f32.gmra.mxu1 %vm960_vm2, %v1082_v62 }
 0x1ad   : > { %9637 = vmatmul.msk.f32.gmra.mxu2 %vm960_vm2, %v1727_v63 }
 0x1af   : > { %v728_v0 = vpop.f32.mrf.mxu0 }
 0x1b0   : > { %v2078_v1 = vpop.f32.mrf.mxu2  ;;  %v729_v5 = vadd.f32 %v10379_v18, %v728_v0  ;;  %v309_v0 = vld [vmem:[%s10342_s30 + $0x1c8] sm:$0xff] }
 0x1b1   : > { %v2356_v6 = vadd.f32 %v2278_v2, %v2078_v1  ;;  %v1438_v7 = vpop.f32.mrf.mxu1  ;;  %v2279_v14 = vld [vmem:[#allocation3 + $0x90] sm:$0xff] }
 0x1b2   : > { %v911_v8 = vmax.f32 %v729_v5, 0.0  ;;  %9493 = vmatmul.msk.f32.gmra.mxu0 %vm343_vm1, %v304_v3  ;;  %1635 = vst.msk [vmem:[#allocation3 + $0x98] sm:$0xff] %vm1615_vm3, %v1438_v7 }
 0x1b3   : > { %2434 = vst.msk [vmem:[#allocation3 + $0x88] sm:$0xff] %vm1615_vm3, %v2356_v6  ;;  %v1083_v9 = vld [vmem:[#allocation2 + $0x118] sm:$0xff] }
 0x1b4   : > { %v1728_v10 = vld [vmem:[#allocation2 + $0x111] sm:$0xff]  ;;  %997 = vst.msk [vmem:[#allocation2 + $0x120] sm:$0xff] %vm960_vm2, %v911_v8  ;;  %9561 = vmatmul.msk.f32.gmra.mxu1 %vm960_vm2, %v1083_v9 }
 0x1b5   : > { %9638 = vmatmul.msk.f32.gmra.mxu2 %vm960_vm2, %v1728_v10 }
 0x1b7   : > { %v731_v12 = vpop.f32.mrf.mxu0 }
 0x1b8   : > { %v2081_v13 = vpop.f32.mrf.mxu2  ;;  %v732_v16 = vadd.f32 %v10379_v18, %v731_v12  ;;  %v310_v12 = vld [vmem:[%s10342_s30 + $0x1d0] sm:$0xff] }
 0x1b9   : > { %v2357_v17 = vadd.f32 %v2279_v14, %v2081_v13  ;;  %v1441_v20 = vpop.f32.mrf.mxu1  ;;  %v2280_v28 = vld [vmem:[#allocation3 + $0x98] sm:$0xff] }
 0x1ba   : > { %v912_v22 = vmax.f32 %v732_v16, 0.0  ;;  %9494 = vmatmul.msk.f32.gmra.mxu0 %vm343_vm1, %v305_v15  ;;  %1636 = vst.msk [vmem:[#allocation3 + $0xa0] sm:$0xff] %vm1615_vm3, %v1441_v20 }
 0x1bb   : > { %2435 = vst.msk [vmem:[#allocation3 + $0x90] sm:$0xff] %vm1615_vm3, %v2357_v17  ;;  %v1084_v23 = vld [vmem:[#allocation2 + $0x120] sm:$0xff] }
 0x1bc   : > { %v1729_v24 = vld [vmem:[#allocation2 + $0x119] sm:$0xff]  ;;  %998 = vst.msk [vmem:[#allocation2 + $0x128] sm:$0xff] %vm960_vm2, %v912_v22  ;;  %9562 = vmatmul.msk.f32.gmra.mxu1 %vm960_vm2, %v1084_v23 }
 0x1bd   : > { %9639 = vmatmul.msk.f32.gmra.mxu2 %vm960_vm2, %v1729_v24 }
 0x1bf   : > { %v734_v25 = vpop.f32.mrf.mxu0 }
 0x1c0   : > { %v2084_v27 = vpop.f32.mrf.mxu2  ;;  %v735_v30 = vadd.f32 %v10379_v18, %v734_v25  ;;  %v311_v25 = vld [vmem:[%s10342_s30 + $0x1d8] sm:$0xff] }
 0x1c1   : > { %v2358_v31 = vadd.f32 %v2280_v28, %v2084_v27  ;;  %v1444_v32 = vpop.f32.mrf.mxu1  ;;  %v2281_v39 = vld [vmem:[#allocation3 + $0xa0] sm:$0xff] }
 0x1c2   : > { %v913_v34 = vmax.f32 %v735_v30, 0.0  ;;  %9495 = vmatmul.msk.f32.gmra.mxu0 %vm343_vm1, %v306_v29  ;;  %1637 = vst.msk [vmem:[#allocation3 + $0xa8] sm:$0xff] %vm1615_vm3, %v1444_v32 }
 0x1c3   : > { %2436 = vst.msk [vmem:[#allocation3 + $0x98] sm:$0xff] %vm1615_vm3, %v2358_v31  ;;  %v1085_v35 = vld [vmem:[#allocation2 + $0x128] sm:$0xff] }
 0x1c4   : > { %v1730_v36 = vld [vmem:[#allocation2 + $0x121] sm:$0xff]  ;;  %999 = vst.msk [vmem:[#allocation2 + $0x130] sm:$0xff] %vm960_vm2, %v913_v34  ;;  %9563 = vmatmul.msk.f32.gmra.mxu1 %vm960_vm2, %v1085_v35 }
 0x1c5   : > { %9640 = vmatmul.msk.f32.gmra.mxu2 %vm960_vm2, %v1730_v36  ;;  %v312_v36 = vld [vmem:[%s10342_s30 + $0x1e0] sm:$0xff] }
 0x1c7   : > { %v737_v37 = vpop.f32.mrf.mxu0 }
 0x1c8   : > { %v2087_v38 = vpop.f32.mrf.mxu2  ;;  %v738_v42 = vadd.f32 %v10379_v18, %v737_v37  ;;  %v10716_v37 = vld [vmem:[%s14119_s2] ss:$0 sm:$0xff] }
 0x1c9   : > { %v2359_v43 = vadd.f32 %v2281_v39, %v2087_v38  ;;  %v1447_v44 = vpop.f32.mrf.mxu1  ;;  %v2282_v51 = vld [vmem:[#allocation3 + $0xa8] sm:$0xff] }
 0x1ca   : > { %v914_v45 = vmax.f32 %v738_v42, 0.0  ;;  %9496 = vmatmul.msk.f32.gmra.mxu0 %vm343_vm1, %v307_v41  ;;  %1638 = vst.msk [vmem:[#allocation3 + $0xb0] sm:$0xff] %vm1615_vm3, %v1447_v44 }
 0x1cb   : > { %2437 = vst.msk [vmem:[#allocation3 + $0xa0] sm:$0xff] %vm1615_vm3, %v2359_v43  ;;  %v1086_v46 = vld [vmem:[#allocation2 + $0x130] sm:$0xff] }
 0x1cc   : > { %v1731_v48 = vld [vmem:[#allocation2 + $0x129] sm:$0xff]  ;;  %1000 = vst.msk [vmem:[#allocation2 + $0x138] sm:$0xff] %vm960_vm2, %v914_v45  ;;  %9564 = vmatmul.msk.f32.gmra.mxu1 %vm960_vm2, %v1086_v46 }
 0x1cd   : > { %9641 = vmatmul.msk.f32.gmra.mxu2 %vm960_vm2, %v1731_v48 }
 0x1cf   : > { %v740_v49 = vpop.f32.mrf.mxu0 }
 0x1d0   : > { %v2090_v50 = vpop.f32.mrf.mxu2  ;;  %v741_v53 = vadd.f32 %v10379_v18, %v740_v49  ;;  %v313_v49 = vld [vmem:[%s10342_s30 + $0x1e8] sm:$0xff] }
 0x1d1   : > { %v2360_v55 = vadd.f32 %v2282_v51, %v2090_v50  ;;  %v1450_v56 = vpop.f32.mrf.mxu1  ;;  %v2283_v63 = vld [vmem:[#allocation3 + $0xb0] sm:$0xff] }
 0x1d2   : > { %v915_v57 = vmax.f32 %v741_v53, 0.0  ;;  %9497 = vmatmul.msk.f32.gmra.mxu0 %vm343_vm1, %v308_v52  ;;  %1639 = vst.msk [vmem:[#allocation3 + $0xb8] sm:$0xff] %vm1615_vm3, %v1450_v56 }
 0x1d3   : > { %2438 = vst.msk [vmem:[#allocation3 + $0xa8] sm:$0xff] %vm1615_vm3, %v2360_v55  ;;  %v1087_v58 = vld [vmem:[#allocation2 + $0x138] sm:$0xff] }
 0x1d4   : > { %v1732_v59 = vld [vmem:[#allocation2 + $0x131] sm:$0xff]  ;;  %1001 = vst.msk [vmem:[#allocation2 + $0x140] sm:$0xff] %vm960_vm2, %v915_v57  ;;  %9565 = vmatmul.msk.f32.gmra.mxu1 %vm960_vm2, %v1087_v58 }
 0x1d5   : > { %9642 = vmatmul.msk.f32.gmra.mxu2 %vm960_vm2, %v1732_v59 }
 0x1d7   : > { %v743_v60 = vpop.f32.mrf.mxu0 }
 0x1d8   : > { %v2093_v62 = vpop.f32.mrf.mxu2  ;;  %v744_v1 = vadd.f32 %v10379_v18, %v743_v60  ;;  %v314_v60 = vld [vmem:[%s10342_s30 + $0x1f0] sm:$0xff] }
 0x1d9   : > { %v2361_v2 = vadd.f32 %v2283_v63, %v2093_v62  ;;  %v1453_v3 = vpop.f32.mrf.mxu1  ;;  %v2284_v10 = vld [vmem:[#allocation3 + $0xb8] sm:$0xff] }
 0x1da   : > { %v916_v5 = vmax.f32 %v744_v1, 0.0  ;;  %9498 = vmatmul.msk.f32.gmra.mxu0 %vm343_vm1, %v309_v0  ;;  %1640 = vst.msk [vmem:[#allocation3 + $0xc0] sm:$0xff] %vm1615_vm3, %v1453_v3 }
 0x1db   : > { %2439 = vst.msk [vmem:[#allocation3 + $0xb0] sm:$0xff] %vm1615_vm3, %v2361_v2  ;;  %v1088_v6 = vld [vmem:[#allocation2 + $0x140] sm:$0xff] }
 0x1dc   : > { %v1733_v7 = vld [vmem:[#allocation2 + $0x139] sm:$0xff]  ;;  %1002 = vst.msk [vmem:[#allocation2 + $0x148] sm:$0xff] %vm960_vm2, %v916_v5  ;;  %9566 = vmatmul.msk.f32.gmra.mxu1 %vm960_vm2, %v1088_v6 }
 0x1dd   : > { %9643 = vmatmul.msk.f32.gmra.mxu2 %vm960_vm2, %v1733_v7 }
 0x1df   : > { %v746_v8 = vpop.f32.mrf.mxu0 }
 0x1e0   : > { %v2096_v9 = vpop.f32.mrf.mxu2  ;;  %v747_v13 = vadd.f32 %v10379_v18, %v746_v8  ;;  %v315_v8 = vld [vmem:[%s10342_s30 + $0x1f8] sm:$0xff] }
 0x1e1   : > { %v2362_v14 = vadd.f32 %v2284_v10, %v2096_v9  ;;  %v1456_v15 = vpop.f32.mrf.mxu1  ;;  %v2285_v24 = vld [vmem:[#allocation3 + $0xc0] sm:$0xff] }
 0x1e2   : > { %v917_v16 = vmax.f32 %v747_v13, 0.0  ;;  %9499 = vmatmul.msk.f32.gmra.mxu0 %vm343_vm1, %v310_v12  ;;  %1641 = vst.msk [vmem:[#allocation3 + $0xc8] sm:$0xff] %vm1615_vm3, %v1456_v15 }
 0x1e3   : > { %2440 = vst.msk [vmem:[#allocation3 + $0xb8] sm:$0xff] %vm1615_vm3, %v2362_v14  ;;  %v1089_v17 = vld [vmem:[#allocation2 + $0x148] sm:$0xff] }
 0x1e4   : > { %v1734_v20 = vld [vmem:[#allocation2 + $0x141] sm:$0xff]  ;;  %1003 = vst.msk [vmem:[#allocation2 + $0x150] sm:$0xff] %vm960_vm2, %v917_v16  ;;  %9567 = vmatmul.msk.f32.gmra.mxu1 %vm960_vm2, %v1089_v17 }
 0x1e5   : > { %9644 = vmatmul.msk.f32.gmra.mxu2 %vm960_vm2, %v1734_v20 }
 0x1e7   : > { %v749_v22 = vpop.f32.mrf.mxu0 }
 0x1e8   : > { %v2099_v23 = vpop.f32.mrf.mxu2  ;;  %v750_v27 = vadd.f32 %v10379_v18, %v749_v22  ;;  %v316_v22 = vld [vmem:[%s10342_s30 + $0x200] sm:$0xff] }
 0x1e9   : > { %v2363_v28 = vadd.f32 %v2285_v24, %v2099_v23  ;;  %v1459_v29 = vpop.f32.mrf.mxu1  ;;  %v2286_v18 = vld [vmem:[#allocation3 + $0xc8] sm:$0xff] }
 0x1ea   : > { %v918_v30 = vmax.f32 %v750_v27, 0.0  ;;  %9500 = vmatmul.msk.f32.gmra.mxu0 %vm343_vm1, %v311_v25  ;;  %1642 = vst.msk [vmem:[#allocation3 + $0xd0] sm:$0xff] %vm1615_vm3, %v1459_v29 }
 0x1eb   : > { %2441 = vst.msk [vmem:[#allocation3 + $0xc0] sm:$0xff] %vm1615_vm3, %v2363_v28  ;;  %v1090_v31 = vld [vmem:[#allocation2 + $0x150] sm:$0xff] }
 0x1ec   : > { %v1735_v32 = vld [vmem:[#allocation2 + $0x149] sm:$0xff]  ;;  %1004 = vst.msk [vmem:[#allocation2 + $0x158] sm:$0xff] %vm960_vm2, %v918_v30  ;;  %9568 = vmatmul.msk.f32.gmra.mxu1 %vm960_vm2, %v1090_v31 }
 0x1ed   : > { %9645 = vmatmul.msk.f32.gmra.mxu2 %vm960_vm2, %v1735_v32 }
 0x1ef   : > { %v752_v34 = vpop.f32.mrf.mxu0 }
 0x1f0   : > { %v2102_v35 = vpop.f32.mrf.mxu2  ;;  %v753_v38 = vadd.f32 %v10716_v37, %v752_v34  ;;  %v317_v34 = vld [vmem:[%s10342_s30 + $0x208] sm:$0xff] }
 0x1f1   : > { %v2364_v39 = vadd.f32 %v2286_v18, %v2102_v35  ;;  %v1462_v41 = vpop.f32.mrf.mxu1  ;;  %v2287_v48 = vld [vmem:[#allocation3 + $0xd0] sm:$0xff] }
 0x1f2   : > { %v919_v42 = vmax.f32 %v753_v38, 0.0  ;;  %9501 = vmatmul.msk.f32.gmra.mxu0 %vm343_vm1, %v312_v36  ;;  %1643 = vst.msk [vmem:[#allocation3 + $0xd8] sm:$0xff] %vm1615_vm3, %v1462_v41 }
 0x1f3   : > { %2442 = vst.msk [vmem:[#allocation3 + $0xc8] sm:$0xff] %vm1615_vm3, %v2364_v39  ;;  %v1091_v43 = vld [vmem:[#allocation2 + $0x158] sm:$0xff] }
 0x1f4   : > { %v1736_v44 = vld [vmem:[#allocation2 + $0x151] sm:$0xff]  ;;  %1005 = vst.msk [vmem:[#allocation2 + $0x160] sm:$0xff] %vm960_vm2, %v919_v42  ;;  %9569 = vmatmul.msk.f32.gmra.mxu1 %vm960_vm2, %v1091_v43 }
 0x1f5   : > { %9646 = vmatmul.msk.f32.gmra.mxu2 %vm960_vm2, %v1736_v44 }
 0x1f7   : > { %v755_v45 = vpop.f32.mrf.mxu0 }
 0x1f8   : > { %v2105_v46 = vpop.f32.mrf.mxu2  ;;  %v756_v50 = vadd.f32 %v10716_v37, %v755_v45  ;;  %v318_v45 = vld [vmem:[%s10342_s30 + $0x210] sm:$0xff] }
 0x1f9   : > { %v2365_v51 = vadd.f32 %v2287_v48, %v2105_v46  ;;  %v1465_v52 = vpop.f32.mrf.mxu1  ;;  %v2288_v59 = vld [vmem:[#allocation3 + $0xd8] sm:$0xff] }
 0x1fa   : > { %v920_v53 = vmax.f32 %v756_v50, 0.0  ;;  %9502 = vmatmul.msk.f32.gmra.mxu0 %vm343_vm1, %v313_v49  ;;  %1644 = vst.msk [vmem:[#allocation3 + $0xe0] sm:$0xff] %vm1615_vm3, %v1465_v52 }
 0x1fb   : > { %2443 = vst.msk [vmem:[#allocation3 + $0xd0] sm:$0xff] %vm1615_vm3, %v2365_v51  ;;  %v1092_v55 = vld [vmem:[#allocation2 + $0x160] sm:$0xff] }
 0x1fc   : > { %v1737_v56 = vld [vmem:[#allocation2 + $0x159] sm:$0xff]  ;;  %1006 = vst.msk [vmem:[#allocation2 + $0x168] sm:$0xff] %vm960_vm2, %v920_v53  ;;  %9570 = vmatmul.msk.f32.gmra.mxu1 %vm960_vm2, %v1092_v55 }
 0x1fd   : > { %9647 = vmatmul.msk.f32.gmra.mxu2 %vm960_vm2, %v1737_v56 }
 0x1ff   : > { %v758_v57 = vpop.f32.mrf.mxu0 }
 0x200   : > { %v2108_v58 = vpop.f32.mrf.mxu2  ;;  %v759_v62 = vadd.f32 %v10716_v37, %v758_v57  ;;  %v319_v57 = vld [vmem:[%s10342_s30 + $0x218] sm:$0xff] }
 0x201   : > { %v2366_v63 = vadd.f32 %v2288_v59, %v2108_v58  ;;  %v1468_v0 = vpop.f32.mrf.mxu1  ;;  %v2289_v7 = vld [vmem:[#allocation3 + $0xe0] sm:$0xff] }
 0x202   : > { %v921_v1 = vmax.f32 %v759_v62, 0.0  ;;  %9503 = vmatmul.msk.f32.gmra.mxu0 %vm343_vm1, %v314_v60  ;;  %1645 = vst.msk [vmem:[#allocation3 + $0xe8] sm:$0xff] %vm1615_vm3, %v1468_v0 }
 0x203   : > { %2444 = vst.msk [vmem:[#allocation3 + $0xd8] sm:$0xff] %vm1615_vm3, %v2366_v63  ;;  %v1093_v2 = vld [vmem:[#allocation2 + $0x168] sm:$0xff] }
 0x204   : > { %v1738_v3 = vld [vmem:[#allocation2 + $0x161] sm:$0xff]  ;;  %1007 = vst.msk [vmem:[#allocation2 + $0x170] sm:$0xff] %vm960_vm2, %v921_v1  ;;  %9571 = vmatmul.msk.f32.gmra.mxu1 %vm960_vm2, %v1093_v2 }
 0x205   : > { %9648 = vmatmul.msk.f32.gmra.mxu2 %vm960_vm2, %v1738_v3 }
 0x207   : > { %v761_v5 = vpop.f32.mrf.mxu0 }
 0x208   : > { %v2111_v6 = vpop.f32.mrf.mxu2  ;;  %v762_v9 = vadd.f32 %v10716_v37, %v761_v5  ;;  %v320_v5 = vld [vmem:[%s10342_s30 + $0x220] sm:$0xff] }
 0x209   : > { %v2367_v10 = vadd.f32 %v2289_v7, %v2111_v6  ;;  %v1471_v12 = vpop.f32.mrf.mxu1  ;;  %v2290_v20 = vld [vmem:[#allocation3 + $0xe8] sm:$0xff] }
 0x20a   : > { %v922_v13 = vmax.f32 %v762_v9, 0.0  ;;  %9504 = vmatmul.msk.f32.gmra.mxu0 %vm343_vm1, %v315_v8  ;;  %1646 = vst.msk [vmem:[#allocation3 + $0xf0] sm:$0xff] %vm1615_vm3, %v1471_v12 }
 0x20b   : > { %2445 = vst.msk [vmem:[#allocation3 + $0xe0] sm:$0xff] %vm1615_vm3, %v2367_v10  ;;  %v1094_v14 = vld [vmem:[#allocation2 + $0x170] sm:$0xff] }
 0x20c   : > { %v1739_v15 = vld [vmem:[#allocation2 + $0x169] sm:$0xff]  ;;  %1008 = vst.msk [vmem:[#allocation2 + $0x178] sm:$0xff] %vm960_vm2, %v922_v13  ;;  %9572 = vmatmul.msk.f32.gmra.mxu1 %vm960_vm2, %v1094_v14 }
 0x20d   : > { %9649 = vmatmul.msk.f32.gmra.mxu2 %vm960_vm2, %v1739_v15 }
 0x20f   : > { %v764_v16 = vpop.f32.mrf.mxu0 }
 0x210   : > { %v2114_v17 = vpop.f32.mrf.mxu2  ;;  %v765_v23 = vadd.f32 %v10716_v37, %v764_v16  ;;  %v321_v16 = vld [vmem:[%s10342_s30 + $0x228] sm:$0xff] }
 0x211   : > { %v2368_v24 = vadd.f32 %v2290_v20, %v2114_v17  ;;  %v1474_v25 = vpop.f32.mrf.mxu1  ;;  %v2291_v32 = vld [vmem:[#allocation3 + $0xf0] sm:$0xff] }
 0x212   : > { %v923_v27 = vmax.f32 %v765_v23, 0.0  ;;  %9505 = vmatmul.msk.f32.gmra.mxu0 %vm343_vm1, %v316_v22  ;;  %1647 = vst.msk [vmem:[#allocation3 + $0xf8] sm:$0xff] %vm1615_vm3, %v1474_v25 }
 0x213   : > { %2446 = vst.msk [vmem:[#allocation3 + $0xe8] sm:$0xff] %vm1615_vm3, %v2368_v24  ;;  %v1095_v28 = vld [vmem:[#allocation2 + $0x178] sm:$0xff] }
 0x214   : > { %v1740_v29 = vld [vmem:[#allocation2 + $0x171] sm:$0xff]  ;;  %1009 = vst.msk [vmem:[#allocation2 + $0x180] sm:$0xff] %vm960_vm2, %v923_v27  ;;  %9573 = vmatmul.msk.f32.gmra.mxu1 %vm960_vm2, %v1095_v28 }
 0x215   : > { %9650 = vmatmul.msk.f32.gmra.mxu2 %vm960_vm2, %v1740_v29 }
 0x217   : > { %v767_v30 = vpop.f32.mrf.mxu0 }
 0x218   : > { %v2117_v31 = vpop.f32.mrf.mxu2  ;;  %v768_v35 = vadd.f32 %v10716_v37, %v767_v30  ;;  %v322_v30 = vld [vmem:[%s10342_s30 + $0x230] sm:$0xff] }
 0x219   : > { %v2369_v18 = vadd.f32 %v2291_v32, %v2117_v31  ;;  %v1477_v36 = vpop.f32.mrf.mxu1  ;;  %v2292_v44 = vld [vmem:[#allocation3 + $0xf8] sm:$0xff] }
 0x21a   : > { %v924_v38 = vmax.f32 %v768_v35, 0.0  ;;  %9506 = vmatmul.msk.f32.gmra.mxu0 %vm343_vm1, %v317_v34  ;;  %1648 = vst.msk [vmem:[#allocation3 + $0x100] sm:$0xff] %vm1615_vm3, %v1477_v36 }
 0x21b   : > { %2447 = vst.msk [vmem:[#allocation3 + $0xf0] sm:$0xff] %vm1615_vm3, %v2369_v18  ;;  %v1096_v39 = vld [vmem:[#allocation2 + $0x180] sm:$0xff] }
 0x21c   : > { %v1741_v41 = vld [vmem:[#allocation2 + $0x179] sm:$0xff]  ;;  %1010 = vst.msk [vmem:[#allocation2 + $0x188] sm:$0xff] %vm960_vm2, %v924_v38  ;;  %9574 = vmatmul.msk.f32.gmra.mxu1 %vm960_vm2, %v1096_v39 }
 0x21d   : > { %9651 = vmatmul.msk.f32.gmra.mxu2 %vm960_vm2, %v1741_v41 }
 0x21f   : > { %v770_v42 = vpop.f32.mrf.mxu0 }
 0x220   : > { %v2120_v43 = vpop.f32.mrf.mxu2  ;;  %v771_v46 = vadd.f32 %v10716_v37, %v770_v42  ;;  %v323_v42 = vld [vmem:[%s10342_s30 + $0x238] sm:$0xff] }
 0x221   : > { %v2370_v48 = vadd.f32 %v2292_v44, %v2120_v43  ;;  %v1480_v49 = vpop.f32.mrf.mxu1  ;;  %v2293_v56 = vld [vmem:[#allocation3 + $0x100] sm:$0xff] }
 0x222   : > { %v925_v50 = vmax.f32 %v771_v46, 0.0  ;;  %9507 = vmatmul.msk.f32.gmra.mxu0 %vm343_vm1, %v318_v45  ;;  %1649 = vst.msk [vmem:[#allocation3 + $0x108] sm:$0xff] %vm1615_vm3, %v1480_v49 }
 0x223   : > { %2448 = vst.msk [vmem:[#allocation3 + $0xf8] sm:$0xff] %vm1615_vm3, %v2370_v48  ;;  %v1097_v51 = vld [vmem:[#allocation2 + $0x188] sm:$0xff] }
 0x224   : > { %v1742_v52 = vld [vmem:[#allocation2 + $0x181] sm:$0xff]  ;;  %1011 = vst.msk [vmem:[#allocation2 + $0x190] sm:$0xff] %vm960_vm2, %v925_v50  ;;  %9575 = vmatmul.msk.f32.gmra.mxu1 %vm960_vm2, %v1097_v51 }
 0x225   : > { %9652 = vmatmul.msk.f32.gmra.mxu2 %vm960_vm2, %v1742_v52 }
 0x227   : > { %v773_v53 = vpop.f32.mrf.mxu0 }
 0x228   : > { %v2123_v55 = vpop.f32.mrf.mxu2  ;;  %v774_v58 = vadd.f32 %v10716_v37, %v773_v53  ;;  %v324_v53 = vld [vmem:[%s10342_s30 + $0x240] sm:$0xff] }
 0x229   : > { %v2371_v59 = vadd.f32 %v2293_v56, %v2123_v55  ;;  %v1483_v60 = vpop.f32.mrf.mxu1  ;;  %v2294_v3 = vld [vmem:[#allocation3 + $0x108] sm:$0xff] }
 0x22a   : > { %v926_v62 = vmax.f32 %v774_v58, 0.0  ;;  %9508 = vmatmul.msk.f32.gmra.mxu0 %vm343_vm1, %v319_v57  ;;  %1650 = vst.msk [vmem:[#allocation3 + $0x110] sm:$0xff] %vm1615_vm3, %v1483_v60 }
 0x22b   : > { %2449 = vst.msk [vmem:[#allocation3 + $0x100] sm:$0xff] %vm1615_vm3, %v2371_v59  ;;  %v1098_v63 = vld [vmem:[#allocation2 + $0x190] sm:$0xff] }
 0x22c   : > { %v1743_v0 = vld [vmem:[#allocation2 + $0x189] sm:$0xff]  ;;  %1012 = vst.msk [vmem:[#allocation2 + $0x198] sm:$0xff] %vm960_vm2, %v926_v62  ;;  %9576 = vmatmul.msk.f32.gmra.mxu1 %vm960_vm2, %v1098_v63 }
 0x22d   : > { %9653 = vmatmul.msk.f32.gmra.mxu2 %vm960_vm2, %v1743_v0 }
 0x22f   : > { %v776_v1 = vpop.f32.mrf.mxu0 }
 0x230   : > { %v2126_v2 = vpop.f32.mrf.mxu2  ;;  %v777_v6 = vadd.f32 %v10716_v37, %v776_v1  ;;  %v325_v1 = vld [vmem:[%s10342_s30 + $0x248] sm:$0xff] }
 0x231   : > { %v2372_v7 = vadd.f32 %v2294_v3, %v2126_v2  ;;  %v1486_v8 = vpop.f32.mrf.mxu1  ;;  %v2295_v15 = vld [vmem:[#allocation3 + $0x110] sm:$0xff] }
 0x232   : > { %v927_v9 = vmax.f32 %v777_v6, 0.0  ;;  %9509 = vmatmul.msk.f32.gmra.mxu0 %vm343_vm1, %v320_v5  ;;  %1651 = vst.msk [vmem:[#allocation3 + $0x118] sm:$0xff] %vm1615_vm3, %v1486_v8 }
 0x233   : > { %2450 = vst.msk [vmem:[#allocation3 + $0x108] sm:$0xff] %vm1615_vm3, %v2372_v7  ;;  %v1099_v10 = vld [vmem:[#allocation2 + $0x198] sm:$0xff] }
 0x234   : > { %v1744_v12 = vld [vmem:[#allocation2 + $0x191] sm:$0xff]  ;;  %1013 = vst.msk [vmem:[#allocation2 + $0x1a0] sm:$0xff] %vm960_vm2, %v927_v9  ;;  %9577 = vmatmul.msk.f32.gmra.mxu1 %vm960_vm2, %v1099_v10 }
 0x235   : > { %9654 = vmatmul.msk.f32.gmra.mxu2 %vm960_vm2, %v1744_v12 }
 0x237   : > { %v779_v13 = vpop.f32.mrf.mxu0 }
 0x238   : > { %v2129_v14 = vpop.f32.mrf.mxu2  ;;  %v780_v17 = vadd.f32 %v10716_v37, %v779_v13  ;;  %v326_v13 = vld [vmem:[%s10342_s30 + $0x250] sm:$0xff] }
 0x239   : > { %v2373_v20 = vadd.f32 %v2295_v15, %v2129_v14  ;;  %v1489_v22 = vpop.f32.mrf.mxu1  ;;  %v2296_v29 = vld [vmem:[#allocation3 + $0x118] sm:$0xff] }
 0x23a   : > { %v928_v23 = vmax.f32 %v780_v17, 0.0  ;;  %9510 = vmatmul.msk.f32.gmra.mxu0 %vm343_vm1, %v321_v16  ;;  %1652 = vst.msk [vmem:[#allocation3 + $0x120] sm:$0xff] %vm1615_vm3, %v1489_v22 }
 0x23b   : > { %2451 = vst.msk [vmem:[#allocation3 + $0x110] sm:$0xff] %vm1615_vm3, %v2373_v20  ;;  %v1100_v24 = vld [vmem:[#allocation2 + $0x1a0] sm:$0xff] }
 0x23c   : > { %v1745_v25 = vld [vmem:[#allocation2 + $0x199] sm:$0xff]  ;;  %1014 = vst.msk [vmem:[#allocation2 + $0x1a8] sm:$0xff] %vm960_vm2, %v928_v23  ;;  %9578 = vmatmul.msk.f32.gmra.mxu1 %vm960_vm2, %v1100_v24 }
 0x23d   : > { %9655 = vmatmul.msk.f32.gmra.mxu2 %vm960_vm2, %v1745_v25 }
 0x23f   : > { %v782_v27 = vpop.f32.mrf.mxu0 }
 0x240   : > { %v2132_v28 = vpop.f32.mrf.mxu2  ;;  %v783_v31 = vadd.f32 %v10716_v37, %v782_v27  ;;  %v327_v27 = vld [vmem:[%s10342_s30 + $0x258] sm:$0xff] }
 0x241   : > { %v2374_v32 = vadd.f32 %v2296_v29, %v2132_v28  ;;  %v1492_v34 = vpop.f32.mrf.mxu1  ;;  %v2297_v41 = vld [vmem:[#allocation3 + $0x120] sm:$0xff] }
 0x242   : > { %v929_v35 = vmax.f32 %v783_v31, 0.0  ;;  %9511 = vmatmul.msk.f32.gmra.mxu0 %vm343_vm1, %v322_v30  ;;  %1653 = vst.msk [vmem:[#allocation3 + $0x128] sm:$0xff] %vm1615_vm3, %v1492_v34 }
 0x243   : > { %2452 = vst.msk [vmem:[#allocation3 + $0x118] sm:$0xff] %vm1615_vm3, %v2374_v32  ;;  %v1101_v18 = vld [vmem:[#allocation2 + $0x1a8] sm:$0xff] }
 0x244   : > { %v1746_v36 = vld [vmem:[#allocation2 + $0x1a1] sm:$0xff]  ;;  %1015 = vst.msk [vmem:[#allocation2 + $0x1b0] sm:$0xff] %vm960_vm2, %v929_v35  ;;  %9579 = vmatmul.msk.f32.gmra.mxu1 %vm960_vm2, %v1101_v18 }
 0x245   : > { %9656 = vmatmul.msk.f32.gmra.mxu2 %vm960_vm2, %v1746_v36 }
 0x247   : > { %v785_v38 = vpop.f32.mrf.mxu0 }
 0x248   : > { %v2135_v39 = vpop.f32.mrf.mxu2  ;;  %v786_v43 = vadd.f32 %v10716_v37, %v785_v38  ;;  %v328_v38 = vld [vmem:[%s10342_s30 + $0x260] sm:$0xff] }
 0x249   : > { %v2375_v44 = vadd.f32 %v2297_v41, %v2135_v39  ;;  %v1495_v45 = vpop.f32.mrf.mxu1  ;;  %v2298_v52 = vld [vmem:[#allocation3 + $0x128] sm:$0xff] }
 0x24a   : > { %v930_v46 = vmax.f32 %v786_v43, 0.0  ;;  %9512 = vmatmul.msk.f32.gmra.mxu0 %vm343_vm1, %v323_v42  ;;  %1654 = vst.msk [vmem:[#allocation3 + $0x130] sm:$0xff] %vm1615_vm3, %v1495_v45 }
 0x24b   : > { %2453 = vst.msk [vmem:[#allocation3 + $0x120] sm:$0xff] %vm1615_vm3, %v2375_v44  ;;  %v1102_v48 = vld [vmem:[#allocation2 + $0x1b0] sm:$0xff] }
 0x24c   : > { %v1747_v49 = vld [vmem:[#allocation2 + $0x1a9] sm:$0xff]  ;;  %1016 = vst.msk [vmem:[#allocation2 + $0x1b8] sm:$0xff] %vm960_vm2, %v930_v46  ;;  %9580 = vmatmul.msk.f32.gmra.mxu1 %vm960_vm2, %v1102_v48 }
 0x24d   : > { %9657 = vmatmul.msk.f32.gmra.mxu2 %vm960_vm2, %v1747_v49 }
 0x24f   : > { %v788_v50 = vpop.f32.mrf.mxu0 }
 0x250   : > { %v2138_v51 = vpop.f32.mrf.mxu2  ;;  %v789_v55 = vadd.f32 %v10716_v37, %v788_v50  ;;  %v329_v50 = vld [vmem:[%s10342_s30 + $0x268] sm:$0xff] }
 0x251   : > { %v2376_v56 = vadd.f32 %v2298_v52, %v2138_v51  ;;  %v1498_v57 = vpop.f32.mrf.mxu1  ;;  %v2299_v0 = vld [vmem:[#allocation3 + $0x130] sm:$0xff] }
 0x252   : > { %v931_v58 = vmax.f32 %v789_v55, 0.0  ;;  %9513 = vmatmul.msk.f32.gmra.mxu0 %vm343_vm1, %v324_v53  ;;  %1655 = vst.msk [vmem:[#allocation3 + $0x138] sm:$0xff] %vm1615_vm3, %v1498_v57 }
 0x253   : > { %2454 = vst.msk [vmem:[#allocation3 + $0x128] sm:$0xff] %vm1615_vm3, %v2376_v56  ;;  %v1103_v59 = vld [vmem:[#allocation2 + $0x1b8] sm:$0xff] }
 0x254   : > { %v1748_v60 = vld [vmem:[#allocation2 + $0x1b1] sm:$0xff]  ;;  %1017 = vst.msk [vmem:[#allocation2 + $0x1c0] sm:$0xff] %vm960_vm2, %v931_v58  ;;  %9581 = vmatmul.msk.f32.gmra.mxu1 %vm960_vm2, %v1103_v59 }
 0x255   : > { %9658 = vmatmul.msk.f32.gmra.mxu2 %vm960_vm2, %v1748_v60 }
 0x257   : > { %v791_v62 = vpop.f32.mrf.mxu0 }
 0x258   : > { %v2141_v63 = vpop.f32.mrf.mxu2  ;;  %v792_v2 = vadd.f32 %v10716_v37, %v791_v62  ;;  %v330_v62 = vld [vmem:[%s10342_s30 + $0x270] sm:$0xff] }
 0x259   : > { %v2377_v3 = vadd.f32 %v2299_v0, %v2141_v63  ;;  %v1501_v5 = vpop.f32.mrf.mxu1  ;;  %v2300_v12 = vld [vmem:[#allocation3 + $0x138] sm:$0xff] }
 0x25a   : > { %v932_v6 = vmax.f32 %v792_v2, 0.0  ;;  %9514 = vmatmul.msk.f32.gmra.mxu0 %vm343_vm1, %v325_v1  ;;  %1656 = vst.msk [vmem:[#allocation3 + $0x140] sm:$0xff] %vm1615_vm3, %v1501_v5 }
 0x25b   : > { %2455 = vst.msk [vmem:[#allocation3 + $0x130] sm:$0xff] %vm1615_vm3, %v2377_v3  ;;  %v1104_v7 = vld [vmem:[#allocation2 + $0x1c0] sm:$0xff] }
 0x25c   : > { %v1749_v8 = vld [vmem:[#allocation2 + $0x1b9] sm:$0xff]  ;;  %1018 = vst.msk [vmem:[#allocation2 + $0x1c8] sm:$0xff] %vm960_vm2, %v932_v6  ;;  %9582 = vmatmul.msk.f32.gmra.mxu1 %vm960_vm2, %v1104_v7 }
 0x25d   : > { %9659 = vmatmul.msk.f32.gmra.mxu2 %vm960_vm2, %v1749_v8 }
 0x25f   : > { %v794_v9 = vpop.f32.mrf.mxu0 }
 0x260   : > { %v2144_v10 = vpop.f32.mrf.mxu2  ;;  %v795_v14 = vadd.f32 %v10716_v37, %v794_v9  ;;  %v331_v9 = vld [vmem:[%s10342_s30 + $0x278] sm:$0xff] }
 0x261   : > { %v2378_v15 = vadd.f32 %v2300_v12, %v2144_v10  ;;  %v1504_v16 = vpop.f32.mrf.mxu1  ;;  %v2301_v25 = vld [vmem:[#allocation3 + $0x140] sm:$0xff] }
 0x262   : > { %v933_v17 = vmax.f32 %v795_v14, 0.0  ;;  %9515 = vmatmul.msk.f32.gmra.mxu0 %vm343_vm1, %v326_v13  ;;  %1657 = vst.msk [vmem:[#allocation3 + $0x148] sm:$0xff] %vm1615_vm3, %v1504_v16 }
 0x263   : > { %2456 = vst.msk [vmem:[#allocation3 + $0x138] sm:$0xff] %vm1615_vm3, %v2378_v15  ;;  %v1105_v20 = vld [vmem:[#allocation2 + $0x1c8] sm:$0xff] }
 0x264   : > { %v1750_v22 = vld [vmem:[#allocation2 + $0x1c1] sm:$0xff]  ;;  %1019 = vst.msk [vmem:[#allocation2 + $0x1d0] sm:$0xff] %vm960_vm2, %v933_v17  ;;  %9583 = vmatmul.msk.f32.gmra.mxu1 %vm960_vm2, %v1105_v20 }
 0x265   : > { %9660 = vmatmul.msk.f32.gmra.mxu2 %vm960_vm2, %v1750_v22 }
 0x267   : > { %v797_v23 = vpop.f32.mrf.mxu0 }
 0x268   : > { %v2147_v24 = vpop.f32.mrf.mxu2  ;;  %v798_v28 = vadd.f32 %v10716_v37, %v797_v23  ;;  %v332_v23 = vld [vmem:[%s10342_s30 + $0x280] sm:$0xff] }
 0x269   : > { %v2379_v29 = vadd.f32 %v2301_v25, %v2147_v24  ;;  %v1507_v30 = vpop.f32.mrf.mxu1  ;;  %v2302_v36 = vld [vmem:[#allocation3 + $0x148] sm:$0xff] }
 0x26a   : > { %v934_v31 = vmax.f32 %v798_v28, 0.0  ;;  %9516 = vmatmul.msk.f32.gmra.mxu0 %vm343_vm1, %v327_v27  ;;  %1658 = vst.msk [vmem:[#allocation3 + $0x150] sm:$0xff] %vm1615_vm3, %v1507_v30 }
 0x26b   : > { %2457 = vst.msk [vmem:[#allocation3 + $0x140] sm:$0xff] %vm1615_vm3, %v2379_v29  ;;  %v1106_v32 = vld [vmem:[#allocation2 + $0x1d0] sm:$0xff] }
 0x26c   : > { %v1751_v34 = vld [vmem:[#allocation2 + $0x1c9] sm:$0xff]  ;;  %1020 = vst.msk [vmem:[#allocation2 + $0x1d8] sm:$0xff] %vm960_vm2, %v934_v31  ;;  %9584 = vmatmul.msk.f32.gmra.mxu1 %vm960_vm2, %v1106_v32 }
 0x26d   : > { %9661 = vmatmul.msk.f32.gmra.mxu2 %vm960_vm2, %v1751_v34 }
 0x26f   : > { %v800_v35 = vpop.f32.mrf.mxu0 }
 0x270   : > { %v2150_v18 = vpop.f32.mrf.mxu2  ;;  %v801_v39 = vadd.f32 %v10716_v37, %v800_v35  ;;  %v333_v35 = vld [vmem:[%s10342_s30 + $0x288] sm:$0xff] }
 0x271   : > { %v2380_v41 = vadd.f32 %v2302_v36, %v2150_v18  ;;  %v1510_v42 = vpop.f32.mrf.mxu1  ;;  %v2303_v49 = vld [vmem:[#allocation3 + $0x150] sm:$0xff] }
 0x272   : > { %v935_v43 = vmax.f32 %v801_v39, 0.0  ;;  %9517 = vmatmul.msk.f32.gmra.mxu0 %vm343_vm1, %v328_v38  ;;  %1659 = vst.msk [vmem:[#allocation3 + $0x158] sm:$0xff] %vm1615_vm3, %v1510_v42 }
 0x273   : > { %2458 = vst.msk [vmem:[#allocation3 + $0x148] sm:$0xff] %vm1615_vm3, %v2380_v41  ;;  %v1107_v44 = vld [vmem:[#allocation2 + $0x1d8] sm:$0xff] }
 0x274   : > { %v1752_v45 = vld [vmem:[#allocation2 + $0x1d1] sm:$0xff]  ;;  %1021 = vst.msk [vmem:[#allocation2 + $0x1e0] sm:$0xff] %vm960_vm2, %v935_v43  ;;  %9585 = vmatmul.msk.f32.gmra.mxu1 %vm960_vm2, %v1107_v44 }
 0x275   : > { %9662 = vmatmul.msk.f32.gmra.mxu2 %vm960_vm2, %v1752_v45  ;;  %v4178_v43 = vld [vmem:[%s14120_s3 + $0x98] sm:$0xff] }
 0x276   : > { %4425 = vmatpush.msrb.mxu2 %v4178_v43 }
 0x277   : > { %v803_v46 = vpop.f32.mrf.mxu0 }
 0x278   : > { %v2153_v48 = vpop.f32.mrf.mxu2  ;;  %v804_v51 = vadd.f32 %v10716_v37, %v803_v46 }
 0x279   : > { %v2381_v52 = vadd.f32 %v2303_v49, %v2153_v48  ;;  %v1513_v53 = vpop.f32.mrf.mxu1  ;;  %v2304_v60 = vld [vmem:[#allocation3 + $0x158] sm:$0xff]  ;;  %v334_v48 = vld [vmem:[%s10342_s30 + $0x290] sm:$0xff] }
 0x27a   : > { %v936_v55 = vmax.f32 %v804_v51, 0.0  ;;  %9518 = vmatmul.msk.f32.gmra.mxu0 %vm343_vm1, %v329_v50  ;;  %1660 = vst.msk [vmem:[#allocation3 + $0x160] sm:$0xff] %vm1615_vm3, %v1513_v53  ;;  %v4177_v49 = vld [vmem:[%s14120_s3 + $0x90] sm:$0xff]  ;;  %v4176_v53 = vld [vmem:[%s14120_s3 + $0x88] sm:$0xff] }
 0x27b   : > { %2459 = vst.msk [vmem:[#allocation3 + $0x150] sm:$0xff] %vm1615_vm3, %v2381_v52  ;;  %v1108_v56 = vld [vmem:[#allocation2 + $0x1e0] sm:$0xff]  ;;  %4426 = vmatpush.msrb.mxu2 %v4177_v49 }
 0x27c   : > { %v1753_v57 = vld [vmem:[#allocation2 + $0x1d9] sm:$0xff]  ;;  %1022 = vst.msk [vmem:[#allocation2 + $0x1e8] sm:$0xff] %vm960_vm2, %v936_v55  ;;  %9586 = vmatmul.msk.f32.gmra.mxu1 %vm960_vm2, %v1108_v56 }
 0x27d   : > { %9663 = vmatmul.msk.f32.gmra.mxu2 %vm960_vm2, %v1753_v57 }
 0x27e   : > { %4427 = vmatpush.msrb.mxu2 %v4176_v53  ;;  %v1050_v53 = vld [vmem:[#allocation2 + $0x10] sm:$0xff] }
 0x27f   : > { %v806_v58 = vpop.f32.mrf.mxu0 }
 0x280   : > { %v2156_v59 = vpop.f32.mrf.mxu2  ;;  %v807_v63 = vadd.f32 %v10716_v37, %v806_v58  ;;  %v4175_v58 = vld [vmem:[%s14120_s3 + $0x80] sm:$0xff] }
 0x281   : > { %v2382_v0 = vadd.f32 %v2304_v60, %v2156_v59  ;;  %v1516_v1 = vpop.f32.mrf.mxu1  ;;  %v2305_v8 = vld [vmem:[#allocation3 + $0x160] sm:$0xff]  ;;  %4428 = vmatpush.msrb.mxu2 %v4175_v58 }
 0x282   : > { %v937_v2 = vmax.f32 %v807_v63, 0.0  ;;  %9519 = vmatmul.msk.f32.gmra.mxu0 %vm343_vm1, %v330_v62  ;;  %1661 = vst.msk [vmem:[#allocation3 + $0x168] sm:$0xff] %vm1615_vm3, %v1516_v1  ;;  %v335_v63 = vld [vmem:[%s10342_s30 + $0x298] sm:$0xff]  ;;  %v4098_v58 = vld [vmem:[#allocation2 + $0x23] sm:$0xff] }
 0x283   : > { %2460 = vst.msk [vmem:[#allocation3 + $0x158] sm:$0xff] %vm1615_vm3, %v2382_v0  ;;  %v1109_v3 = vld [vmem:[#allocation2 + $0x1e8] sm:$0xff] }
 0x284   : > { %v1754_v5 = vld [vmem:[#allocation2 + $0x1e1] sm:$0xff]  ;;  %1023 = vst.msk [vmem:[#allocation2 + $0x1f0] sm:$0xff] %vm960_vm2, %v937_v2  ;;  %9587 = vmatmul.msk.f32.gmra.mxu1 %vm960_vm2, %v1109_v3 }
 0x285   : > { %9664 = vmatmul.msk.f32.gmra.mxu2 %vm960_vm2, %v1754_v5 }
 0x287   : > { %v809_v6 = vpop.f32.mrf.mxu0 }
 0x288   : > { %v2159_v7 = vpop.f32.mrf.mxu2  ;;  %v810_v10 = vadd.f32 %v10716_v37, %v809_v6 }
 0x289   : > { %v2383_v12 = vadd.f32 %v2305_v8, %v2159_v7  ;;  %v1519_v13 = vpop.f32.mrf.mxu1  ;;  %v2306_v22 = vld [vmem:[#allocation3 + $0x168] sm:$0xff] }
 0x28a   : > { %v938_v14 = vmax.f32 %v810_v10, 0.0  ;;  %9520 = vmatmul.msk.f32.gmra.mxu0 %vm343_vm1, %v331_v9  ;;  %1662 = vst.msk [vmem:[#allocation3 + $0x170] sm:$0xff] %vm1615_vm3, %v1519_v13  ;;  %v336_v10 = vld [vmem:[%s10342_s30 + $0x2a0] sm:$0xf] }
 0x28b   : > { %2461 = vst.msk [vmem:[#allocation3 + $0x160] sm:$0xff] %vm1615_vm3, %v2383_v12  ;;  %v1110_v15 = vld [vmem:[#allocation2 + $0x1f0] sm:$0xff] }
 0x28c   : > { %v1755_v16 = vld [vmem:[#allocation2 + $0x1e9] sm:$0xff]  ;;  %1024 = vst.msk [vmem:[#allocation2 + $0x1f8] sm:$0xff] %vm960_vm2, %v938_v14  ;;  %9588 = vmatmul.msk.f32.gmra.mxu1 %vm960_vm2, %v1110_v15 }
 0x28d   : > { %9665 = vmatmul.msk.f32.gmra.mxu2 %vm960_vm2, %v1755_v16 }
 0x28f   : > { %v812_v17 = vpop.f32.mrf.mxu0 }
 0x290   : > { %v2162_v20 = vpop.f32.mrf.mxu2  ;;  %v813_v24 = vadd.f32 %v10716_v37, %v812_v17 }
 0x291   : > { %v2384_v25 = vadd.f32 %v2306_v22, %v2162_v20  ;;  %v1522_v27 = vpop.f32.mrf.mxu1  ;;  %v2307_v34 = vld [vmem:[#allocation3 + $0x170] sm:$0xff] }
 0x292   : > { %v939_v28 = vmax.f32 %v813_v24, 0.0  ;;  %9521 = vmatmul.msk.f32.gmra.mxu0 %vm343_vm1, %v332_v23  ;;  %1663 = vst.msk [vmem:[#allocation3 + $0x178] sm:$0xff] %vm1615_vm3, %v1522_v27 }
 0x293   : > { %2462 = vst.msk [vmem:[#allocation3 + $0x168] sm:$0xff] %vm1615_vm3, %v2384_v25  ;;  %v1111_v29 = vld [vmem:[#allocation2 + $0x1f8] sm:$0xff] }
 0x294   : > { %v1756_v30 = vld [vmem:[#allocation2 + $0x1f1] sm:$0xff]  ;;  %1025 = vst.msk [vmem:[#allocation2 + $0x200] sm:$0xff] %vm960_vm2, %v939_v28  ;;  %9589 = vmatmul.msk.f32.gmra.mxu1 %vm960_vm2, %v1111_v29  ;;  %v1048_v28 = vld [vmem:[#allocation2] sm:$0xff] }
 0x295   : > { %9666 = vmatmul.msk.f32.gmra.mxu2 %vm960_vm2, %v1756_v30 }
 0x297   : > { %v815_v31 = vpop.f32.mrf.mxu0 }
 0x298   : > { %v2165_v32 = vpop.f32.mrf.mxu2  ;;  %v816_v18 = vadd.f32 %v10716_v37, %v815_v31 }
 0x299   : > { %v2385_v36 = vadd.f32 %v2307_v34, %v2165_v32  ;;  %v1525_v38 = vpop.f32.mrf.mxu1  ;;  %v2308_v46 = vld [vmem:[#allocation3 + $0x178] sm:$0xff]  ;;  %v3377_v32 = vld [vmem:[%s14120_s3 + $0x78] sm:$0xff] }
 0x29a   : > { %v940_v39 = vmax.f32 %v816_v18, 0.0  ;;  %9522 = vmatmul.msk.f32.gmra.mxu0 %vm343_vm1, %v333_v35  ;;  %1664 = vst.msk [vmem:[#allocation3 + $0x180] sm:$0xff] %vm1615_vm3, %v1525_v38  ;;  %3624 = vmatpush.msrb.mxu1 %v3377_v32 }
 0x29b   : > { %2463 = vst.msk [vmem:[#allocation3 + $0x170] sm:$0xff] %vm1615_vm3, %v2385_v36  ;;  %v1112_v41 = vld [vmem:[#allocation2 + $0x200] sm:$0xff] }
 0x29c   : > { %v1757_v42 = vld [vmem:[#allocation2 + $0x1f9] sm:$0xff]  ;;  %1026 = vst.msk [vmem:[#allocation2 + $0x208] sm:$0xff] %vm960_vm2, %v940_v39  ;;  %9590 = vmatmul.msk.f32.gmra.mxu1 %vm960_vm2, %v1112_v41  ;;  %v1049_v41 = vld [vmem:[#allocation2 + $0x8] sm:$0xff] }
 0x29d   : > { %9667 = vmatmul.msk.f32.gmra.mxu2 %vm960_vm2, %v1757_v42 }
 0x29f   : > { %v818_v44 = vpop.f32.mrf.mxu0 }
 0x2a0   : > { %v2168_v45 = vpop.f32.mrf.mxu2  ;;  %v819_v50 = vadd.f32 %v10716_v37, %v818_v44 }
 0x2a1   : > { %v2386_v51 = vadd.f32 %v2308_v46, %v2168_v45  ;;  %v1528_v52 = vpop.f32.mrf.mxu1  ;;  %v2309_v62 = vld [vmem:[#allocation3 + $0x180] sm:$0xff]  ;;  %v4097_v45 = vld [vmem:[#allocation2 + $0x1b] sm:$0xff] }
 0x2a2   : > { %v941_v55 = vmax.f32 %v819_v50, 0.0  ;;  %9523 = vmatmul.msk.f32.gmra.mxu0 %vm343_vm1, %v334_v48  ;;  %1665 = vst.msk [vmem:[#allocation3 + $0x188] sm:$0xff] %vm1615_vm3, %v1528_v52 }
 0x2a3   : > { %2464 = vst.msk [vmem:[#allocation3 + $0x178] sm:$0xff] %vm1615_vm3, %v2386_v51  ;;  %v1113_v56 = vld [vmem:[#allocation2 + $0x208] sm:$0xff] }
 0x2a4   : > { %v1758_v57 = vld [vmem:[#allocation2 + $0x201] sm:$0xff]  ;;  %1027 = vst.msk [vmem:[#allocation2 + $0x210] sm:$0xff] %vm960_vm2, %v941_v55  ;;  %9591 = vmatmul.msk.f32.gmra.mxu1 %vm960_vm2, %v1113_v56 }
 0x2a5   : > { %9668 = vmatmul.msk.f32.gmra.mxu2 %vm960_vm2, %v1758_v57 }
 0x2a7   : > { %v821_v59 = vpop.f32.mrf.mxu0 }
 0x2a8   : > { %v2171_v60 = vpop.f32.mrf.mxu2  ;;  %v822_v0 = vadd.f32 %v10716_v37, %v821_v59 }
 0x2a9   : > { %v2387_v1 = vadd.f32 %v2309_v62, %v2171_v60  ;;  %v1531_v2 = vpop.f32.mrf.mxu1  ;;  %v2310_v9 = vld [vmem:[#allocation3 + $0x188] sm:$0xff] }
 0x2aa   : > { %v942_v3 = vmax.f32 %v822_v0, 0.0  ;;  %9524 = vmatmul.msk.f32.gmra.mxu0 %vm343_vm1, %v335_v63  ;;  %1666 = vst.msk [vmem:[#allocation3 + $0x190] sm:$0xff] %vm1615_vm3, %v1531_v2  ;;  %v1051_v2 = vld [vmem:[#allocation2 + $0x18] sm:$0xff] }
 0x2ab   : > { %2465 = vst.msk [vmem:[#allocation3 + $0x180] sm:$0xff] %vm1615_vm3, %v2387_v1  ;;  %v1114_v5 = vld [vmem:[#allocation2 + $0x210] sm:$0xff] }
 0x2ac   : > { %v1759_v6 = vld [vmem:[#allocation2 + $0x209] sm:$0xff]  ;;  %1028 = vst.msk [vmem:[#allocation2 + $0x218] sm:$0xff] %vm960_vm2, %v942_v3  ;;  %9592 = vmatmul.msk.f32.gmra.mxu1 %vm960_vm2, %v1114_v5 }
 0x2ad   : > { %9669 = vmatmul.msk.f32.gmra.mxu2 %vm960_vm2, %v1759_v6 }
 0x2af   : > { %v824_v7 = vpop.f32.mrf.mxu0 }
 0x2b0   : > { %v2174_v8 = vpop.f32.mrf.mxu2  ;;  %v825_v12 = vadd.f32 %v10716_v37, %v824_v7  ;;  %v4099_v7 = vld [vmem:[#allocation2 + $0x2b] sm:$0xff] }
 0x2b1   : > { %v2388_v13 = vadd.f32 %v2310_v9, %v2174_v8  ;;  %v1534_v14 = vpop.f32.mrf.mxu1  ;;  %v2311_v23 = vld [vmem:[#allocation3 + $0x190] sm:$0xff] }
 0x2b2   : > { %v943_v15 = vmax.f32 %v825_v12, 0.0  ;;  %9525 = vmatmul.msk.f32.gmra.mxu0 %vm343_vm1, %v336_v10  ;;  %1667 = vst.msk [vmem:[#allocation3 + $0x198] sm:$0xff] %vm1615_vm3, %v1534_v14 }
 0x2b3   : > { %2466 = vst.msk [vmem:[#allocation3 + $0x188] sm:$0xff] %vm1615_vm3, %v2388_v13  ;;  %v1115_v16 = vld [vmem:[#allocation2 + $0x218] sm:$0xff] }
 0x2b4   : > { %v1760_v17 = vld [vmem:[#allocation2 + $0x211] sm:$0xff]  ;;  %1029 = vst.msk [vmem:[#allocation2 + $0x220] sm:$0xff] %vm960_vm2, %v943_v15  ;;  %9593 = vmatmul.msk.f32.gmra.mxu1 %vm960_vm2, %v1115_v16  ;;  %v1052_v15 = vld [vmem:[#allocation2 + $0x20] sm:$0xff] }
 0x2b5   : > { %9670 = vmatmul.msk.f32.gmra.mxu2 %vm960_vm2, %v1760_v17 }
 0x2b7   : > { %v827_v20 = vpop.f32.mrf.mxu0 }
 0x2b8   : > { %v2177_v22 = vpop.f32.mrf.mxu2  ;;  %v828_v24 = vadd.f32 %v10716_v37, %v827_v20 }
 0x2b9   : > { %v2389_v25 = vadd.f32 %v2311_v23, %v2177_v22  ;;  %v1537_v27 = vpop.f32.mrf.mxu1  ;;  %v2312_v18 = vld [vmem:[#allocation3 + $0x198] sm:$0xff]  ;;  %v4100_v22 = vld [vmem:[#allocation2 + $0x33] sm:$0xff] }
 0x2ba   : > { %v944_v29 = vmax.f32 %v828_v24, 0.0  ;;  %9526 = vmatmul.msk.f32.vlgmr.msrb.gmra.mxu0 %vm960_vm2, %v1048_v28  ;;  %1668 = vst.msk [vmem:[#allocation3 + $0x1a0] sm:$0xff] %vm1615_vm3, %v1537_v27 }
 0x2bb   : > { %2467 = vst.msk [vmem:[#allocation3 + $0x190] sm:$0xff] %vm1615_vm3, %v2389_v25  ;;  %v1116_v30 = vld [vmem:[#allocation2 + $0x220] sm:$0xff] }
 0x2bc   : > { %v1761_v31 = vld [vmem:[#allocation2 + $0x219] sm:$0xff]  ;;  %1030 = vst.msk [vmem:[#allocation2 + $0x228] sm:$0xff] %vm960_vm2, %v944_v29  ;;  %9594 = vmatmul.msk.f32.gmra.mxu1 %vm960_vm2, %v1116_v30  ;;  %v1053_v30 = vld [vmem:[#allocation2 + $0x28] sm:$0xff] }
 0x2bd   : > { %9671 = vmatmul.msk.f32.gmra.mxu2 %vm960_vm2, %v1761_v31 }
 0x2bf   : > { %v830_v34 = vpop.f32.mrf.mxu0 }
 0x2c0   : > { %v2180_v35 = vpop.f32.mrf.mxu2  ;;  %v831_v36 = vadd.f32 %v10716_v37, %v830_v34 }
 0x2c1   : > { %v2390_v38 = vadd.f32 %v2312_v18, %v2180_v35  ;;  %v1540_v39 = vpop.f32.mrf.mxu1  ;;  %v2313_v49 = vld [vmem:[#allocation3 + $0x1a0] sm:$0xff]  ;;  %v4101_v35 = vld [vmem:[#allocation2 + $0x3b] sm:$0xff] }
 0x2c2   : > { %v945_v42 = vmax.f32 %v831_v36, 0.0  ;;  %9527 = vmatmul.msk.f32.gmra.mxu0 %vm960_vm2, %v1049_v41  ;;  %1669 = vst.msk [vmem:[#allocation3 + $0x1a8] sm:$0xff] %vm1615_vm3, %v1540_v39  ;;  %v10985_v39 = vld [vmem:[%s14119_s2] ss:$0 sm:$0xff] }
 0x2c3   : > { %2468 = vst.msk [vmem:[#allocation3 + $0x198] sm:$0xff] %vm1615_vm3, %v2390_v38  ;;  %v1117_v43 = vld [vmem:[#allocation2 + $0x228] sm:$0xff]  ;;  %v3376_v38 = vld [vmem:[%s14120_s3 + $0x70] sm:$0xff] }
 0x2c4   : > { %v1762_v44 = vld [vmem:[#allocation2 + $0x221] sm:$0xff]  ;;  %1031 = vst.msk [vmem:[#allocation2 + $0x230] sm:$0xff] %vm960_vm2, %v945_v42  ;;  %9595 = vmatmul.msk.f32.gmra.mxu1 %vm960_vm2, %v1117_v43 }
 0x2c5   : > { %9672 = vmatmul.msk.f32.vlgmr.msra.gmra.mxu3 %vm960_vm2, %v1762_v44  ;;  %9838 = vmatmul.msk.f32.vlgmr.msrb.gmra.mxu2 %vm960_vm2, %v4097_v45  ;;  %v1054_v44 = vld [vmem:[#allocation2 + $0x30] sm:$0xff]  ;;  %v3375_v45 = vld [vmem:[%s14120_s3 + $0x68] sm:$0xff] }
 0x2c6   : > { %3625 = vmatpush.msrb.mxu1 %v3376_v38 }
 0x2c7   : > { %v833_v46 = vpop.f32.mrf.mxu0 }
 0x2c8   : > { %v2183_v48 = vpop.f32.mrf.mxu2  ;;  %v834_v50 = vadd.f32 %v10716_v37, %v833_v46  ;;  %3626 = vmatpush.msrb.mxu1 %v3375_v45  ;;  %v4106_v45 = vld [vmem:[#allocation2 + $0x63] sm:$0xff] }
 0x2c9   : > { %v2391_v51 = vadd.f32 %v2313_v49, %v2183_v48  ;;  %v1543_v52 = vpop.f32.mrf.mxu1  ;;  %v2314_v62 = vld [vmem:[#allocation3 + $0x1a8] sm:$0xff] }
 0x2ca   : > { %v946_v55 = vmax.f32 %v834_v50, 0.0  ;;  %9528 = vmatmul.msk.f32.gmra.mxu0 %vm960_vm2, %v1050_v53  ;;  %1670 = vst.msk [vmem:[#allocation3 + $0x1b0] sm:$0xff] %vm1615_vm3, %v1543_v52  ;;  %v3374_v50 = vld [vmem:[%s14120_s3 + $0x60] sm:$0xff]  ;;  %v2576_v52 = vld [vmem:[%s14120_s3 + $0x58] sm:$0xff] }
 0x2cb   : > { %2469 = vst.msk [vmem:[#allocation3 + $0x1a0] sm:$0xff] %vm1615_vm3, %v2391_v51  ;;  %v1118_v56 = vld [vmem:[#allocation2 + $0x230] sm:$0xff]  ;;  %v4102_v51 = vld [vmem:[#allocation2 + $0x43] sm:$0xff]  ;;  %3627 = vmatpush.msrb.mxu1 %v3374_v50  ;;  %2823 = vmatpush.msrb.mxu3 %v2576_v52 }
 0x2cc   : > { %v1763_v57 = vld [vmem:[#allocation2 + $0x229] sm:$0xff]  ;;  %1032 = vst.msk [vmem:[#allocation2 + $0x238] sm:$0xff] %vm960_vm2, %v946_v55  ;;  %9596 = vmatmul.msk.f32.gmra.mxu1 %vm960_vm2, %v1118_v56 }
 0x2cd   : > { %9673 = vmatmul.msk.f32.gmra.mxu3 %vm960_vm2, %v1763_v57  ;;  %9839 = vmatmul.msk.f32.gmra.mxu2 %vm960_vm2, %v4098_v58  ;;  %v2575_v57 = vld [vmem:[%s14120_s3 + $0x50] sm:$0xff] }
 0x2ce   : > { %2824 = vmatpush.msrb.mxu3 %v2575_v57  ;;  %v11052_v57 = vld [vmem:[#allocation2 + $0x22] sm:$0xff] }
 0x2cf   : > { %v836_v59 = vpop.f32.mrf.mxu0 }
 0x2d0   : > { %v2186_v60 = vpop.f32.mrf.mxu2  ;;  %v837_v63 = vadd.f32 %v10716_v37, %v836_v59 }
 0x2d1   : > { %v2392_v0 = vadd.f32 %v2314_v62, %v2186_v60  ;;  %v1546_v1 = vpop.f32.mrf.mxu1  ;;  %v2315_v10 = vld [vmem:[#allocation3 + $0x1b0] sm:$0xff] }
 0x2d2   : > { %v947_v3 = vmax.f32 %v837_v63, 0.0  ;;  %9529 = vmatmul.msk.f32.gmra.mxu0 %vm960_vm2, %v1051_v2  ;;  %1671 = vst.msk [vmem:[#allocation3 + $0x1b8] sm:$0xff] %vm1615_vm3, %v1546_v1  ;;  %v1055_v62 = vld [vmem:[#allocation2 + $0x38] sm:$0xff]  ;;  %v2574_v63 = vld [vmem:[%s14120_s3 + $0x48] sm:$0xff] }
 0x2d3   : > { %2470 = vst.msk [vmem:[#allocation3 + $0x1a8] sm:$0xff] %vm1615_vm3, %v2392_v0  ;;  %v1119_v5 = vld [vmem:[#allocation2 + $0x238] sm:$0xff]  ;;  %2825 = vmatpush.msrb.mxu3 %v2574_v63 }
 0x2d4   : > { %v1764_v6 = vld [vmem:[#allocation2 + $0x231] sm:$0xff]  ;;  %1033 = vst.msk [vmem:[#allocation2 + $0x240] sm:$0xff] %vm960_vm2, %v947_v3  ;;  %9597 = vmatmul.msk.f32.gmra.mxu1 %vm960_vm2, %v1119_v5  ;;  %v2573_v3 = vld [vmem:[%s14120_s3 + $0x40] sm:$0xff] }
 0x2d5   : > { %9674 = vmatmul.msk.f32.gmra.mxu3 %vm960_vm2, %v1764_v6  ;;  %9840 = vmatmul.msk.f32.gmra.mxu2 %vm960_vm2, %v4099_v7  ;;  %v4103_v5 = vld [vmem:[#allocation2 + $0x4b] sm:$0xff] }
 0x2d6   : > { %2826 = vmatpush.msrb.mxu3 %v2573_v3  ;;  %v1060_v3 = vld [vmem:[#allocation2 + $0x60] sm:$0xff] }
 0x2d7   : > { %v839_v8 = vpop.f32.mrf.mxu0 }
 0x2d8   : > { %v2189_v9 = vpop.f32.mrf.mxu2  ;;  %v840_v12 = vadd.f32 %v10716_v37, %v839_v8 }
 0x2d9   : > { %v2393_v13 = vadd.f32 %v2315_v10, %v2189_v9  ;;  %v1549_v14 = vpop.f32.mrf.mxu1  ;;  %v2316_v25 = vld [vmem:[#allocation3 + $0x1b8] sm:$0xff] }
 0x2da   : > { %v948_v16 = vmax.f32 %v840_v12, 0.0  ;;  %9530 = vmatmul.msk.f32.gmra.mxu0 %vm960_vm2, %v1052_v15  ;;  %1672 = vst.msk [vmem:[#allocation3 + $0x1c0] sm:$0xff] %vm1615_vm3, %v1549_v14 }
 0x2db   : > { %2471 = vst.msk [vmem:[#allocation3 + $0x1b0] sm:$0xff] %vm1615_vm3, %v2393_v13  ;;  %v1120_v17 = vld [vmem:[#allocation2 + $0x240] sm:$0xff] }
 0x2dc   : > { %v1765_v20 = vld [vmem:[#allocation2 + $0x239] sm:$0xff]  ;;  %1034 = vst.msk [vmem:[#allocation2 + $0x248] sm:$0xff] %vm960_vm2, %v948_v16  ;;  %9598 = vmatmul.msk.f32.gmra.mxu1 %vm960_vm2, %v1120_v17 }
 0x2dd   : > { %9675 = vmatmul.msk.f32.gmra.mxu3 %vm960_vm2, %v1765_v20  ;;  %9841 = vmatmul.msk.f32.gmra.mxu2 %vm960_vm2, %v4100_v22  ;;  %v1056_v13 = vld [vmem:[#allocation2 + $0x40] sm:$0xff]  ;;  %v4104_v17 = vld [vmem:[#allocation2 + $0x53] sm:$0xff] }
 0x2df   : > { %v842_v23 = vpop.f32.mrf.mxu0 }
 0x2e0   : > { %v2192_v24 = vpop.f32.mrf.mxu2  ;;  %v843_v27 = vadd.f32 %v10716_v37, %v842_v23 }
 0x2e1   : > { %v2394_v28 = vadd.f32 %v2316_v25, %v2192_v24  ;;  %v1552_v29 = vpop.f32.mrf.mxu1  ;;  %v2317_v36 = vld [vmem:[#allocation3 + $0x1c0] sm:$0xff] }
 0x2e2   : > { %v949_v31 = vmax.f32 %v843_v27, 0.0  ;;  %9531 = vmatmul.msk.f32.gmra.mxu0 %vm960_vm2, %v1053_v30  ;;  %1673 = vst.msk [vmem:[#allocation3 + $0x1c8] sm:$0xff] %vm1615_vm3, %v1552_v29 }
 0x2e3   : > { %2472 = vst.msk [vmem:[#allocation3 + $0x1b8] sm:$0xff] %vm1615_vm3, %v2394_v28  ;;  %v1121_v32 = vld [vmem:[#allocation2 + $0x248] sm:$0xff] }
 0x2e4   : > { %v1766_v34 = vld [vmem:[#allocation2 + $0x241] sm:$0xff]  ;;  %1035 = vst.msk [vmem:[#allocation2 + $0x250] sm:$0xff] %vm960_vm2, %v949_v31  ;;  %9599 = vmatmul.msk.f32.gmra.mxu1 %vm960_vm2, %v1121_v32 }
 0x2e5   : > { %9676 = vmatmul.msk.f32.gmra.mxu3 %vm960_vm2, %v1766_v34  ;;  %9842 = vmatmul.msk.f32.gmra.mxu2 %vm960_vm2, %v4101_v35  ;;  %v1057_v28 = vld [vmem:[#allocation2 + $0x48] sm:$0xff]  ;;  %v4105_v32 = vld [vmem:[#allocation2 + $0x5b] sm:$0xff] }
 0x2e7   : > { %v845_v37 = vpop.f32.mrf.mxu0 }
 0x2e8   : > { %v2195_v18 = vpop.f32.mrf.mxu2  ;;  %v846_v41 = vadd.f32 %v10985_v39, %v845_v37 }
 0x2e9   : > { %v2395_v42 = vadd.f32 %v2317_v36, %v2195_v18  ;;  %v1555_v43 = vpop.f32.mrf.mxu1  ;;  %v2318_v56 = vld [vmem:[#allocation3 + $0x1c8] sm:$0xff] }
 0x2ea   : > { %v950_v46 = vmax.f32 %v846_v41, 0.0  ;;  %9532 = vmatmul.msk.f32.gmra.mxu0 %vm960_vm2, %v1054_v44  ;;  %1674 = vst.msk [vmem:[#allocation3 + $0x1d0] sm:$0xff] %vm1615_vm3, %v1555_v43  ;;  %v1058_v41 = vld [vmem:[#allocation2 + $0x50] sm:$0xff]  ;;  %v11041_v44 = vld [vmem:[#allocation2 + $0x1a] sm:$0xff] }
 0x2eb   : > { %2473 = vst.msk [vmem:[#allocation3 + $0x1c0] sm:$0xff] %vm1615_vm3, %v2395_v42  ;;  %v1122_v48 = vld [vmem:[#allocation2 + $0x250] sm:$0xff] }
 0x2ec   : > { %v1767_v49 = vld [vmem:[#allocation2 + $0x249] sm:$0xff]  ;;  %1036 = vst.msk [vmem:[#allocation2 + $0x258] sm:$0xff] %vm960_vm2, %v950_v46  ;;  %9600 = vmatmul.msk.f32.gmra.mxu1 %vm960_vm2, %v1122_v48 }
 0x2ed   : > { %9677 = vmatmul.msk.f32.gmra.mxu3 %vm960_vm2, %v1767_v49  ;;  %9843 = vmatmul.msk.f32.gmra.mxu2 %vm960_vm2, %v4102_v51 }
 0x2ef   : > { %v848_v53 = vpop.f32.mrf.mxu0 }
 0x2f0   : > { %v2198_v55 = vpop.f32.mrf.mxu2  ;;  %v849_v58 = vadd.f32 %v10985_v39, %v848_v53  ;;  %v1059_v53 = vld [vmem:[#allocation2 + $0x58] sm:$0xff] }
 0x2f1   : > { %v2396_v59 = vadd.f32 %v2318_v56, %v2198_v55  ;;  %v1558_v60 = vpop.f32.mrf.mxu1  ;;  %v2319_v8 = vld [vmem:[#allocation3 + $0x1d0] sm:$0xff]  ;;  %v2495_v56 = vld [vmem:[#allocation2 + $0x2] sm:$0xff] }
 0x2f2   : > { %v951_v0 = vmax.f32 %v849_v58, 0.0  ;;  %9533 = vmatmul.msk.f32.gmra.mxu0 %vm960_vm2, %v1055_v62  ;;  %1675 = vst.msk [vmem:[#allocation3 + $0x1d8] sm:$0xff] %vm1615_vm3, %v1558_v60  ;;  %v4107_v58 = vld [vmem:[#allocation2 + $0x6b] sm:$0xff] }
 0x2f3   : > { %2474 = vst.msk [vmem:[#allocation3 + $0x1c8] sm:$0xff] %vm1615_vm3, %v2396_v59  ;;  %v1123_v1 = vld [vmem:[#allocation2 + $0x258] sm:$0xff]  ;;  %v10285_v59 = vmov 0.0  }
 0x2f4   : > { %v1768_v2 = vld [vmem:[#allocation2 + $0x251] sm:$0xff]  ;;  %1037 = vst.msk [vmem:[#allocation2 + $0x260] sm:$0xff] %vm960_vm2, %v951_v0  ;;  %9601 = vmatmul.msk.f32.gmra.mxu1 %vm960_vm2, %v1123_v1 }
 0x2f5   : > { %9678 = vmatmul.msk.f32.gmra.mxu3 %vm960_vm2, %v1768_v2  ;;  %9844 = vmatmul.msk.f32.gmra.mxu2 %vm960_vm2, %v4103_v5  ;;  %1047 = vst.msk [vmem:[#allocation2 + $0x2a4] sm:$0xf] %vm1045_vm4, %v10285_v59  ;;  %v4112_v59 = vld [vmem:[#allocation2 + $0x93] sm:$0xff] }
 0x2f7   : > { %v851_v6 = vpop.f32.mrf.mxu0 }
 0x2f8   : > { %v2201_v7 = vpop.f32.mrf.mxu2  ;;  %v852_v9 = vadd.f32 %v10985_v39, %v851_v6  ;;  %v2496_v6 = vld [vmem:[#allocation2 + $0xa] sm:$0xff] }
 0x2f9   : > { %v2397_v10 = vadd.f32 %v2319_v8, %v2201_v7  ;;  %v1561_v12 = vpop.f32.mrf.mxu1  ;;  %v2320_v23 = vld [vmem:[#allocation3 + $0x1d8] sm:$0xff]  ;;  %v11064_v7 = vld [vmem:[#allocation2 + $0x2a] sm:$0xff]  ;;  %v4108_v8 = vld [vmem:[#allocation2 + $0x73] sm:$0xff] }
 0x2fa   : > { %v952_v14 = vmax.f32 %v852_v9, 0.0  ;;  %9534 = vmatmul.msk.f32.gmra.mxu0 %vm960_vm2, %v1056_v13  ;;  %1676 = vst.msk [vmem:[#allocation3 + $0x1e0] sm:$0xff] %vm1615_vm3, %v1561_v12 }
 0x2fb   : > { %2475 = vst.msk [vmem:[#allocation3 + $0x1d0] sm:$0xff] %vm1615_vm3, %v2397_v10  ;;  %v1124_v15 = vld [vmem:[#allocation2 + $0x260] sm:$0xff] }
 0x2fc   : > { %v1769_v16 = vld [vmem:[#allocation2 + $0x259] sm:$0xff]  ;;  %1038 = vst.msk [vmem:[#allocation2 + $0x268] sm:$0xff] %vm960_vm2, %v952_v14  ;;  %9602 = vmatmul.msk.f32.gmra.mxu1 %vm960_vm2, %v1124_v15 }
 0x2fd   : > { %9679 = vmatmul.msk.f32.gmra.mxu3 %vm960_vm2, %v1769_v16  ;;  %9845 = vmatmul.msk.f32.gmra.mxu2 %vm960_vm2, %v4104_v17  ;;  %v1061_v16 = vld [vmem:[#allocation2 + $0x68] sm:$0xff] }
 0x2ff   : > { %v854_v20 = vpop.f32.mrf.mxu0 }
 0x300   : > { %v2204_v22 = vpop.f32.mrf.mxu2  ;;  %v855_v24 = vadd.f32 %v10985_v39, %v854_v20  ;;  %v2497_v20 = vld [vmem:[#allocation2 + $0x12] sm:$0xff] }
 0x301   : > { %v2398_v25 = vadd.f32 %v2320_v23, %v2204_v22  ;;  %v1564_v27 = vpop.f32.mrf.mxu1  ;;  %v2321_v37 = vld [vmem:[#allocation3 + $0x1e0] sm:$0xff]  ;;  %v11075_v22 = vld [vmem:[#allocation2 + $0x32] sm:$0xff] }
 0x302   : > { %v953_v29 = vmax.f32 %v855_v24, 0.0  ;;  %9535 = vmatmul.msk.f32.gmra.mxu0 %vm960_vm2, %v1057_v28  ;;  %1677 = vst.msk [vmem:[#allocation3 + $0x1e8] sm:$0xff] %vm1615_vm3, %v1564_v27  ;;  %v5780_v23 = vld [vmem:[%s14120_s3 + $0xd8] sm:$0xff] }
 0x303   : > { %2476 = vst.msk [vmem:[#allocation3 + $0x1d8] sm:$0xff] %vm1615_vm3, %v2398_v25  ;;  %v1125_v30 = vld [vmem:[#allocation2 + $0x268] sm:$0xff]  ;;  %v4109_v24 = vld [vmem:[#allocation2 + $0x7b] sm:$0xff]  ;;  %6027 = vmatpush.msrb.mxu0 %v5780_v23  ;;  %v5779_v25 = vld [vmem:[%s14120_s3 + $0xd0] sm:$0xff] }
 0x304   : > { %v1770_v31 = vld [vmem:[#allocation2 + $0x261] sm:$0xff]  ;;  %1039 = vst.msk [vmem:[#allocation2 + $0x270] sm:$0xff] %vm960_vm2, %v953_v29  ;;  %9603 = vmatmul.msk.f32.gmra.mxu1 %vm960_vm2, %v1125_v30 }
 0x305   : > { %9680 = vmatmul.msk.f32.gmra.mxu3 %vm960_vm2, %v1770_v31  ;;  %9846 = vmatmul.msk.f32.gmra.mxu2 %vm960_vm2, %v4105_v32  ;;  %v5778_v30 = vld [vmem:[%s14120_s3 + $0xc8] sm:$0xff] }
 0x306   : > { %6028 = vmatpush.msrb.mxu0 %v5779_v25  ;;  %v5700_v25 = vld [vmem:[#allocation2 + $0x3c] sm:$0xff] }
 0x307   : > { %v857_v34 = vpop.f32.mrf.mxu0 }
 0x308   : > { %v2207_v35 = vpop.f32.mrf.mxu2  ;;  %v858_v18 = vadd.f32 %v10985_v39, %v857_v34  ;;  %6029 = vmatpush.msrb.mxu0 %v5778_v30 }
 0x309   : > { %v2399_v36 = vadd.f32 %v2321_v37, %v2207_v35  ;;  %v1567_v38 = vpop.f32.mrf.mxu1  ;;  %v2322_v49 = vld [vmem:[#allocation3 + $0x1e8] sm:$0xff]  ;;  %v1694_v35 = vld [vmem:[#allocation2 + $0x1] sm:$0xff] }
 0x30a   : > { %v954_v42 = vmax.f32 %v858_v18, 0.0  ;;  %9536 = vmatmul.msk.f32.gmra.mxu0 %vm960_vm2, %v1058_v41  ;;  %1678 = vst.msk [vmem:[#allocation3 + $0x1f0] sm:$0xff] %vm1615_vm3, %v1567_v38  ;;  %v5777_v37 = vld [vmem:[%s14120_s3 + $0xc0] sm:$0xff] }
 0x30b   : > { %2477 = vst.msk [vmem:[#allocation3 + $0x1e0] sm:$0xff] %vm1615_vm3, %v2399_v36  ;;  %v1771_v43 = vld [vmem:[#allocation2 + $0x269] sm:$0xff]  ;;  %v11098_v36 = vld [vmem:[#allocation2 + $0x3a] sm:$0xff]  ;;  %6030 = vmatpush.msrb.mxu0 %v5777_v37 }
 0x30c   : > { %1040 = vst.msk [vmem:[#allocation2 + $0x278] sm:$0xff] %vm960_vm2, %v954_v42  ;;  %9760 = vmatmul.msk.f32.vlgmr.msrb.gmra.mxu1 %vm960_vm2, %v11041_v44  ;;  %v4110_v38 = vld [vmem:[#allocation2 + $0x83] sm:$0xff] }
 0x30d   : > { %9681 = vmatmul.msk.f32.gmra.mxu3 %vm960_vm2, %v1771_v43  ;;  %9847 = vmatmul.msk.f32.gmra.mxu2 %vm960_vm2, %v4106_v45  ;;  %v5701_v37 = vld [vmem:[#allocation2 + $0x44] sm:$0xff] }
 0x30f   : > { %v860_v46 = vpop.f32.mrf.mxu0 }
 0x310   : > { %v2210_v48 = vpop.f32.mrf.mxu2  ;;  %v861_v50 = vadd.f32 %v10985_v39, %v860_v46 }
 0x311   : > { %v2400_v51 = vadd.f32 %v2322_v49, %v2210_v48  ;;  %v1570_v52 = vpop.f32.mrf.mxu1  ;;  %v2323_v63 = vld [vmem:[#allocation3 + $0x1f0] sm:$0xff]  ;;  %v1695_v49 = vld [vmem:[#allocation2 + $0x9] sm:$0xff] }
 0x312   : > { %v955_v55 = vmax.f32 %v861_v50, 0.0  ;;  %9537 = vmatmul.msk.f32.gmra.mxu0 %vm960_vm2, %v1059_v53  ;;  %1679 = vst.msk [vmem:[#allocation3 + $0x1f8] sm:$0xff] %vm1615_vm3, %v1570_v52 }
 0x313   : > { %2478 = vst.msk [vmem:[#allocation3 + $0x1e8] sm:$0xff] %vm1615_vm3, %v2400_v51 }
 0x314   : > { %1041 = vst.msk [vmem:[#allocation2 + $0x280] sm:$0xff] %vm960_vm2, %v955_v55  ;;  %9761 = vmatmul.msk.f32.gmra.mxu1 %vm960_vm2, %v11052_v57 }
 0x315   : > { %9682 = vmatmul.msk.f32.vlgmr.msrb.gmra.mxu3 %vm960_vm2, %v2495_v56  ;;  %9848 = vmatmul.msk.f32.gmra.mxu2 %vm960_vm2, %v4107_v58  ;;  %v1696_v58 = vld [vmem:[#allocation2 + $0x11] sm:$0xff] }
 0x317   : > { %v863_v60 = vpop.f32.mrf.mxu0 }
 0x318   : > { %v2213_v62 = vpop.f32.mrf.mxu2  ;;  %v864_v0 = vadd.f32 %v10985_v39, %v863_v60 }
 0x319   : > { %v2401_v1 = vadd.f32 %v2323_v63, %v2213_v62  ;;  %v1573_v2 = vpop.f32.mrf.mxu1  ;;  %v2324_v12 = vld [vmem:[#allocation3 + $0x1f8] sm:$0xff] }
 0x31a   : > { %v956_v5 = vmax.f32 %v864_v0, 0.0  ;;  %9538 = vmatmul.msk.f32.gmra.mxu0 %vm960_vm2, %v1060_v3  ;;  %1680 = vst.msk [vmem:[#allocation3 + $0x200] sm:$0xff] %vm1615_vm3, %v1573_v2  ;;  %v1697_v2 = vld [vmem:[#allocation2 + $0x19] sm:$0xff] }
 0x31b   : > { %2479 = vst.msk [vmem:[#allocation3 + $0x1f0] sm:$0xff] %vm1615_vm3, %v2401_v1  ;;  %v11133_v3 = vld [vmem:[#allocation2 + $0x52] sm:$0xff] }
 0x31c   : > { %1042 = vst.msk [vmem:[#allocation2 + $0x288] sm:$0xff] %vm960_vm2, %v956_v5  ;;  %9762 = vmatmul.msk.f32.gmra.mxu1 %vm960_vm2, %v11064_v7  ;;  %v4113_v5 = vld [vmem:[#allocation2 + $0x9b] sm:$0xff] }
 0x31d   : > { %9683 = vmatmul.msk.f32.gmra.mxu3 %vm960_vm2, %v2496_v6  ;;  %9849 = vmatmul.msk.f32.gmra.mxu2 %vm960_vm2, %v4108_v8 }
 0x31f   : > { %v866_v9 = vpop.f32.mrf.mxu0 }
 0x320   : > { %v2216_v10 = vpop.f32.mrf.mxu2  ;;  %v867_v13 = vadd.f32 %v10985_v39, %v866_v9 }
 0x321   : > { %v2402_v14 = vadd.f32 %v2324_v12, %v2216_v10  ;;  %v1576_v15 = vpop.f32.mrf.mxu1  ;;  %v2325_v29 = vld [vmem:[#allocation3 + $0x200] sm:$0xff] }
 0x322   : > { %v957_v17 = vmax.f32 %v867_v13, 0.0  ;;  %9539 = vmatmul.msk.f32.gmra.mxu0 %vm960_vm2, %v1061_v16  ;;  %1681 = vst.msk [vmem:[#allocation3 + $0x208] sm:$0xff] %vm1615_vm3, %v1576_v15  ;;  %v5699_v13 = vld [vmem:[#allocation2 + $0x34] sm:$0xff]  ;;  %v4114_v15 = vld [vmem:[#allocation2 + $0xa3] sm:$0xff] }
 0x323   : > { %2480 = vst.msk [vmem:[#allocation3 + $0x1f8] sm:$0xff] %vm1615_vm3, %v2402_v14  ;;  %v11146_v14 = vld [vmem:[#allocation2 + $0x5a] sm:$0xff] }
 0x324   : > { %1043 = vst.msk [vmem:[#allocation2 + $0x290] sm:$0xff] %vm960_vm2, %v957_v17  ;;  %9763 = vmatmul.msk.f32.gmra.mxu1 %vm960_vm2, %v11075_v22 }
 0x325   : > { %9684 = vmatmul.msk.f32.gmra.mxu3 %vm960_vm2, %v2497_v20  ;;  %9850 = vmatmul.msk.f32.gmra.mxu2 %vm960_vm2, %v4109_v24 }
 0x327   : > { %v869_v27 = vpop.f32.mrf.mxu0 }
 0x328   : > { %v2219_v28 = vpop.f32.mrf.mxu2  ;;  %v870_v31 = vadd.f32 %v10985_v39, %v869_v27  ;;  %v11159_v27 = vld [vmem:[#allocation2 + $0x62] sm:$0xff] }
 0x329   : > { %v2403_v32 = vadd.f32 %v2325_v29, %v2219_v28  ;;  %v1579_v34 = vpop.f32.mrf.mxu1  ;;  %v2326_v43 = vld [vmem:[#allocation3 + $0x208] sm:$0xff] }
 0x32a   : > { %v958_v18 = vmax.f32 %v870_v31, 0.0  ;;  %9604 = vmatmul.msk.f32.vlgmr.msra.gmra.mxu0 %vm960_vm2, %v1694_v35  ;;  %1682 = vst.msk [vmem:[#allocation3 + $0x210] sm:$0xff] %vm1615_vm3, %v1579_v34  ;;  %v4115_v28 = vld [vmem:[#allocation2 + $0xab] sm:$0xff] }
 0x32b   : > { %2481 = vst.msk [vmem:[#allocation3 + $0x200] sm:$0xff] %vm1615_vm3, %v2403_v32 }
 0x32c   : > { %1044 = vst.msk [vmem:[#allocation2 + $0x298] sm:$0xff] %vm960_vm2, %v958_v18  ;;  %9764 = vmatmul.msk.f32.gmra.mxu1 %vm960_vm2, %v11098_v36  ;;  %v11172_v18 = vld [vmem:[#allocation2 + $0x6a] sm:$0xff] }
 0x32d   : > { %9685 = vmatmul.msk.f32.gmra.mxu3 %vm960_vm2, %v11041_v44  ;;  %9851 = vmatmul.msk.f32.gmra.mxu2 %vm960_vm2, %v4110_v38  ;;  %v11110_v44 = vld [vmem:[#allocation2 + $0x42] sm:$0xff] }
 0x32f   : > { %v872_v41 = vpop.f32.mrf.mxu0 }
 0x330   : > { %v2222_v42 = vpop.f32.mrf.mxu2  ;;  %v873_v45 = vadd.f32 %v10985_v39, %v872_v41  ;;  %v4111_v39 = vld [vmem:[#allocation2 + $0x8b] sm:$0xff] }
 0x331   : > { %v2404_v46 = vadd.f32 %v2326_v43, %v2222_v42  ;;  %v1582_v48 = vpop.f32.mrf.mxu1  ;;  %v2327_v53 = vld [vmem:[#allocation3 + $0x210] sm:$0xff] }
 0x332   : > { %v959_v50 = vmax.f32 %v873_v45, 0.0  ;;  %9605 = vmatmul.msk.f32.gmra.mxu0 %vm960_vm2, %v1695_v49  ;;  %1683 = vst.msk [vmem:[#allocation3 + $0x218] sm:$0xff] %vm1615_vm3, %v1582_v48 }
 0x333   : > { %2482 = vst.msk [vmem:[#allocation3 + $0x208] sm:$0xff] %vm1615_vm3, %v2404_v46 }
 0x334   : > { %1046 = vst.msk [vmem:[#allocation2 + $0x2a0] sm:$0xf] %vm1045_vm4, %v959_v50  ;;  %9765 = vmatmul.msk.f32.gmra.mxu1 %vm960_vm2, %v11110_v44  ;;  %v5702_v50 = vld [vmem:[#allocation2 + $0x4c] sm:$0xff] }
 0x335   : > { %9686 = vmatmul.msk.f32.gmra.mxu3 %vm960_vm2, %v11052_v57  ;;  %9852 = vmatmul.msk.f32.gmra.mxu2 %vm960_vm2, %v4111_v39  ;;  %v11122_v57 = vld [vmem:[#allocation2 + $0x4a] sm:$0xff] }
 0x337   : > { %v1381_v51 = vpop.f32.mrf.mxu0 }
 0x338   : > { %v2225_v52 = vpop.f32.mrf.mxu2  ;;  %1616 = vst.msk [vmem:[#allocation3] sm:$0xff] %vm1615_vm3, %v1381_v51 }
 0x339   : > { %v2405_v55 = vadd.f32 %v2327_v53, %v2225_v52  ;;  %v1585_v56 = vpop.f32.mrf.mxu1  ;;  %v2328_v63 = vld [vmem:[#allocation3 + $0x218] sm:$0xff] }
 0x33a   : > { %9606 = vmatmul.msk.f32.gmra.mxu0 %vm960_vm2, %v1696_v58  ;;  %1684 = vst.msk [vmem:[#allocation3 + $0x220] sm:$0xff] %vm1615_vm3, %v1585_v56 }
 0x33b   : > { %2483 = vst.msk [vmem:[#allocation3 + $0x210] sm:$0xff] %vm1615_vm3, %v2405_v55 }
 0x33c   : > { %9766 = vmatmul.msk.f32.gmra.mxu1 %vm960_vm2, %v11122_v57 }
 0x33d   : > { %9687 = vmatmul.msk.f32.gmra.mxu3 %vm960_vm2, %v11064_v7  ;;  %9853 = vmatmul.msk.f32.gmra.mxu2 %vm960_vm2, %v4112_v59  ;;  %v5703_v59 = vld [vmem:[#allocation2 + $0x54] sm:$0xff] }
 0x33f   : > { %v1384_v60 = vpop.f32.mrf.mxu0 }
 0x340   : > { %v2228_v62 = vpop.f32.mrf.mxu2  ;;  %1617 = vst.msk [vmem:[#allocation3 + $0x8] sm:$0xff] %vm1615_vm3, %v1384_v60  ;;  %v11201_v60 = vld [vmem:[#allocation2 + $0x7a] sm:$0xff] }
 0x341   : > { %v2406_v0 = vadd.f32 %v2328_v63, %v2228_v62  ;;  %v1588_v1 = vpop.f32.mrf.mxu1  ;;  %v2329_v8 = vld [vmem:[#allocation3 + $0x220] sm:$0xff] }
 0x342   : > { %9607 = vmatmul.msk.f32.gmra.mxu0 %vm960_vm2, %v1697_v2  ;;  %1685 = vst.msk [vmem:[#allocation3 + $0x228] sm:$0xff] %vm1615_vm3, %v1588_v1 }
 0x343   : > { %2484 = vst.msk [vmem:[#allocation3 + $0x218] sm:$0xff] %vm1615_vm3, %v2406_v0 }
 0x344   : > { %9767 = vmatmul.msk.f32.gmra.mxu1 %vm960_vm2, %v11133_v3 }
 0x345   : > { %9688 = vmatmul.msk.f32.gmra.mxu3 %vm960_vm2, %v11075_v22  ;;  %9854 = vmatmul.msk.f32.gmra.mxu2 %vm960_vm2, %v4113_v5 }
 0x347   : > { %v1387_v6 = vpop.f32.mrf.mxu0 }
 0x348   : > { %v2231_v7 = vpop.f32.mrf.mxu3  ;;  %1618 = vst.msk [vmem:[#allocation3 + $0x10] sm:$0xff] %vm1615_vm3, %v1387_v6  ;;  %v11141_v10 = vpop.f32.mrf.mxu2 }
 0x349   : > { %v2407_v9 = vadd.f32 %v2329_v8, %v2231_v7  ;;  %v1591_v12 = vpop.f32.mrf.mxu1  ;;  %v2330_v20 = vld [vmem:[#allocation3 + $0x228] sm:$0xff]  ;;  %v5704_v7 = vld [vmem:[#allocation2 + $0x5c] sm:$0xff] }
 0x34a   : > { %9994 = vmatmul.msk.f32.vlgmr.msrb.gmra.mxu0 %vm960_vm2, %v5699_v13  ;;  %1686 = vst.msk [vmem:[#allocation3 + $0x230] sm:$0xff] %vm1615_vm3, %v1591_v12  ;;  %v11216_v8 = vld [vmem:[#allocation2 + $0x82] sm:$0xff] }
 0x34b   : > { %2485 = vst.msk [vmem:[#allocation3 + $0x220] sm:$0xff] %vm1615_vm3, %v2407_v9 }
 0x34c   : > { %9768 = vmatmul.msk.f32.gmra.mxu1 %vm960_vm2, %v11146_v14 }
 0x34d   : > { %9689 = vmatmul.msk.f32.gmra.mxu3 %vm960_vm2, %v11098_v36  ;;  %9855 = vmatmul.msk.f32.gmra.mxu2 %vm960_vm2, %v4114_v15  ;;  %v4116_v36 = vld [vmem:[#allocation2 + $0xb3] sm:$0xff] }
 0x34f   : > { %v1390_v16 = vpop.f32.mrf.mxu0 }
 0x350   : > { %v2234_v17 = vpop.f32.mrf.mxu3  ;;  %1619 = vst.msk [vmem:[#allocation3 + $0x18] sm:$0xff] %vm1615_vm3, %v1390_v16  ;;  %v11154_v23 = vpop.f32.mrf.mxu2 }
 0x351   : > { %v2408_v22 = vadd.f32 %v2330_v20, %v2234_v17  ;;  %v1594_v24 = vpop.f32.mrf.mxu1  ;;  %v2331_v31 = vld [vmem:[#allocation3 + $0x230] sm:$0xff] }
 0x352   : > { %9995 = vmatmul.msk.f32.gmra.mxu0 %vm960_vm2, %v5700_v25  ;;  %1687 = vst.msk [vmem:[#allocation3 + $0x238] sm:$0xff] %vm1615_vm3, %v1594_v24  ;;  %v11231_v24 = vld [vmem:[#allocation2 + $0x8a] sm:$0xff] }
 0x353   : > { %2486 = vst.msk [vmem:[#allocation3 + $0x228] sm:$0xff] %vm1615_vm3, %v2408_v22  ;;  %v5705_v22 = vld [vmem:[#allocation2 + $0x64] sm:$0xff] }
 0x354   : > { %9769 = vmatmul.msk.f32.gmra.mxu1 %vm960_vm2, %v11159_v27 }
 0x355   : > { %9690 = vmatmul.msk.f32.gmra.mxu3 %vm960_vm2, %v11110_v44  ;;  %9856 = vmatmul.msk.f32.gmra.mxu2 %vm960_vm2, %v4115_v28  ;;  %v11186_v44 = vld [vmem:[#allocation2 + $0x72] sm:$0xff] }
 0x357   : > { %v1393_v29 = vpop.f32.mrf.mxu0 }
 0x358   : > { %v2237_v30 = vpop.f32.mrf.mxu3  ;;  %1620 = vst.msk [vmem:[#allocation3 + $0x20] sm:$0xff] %vm1615_vm3, %v1393_v29  ;;  %v11167_v34 = vpop.f32.mrf.mxu2 }
 0x359   : > { %v2409_v32 = vadd.f32 %v2331_v31, %v2237_v30  ;;  %v1597_v35 = vpop.f32.mrf.mxu1  ;;  %v2332_v43 = vld [vmem:[#allocation3 + $0x238] sm:$0xff] }
 0x35a   : > { %9996 = vmatmul.msk.f32.gmra.mxu0 %vm960_vm2, %v5701_v37  ;;  %1688 = vst.msk [vmem:[#allocation3 + $0x240] sm:$0xff] %vm1615_vm3, %v1597_v35  ;;  %v5706_v37 = vld [vmem:[#allocation2 + $0x6c] sm:$0xff] }
 0x35b   : > { %2487 = vst.msk [vmem:[#allocation3 + $0x230] sm:$0xff] %vm1615_vm3, %v2409_v32 }
 0x35c   : > { %9770 = vmatmul.msk.f32.gmra.mxu1 %vm960_vm2, %v11172_v18 }
 0x35d   : > { %9691 = vmatmul.msk.f32.gmra.mxu3 %vm960_vm2, %v11122_v57  ;;  %9857 = vmatmul.msk.f32.gmra.mxu2 %vm960_vm2, %v4116_v36 }
 0x35f   : > { %v2265_v38 = vld [vmem:[#allocation3 + $0x20] sm:$0xff]  ;;  %v1396_v41 = vpop.f32.mrf.mxu0 }
 0x360   : > { %v2240_v42 = vpop.f32.mrf.mxu3  ;;  %v2343_v45 = vadd.f32 %v2265_v38, %v10542_v19  ;;  %1621 = vst.msk [vmem:[#allocation3 + $0x28] sm:$0xff] %vm1615_vm3, %v1396_v41  ;;  %v11181_v48 = vpop.f32.mrf.mxu2  ;;  %v4117_v19 = vld [vmem:[#allocation2 + $0xbb] sm:$0xff] }
 0x361   : > { %v2410_v46 = vadd.f32 %v2332_v43, %v2240_v42  ;;  %v1600_v49 = vpop.f32.mrf.mxu1  ;;  %v2333_v53 = vld [vmem:[#allocation3 + $0x240] sm:$0xff] }
 0x362   : > { %2421 = vst.msk [vmem:[#allocation3 + $0x20] sm:$0xff] %vm1615_vm3, %v2343_v45  ;;  %9997 = vmatmul.msk.f32.gmra.mxu0 %vm960_vm2, %v5702_v50  ;;  %v5707_v50 = vld [vmem:[#allocation2 + $0x74] sm:$0xff] }
 0x363   : > { %2488 = vst.msk [vmem:[#allocation3 + $0x238] sm:$0xff] %vm1615_vm3, %v2410_v46 }
 0x364   : > { %1689 = vst.msk [vmem:[#allocation3 + $0x248] sm:$0xff] %vm1615_vm3, %v1600_v49  ;;  %9771 = vmatmul.msk.f32.gmra.mxu1 %vm960_vm2, %v11186_v44 }
 0x365   : > { %9692 = vmatmul.msk.f32.gmra.mxu3 %vm960_vm2, %v11133_v3  ;;  %9858 = vmatmul.msk.f32.gmra.mxu2 %vm960_vm2, %v4117_v19 }
 0x367   : > { %v2266_v39 = vld [vmem:[#allocation3 + $0x28] sm:$0xff]  ;;  %v1399_v51 = vpop.f32.mrf.mxu0 }
 0x368   : > { %v2243_v52 = vpop.f32.mrf.mxu3  ;;  %v2344_v55 = vadd.f32 %v2266_v39, %v10550_v26  ;;  %1622 = vst.msk [vmem:[#allocation3 + $0x30] sm:$0xff] %vm1615_vm3, %v1399_v51  ;;  %v11196_v58 = vpop.f32.mrf.mxu2  ;;  %v4118_v26 = vld [vmem:[#allocation2 + $0xc3] sm:$0xff] }
 0x369   : > { %v2411_v56 = vadd.f32 %v2333_v53, %v2243_v52  ;;  %v1603_v57 = vpop.f32.mrf.mxu1 }
 0x36a   : > { %2422 = vst.msk [vmem:[#allocation3 + $0x28] sm:$0xff] %vm1615_vm3, %v2344_v55  ;;  %9998 = vmatmul.msk.f32.gmra.mxu0 %vm960_vm2, %v5703_v59  ;;  %v5708_v59 = vld [vmem:[#allocation2 + $0x7c] sm:$0xff] }
 0x36b   : > { %2489 = vst.msk [vmem:[#allocation3 + $0x240] sm:$0xff] %vm1615_vm3, %v2411_v56  ;;  %v2334_v1 = vld [vmem:[#allocation3 + $0x248] sm:$0xff] }
 0x36c   : > { %1690 = vst.msk [vmem:[#allocation3 + $0x250] sm:$0xff] %vm1615_vm3, %v1603_v57  ;;  %9772 = vmatmul.msk.f32.gmra.mxu1 %vm960_vm2, %v11201_v60 }
 0x36d   : > { %9693 = vmatmul.msk.f32.gmra.mxu3 %vm960_vm2, %v11146_v14  ;;  %9859 = vmatmul.msk.f32.gmra.mxu2 %vm960_vm2, %v4118_v26 }
 0x36f   : > { %v2267_v62 = vld [vmem:[#allocation3 + $0x30] sm:$0xff]  ;;  %v1402_v63 = vpop.f32.mrf.mxu0 }
 0x370   : > { %v2246_v0 = vpop.f32.mrf.mxu3  ;;  %v2345_v2 = vadd.f32 %v2267_v62, %v10558_v33  ;;  %1623 = vst.msk [vmem:[#allocation3 + $0x38] sm:$0xff] %vm1615_vm3, %v1402_v63  ;;  %v11211_v5 = vpop.f32.mrf.mxu2  ;;  %v4119_v33 = vld [vmem:[#allocation2 + $0xcb] sm:$0xff] }
 0x371   : > { %v2412_v3 = vadd.f32 %v2334_v1, %v2246_v0  ;;  %v1606_v6 = vpop.f32.mrf.mxu1 }
 0x372   : > { %2423 = vst.msk [vmem:[#allocation3 + $0x30] sm:$0xff] %vm1615_vm3, %v2345_v2  ;;  %9999 = vmatmul.msk.f32.gmra.mxu0 %vm960_vm2, %v5704_v7 }
 0x373   : > { %2490 = vst.msk [vmem:[#allocation3 + $0x248] sm:$0xff] %vm1615_vm3, %v2412_v3  ;;  %v2335_v14 = vld [vmem:[#allocation3 + $0x250] sm:$0xff]  ;;  %v5709_v3 = vld [vmem:[#allocation2 + $0x84] sm:$0xff] }
 0x374   : > { %1691 = vst.msk [vmem:[#allocation3 + $0x258] sm:$0xff] %vm1615_vm3, %v1606_v6  ;;  %9773 = vmatmul.msk.f32.gmra.mxu1 %vm960_vm2, %v11216_v8  ;;  %v11294_v6 = vld [vmem:[#allocation2 + $0xaa] sm:$0xff] }
 0x375   : > { %9694 = vmatmul.msk.f32.gmra.mxu3 %vm960_vm2, %v11159_v27  ;;  %9860 = vmatmul.msk.f32.gmra.mxu2 %vm960_vm2, %v4119_v33 }
 0x377   : > { %v2268_v9 = vld [vmem:[#allocation3 + $0x38] sm:$0xff]  ;;  %v1405_v12 = vpop.f32.mrf.mxu0 }
 0x378   : > { %v2249_v13 = vpop.f32.mrf.mxu3  ;;  %v2346_v15 = vadd.f32 %v2268_v9, %v10566_v40  ;;  %1624 = vst.msk [vmem:[#allocation3 + $0x40] sm:$0xff] %vm1615_vm3, %v1405_v12  ;;  %v11226_v17 = vpop.f32.mrf.mxu2  ;;  %v4120_v40 = vld [vmem:[#allocation2 + $0xd3] sm:$0xff] }
 0x379   : > { %v2413_v16 = vadd.f32 %v2335_v14, %v2249_v13  ;;  %v1609_v20 = vpop.f32.mrf.mxu1  ;;  %v5710_v14 = vld [vmem:[#allocation2 + $0x8c] sm:$0xff] }
 0x37a   : > { %2424 = vst.msk [vmem:[#allocation3 + $0x38] sm:$0xff] %vm1615_vm3, %v2346_v15  ;;  %10000 = vmatmul.msk.f32.gmra.mxu0 %vm960_vm2, %v5705_v22  ;;  %v11309_v15 = vld [vmem:[#allocation2 + $0xb2] sm:$0xff]  ;;  %v2261_v22 = vld [vmem:[#allocation3] sm:$0xff] }
 0x37b   : > { %2491 = vst.msk [vmem:[#allocation3 + $0x250] sm:$0xff] %vm1615_vm3, %v2413_v16  ;;  %v2336_v29 = vld [vmem:[#allocation3 + $0x258] sm:$0xff] }
 0x37c   : > { %1692 = vst.msk [vmem:[#allocation3 + $0x260] sm:$0xff] %vm1615_vm3, %v1609_v20  ;;  %9774 = vmatmul.msk.f32.gmra.mxu1 %vm960_vm2, %v11231_v24 }
 0x37d   : > { %9695 = vmatmul.msk.f32.gmra.mxu3 %vm960_vm2, %v11172_v18  ;;  %9861 = vmatmul.msk.f32.gmra.mxu2 %vm960_vm2, %v4120_v40  ;;  %v11246_v18 = vld [vmem:[#allocation2 + $0x92] sm:$0xff] }
 0x37f   : > { %v2269_v25 = vld [vmem:[#allocation3 + $0x40] sm:$0xff]  ;;  %v1408_v27 = vpop.f32.mrf.mxu0 }
 0x380   : > { %v2252_v28 = vpop.f32.mrf.mxu3  ;;  %v2347_v30 = vadd.f32 %v2269_v25, %v10574_v47  ;;  %1625 = vst.msk [vmem:[#allocation3 + $0x48] sm:$0xff] %vm1615_vm3, %v1408_v27  ;;  %v11241_v32 = vpop.f32.mrf.mxu2  ;;  %v4121_v47 = vld [vmem:[#allocation2 + $0xdb] sm:$0xff] }
 0x381   : > { %v2414_v31 = vadd.f32 %v2336_v29, %v2252_v28  ;;  %v1612_v35 = vpop.f32.mrf.mxu1  ;;  %v5711_v29 = vld [vmem:[#allocation2 + $0x94] sm:$0xff] }
 0x382   : > { %2425 = vst.msk [vmem:[#allocation3 + $0x40] sm:$0xff] %vm1615_vm3, %v2347_v30  ;;  %10001 = vmatmul.msk.f32.gmra.mxu0 %vm960_vm2, %v5706_v37  ;;  %v11326_v30 = vld [vmem:[#allocation2 + $0xba] sm:$0xff] }
 0x383   : > { %2492 = vst.msk [vmem:[#allocation3 + $0x258] sm:$0xff] %vm1615_vm3, %v2414_v31  ;;  %v2337_v42 = vld [vmem:[#allocation3 + $0x260] sm:$0xff] }
 0x384   : > { %1693 = vst.msk [vmem:[#allocation3 + $0x268] sm:$0xff] %vm1615_vm3, %v1612_v35  ;;  %9775 = vmatmul.msk.f32.gmra.mxu1 %vm960_vm2, %v11246_v18  ;;  %v2262_v35 = vld [vmem:[#allocation3 + $0x8] sm:$0xff] }
 0x385   : > { %9696 = vmatmul.msk.f32.gmra.mxu3 %vm960_vm2, %v11186_v44  ;;  %9862 = vmatmul.msk.f32.gmra.mxu2 %vm960_vm2, %v4121_v47  ;;  %v11263_v44 = vld [vmem:[#allocation2 + $0x9a] sm:$0xff] }
 0x387   : > { %v2270_v36 = vld [vmem:[#allocation3 + $0x48] sm:$0xff]  ;;  %v1411_v38 = vpop.f32.mrf.mxu0 }
 0x388   : > { %v2255_v41 = vpop.f32.mrf.mxu3  ;;  %v2348_v43 = vadd.f32 %v2270_v36, %v10582_v54  ;;  %1626 = vst.msk [vmem:[#allocation3 + $0x50] sm:$0xff] %vm1615_vm3, %v1411_v38  ;;  %v11256_v46 = vpop.f32.mrf.mxu2  ;;  %v4122_v54 = vld [vmem:[#allocation2 + $0xe3] sm:$0xff] }
 0x389   : > { %v2415_v45 = vadd.f32 %v2337_v42, %v2255_v41  ;;  %v11258_v49 = vpop.f32.mrf.mxu1  ;;  %v5712_v38 = vld [vmem:[#allocation2 + $0x9c] sm:$0xff] }
 0x38a   : > { %2426 = vst.msk [vmem:[#allocation3 + $0x48] sm:$0xff] %vm1615_vm3, %v2348_v43  ;;  %10002 = vmatmul.msk.f32.gmra.mxu0 %vm960_vm2, %v5707_v50  ;;  %v11341_v43 = vld [vmem:[#allocation2 + $0xc2] sm:$0xff] }
 0x38b   : > { %2493 = vst.msk [vmem:[#allocation3 + $0x260] sm:$0xff] %vm1615_vm3, %v2415_v45  ;;  %v2338_v52 = vld [vmem:[#allocation3 + $0x268] sm:$0xff] }
 0x38c   : > { %9776 = vmatmul.msk.f32.gmra.mxu1 %vm960_vm2, %v11263_v44  ;;  %v4127_v45 = vld [vmem:[#allocation2 + $0x10b] sm:$0xff] }
 0x38d   : > { %9697 = vmatmul.msk.f32.gmra.mxu3 %vm960_vm2, %v11201_v60  ;;  %9863 = vmatmul.msk.f32.gmra.mxu2 %vm960_vm2, %v4122_v54  ;;  %v11279_v60 = vld [vmem:[#allocation2 + $0xa2] sm:$0xff] }
 0x38f   : > { %v2271_v19 = vld [vmem:[#allocation3 + $0x50] sm:$0xff]  ;;  %v1414_v39 = vpop.f32.mrf.mxu0 }
 0x390   : > { %v2258_v51 = vpop.f32.mrf.mxu3  ;;  %v2349_v53 = vadd.f32 %v2271_v19, %v10590_v61  ;;  %1627 = vst.msk [vmem:[#allocation3 + $0x58] sm:$0xff] %vm1615_vm3, %v1414_v39  ;;  %v11272_v56 = vpop.f32.mrf.mxu2  ;;  %v4123_v61 = vld [vmem:[#allocation2 + $0xeb] sm:$0xff] }
 0x391   : > { %v2416_v55 = vadd.f32 %v2338_v52, %v2258_v51  ;;  %v11274_v57 = vpop.f32.mrf.mxu1  ;;  %v3066_v19 = vld [vmem:[#allocation3 + $0x20] sm:$0xff] }
 0x392   : > { %2427 = vst.msk [vmem:[#allocation3 + $0x50] sm:$0xff] %vm1615_vm3, %v2349_v53  ;;  %10003 = vmatmul.msk.f32.gmra.mxu0 %vm960_vm2, %v5708_v59  ;;  %v5713_v59 = vld [vmem:[#allocation2 + $0xa4] sm:$0xff] }
 0x393   : > { %2494 = vst.msk [vmem:[#allocation3 + $0x268] sm:$0xff] %vm1615_vm3, %v2416_v55 }
 0x394   : > { %9777 = vmatmul.msk.f32.gmra.mxu1 %vm960_vm2, %v11279_v60 }
 0x395   : > { %9698 = vmatmul.msk.f32.gmra.mxu3 %vm960_vm2, %v11216_v8  ;;  %9864 = vmatmul.msk.f32.gmra.mxu2 %vm960_vm2, %v4123_v61  ;;  %v11356_v61 = vld [vmem:[#allocation2 + $0xca] sm:$0xff] }
 0x397   : > { %v2272_v26 = vld [vmem:[#allocation3 + $0x58] sm:$0xff]  ;;  %v1417_v62 = vpop.f32.mrf.mxu0 }
 0x398   : > { %v2828_v63 = vpop.f32.mrf.mxu3  ;;  %v2350_v0 = vadd.f32 %v2272_v26, %v10598_v4  ;;  %1628 = vst.msk [vmem:[#allocation3 + $0x60] sm:$0xff] %vm1615_vm3, %v1417_v62  ;;  %v11288_v1 = vpop.f32.mrf.mxu2  ;;  %v4124_v4 = vld [vmem:[#allocation2 + $0xf3] sm:$0xff] }
 0x399   : > { %v11290_v2 = vpop.f32.mrf.mxu1  ;;  %v4128_v26 = vld [vmem:[#allocation2 + $0x113] sm:$0xff] }
 0x39a   : > { %2428 = vst.msk [vmem:[#allocation3 + $0x58] sm:$0xff] %vm1615_vm3, %v2350_v0  ;;  %10004 = vmatmul.msk.f32.gmra.mxu0 %vm960_vm2, %v5709_v3  ;;  %v2264_v3 = vld [vmem:[#allocation3 + $0x18] sm:$0xff] }
 0x39c   : > { %9778 = vmatmul.msk.f32.gmra.mxu1 %vm960_vm2, %v11294_v6 }
 0x39d   : > { %9699 = vmatmul.msk.f32.gmra.mxu3 %vm960_vm2, %v11231_v24  ;;  %9865 = vmatmul.msk.f32.gmra.mxu2 %vm960_vm2, %v4124_v4 }
 0x39f   : > { %v2273_v7 = vld [vmem:[#allocation3 + $0x60] sm:$0xff]  ;;  %v1420_v8 = vpop.f32.mrf.mxu0 }
 0x3a0   : > { %v2831_v33 = vpop.f32.mrf.mxu3  ;;  %v2351_v9 = vadd.f32 %v2273_v7, %v10606_v11  ;;  %1629 = vst.msk [vmem:[#allocation3 + $0x68] sm:$0xff] %vm1615_vm3, %v1420_v8  ;;  %v11303_v12 = vpop.f32.mrf.mxu2  ;;  %v4125_v11 = vld [vmem:[#allocation2 + $0xfb] sm:$0xff]  ;;  %v3067_v7 = vld [vmem:[#allocation3 + $0x28] sm:$0xff] }
 0x3a1   : > { %v11305_v13 = vpop.f32.mrf.mxu1 }
 0x3a2   : > { %2429 = vst.msk [vmem:[#allocation3 + $0x60] sm:$0xff] %vm1615_vm3, %v2351_v9  ;;  %10005 = vmatmul.msk.f32.gmra.mxu0 %vm960_vm2, %v5710_v14 }
 0x3a4   : > { %9779 = vmatmul.msk.f32.gmra.mxu1 %vm960_vm2, %v11309_v15 }
 0x3a5   : > { %9700 = vmatmul.msk.f32.gmra.mxu3 %vm960_vm2, %v11246_v18  ;;  %9866 = vmatmul.msk.f32.gmra.mxu2 %vm960_vm2, %v4125_v11  ;;  %v5714_v11 = vld [vmem:[#allocation2 + $0xac] sm:$0xff] }
 0x3a7   : > { %v2274_v16 = vld [vmem:[#allocation3 + $0x68] sm:$0xff]  ;;  %v2027_v20 = vpop.f32.mrf.mxu0 }
 0x3a8   : > { %v11316_v24 = vpop.f32.mrf.mxu3  ;;  %v2352_v40 = vadd.f32 %v2274_v16, %v10615_v21  ;;  %v2339_v25 = vadd.f32 %v2261_v22, %v2027_v20  ;;  %v11319_v27 = vpop.f32.mrf.mxu2  ;;  %v4126_v21 = vld [vmem:[#allocation2 + $0x103] sm:$0xff]  ;;  %v11375_v22 = vld [vmem:[#allocation2 + $0xd2] sm:$0xff] }
 0x3a9   : > { %v11321_v28 = vpop.f32.mrf.mxu1 }
 0x3aa   : > { %2430 = vst.msk [vmem:[#allocation3 + $0x68] sm:$0xff] %vm1615_vm3, %v2352_v40  ;;  %10006 = vmatmul.msk.f32.gmra.mxu0 %vm960_vm2, %v5711_v29 }
 0x3ab   : > { %2417 = vst.msk [vmem:[#allocation3] sm:$0xff] %vm1615_vm3, %v2339_v25 }
 0x3ac   : > { %9780 = vmatmul.msk.f32.gmra.mxu1 %vm960_vm2, %v11326_v30 }
 0x3ad   : > { %9701 = vmatmul.msk.f32.gmra.mxu3 %vm960_vm2, %v11263_v44  ;;  %9867 = vmatmul.msk.f32.gmra.mxu2 %vm960_vm2, %v4126_v21  ;;  %v2263_v44 = vld [vmem:[#allocation3 + $0x10] sm:$0xff] }
 0x3ae   : > { %v3068_v21 = vld [vmem:[#allocation3 + $0x30] sm:$0xff] }
 0x3af   : > { %v2030_v31 = vpop.f32.mrf.mxu0 }
 0x3b0   : > { %v11333_v37 = vpop.f32.mrf.mxu3  ;;  %v2340_v18 = vadd.f32 %v2262_v35, %v2030_v31  ;;  %v11335_v47 = vpop.f32.mrf.mxu2 }
 0x3b1   : > { %v11337_v36 = vpop.f32.mrf.mxu1 }
 0x3b2   : > { %v3062_v41 = vld [vmem:[#allocation3] sm:$0xff]  ;;  %2418 = vst.msk [vmem:[#allocation3 + $0x8] sm:$0xff] %vm1615_vm3, %v2340_v18  ;;  %10007 = vmatmul.msk.f32.gmra.mxu0 %vm960_vm2, %v5712_v38 }
 0x3b3   : > { %v3140_v42 = vadd.f32 %v3062_v41, %v2828_v63 }
 0x3b4   : > { %9781 = vmatmul.msk.f32.gmra.mxu1 %vm960_vm2, %v11341_v43 }
 0x3b5   : > { %9702 = vmatmul.msk.f32.gmra.mxu3 %vm960_vm2, %v11279_v60  ;;  %3218 = vst.msk [vmem:[#allocation3] sm:$0xff] %vm1615_vm3, %v3140_v42  ;;  %9868 = vmatmul.msk.f32.gmra.mxu2 %vm960_vm2, %v4127_v45 }
 0x3b7   : > { %v2033_v50 = vpop.f32.mrf.mxu0 }
 0x3b8   : > { %v2840_v54 = vpop.f32.mrf.mxu3  ;;  %v2341_v39 = vadd.f32 %v2263_v44, %v2033_v50  ;;  %v11349_v52 = vpop.f32.mrf.mxu2  ;;  %v11398_v44 = vld [vmem:[#allocation2 + $0xda] sm:$0xff] }
 0x3b9   : > { %v3144_v51 = vadd.f32 %v3066_v19, %v2840_v54  ;;  %v3063_v53 = vld [vmem:[#allocation3 + $0x8] sm:$0xff]  ;;  %v11351_v55 = vpop.f32.mrf.mxu1  ;;  %v4130_v54 = vld [vmem:[#allocation2 + $0x123] sm:$0xff] }
 0x3ba   : > { %v3141_v60 = vadd.f32 %v3063_v53, %v2831_v33  ;;  %2419 = vst.msk [vmem:[#allocation3 + $0x10] sm:$0xff] %vm1615_vm3, %v2341_v39  ;;  %10008 = vmatmul.msk.f32.gmra.mxu0 %vm960_vm2, %v5713_v59 }
 0x3bb   : > { %3222 = vst.msk [vmem:[#allocation3 + $0x20] sm:$0xff] %vm1615_vm3, %v3144_v51 }
 0x3bc   : > { %3219 = vst.msk [vmem:[#allocation3 + $0x8] sm:$0xff] %vm1615_vm3, %v3141_v60  ;;  %9782 = vmatmul.msk.f32.gmra.mxu1 %vm960_vm2, %v11356_v61  ;;  %v3863_v62 = vld [vmem:[#allocation3] sm:$0xff] }
 0x3bd   : > { %9703 = vmatmul.msk.f32.gmra.mxu3 %vm960_vm2, %v11294_v6  ;;  %9869 = vmatmul.msk.f32.gmra.mxu2 %vm960_vm2, %v4128_v26  ;;  %v3941_v63 = vadd.f32 %v3863_v62, %v11258_v49 }
 0x3bf   : > { %v2036_v0 = vpop.f32.mrf.mxu0  ;;  %4019 = vst.msk [vmem:[#allocation3] sm:$0xff] %vm1615_vm3, %v3941_v63  ;;  %v5716_v63 = vld [vmem:[#allocation2 + $0xbc] sm:$0xff] }
 0x3c0   : > { %v2843_v4 = vpop.f32.mrf.mxu3  ;;  %v2342_v8 = vadd.f32 %v2264_v3, %v2036_v0  ;;  %v11366_v9 = vpop.f32.mrf.mxu2  ;;  %v4131_v3 = vld [vmem:[#allocation2 + $0x12b] sm:$0xff] }
 0x3c1   : > { %v3145_v33 = vadd.f32 %v3067_v7, %v2843_v4  ;;  %v3064_v6 = vld [vmem:[#allocation3 + $0x10] sm:$0xff]  ;;  %v11368_v14 = vpop.f32.mrf.mxu1 }
 0x3c2   : > { %v3142_v16 = vadd.f32 %v3064_v6, %v11316_v24  ;;  %v3867_v20 = vld [vmem:[#allocation3 + $0x20] sm:$0xff]  ;;  %2420 = vst.msk [vmem:[#allocation3 + $0x18] sm:$0xff] %vm1615_vm3, %v2342_v8  ;;  %10009 = vmatmul.msk.f32.gmra.mxu0 %vm960_vm2, %v5714_v11  ;;  %v4129_v24 = vld [vmem:[#allocation2 + $0x11b] sm:$0xff] }
 0x3c3   : > { %v3945_v49 = vadd.f32 %v3867_v20, %v11321_v28  ;;  %3223 = vst.msk [vmem:[#allocation3 + $0x28] sm:$0xff] %vm1615_vm3, %v3145_v33  ;;  %v3864_v40 = vld [vmem:[#allocation3 + $0x8] sm:$0xff]  ;;  %v3070_v11 = vld [vmem:[#allocation3 + $0x40] sm:$0xff] }
 0x3c4   : > { %3220 = vst.msk [vmem:[#allocation3 + $0x10] sm:$0xff] %vm1615_vm3, %v3142_v16  ;;  %9783 = vmatmul.msk.f32.gmra.mxu1 %vm960_vm2, %v11375_v22  ;;  %v3942_v25 = vadd.f32 %v3864_v40, %v11274_v57  ;;  %v5715_v57 = vld [vmem:[#allocation2 + $0xb4] sm:$0xff]  ;;  %v5717_v40 = vld [vmem:[#allocation2 + $0xc4] sm:$0xff] }
 0x3c5   : > { %9704 = vmatmul.msk.f32.gmra.mxu3 %vm960_vm2, %v11309_v15  ;;  %4023 = vst.msk [vmem:[#allocation3 + $0x20] sm:$0xff] %vm1615_vm3, %v3945_v49  ;;  %9870 = vmatmul.msk.f32.gmra.mxu2 %vm960_vm2, %v4129_v24 }
 0x3c6   : > { %v4664_v28 = vld [vmem:[#allocation3] sm:$0xff]  ;;  %4020 = vst.msk [vmem:[#allocation3 + $0x8] sm:$0xff] %vm1615_vm3, %v3942_v25  ;;  %v4132_v25 = vld [vmem:[#allocation2 + $0x133] sm:$0xff] }
 0x3c7   : > { %v11386_v31 = vpop.f32.mrf.mxu0  ;;  %v4742_v35 = vadd.f32 %v4664_v28, %v11141_v10 }
 0x3c8   : > { %v2846_v29 = vpop.f32.mrf.mxu3  ;;  %v11389_v18 = vpop.f32.mrf.mxu2 }
 0x3c9   : > { %v3146_v15 = vadd.f32 %v3068_v21, %v2846_v29  ;;  %v3065_v38 = vld [vmem:[#allocation3 + $0x18] sm:$0xff]  ;;  %v11391_v41 = vpop.f32.mrf.mxu1  ;;  %4820 = vst.msk [vmem:[#allocation3] sm:$0xff] %vm1615_vm3, %v4742_v35  ;;  %v3071_v35 = vld [vmem:[#allocation3 + $0x48] sm:$0xff] }
 0x3ca   : > { %v3143_v42 = vadd.f32 %v3065_v38, %v11333_v37  ;;  %v3868_v45 = vld [vmem:[#allocation3 + $0x28] sm:$0xff]  ;;  %10010 = vmatmul.msk.f32.gmra.mxu0 %vm960_vm2, %v5715_v57 }
 0x3cb   : > { %3224 = vst.msk [vmem:[#allocation3 + $0x30] sm:$0xff] %vm1615_vm3, %v3146_v15  ;;  %v3946_v50 = vadd.f32 %v3868_v45, %v11337_v36  ;;  %v3865_v10 = vld [vmem:[#allocation3 + $0x10] sm:$0xff]  ;;  %v5718_v45 = vld [vmem:[#allocation2 + $0xcc] sm:$0xff] }
 0x3cc   : > { %3221 = vst.msk [vmem:[#allocation3 + $0x18] sm:$0xff] %vm1615_vm3, %v3143_v42  ;;  %9784 = vmatmul.msk.f32.gmra.mxu1 %vm960_vm2, %v11398_v44  ;;  %v3943_v37 = vadd.f32 %v3865_v10, %v11290_v2  ;;  %v4668_v19 = vld [vmem:[#allocation3 + $0x20] sm:$0xff]  ;;  %v4133_v10 = vld [vmem:[#allocation2 + $0x13b] sm:$0xff] }
 0x3cd   : > { %9705 = vmatmul.msk.f32.gmra.mxu3 %vm960_vm2, %v11326_v30  ;;  %4024 = vst.msk [vmem:[#allocation3 + $0x28] sm:$0xff] %vm1615_vm3, %v3946_v50  ;;  %9871 = vmatmul.msk.f32.gmra.mxu2 %vm960_vm2, %v4130_v54  ;;  %v4665_v36 = vld [vmem:[#allocation3 + $0x8] sm:$0xff]  ;;  %v4746_v39 = vadd.f32 %v4668_v19, %v11196_v58  ;;  %v3069_v30 = vld [vmem:[#allocation3 + $0x38] sm:$0xff] }
 0x3ce   : > { %v4743_v51 = vadd.f32 %v4665_v36, %v11154_v23  ;;  %4021 = vst.msk [vmem:[#allocation3 + $0x10] sm:$0xff] %vm1615_vm3, %v3943_v37  ;;  %v11422_v23 = vld [vmem:[#allocation2 + $0xe2] sm:$0xff]  ;;  %v3072_v37 = vld [vmem:[#allocation3 + $0x50] sm:$0xff] }
 0x3cf   : > { %v11411_v59 = vpop.f32.mrf.mxu0  ;;  %4824 = vst.msk [vmem:[#allocation3 + $0x20] sm:$0xff] %vm1615_vm3, %v4746_v39 }
 0x3d0   : > { %v2849_v53 = vpop.f32.mrf.mxu3  ;;  %v11414_v2 = vpop.f32.mrf.mxu2  ;;  %4821 = vst.msk [vmem:[#allocation3 + $0x8] sm:$0xff] %vm1615_vm3, %v4743_v51 }
 0x3d1   : > { %v3147_v60 = vadd.f32 %v3069_v30, %v2849_v53  ;;  %v11417_v62 = vpop.f32.mrf.mxu1 }
 0x3d2   : > { %v3869_v26 = vld [vmem:[#allocation3 + $0x30] sm:$0xff]  ;;  %10011 = vmatmul.msk.f32.gmra.mxu0 %vm960_vm2, %v5716_v63 }
 0x3d3   : > { %v3947_v58 = vadd.f32 %v3869_v26, %v11351_v55  ;;  %3225 = vst.msk [vmem:[#allocation3 + $0x38] sm:$0xff] %vm1615_vm3, %v3147_v60  ;;  %v3866_v0 = vld [vmem:[#allocation3 + $0x18] sm:$0xff] }
 0x3d4   : > { %9785 = vmatmul.msk.f32.gmra.mxu1 %vm960_vm2, %v11422_v23  ;;  %v3944_v4 = vadd.f32 %v3866_v0, %v11305_v13  ;;  %v4669_v7 = vld [vmem:[#allocation3 + $0x28] sm:$0xff]  ;;  %v4134_v26 = vld [vmem:[#allocation2 + $0x143] sm:$0xff] }
 0x3d5   : > { %4025 = vst.msk [vmem:[#allocation3 + $0x30] sm:$0xff] %vm1615_vm3, %v3947_v58  ;;  %9706 = vmatmul.msk.f32.gmra.mxu3 %vm960_vm2, %v11341_v43  ;;  %9872 = vmatmul.msk.f32.gmra.mxu2 %vm960_vm2, %v4131_v3  ;;  %v4666_v55 = vld [vmem:[#allocation3 + $0x10] sm:$0xff]  ;;  %v4747_v8 = vadd.f32 %v4669_v7, %v11211_v5  ;;  %v3073_v58 = vld [vmem:[#allocation3 + $0x58] sm:$0xff] }
 0x3d6   : > { %v4744_v33 = vadd.f32 %v4666_v55, %v11167_v34  ;;  %4022 = vst.msk [vmem:[#allocation3 + $0x18] sm:$0xff] %vm1615_vm3, %v3944_v4  ;;  %v11445_v34 = vld [vmem:[#allocation2 + $0xea] sm:$0xff] }
 0x3d7   : > { %v11434_v16 = vpop.f32.mrf.mxu0  ;;  %4825 = vst.msk [vmem:[#allocation3 + $0x28] sm:$0xff] %vm1615_vm3, %v4747_v8 }
 0x3d8   : > { %v2852_v6 = vpop.f32.mrf.mxu3  ;;  %v11437_v20 = vpop.f32.mrf.mxu2  ;;  %4822 = vst.msk [vmem:[#allocation3 + $0x10] sm:$0xff] %vm1615_vm3, %v4744_v33 }
 0x3d9   : > { %v3148_v43 = vadd.f32 %v3070_v11, %v2852_v6  ;;  %v11440_v49 = vpop.f32.mrf.mxu1  ;;  %v4135_v6 = vld [vmem:[#allocation2 + $0x14b] sm:$0xff] }
 0x3da   : > { %v3870_v13 = vld [vmem:[#allocation3 + $0x38] sm:$0xff]  ;;  %10012 = vmatmul.msk.f32.gmra.mxu0 %vm960_vm2, %v5717_v40 }
 0x3db   : > { %v3948_v5 = vadd.f32 %v3870_v13, %v11368_v14  ;;  %3226 = vst.msk [vmem:[#allocation3 + $0x40] sm:$0xff] %vm1615_vm3, %v3148_v43  ;;  %v3074_v13 = vld [vmem:[#allocation3 + $0x60] sm:$0xff] }
 0x3dc   : > { %v4670_v24 = vld [vmem:[#allocation3 + $0x30] sm:$0xff]  ;;  %9786 = vmatmul.msk.f32.gmra.mxu1 %vm960_vm2, %v11445_v34 }
 0x3dd   : > { %4026 = vst.msk [vmem:[#allocation3 + $0x38] sm:$0xff] %vm1615_vm3, %v3948_v5  ;;  %9707 = vmatmul.msk.f32.gmra.mxu3 %vm960_vm2, %v11356_v61  ;;  %v4748_v28 = vadd.f32 %v4670_v24, %v11226_v17  ;;  %9873 = vmatmul.msk.f32.gmra.mxu2 %vm960_vm2, %v4132_v25  ;;  %v4667_v14 = vld [vmem:[#allocation3 + $0x18] sm:$0xff] }
 0x3de   : > { %v4745_v29 = vadd.f32 %v4667_v14, %v11181_v48  ;;  %v11464_v48 = vld [vmem:[#allocation2 + $0xf2] sm:$0xff] }
 0x3df   : > { %4826 = vst.msk [vmem:[#allocation3 + $0x30] sm:$0xff] %vm1615_vm3, %v4748_v28  ;;  %v11456_v15 = vpop.f32.mrf.mxu0 }
 0x3e0   : > { %v2855_v21 = vpop.f32.mrf.mxu3  ;;  %v11458_v57 = vpop.f32.mrf.mxu2  ;;  %4823 = vst.msk [vmem:[#allocation3 + $0x18] sm:$0xff] %vm1615_vm3, %v4745_v29  ;;  %v4136_v29 = vld [vmem:[#allocation2 + $0x153] sm:$0xff] }
 0x3e1   : > { %v3149_v38 = vadd.f32 %v3071_v35, %v2855_v21  ;;  %v3662_v42 = vpop.f32.mrf.mxu1 }
 0x3e2   : > { %v3871_v61 = vld [vmem:[#allocation3 + $0x40] sm:$0xff]  ;;  %10013 = vmatmul.msk.f32.gmra.mxu0 %vm960_vm2, %v5718_v45 }
 0x3e3   : > { %v3949_v17 = vadd.f32 %v3871_v61, %v11391_v41  ;;  %3227 = vst.msk [vmem:[#allocation3 + $0x48] sm:$0xff] %vm1615_vm3, %v3149_v38  ;;  %v3075_v38 = vld [vmem:[#allocation3 + $0x68] sm:$0xff] }
 0x3e4   : > { %v4671_v50 = vld [vmem:[#allocation3 + $0x38] sm:$0xff]  ;;  %9787 = vmatmul.msk.f32.gmra.mxu1 %vm960_vm2, %v11464_v48 }
 0x3e5   : > { %4027 = vst.msk [vmem:[#allocation3 + $0x40] sm:$0xff] %vm1615_vm3, %v3949_v17  ;;  %9708 = vmatmul.msk.f32.gmra.mxu3 %vm960_vm2, %v11375_v22  ;;  %v4749_v54 = vadd.f32 %v4671_v50, %v11241_v32  ;;  %9874 = vmatmul.msk.f32.gmra.mxu2 %vm960_vm2, %v4133_v10  ;;  %v5719_v22 = vld [vmem:[#allocation2 + $0xd4] sm:$0xff] }
 0x3e6   : > { %v11481_v32 = vld [vmem:[#allocation2 + $0xfa] sm:$0xff] }
 0x3e7   : > { %4827 = vst.msk [vmem:[#allocation3 + $0x38] sm:$0xff] %vm1615_vm3, %v4749_v54  ;;  %v11474_v19 = vpop.f32.mrf.mxu0 }
 0x3e8   : > { %v2858_v41 = vpop.f32.mrf.mxu3  ;;  %v11476_v39 = vpop.f32.mrf.mxu2 }
 0x3e9   : > { %v3150_v36 = vadd.f32 %v3072_v37, %v2858_v41  ;;  %v3665_v53 = vpop.f32.mrf.mxu1  ;;  %v4137_v41 = vld [vmem:[#allocation2 + $0x15b] sm:$0xff] }
 0x3ea   : > { %v3872_v51 = vld [vmem:[#allocation3 + $0x48] sm:$0xff]  ;;  %10014 = vmatmul.msk.f32.gmra.mxu0 %vm960_vm2, %v5719_v22 }
 0x3eb   : > { %v3950_v30 = vadd.f32 %v3872_v51, %v11417_v62  ;;  %3228 = vst.msk [vmem:[#allocation3 + $0x50] sm:$0xff] %vm1615_vm3, %v3150_v36  ;;  %v3076_v51 = vld [vmem:[#allocation3 + $0x70] sm:$0xff] }
 0x3ec   : > { %v4672_v60 = vld [vmem:[#allocation3 + $0x40] sm:$0xff]  ;;  %9788 = vmatmul.msk.f32.gmra.mxu1 %vm960_vm2, %v11481_v32 }
 0x3ed   : > { %4028 = vst.msk [vmem:[#allocation3 + $0x48] sm:$0xff] %vm1615_vm3, %v3950_v30  ;;  %9709 = vmatmul.msk.f32.gmra.mxu3 %vm960_vm2, %v11398_v44  ;;  %v4750_v63 = vadd.f32 %v4672_v60, %v11256_v46  ;;  %9875 = vmatmul.msk.f32.gmra.mxu2 %vm960_vm2, %v4134_v26  ;;  %v5720_v44 = vld [vmem:[#allocation2 + $0xdc] sm:$0xff] }
 0x3ee   : > { %v11498_v46 = vld [vmem:[#allocation2 + $0x102] sm:$0xff] }
 0x3ef   : > { %4828 = vst.msk [vmem:[#allocation3 + $0x40] sm:$0xff] %vm1615_vm3, %v4750_v63  ;;  %v11491_v0 = vpop.f32.mrf.mxu0 }
 0x3f0   : > { %v2861_v62 = vpop.f32.mrf.mxu3  ;;  %v11493_v4 = vpop.f32.mrf.mxu2 }
 0x3f1   : > { %v3151_v3 = vadd.f32 %v3073_v58, %v2861_v62  ;;  %v3668_v55 = vpop.f32.mrf.mxu1  ;;  %v4138_v58 = vld [vmem:[#allocation2 + $0x163] sm:$0xff] }
 0x3f2   : > { %v3873_v7 = vld [vmem:[#allocation3 + $0x50] sm:$0xff]  ;;  %10015 = vmatmul.msk.f32.gmra.mxu0 %vm960_vm2, %v5720_v44 }
 0x3f3   : > { %v3951_v8 = vadd.f32 %v3873_v7, %v11440_v49  ;;  %3229 = vst.msk [vmem:[#allocation3 + $0x58] sm:$0xff] %vm1615_vm3, %v3151_v3 }
 0x3f4   : > { %v4673_v33 = vld [vmem:[#allocation3 + $0x48] sm:$0xff]  ;;  %9789 = vmatmul.msk.f32.gmra.mxu1 %vm960_vm2, %v11498_v46 }
 0x3f5   : > { %4029 = vst.msk [vmem:[#allocation3 + $0x50] sm:$0xff] %vm1615_vm3, %v3951_v8  ;;  %9710 = vmatmul.msk.f32.gmra.mxu3 %vm960_vm2, %v11422_v23  ;;  %v4751_v11 = vadd.f32 %v4673_v33, %v11272_v56  ;;  %9876 = vmatmul.msk.f32.gmra.mxu2 %vm960_vm2, %v4135_v6  ;;  %v5721_v23 = vld [vmem:[#allocation2 + $0xe4] sm:$0xff] }
 0x3f6   : > { %v11514_v56 = vld [vmem:[#allocation2 + $0x10a] sm:$0xff] }
 0x3f7   : > { %4829 = vst.msk [vmem:[#allocation3 + $0x48] sm:$0xff] %vm1615_vm3, %v4751_v11  ;;  %v11508_v49 = vpop.f32.mrf.mxu0 }
 0x3f8   : > { %v2864_v43 = vpop.f32.mrf.mxu3  ;;  %v11510_v5 = vpop.f32.mrf.mxu2 }
 0x3f9   : > { %v3152_v40 = vadd.f32 %v3074_v13, %v2864_v43  ;;  %v3671_v25 = vpop.f32.mrf.mxu1 }
 0x3fa   : > { %v3874_v24 = vld [vmem:[#allocation3 + $0x58] sm:$0xff]  ;;  %10016 = vmatmul.msk.f32.gmra.mxu0 %vm960_vm2, %v5721_v23  ;;  %v3078_v23 = vld [vmem:[#allocation3 + $0x80] sm:$0xff] }
 0x3fb   : > { %v3952_v28 = vadd.f32 %v3874_v24, %v3662_v42  ;;  %3230 = vst.msk [vmem:[#allocation3 + $0x60] sm:$0xff] %vm1615_vm3, %v3152_v40  ;;  %v4139_v40 = vld [vmem:[#allocation2 + $0x16b] sm:$0xff] }
 0x3fc   : > { %v4674_v14 = vld [vmem:[#allocation3 + $0x50] sm:$0xff]  ;;  %9790 = vmatmul.msk.f32.gmra.mxu1 %vm960_vm2, %v11514_v56 }
 0x3fd   : > { %4030 = vst.msk [vmem:[#allocation3 + $0x58] sm:$0xff] %vm1615_vm3, %v3952_v28  ;;  %9711 = vmatmul.msk.f32.gmra.mxu3 %vm960_vm2, %v11445_v34  ;;  %v4752_v21 = vadd.f32 %v4674_v14, %v11288_v1  ;;  %9877 = vmatmul.msk.f32.gmra.mxu2 %vm960_vm2, %v4136_v29  ;;  %v5722_v34 = vld [vmem:[#allocation2 + $0xec] sm:$0xff] }
 0x3fe   : > { %v11530_v1 = vld [vmem:[#allocation2 + $0x112] sm:$0xff] }
 0x3ff   : > { %4830 = vst.msk [vmem:[#allocation3 + $0x50] sm:$0xff] %vm1615_vm3, %v4752_v21  ;;  %v11524_v61 = vpop.f32.mrf.mxu0 }
 0x400   : > { %v2867_v35 = vpop.f32.mrf.mxu3  ;;  %v11526_v45 = vpop.f32.mrf.mxu2 }
 0x401   : > { %v3153_v42 = vadd.f32 %v3075_v38, %v2867_v35  ;;  %v3674_v50 = vpop.f32.mrf.mxu1 }
 0x402   : > { %v3875_v17 = vld [vmem:[#allocation3 + $0x60] sm:$0xff]  ;;  %10017 = vmatmul.msk.f32.gmra.mxu0 %vm960_vm2, %v5722_v34 }
 0x403   : > { %v3953_v10 = vadd.f32 %v3875_v17, %v3665_v53  ;;  %3231 = vst.msk [vmem:[#allocation3 + $0x68] sm:$0xff] %vm1615_vm3, %v3153_v42  ;;  %v4140_v17 = vld [vmem:[#allocation2 + $0x173] sm:$0xff] }
 0x404   : > { %v4675_v54 = vld [vmem:[#allocation3 + $0x58] sm:$0xff]  ;;  %9791 = vmatmul.msk.f32.gmra.mxu1 %vm960_vm2, %v11530_v1 }
 0x405   : > { %4031 = vst.msk [vmem:[#allocation3 + $0x60] sm:$0xff] %vm1615_vm3, %v3953_v10  ;;  %9712 = vmatmul.msk.f32.gmra.mxu3 %vm960_vm2, %v11464_v48  ;;  %v4753_v37 = vadd.f32 %v4675_v54, %v11303_v12  ;;  %9878 = vmatmul.msk.f32.gmra.mxu2 %vm960_vm2, %v4137_v41  ;;  %v5723_v48 = vld [vmem:[#allocation2 + $0xf4] sm:$0xff] }
 0x406   : > { %v11546_v12 = vld [vmem:[#allocation2 + $0x11a] sm:$0xff]  ;;  %v3079_v10 = vld [vmem:[#allocation3 + $0x88] sm:$0xff] }
 0x407   : > { %4831 = vst.msk [vmem:[#allocation3 + $0x58] sm:$0xff] %vm1615_vm3, %v4753_v37  ;;  %v11540_v53 = vpop.f32.mrf.mxu0 }
 0x408   : > { %v2870_v36 = vpop.f32.mrf.mxu3  ;;  %v11542_v30 = vpop.f32.mrf.mxu2 }
 0x409   : > { %v3154_v22 = vadd.f32 %v3076_v51, %v2870_v36  ;;  %v3677_v26 = vpop.f32.mrf.mxu1 }
 0x40a   : > { %v3876_v60 = vld [vmem:[#allocation3 + $0x68] sm:$0xff]  ;;  %10018 = vmatmul.msk.f32.gmra.mxu0 %vm960_vm2, %v5723_v48  ;;  %v4141_v48 = vld [vmem:[#allocation2 + $0x17b] sm:$0xff] }
 0x40b   : > { %v3954_v63 = vadd.f32 %v3876_v60, %v3668_v55  ;;  %3232 = vst.msk [vmem:[#allocation3 + $0x70] sm:$0xff] %vm1615_vm3, %v3154_v22  ;;  %v3077_v55 = vld [vmem:[#allocation3 + $0x78] sm:$0xff] }
 0x40c   : > { %v4676_v62 = vld [vmem:[#allocation3 + $0x60] sm:$0xff]  ;;  %9792 = vmatmul.msk.f32.gmra.mxu1 %vm960_vm2, %v11546_v12 }
 0x40d   : > { %4032 = vst.msk [vmem:[#allocation3 + $0x68] sm:$0xff] %vm1615_vm3, %v3954_v63  ;;  %9713 = vmatmul.msk.f32.gmra.mxu3 %vm960_vm2, %v11481_v32  ;;  %v4754_v3 = vadd.f32 %v4676_v62, %v11319_v27  ;;  %9879 = vmatmul.msk.f32.gmra.mxu2 %vm960_vm2, %v4138_v58  ;;  %v5724_v32 = vld [vmem:[#allocation2 + $0xfc] sm:$0xff] }
 0x40e   : > { %v11562_v27 = vld [vmem:[#allocation2 + $0x122] sm:$0xff]  ;;  %v3080_v62 = vld [vmem:[#allocation3 + $0x90] sm:$0xff] }
 0x40f   : > { %4832 = vst.msk [vmem:[#allocation3 + $0x60] sm:$0xff] %vm1615_vm3, %v4754_v3  ;;  %v11556_v44 = vpop.f32.mrf.mxu0 }
 0x410   : > { %v2873_v7 = vpop.f32.mrf.mxu3  ;;  %v11558_v33 = vpop.f32.mrf.mxu2 }
 0x411   : > { %v3155_v8 = vadd.f32 %v3077_v55, %v2873_v7  ;;  %v3680_v11 = vpop.f32.mrf.mxu1 }
 0x412   : > { %v3877_v6 = vld [vmem:[#allocation3 + $0x70] sm:$0xff]  ;;  %10019 = vmatmul.msk.f32.gmra.mxu0 %vm960_vm2, %v5724_v32 }
 0x413   : > { %v3955_v43 = vadd.f32 %v3877_v6, %v3671_v25  ;;  %3233 = vst.msk [vmem:[#allocation3 + $0x78] sm:$0xff] %vm1615_vm3, %v3155_v8 }
 0x414   : > { %v4677_v13 = vld [vmem:[#allocation3 + $0x68] sm:$0xff]  ;;  %9793 = vmatmul.msk.f32.gmra.mxu1 %vm960_vm2, %v11562_v27 }
 0x415   : > { %4033 = vst.msk [vmem:[#allocation3 + $0x70] sm:$0xff] %vm1615_vm3, %v3955_v43  ;;  %9714 = vmatmul.msk.f32.gmra.mxu3 %vm960_vm2, %v11498_v46  ;;  %v4755_v24 = vadd.f32 %v4677_v13, %v11335_v47  ;;  %9880 = vmatmul.msk.f32.gmra.mxu2 %vm960_vm2, %v4139_v40  ;;  %v5725_v46 = vld [vmem:[#allocation2 + $0x104] sm:$0xff] }
 0x416   : > { %v11578_v47 = vld [vmem:[#allocation2 + $0x12a] sm:$0xff]  ;;  %v3081_v40 = vld [vmem:[#allocation3 + $0x98] sm:$0xff] }
 0x417   : > { %4833 = vst.msk [vmem:[#allocation3 + $0x68] sm:$0xff] %vm1615_vm3, %v4755_v24  ;;  %v11572_v28 = vpop.f32.mrf.mxu0  ;;  %v4142_v43 = vld [vmem:[#allocation2 + $0x183] sm:$0xff] }
 0x418   : > { %v2876_v25 = vpop.f32.mrf.mxu3  ;;  %v11574_v29 = vpop.f32.mrf.mxu2 }
 0x419   : > { %v3156_v14 = vadd.f32 %v3078_v23, %v2876_v25  ;;  %v3683_v35 = vpop.f32.mrf.mxu1 }
 0x41a   : > { %v3878_v21 = vld [vmem:[#allocation3 + $0x78] sm:$0xff]  ;;  %10020 = vmatmul.msk.f32.gmra.mxu0 %vm960_vm2, %v5725_v46 }
 0x41b   : > { %v3956_v38 = vadd.f32 %v3878_v21, %v3674_v50  ;;  %3234 = vst.msk [vmem:[#allocation3 + $0x80] sm:$0xff] %vm1615_vm3, %v3156_v14 }
 0x41c   : > { %v4678_v42 = vld [vmem:[#allocation3 + $0x70] sm:$0xff]  ;;  %9794 = vmatmul.msk.f32.gmra.mxu1 %vm960_vm2, %v11578_v47 }
 0x41d   : > { %4034 = vst.msk [vmem:[#allocation3 + $0x78] sm:$0xff] %vm1615_vm3, %v3956_v38  ;;  %9715 = vmatmul.msk.f32.gmra.mxu3 %vm960_vm2, %v11514_v56  ;;  %v4756_v34 = vadd.f32 %v4678_v42, %v11349_v52  ;;  %9881 = vmatmul.msk.f32.gmra.mxu2 %vm960_vm2, %v4140_v17  ;;  %v5726_v56 = vld [vmem:[#allocation2 + $0x10c] sm:$0xff] }
 0x41e   : > { %v11594_v52 = vld [vmem:[#allocation2 + $0x132] sm:$0xff] }
 0x41f   : > { %4834 = vst.msk [vmem:[#allocation3 + $0x70] sm:$0xff] %vm1615_vm3, %v4756_v34  ;;  %v11588_v54 = vpop.f32.mrf.mxu0  ;;  %v4143_v42 = vld [vmem:[#allocation2 + $0x18b] sm:$0xff] }
 0x420   : > { %v2879_v50 = vpop.f32.mrf.mxu3  ;;  %v11590_v37 = vpop.f32.mrf.mxu2  ;;  %v3082_v34 = vld [vmem:[#allocation3 + $0xa0] sm:$0xff] }
 0x421   : > { %v3157_v41 = vadd.f32 %v3079_v10, %v2879_v50  ;;  %v3686_v51 = vpop.f32.mrf.mxu1 }
 0x422   : > { %v3879_v36 = vld [vmem:[#allocation3 + $0x80] sm:$0xff]  ;;  %10021 = vmatmul.msk.f32.gmra.mxu0 %vm960_vm2, %v5726_v56 }
 0x423   : > { %v3957_v22 = vadd.f32 %v3879_v36, %v3677_v26  ;;  %3235 = vst.msk [vmem:[#allocation3 + $0x88] sm:$0xff] %vm1615_vm3, %v3157_v41 }
 0x424   : > { %v4679_v60 = vld [vmem:[#allocation3 + $0x78] sm:$0xff]  ;;  %9795 = vmatmul.msk.f32.gmra.mxu1 %vm960_vm2, %v11594_v52 }
 0x425   : > { %4035 = vst.msk [vmem:[#allocation3 + $0x80] sm:$0xff] %vm1615_vm3, %v3957_v22  ;;  %9716 = vmatmul.msk.f32.gmra.mxu3 %vm960_vm2, %v11530_v1  ;;  %v4757_v63 = vadd.f32 %v4679_v60, %v11366_v9  ;;  %9882 = vmatmul.msk.f32.gmra.mxu2 %vm960_vm2, %v4141_v48  ;;  %v5727_v1 = vld [vmem:[#allocation2 + $0x114] sm:$0xff] }
 0x426   : > { %v11610_v9 = vld [vmem:[#allocation2 + $0x13a] sm:$0xff] }
 0x427   : > { %4835 = vst.msk [vmem:[#allocation3 + $0x78] sm:$0xff] %vm1615_vm3, %v4757_v63  ;;  %v11604_v58 = vpop.f32.mrf.mxu0  ;;  %v4144_v48 = vld [vmem:[#allocation2 + $0x193] sm:$0xff] }
 0x428   : > { %v2882_v26 = vpop.f32.mrf.mxu3  ;;  %v11606_v7 = vpop.f32.mrf.mxu2 }
 0x429   : > { %v3158_v3 = vadd.f32 %v3080_v62, %v2882_v26  ;;  %v3689_v8 = vpop.f32.mrf.mxu1  ;;  %v3083_v26 = vld [vmem:[#allocation3 + $0xa8] sm:$0xff] }
 0x42a   : > { %v3880_v55 = vld [vmem:[#allocation3 + $0x88] sm:$0xff]  ;;  %10022 = vmatmul.msk.f32.gmra.mxu0 %vm960_vm2, %v5727_v1 }
 0x42b   : > { %v3958_v6 = vadd.f32 %v3880_v55, %v3680_v11  ;;  %3236 = vst.msk [vmem:[#allocation3 + $0x90] sm:$0xff] %vm1615_vm3, %v3158_v3 }
 0x42c   : > { %v4680_v32 = vld [vmem:[#allocation3 + $0x80] sm:$0xff]  ;;  %9796 = vmatmul.msk.f32.gmra.mxu1 %vm960_vm2, %v11610_v9 }
 0x42d   : > { %4036 = vst.msk [vmem:[#allocation3 + $0x88] sm:$0xff] %vm1615_vm3, %v3958_v6  ;;  %9717 = vmatmul.msk.f32.gmra.mxu3 %vm960_vm2, %v11546_v12  ;;  %v4758_v13 = vadd.f32 %v4680_v32, %v11389_v18  ;;  %9883 = vmatmul.msk.f32.gmra.mxu2 %vm960_vm2, %v4142_v43  ;;  %v5728_v12 = vld [vmem:[#allocation2 + $0x11c] sm:$0xff] }
 0x42e   : > { %v11626_v18 = vld [vmem:[#allocation2 + $0x142] sm:$0xff] }
 0x42f   : > { %4836 = vst.msk [vmem:[#allocation3 + $0x80] sm:$0xff] %vm1615_vm3, %v4758_v13  ;;  %v11620_v24 = vpop.f32.mrf.mxu0  ;;  %v4145_v13 = vld [vmem:[#allocation2 + $0x19b] sm:$0xff] }
 0x430   : > { %v2885_v11 = vpop.f32.mrf.mxu3  ;;  %v11622_v23 = vpop.f32.mrf.mxu2 }
 0x431   : > { %v3159_v25 = vadd.f32 %v3081_v40, %v2885_v11  ;;  %v3692_v21 = vpop.f32.mrf.mxu1  ;;  %v3084_v40 = vld [vmem:[#allocation3 + $0xb0] sm:$0xff] }
 0x432   : > { %v3881_v14 = vld [vmem:[#allocation3 + $0x90] sm:$0xff]  ;;  %10023 = vmatmul.msk.f32.gmra.mxu0 %vm960_vm2, %v5728_v12 }
 0x433   : > { %v3959_v46 = vadd.f32 %v3881_v14, %v3683_v35  ;;  %3237 = vst.msk [vmem:[#allocation3 + $0x98] sm:$0xff] %vm1615_vm3, %v3159_v25 }
 0x434   : > { %v4681_v38 = vld [vmem:[#allocation3 + $0x88] sm:$0xff]  ;;  %9797 = vmatmul.msk.f32.gmra.mxu1 %vm960_vm2, %v11626_v18 }
 0x435   : > { %4037 = vst.msk [vmem:[#allocation3 + $0x90] sm:$0xff] %vm1615_vm3, %v3959_v46  ;;  %9718 = vmatmul.msk.f32.gmra.mxu3 %vm960_vm2, %v11562_v27  ;;  %v4759_v17 = vadd.f32 %v4681_v38, %v11414_v2  ;;  %9884 = vmatmul.msk.f32.gmra.mxu2 %vm960_vm2, %v4143_v42  ;;  %v5729_v27 = vld [vmem:[#allocation2 + $0x124] sm:$0xff] }
 0x436   : > { %v11644_v2 = vld [vmem:[#allocation2 + $0x14a] sm:$0xff] }
 0x437   : > { %4837 = vst.msk [vmem:[#allocation3 + $0x88] sm:$0xff] %vm1615_vm3, %v4759_v17  ;;  %v11636_v50 = vpop.f32.mrf.mxu0 }
 0x438   : > { %v2888_v35 = vpop.f32.mrf.mxu3  ;;  %v11638_v41 = vpop.f32.mrf.mxu2 }
 0x439   : > { %v3160_v10 = vadd.f32 %v3082_v34, %v2888_v35  ;;  %v11640_v56 = vpop.f32.mrf.mxu1  ;;  %v4146_v35 = vld [vmem:[#allocation2 + $0x1a3] sm:$0xff] }
 0x43a   : > { %v3882_v36 = vld [vmem:[#allocation3 + $0x98] sm:$0xff]  ;;  %10024 = vmatmul.msk.f32.gmra.mxu0 %vm960_vm2, %v5729_v27 }
 0x43b   : > { %v3960_v22 = vadd.f32 %v3882_v36, %v3686_v51  ;;  %3238 = vst.msk [vmem:[#allocation3 + $0xa0] sm:$0xff] %vm1615_vm3, %v3160_v10  ;;  %v3085_v36 = vld [vmem:[#allocation3 + $0xb8] sm:$0xff] }
 0x43c   : > { %v4682_v60 = vld [vmem:[#allocation3 + $0x90] sm:$0xff]  ;;  %9798 = vmatmul.msk.f32.gmra.mxu1 %vm960_vm2, %v11644_v2 }
 0x43d   : > { %4038 = vst.msk [vmem:[#allocation3 + $0x98] sm:$0xff] %vm1615_vm3, %v3960_v22  ;;  %9719 = vmatmul.msk.f32.gmra.mxu3 %vm960_vm2, %v11578_v47  ;;  %v4760_v63 = vadd.f32 %v4682_v60, %v11437_v20  ;;  %9885 = vmatmul.msk.f32.gmra.mxu2 %vm960_vm2, %v4144_v48  ;;  %v5730_v47 = vld [vmem:[#allocation2 + $0x12c] sm:$0xff] }
 0x43e   : > { %v11662_v20 = vld [vmem:[#allocation2 + $0x152] sm:$0xff] }
 0x43f   : > { %4838 = vst.msk [vmem:[#allocation3 + $0x90] sm:$0xff] %vm1615_vm3, %v4760_v63  ;;  %v11654_v62 = vpop.f32.mrf.mxu0  ;;  %v5732_v63 = vld [vmem:[#allocation2 + $0x13c] sm:$0xff] }
 0x440   : > { %v2891_v51 = vpop.f32.mrf.mxu3  ;;  %v11656_v55 = vpop.f32.mrf.mxu2 }
 0x441   : > { %v3161_v3 = vadd.f32 %v3083_v26, %v2891_v51  ;;  %v11658_v6 = vpop.f32.mrf.mxu1 }
 0x442   : > { %v3883_v1 = vld [vmem:[#allocation3 + $0xa0] sm:$0xff]  ;;  %10025 = vmatmul.msk.f32.gmra.mxu0 %vm960_vm2, %v5730_v47 }
 0x443   : > { %v3961_v32 = vadd.f32 %v3883_v1, %v3689_v8  ;;  %3239 = vst.msk [vmem:[#allocation3 + $0xa8] sm:$0xff] %vm1615_vm3, %v3161_v3  ;;  %v4147_v3 = vld [vmem:[#allocation2 + $0x1ab] sm:$0xff] }
 0x444   : > { %v4683_v43 = vld [vmem:[#allocation3 + $0x98] sm:$0xff]  ;;  %9799 = vmatmul.msk.f32.gmra.mxu1 %vm960_vm2, %v11662_v20  ;;  %v3086_v47 = vld [vmem:[#allocation3 + $0xc0] sm:$0xff] }
 0x445   : > { %4039 = vst.msk [vmem:[#allocation3 + $0xa0] sm:$0xff] %vm1615_vm3, %v3961_v32  ;;  %9720 = vmatmul.msk.f32.gmra.mxu3 %vm960_vm2, %v11594_v52  ;;  %v4761_v11 = vadd.f32 %v4683_v43, %v11458_v57  ;;  %9886 = vmatmul.msk.f32.gmra.mxu2 %vm960_vm2, %v4145_v13  ;;  %v5731_v52 = vld [vmem:[#allocation2 + $0x134] sm:$0xff] }
 0x446   : > { %v11680_v57 = vld [vmem:[#allocation2 + $0x15a] sm:$0xff] }
 0x447   : > { %4839 = vst.msk [vmem:[#allocation3 + $0x98] sm:$0xff] %vm1615_vm3, %v4761_v11  ;;  %v11672_v25 = vpop.f32.mrf.mxu0 }
 0x448   : > { %v2894_v8 = vpop.f32.mrf.mxu3  ;;  %v11674_v12 = vpop.f32.mrf.mxu2 }
 0x449   : > { %v3162_v14 = vadd.f32 %v3084_v40, %v2894_v8  ;;  %v11676_v38 = vpop.f32.mrf.mxu1 }
 0x44a   : > { %v3884_v46 = vld [vmem:[#allocation3 + $0xa8] sm:$0xff]  ;;  %10026 = vmatmul.msk.f32.gmra.mxu0 %vm960_vm2, %v5731_v52 }
 0x44b   : > { %v3962_v42 = vadd.f32 %v3884_v46, %v3692_v21  ;;  %3240 = vst.msk [vmem:[#allocation3 + $0xb0] sm:$0xff] %vm1615_vm3, %v3162_v14  ;;  %v4979_v21 = vld [vmem:[%s14120_s3 + $0xb8] sm:$0xff] }
 0x44c   : > { %v4684_v17 = vld [vmem:[#allocation3 + $0xa0] sm:$0xff]  ;;  %9800 = vmatmul.msk.f32.gmra.mxu1 %vm960_vm2, %v11680_v57  ;;  %5226 = vmatpush.msra.mxu3 %v4979_v21  ;;  %v4148_v46 = vld [vmem:[#allocation2 + $0x1b3] sm:$0xff] }
 0x44d   : > { %4040 = vst.msk [vmem:[#allocation3 + $0xa8] sm:$0xff] %vm1615_vm3, %v3962_v42  ;;  %9721 = vmatmul.msk.f32.gmra.mxu3 %vm960_vm2, %v11610_v9  ;;  %v4762_v34 = vadd.f32 %v4684_v17, %v11476_v39  ;;  %9887 = vmatmul.msk.f32.gmra.mxu2 %vm960_vm2, %v4146_v35  ;;  %v11700_v39 = vld [vmem:[#allocation2 + $0x162] sm:$0xff]  ;;  %v3087_v42 = vld [vmem:[#allocation3 + $0xc8] sm:$0xff] }
 0x44f   : > { %4840 = vst.msk [vmem:[#allocation3 + $0xa0] sm:$0xff] %vm1615_vm3, %v4762_v34  ;;  %v11693_v27 = vpop.f32.mrf.mxu0 }
 0x450   : > { %v2897_v10 = vpop.f32.mrf.mxu3  ;;  %v11695_v22 = vpop.f32.mrf.mxu2 }
 0x451   : > { %v3163_v9 = vadd.f32 %v3085_v36, %v2897_v10  ;;  %v3704_v48 = vpop.f32.mrf.mxu1 }
 0x452   : > { %v3885_v60 = vld [vmem:[#allocation3 + $0xb0] sm:$0xff]  ;;  %10027 = vmatmul.msk.f32.gmra.mxu0 %vm960_vm2, %v5732_v63 }
 0x453   : > { %v3963_v51 = vadd.f32 %v3885_v60, %v11640_v56  ;;  %3241 = vst.msk [vmem:[#allocation3 + $0xb8] sm:$0xff] %vm1615_vm3, %v3163_v9  ;;  %v4149_v60 = vld [vmem:[#allocation2 + $0x1bb] sm:$0xff] }
 0x454   : > { %v4685_v26 = vld [vmem:[#allocation3 + $0xa8] sm:$0xff]  ;;  %9801 = vmatmul.msk.f32.gmra.mxu1 %vm960_vm2, %v11700_v39 }
 0x455   : > { %4041 = vst.msk [vmem:[#allocation3 + $0xb0] sm:$0xff] %vm1615_vm3, %v3963_v51  ;;  %9722 = vmatmul.msk.f32.gmra.mxu3 %vm960_vm2, %v11626_v18  ;;  %v4763_v1 = vadd.f32 %v4685_v26, %v11493_v4  ;;  %9888 = vmatmul.msk.f32.gmra.mxu2 %vm960_vm2, %v4147_v3  ;;  %v5733_v18 = vld [vmem:[#allocation2 + $0x144] sm:$0xff]  ;;  %v3088_v51 = vld [vmem:[#allocation3 + $0xd0] sm:$0xff] }
 0x456   : > { %v11717_v4 = vld [vmem:[#allocation2 + $0x16a] sm:$0xff] }
 0x457   : > { %4841 = vst.msk [vmem:[#allocation3 + $0xa8] sm:$0xff] %vm1615_vm3, %v4763_v1  ;;  %v11710_v32 = vpop.f32.mrf.mxu0 }
 0x458   : > { %v2900_v56 = vpop.f32.mrf.mxu3  ;;  %v11712_v13 = vpop.f32.mrf.mxu2 }
 0x459   : > { %v3164_v43 = vadd.f32 %v3086_v47, %v2900_v56  ;;  %v3707_v8 = vpop.f32.mrf.mxu1 }
 0x45a   : > { %v3886_v11 = vld [vmem:[#allocation3 + $0xb8] sm:$0xff]  ;;  %10028 = vmatmul.msk.f32.gmra.mxu0 %vm960_vm2, %v5733_v18 }
 0x45b   : > { %v3964_v40 = vadd.f32 %v3886_v11, %v11658_v6  ;;  %3242 = vst.msk [vmem:[#allocation3 + $0xc0] sm:$0xff] %vm1615_vm3, %v3164_v43  ;;  %v4150_v18 = vld [vmem:[#allocation2 + $0x1c3] sm:$0xff] }
 0x45c   : > { %v4686_v14 = vld [vmem:[#allocation3 + $0xb0] sm:$0xff]  ;;  %9802 = vmatmul.msk.f32.gmra.mxu1 %vm960_vm2, %v11717_v4 }
 0x45d   : > { %4042 = vst.msk [vmem:[#allocation3 + $0xb8] sm:$0xff] %vm1615_vm3, %v3964_v40  ;;  %9723 = vmatmul.msk.f32.gmra.mxu3 %vm960_vm2, %v11644_v2  ;;  %v4764_v52 = vadd.f32 %v4686_v14, %v11510_v5  ;;  %9889 = vmatmul.msk.f32.gmra.mxu2 %vm960_vm2, %v4148_v46  ;;  %v5734_v2 = vld [vmem:[#allocation2 + $0x14c] sm:$0xff]  ;;  %v3089_v14 = vld [vmem:[#allocation3 + $0xd8] sm:$0xff] }
 0x45e   : > { %v11734_v5 = vld [vmem:[#allocation2 + $0x172] sm:$0xff] }
 0x45f   : > { %4842 = vst.msk [vmem:[#allocation3 + $0xb0] sm:$0xff] %vm1615_vm3, %v4764_v52  ;;  %v11727_v17 = vpop.f32.mrf.mxu0 }
 0x460   : > { %v2903_v6 = vpop.f32.mrf.mxu3  ;;  %v11729_v21 = vpop.f32.mrf.mxu2 }
 0x461   : > { %v3165_v35 = vadd.f32 %v3087_v42, %v2903_v6  ;;  %v3710_v10 = vpop.f32.mrf.mxu1 }
 0x462   : > { %v3887_v34 = vld [vmem:[#allocation3 + $0xc0] sm:$0xff]  ;;  %10029 = vmatmul.msk.f32.gmra.mxu0 %vm960_vm2, %v5734_v2 }
 0x463   : > { %v3965_v36 = vadd.f32 %v3887_v34, %v11676_v38  ;;  %3243 = vst.msk [vmem:[#allocation3 + $0xc8] sm:$0xff] %vm1615_vm3, %v3165_v35  ;;  %v5736_v35 = vld [vmem:[#allocation2 + $0x15c] sm:$0xff] }
 0x464   : > { %v4687_v9 = vld [vmem:[#allocation3 + $0xb8] sm:$0xff]  ;;  %9803 = vmatmul.msk.f32.gmra.mxu1 %vm960_vm2, %v11734_v5 }
 0x465   : > { %4043 = vst.msk [vmem:[#allocation3 + $0xc0] sm:$0xff] %vm1615_vm3, %v3965_v36  ;;  %9724 = vmatmul.msk.f32.gmra.mxu3 %vm960_vm2, %v11662_v20  ;;  %v4765_v63 = vadd.f32 %v4687_v9, %v11526_v45  ;;  %9890 = vmatmul.msk.f32.gmra.mxu2 %vm960_vm2, %v4149_v60  ;;  %v5735_v20 = vld [vmem:[#allocation2 + $0x154] sm:$0xff]  ;;  %v4151_v36 = vld [vmem:[#allocation2 + $0x1cb] sm:$0xff] }
 0x466   : > { %v11750_v45 = vld [vmem:[#allocation2 + $0x17a] sm:$0xff]  ;;  %v3090_v60 = vld [vmem:[#allocation3 + $0xe0] sm:$0xff] }
 0x467   : > { %4843 = vst.msk [vmem:[#allocation3 + $0xb8] sm:$0xff] %vm1615_vm3, %v4765_v63  ;;  %v11746_v1 = vpop.f32.mrf.mxu0 }
 0x468   : > { %v2906_v38 = vpop.f32.mrf.mxu3  ;;  %v11744_v3 = vpop.f32.mrf.mxu2 }
 0x469   : > { %v3166_v26 = vadd.f32 %v3088_v51, %v2906_v38  ;;  %v3713_v47 = vpop.f32.mrf.mxu1 }
 0x46a   : > { %v3888_v56 = vld [vmem:[#allocation3 + $0xc8] sm:$0xff]  ;;  %10030 = vmatmul.msk.f32.gmra.mxu0 %vm960_vm2, %v5735_v20 }
 0x46b   : > { %v3966_v43 = vadd.f32 %v3888_v56, %v3704_v48  ;;  %3244 = vst.msk [vmem:[#allocation3 + $0xd0] sm:$0xff] %vm1615_vm3, %v3166_v26  ;;  %v5737_v56 = vld [vmem:[#allocation2 + $0x164] sm:$0xff] }
 0x46c   : > { %v4688_v11 = vld [vmem:[#allocation3 + $0xc0] sm:$0xff]  ;;  %9804 = vmatmul.msk.f32.gmra.mxu1 %vm960_vm2, %v11750_v45 }
 0x46d   : > { %4044 = vst.msk [vmem:[#allocation3 + $0xc8] sm:$0xff] %vm1615_vm3, %v3966_v43  ;;  %9725 = vmatmul.msk.f32.gmra.mxu3 %vm960_vm2, %v11680_v57  ;;  %v4766_v40 = vadd.f32 %v4688_v11, %v11542_v30  ;;  %9891 = vmatmul.msk.f32.gmra.mxu2 %vm960_vm2, %v4150_v18  ;;  %v11766_v30 = vld [vmem:[#allocation2 + $0x182] sm:$0xff]  ;;  %v4152_v11 = vld [vmem:[#allocation2 + $0x1d3] sm:$0xff] }
 0x46f   : > { %4844 = vst.msk [vmem:[#allocation3 + $0xc0] sm:$0xff] %vm1615_vm3, %v4766_v40  ;;  %v11763_v57 = vpop.f32.mrf.mxu0  ;;  %v3091_v40 = vld [vmem:[#allocation3 + $0xe8] sm:$0xff] }
 0x470   : > { %v2909_v48 = vpop.f32.mrf.mxu3  ;;  %v11760_v52 = vpop.f32.mrf.mxu2 }
 0x471   : > { %v3167_v46 = vadd.f32 %v3089_v14, %v2909_v48  ;;  %v3716_v42 = vpop.f32.mrf.mxu1 }
 0x472   : > { %v3889_v6 = vld [vmem:[#allocation3 + $0xd0] sm:$0xff]  ;;  %10031 = vmatmul.msk.f32.gmra.mxu0 %vm960_vm2, %v5736_v35  ;;  %v5738_v35 = vld [vmem:[#allocation2 + $0x16c] sm:$0xff] }
 0x473   : > { %v3967_v34 = vadd.f32 %v3889_v6, %v3707_v8  ;;  %3245 = vst.msk [vmem:[#allocation3 + $0xd8] sm:$0xff] %vm1615_vm3, %v3167_v46 }
 0x474   : > { %v4689_v2 = vld [vmem:[#allocation3 + $0xc8] sm:$0xff]  ;;  %9805 = vmatmul.msk.f32.gmra.mxu1 %vm960_vm2, %v11766_v30 }
 0x475   : > { %4045 = vst.msk [vmem:[#allocation3 + $0xd0] sm:$0xff] %vm1615_vm3, %v3967_v34  ;;  %9726 = vmatmul.msk.f32.gmra.mxu3 %vm960_vm2, %v11700_v39  ;;  %v4767_v8 = vadd.f32 %v4689_v2, %v11558_v33  ;;  %9892 = vmatmul.msk.f32.gmra.mxu2 %vm960_vm2, %v4151_v36  ;;  %v11780_v39 = vld [vmem:[#allocation2 + $0x18a] sm:$0xff]  ;;  %v4153_v2 = vld [vmem:[#allocation2 + $0x1db] sm:$0xff] }
 0x477   : > { %4845 = vst.msk [vmem:[#allocation3 + $0xc8] sm:$0xff] %vm1615_vm3, %v4767_v8  ;;  %v11783_v43 = vpop.f32.mrf.mxu0 }
 0x478   : > { %v2912_v9 = vpop.f32.mrf.mxu3  ;;  %v11776_v38 = vpop.f32.mrf.mxu2 }
 0x479   : > { %v3168_v63 = vadd.f32 %v3090_v60, %v2912_v9  ;;  %v3719_v26 = vpop.f32.mrf.mxu1  ;;  %v3092_v9 = vld [vmem:[#allocation3 + $0xf0] sm:$0xff] }
 0x47a   : > { %v3890_v51 = vld [vmem:[#allocation3 + $0xd8] sm:$0xff]  ;;  %10032 = vmatmul.msk.f32.gmra.mxu0 %vm960_vm2, %v5737_v56 }
 0x47b   : > { %v3968_v20 = vadd.f32 %v3890_v51, %v3710_v10  ;;  %3246 = vst.msk [vmem:[#allocation3 + $0xe0] sm:$0xff] %vm1615_vm3, %v3168_v63 }
 0x47c   : > { %v4690_v33 = vld [vmem:[#allocation3 + $0xd0] sm:$0xff]  ;;  %9806 = vmatmul.msk.f32.gmra.mxu1 %vm960_vm2, %v11780_v39 }
 0x47d   : > { %4046 = vst.msk [vmem:[#allocation3 + $0xd8] sm:$0xff] %vm1615_vm3, %v3968_v20  ;;  %9727 = vmatmul.msk.f32.gmra.mxu3 %vm960_vm2, %v11717_v4  ;;  %v4768_v10 = vadd.f32 %v4690_v33, %v11574_v29  ;;  %9893 = vmatmul.msk.f32.gmra.mxu2 %vm960_vm2, %v4152_v11  ;;  %v11796_v4 = vld [vmem:[#allocation2 + $0x192] sm:$0xff]  ;;  %v4154_v11 = vld [vmem:[#allocation2 + $0x1e3] sm:$0xff] }
 0x47f   : > { %4846 = vst.msk [vmem:[#allocation3 + $0xd0] sm:$0xff] %vm1615_vm3, %v4768_v10 }
 0x480   : > { %v2915_v18 = vpop.f32.mrf.mxu3  ;;  %v11792_v14 = vpop.f32.mrf.mxu2 }
 0x481   : > { %v3169_v48 = vadd.f32 %v3091_v40, %v2915_v18  ;;  %v3722_v6 = vpop.f32.mrf.mxu1  ;;  %v3093_v18 = vld [vmem:[#allocation3 + $0xf8] sm:$0xff] }
 0x482   : > { %v3891_v46 = vld [vmem:[#allocation3 + $0xe0] sm:$0xff]  ;;  %10033 = vmatmul.msk.f32.gmra.mxu0 %vm960_vm2, %v5738_v35 }
 0x483   : > { %v3969_v34 = vadd.f32 %v3891_v46, %v3713_v47  ;;  %3247 = vst.msk [vmem:[#allocation3 + $0xe8] sm:$0xff] %vm1615_vm3, %v3169_v48  ;;  %v11805_v47 = vpop.f32.mrf.mxu0 }
 0x484   : > { %v4691_v29 = vld [vmem:[#allocation3 + $0xd8] sm:$0xff]  ;;  %9807 = vmatmul.msk.f32.gmra.mxu1 %vm960_vm2, %v11796_v4 }
 0x485   : > { %4047 = vst.msk [vmem:[#allocation3 + $0xe0] sm:$0xff] %vm1615_vm3, %v3969_v34  ;;  %9728 = vmatmul.msk.f32.gmra.mxu3 %vm960_vm2, %v11734_v5  ;;  %v4769_v36 = vadd.f32 %v4691_v29, %v11590_v37  ;;  %9894 = vmatmul.msk.f32.gmra.mxu2 %vm960_vm2, %v4153_v2  ;;  %v5739_v5 = vld [vmem:[#allocation2 + $0x174] sm:$0xff] }
 0x486   : > { %v11812_v37 = vld [vmem:[#allocation2 + $0x19a] sm:$0xff] }
 0x487   : > { %4847 = vst.msk [vmem:[#allocation3 + $0xd8] sm:$0xff] %vm1615_vm3, %v4769_v36  ;;  %v4155_v36 = vld [vmem:[#allocation2 + $0x1eb] sm:$0xff] }
 0x488   : > { %v2918_v8 = vpop.f32.mrf.mxu3  ;;  %v11808_v63 = vpop.f32.mrf.mxu2 }
 0x489   : > { %v3170_v60 = vadd.f32 %v3092_v9, %v2918_v8  ;;  %v3725_v56 = vpop.f32.mrf.mxu1  ;;  %v3094_v9 = vld [vmem:[#allocation3 + $0x100] sm:$0xff] }
 0x48a   : > { %v3892_v51 = vld [vmem:[#allocation3 + $0xe8] sm:$0xff]  ;;  %10034 = vmatmul.msk.f32.gmra.mxu0 %vm960_vm2, %v5739_v5 }
 0x48b   : > { %v3970_v20 = vadd.f32 %v3892_v51, %v3716_v42  ;;  %3248 = vst.msk [vmem:[#allocation3 + $0xf0] sm:$0xff] %vm1615_vm3, %v3170_v60  ;;  %v11822_v40 = vpop.f32.mrf.mxu0 }
 0x48c   : > { %v4692_v33 = vld [vmem:[#allocation3 + $0xe0] sm:$0xff]  ;;  %9808 = vmatmul.msk.f32.gmra.mxu1 %vm960_vm2, %v11812_v37 }
 0x48d   : > { %4048 = vst.msk [vmem:[#allocation3 + $0xe8] sm:$0xff] %vm1615_vm3, %v3970_v20  ;;  %9729 = vmatmul.msk.f32.gmra.mxu3 %vm960_vm2, %v11750_v45  ;;  %v4770_v10 = vadd.f32 %v4692_v33, %v11606_v7  ;;  %9895 = vmatmul.msk.f32.gmra.mxu2 %vm960_vm2, %v4154_v11  ;;  %v5740_v45 = vld [vmem:[#allocation2 + $0x17c] sm:$0xff]  ;;  %v5741_v33 = vld [vmem:[#allocation2 + $0x184] sm:$0xff] }
 0x48e   : > { %v11828_v7 = vld [vmem:[#allocation2 + $0x1a2] sm:$0xff] }
 0x48f   : > { %4848 = vst.msk [vmem:[#allocation3 + $0xe0] sm:$0xff] %vm1615_vm3, %v4770_v10 }
 0x490   : > { %v2921_v42 = vpop.f32.mrf.mxu3  ;;  %v11824_v46 = vpop.f32.mrf.mxu2 }
 0x491   : > { %v3171_v48 = vadd.f32 %v3093_v18, %v2921_v42  ;;  %v3728_v34 = vpop.f32.mrf.mxu1  ;;  %v4156_v42 = vld [vmem:[#allocation2 + $0x1f3] sm:$0xff] }
 0x492   : > { %v3893_v35 = vld [vmem:[#allocation3 + $0xf0] sm:$0xff]  ;;  %10035 = vmatmul.msk.f32.gmra.mxu0 %vm960_vm2, %v5740_v45 }
 0x493   : > { %v3971_v29 = vadd.f32 %v3893_v35, %v3719_v26  ;;  %3249 = vst.msk [vmem:[#allocation3 + $0xf8] sm:$0xff] %vm1615_vm3, %v3171_v48  ;;  %v3095_v48 = vld [vmem:[#allocation3 + $0x108] sm:$0xff] }
 0x494   : > { %v4693_v2 = vld [vmem:[#allocation3 + $0xe8] sm:$0xff]  ;;  %9809 = vmatmul.msk.f32.gmra.mxu1 %vm960_vm2, %v11828_v7 }
 0x495   : > { %4049 = vst.msk [vmem:[#allocation3 + $0xf0] sm:$0xff] %vm1615_vm3, %v3971_v29  ;;  %9730 = vmatmul.msk.f32.gmra.mxu3 %vm960_vm2, %v11766_v30  ;;  %v4771_v8 = vadd.f32 %v4693_v2, %v11622_v23  ;;  %9896 = vmatmul.msk.f32.gmra.mxu2 %vm960_vm2, %v4155_v36  ;;  %v11840_v30 = vpop.f32.mrf.mxu0  ;;  %v11844_v23 = vld [vmem:[#allocation2 + $0x1aa] sm:$0xff] }
 0x496   : > { %v5742_v36 = vld [vmem:[#allocation2 + $0x18c] sm:$0xff] }
 0x497   : > { %4849 = vst.msk [vmem:[#allocation3 + $0xe8] sm:$0xff] %vm1615_vm3, %v4771_v8 }
 0x498   : > { %v2924_v26 = vpop.f32.mrf.mxu3  ;;  %v11838_v51 = vpop.f32.mrf.mxu2 }
 0x499   : > { %v3172_v60 = vadd.f32 %v3094_v9, %v2924_v26  ;;  %v3731_v20 = vpop.f32.mrf.mxu1  ;;  %v4157_v9 = vld [vmem:[#allocation2 + $0x1fb] sm:$0xff] }
 0x49a   : > { %v3894_v5 = vld [vmem:[#allocation3 + $0xf8] sm:$0xff]  ;;  %10036 = vmatmul.msk.f32.gmra.mxu0 %vm960_vm2, %v5741_v33 }
 0x49b   : > { %v3972_v11 = vadd.f32 %v3894_v5, %v3722_v6  ;;  %3250 = vst.msk [vmem:[#allocation3 + $0x100] sm:$0xff] %vm1615_vm3, %v3172_v60  ;;  %v3096_v5 = vld [vmem:[#allocation3 + $0x110] sm:$0xff] }
 0x49c   : > { %v4694_v10 = vld [vmem:[#allocation3 + $0xf0] sm:$0xff]  ;;  %9810 = vmatmul.msk.f32.gmra.mxu1 %vm960_vm2, %v11844_v23 }
 0x49d   : > { %4050 = vst.msk [vmem:[#allocation3 + $0xf8] sm:$0xff] %vm1615_vm3, %v3972_v11  ;;  %9731 = vmatmul.msk.f32.gmra.mxu3 %vm960_vm2, %v11780_v39  ;;  %v4772_v6 = vadd.f32 %v4694_v10, %v11638_v41  ;;  %9897 = vmatmul.msk.f32.gmra.mxu2 %vm960_vm2, %v4156_v42  ;;  %v11858_v39 = vld [vmem:[#allocation2 + $0x1b2] sm:$0xff]  ;;  %v11861_v26 = vpop.f32.mrf.mxu0 }
 0x49f   : > { %4850 = vst.msk [vmem:[#allocation3 + $0xf0] sm:$0xff] %vm1615_vm3, %v4772_v6  ;;  %v5743_v6 = vld [vmem:[#allocation2 + $0x194] sm:$0xff] }
 0x4a0   : > { %v2927_v18 = vpop.f32.mrf.mxu3  ;;  %v11854_v45 = vpop.f32.mrf.mxu2 }
 0x4a1   : > { %v3173_v35 = vadd.f32 %v3095_v48, %v2927_v18  ;;  %v3734_v2 = vpop.f32.mrf.mxu1  ;;  %v4158_v48 = vld [vmem:[#allocation2 + $0x203] sm:$0xff] }
 0x4a2   : > { %v3895_v29 = vld [vmem:[#allocation3 + $0x100] sm:$0xff]  ;;  %10037 = vmatmul.msk.f32.gmra.mxu0 %vm960_vm2, %v5742_v36  ;;  %v3097_v36 = vld [vmem:[#allocation3 + $0x118] sm:$0xff] }
 0x4a3   : > { %v3973_v8 = vadd.f32 %v3895_v29, %v3725_v56  ;;  %3251 = vst.msk [vmem:[#allocation3 + $0x108] sm:$0xff] %vm1615_vm3, %v3173_v35 }
 0x4a4   : > { %v4695_v41 = vld [vmem:[#allocation3 + $0xf8] sm:$0xff]  ;;  %9811 = vmatmul.msk.f32.gmra.mxu1 %vm960_vm2, %v11858_v39 }
 0x4a5   : > { %4051 = vst.msk [vmem:[#allocation3 + $0x100] sm:$0xff] %vm1615_vm3, %v3973_v8  ;;  %9732 = vmatmul.msk.f32.gmra.mxu3 %vm960_vm2, %v11796_v4  ;;  %v4773_v56 = vadd.f32 %v4695_v41, %v11656_v55  ;;  %9898 = vmatmul.msk.f32.gmra.mxu2 %vm960_vm2, %v4157_v9  ;;  %v11874_v4 = vld [vmem:[#allocation2 + $0x1ba] sm:$0xff] }
 0x4a7   : > { %4851 = vst.msk [vmem:[#allocation3 + $0xf8] sm:$0xff] %vm1615_vm3, %v4773_v56 }
 0x4a8   : > { %v2930_v60 = vpop.f32.mrf.mxu3  ;;  %v11870_v11 = vpop.f32.mrf.mxu2 }
 0x4a9   : > { %v3174_v33 = vadd.f32 %v3096_v5, %v2930_v60  ;;  %v3737_v42 = vpop.f32.mrf.mxu1 }
 0x4aa   : > { %v3896_v10 = vld [vmem:[#allocation3 + $0x108] sm:$0xff]  ;;  %10038 = vmatmul.msk.f32.gmra.mxu0 %vm960_vm2, %v5743_v6  ;;  %v3098_v6 = vld [vmem:[#allocation3 + $0x120] sm:$0xff] }
 0x4ab   : > { %v3974_v18 = vadd.f32 %v3896_v10, %v3728_v34  ;;  %3252 = vst.msk [vmem:[#allocation3 + $0x110] sm:$0xff] %vm1615_vm3, %v3174_v33  ;;  %v11883_v34 = vpop.f32.mrf.mxu0  ;;  %v4159_v33 = vld [vmem:[#allocation2 + $0x20b] sm:$0xff] }
 0x4ac   : > { %v4696_v55 = vld [vmem:[#allocation3 + $0x100] sm:$0xff]  ;;  %9812 = vmatmul.msk.f32.gmra.mxu1 %vm960_vm2, %v11874_v4 }
 0x4ad   : > { %4052 = vst.msk [vmem:[#allocation3 + $0x108] sm:$0xff] %vm1615_vm3, %v3974_v18  ;;  %9733 = vmatmul.msk.f32.gmra.mxu3 %vm960_vm2, %v11812_v37  ;;  %v4774_v35 = vadd.f32 %v4696_v55, %v11674_v12  ;;  %9899 = vmatmul.msk.f32.gmra.mxu2 %vm960_vm2, %v4158_v48  ;;  %v5744_v37 = vld [vmem:[#allocation2 + $0x19c] sm:$0xff] }
 0x4ae   : > { %v11892_v12 = vld [vmem:[#allocation2 + $0x1c2] sm:$0xff] }
 0x4af   : > { %4852 = vst.msk [vmem:[#allocation3 + $0x100] sm:$0xff] %vm1615_vm3, %v4774_v35 }
 0x4b0   : > { %v2933_v29 = vpop.f32.mrf.mxu3  ;;  %v11886_v41 = vpop.f32.mrf.mxu2 }
 0x4b1   : > { %v3175_v8 = vadd.f32 %v3097_v36, %v2933_v29  ;;  %v11888_v56 = vpop.f32.mrf.mxu1 }
 0x4b2   : > { %v3897_v9 = vld [vmem:[#allocation3 + $0x110] sm:$0xff]  ;;  %10039 = vmatmul.msk.f32.gmra.mxu0 %vm960_vm2, %v5744_v37 }
 0x4b3   : > { %v3975_v60 = vadd.f32 %v3897_v9, %v3731_v20  ;;  %3253 = vst.msk [vmem:[#allocation3 + $0x118] sm:$0xff] %vm1615_vm3, %v3175_v8  ;;  %v11902_v18 = vpop.f32.mrf.mxu0  ;;  %v4160_v9 = vld [vmem:[#allocation2 + $0x213] sm:$0xff] }
 0x4b4   : > { %v4697_v5 = vld [vmem:[#allocation3 + $0x108] sm:$0xff]  ;;  %9813 = vmatmul.msk.f32.gmra.mxu1 %vm960_vm2, %v11892_v12 }
 0x4b5   : > { %4053 = vst.msk [vmem:[#allocation3 + $0x110] sm:$0xff] %vm1615_vm3, %v3975_v60  ;;  %9734 = vmatmul.msk.f32.gmra.mxu3 %vm960_vm2, %v11828_v7  ;;  %v4775_v10 = vadd.f32 %v4697_v5, %v11695_v22  ;;  %9900 = vmatmul.msk.f32.gmra.mxu2 %vm960_vm2, %v4159_v33  ;;  %v5745_v7 = vld [vmem:[#allocation2 + $0x1a4] sm:$0xff]  ;;  %v3099_v60 = vld [vmem:[#allocation3 + $0x128] sm:$0xff] }
 0x4b6   : > { %v11910_v22 = vld [vmem:[#allocation2 + $0x1ca] sm:$0xff] }
 0x4b7   : > { %4853 = vst.msk [vmem:[#allocation3 + $0x108] sm:$0xff] %vm1615_vm3, %v4775_v10 }
 0x4b8   : > { %v2936_v20 = vpop.f32.mrf.mxu3  ;;  %v11904_v48 = vpop.f32.mrf.mxu2 }
 0x4b9   : > { %v3176_v55 = vadd.f32 %v3098_v6, %v2936_v20  ;;  %v11906_v29 = vpop.f32.mrf.mxu1  ;;  %v5746_v6 = vld [vmem:[#allocation2 + $0x1ac] sm:$0xff] }
 0x4ba   : > { %v3898_v35 = vld [vmem:[#allocation3 + $0x118] sm:$0xff]  ;;  %10040 = vmatmul.msk.f32.gmra.mxu0 %vm960_vm2, %v5745_v7 }
 0x4bb   : > { %v3976_v36 = vadd.f32 %v3898_v35, %v3734_v2  ;;  %3254 = vst.msk [vmem:[#allocation3 + $0x120] sm:$0xff] %vm1615_vm3, %v3176_v55  ;;  %v4161_v7 = vld [vmem:[#allocation2 + $0x21b] sm:$0xff] }
 0x4bc   : > { %v4698_v8 = vld [vmem:[#allocation3 + $0x110] sm:$0xff]  ;;  %9814 = vmatmul.msk.f32.gmra.mxu1 %vm960_vm2, %v11910_v22 }
 0x4bd   : > { %4054 = vst.msk [vmem:[#allocation3 + $0x118] sm:$0xff] %vm1615_vm3, %v3976_v36  ;;  %9735 = vmatmul.msk.f32.gmra.mxu3 %vm960_vm2, %v11844_v23  ;;  %v4776_v37 = vadd.f32 %v4698_v8, %v11712_v13  ;;  %9901 = vmatmul.msk.f32.gmra.mxu2 %vm960_vm2, %v4160_v9  ;;  %v11924_v23 = vpop.f32.mrf.mxu0  ;;  %v11928_v13 = vld [vmem:[#allocation2 + $0x1d2] sm:$0xff] }
 0x4be   : > { %v7382_v36 = vld [vmem:[%s14120_s3 + $0x118] sm:$0xff] }
 0x4bf   : > { %4854 = vst.msk [vmem:[#allocation3 + $0x110] sm:$0xff] %vm1615_vm3, %v4776_v37  ;;  %7629 = vmatpush.msra.mxu2 %v7382_v36  ;;  %v3100_v9 = vld [vmem:[#allocation3 + $0x130] sm:$0xff]  ;;  %v3101_v36 = vld [vmem:[#allocation3 + $0x138] sm:$0xff] }
 0x4c0   : > { %v2939_v2 = vpop.f32.mrf.mxu3  ;;  %v11920_v33 = vpop.f32.mrf.mxu2 }
 0x4c1   : > { %v3177_v5 = vadd.f32 %v3099_v60, %v2939_v2  ;;  %v11922_v20 = vpop.f32.mrf.mxu1 }
 0x4c2   : > { %v3899_v10 = vld [vmem:[#allocation3 + $0x120] sm:$0xff]  ;;  %10041 = vmatmul.msk.f32.gmra.mxu0 %vm960_vm2, %v5746_v6 }
 0x4c3   : > { %v3977_v55 = vadd.f32 %v3899_v10, %v3737_v42  ;;  %3255 = vst.msk [vmem:[#allocation3 + $0x128] sm:$0xff] %vm1615_vm3, %v3177_v5  ;;  %v6581_v42 = vld [vmem:[%s14120_s3 + $0xf8] sm:$0xff] }
 0x4c4   : > { %v4699_v35 = vld [vmem:[#allocation3 + $0x118] sm:$0xff]  ;;  %9815 = vmatmul.msk.f32.gmra.mxu1 %vm960_vm2, %v11928_v13  ;;  %v5747_v10 = vld [vmem:[#allocation2 + $0x1b4] sm:$0xff] }
 0x4c5   : > { %4055 = vst.msk [vmem:[#allocation3 + $0x120] sm:$0xff] %vm1615_vm3, %v3977_v55  ;;  %9736 = vmatmul.msk.f32.gmra.mxu3 %vm960_vm2, %v11858_v39  ;;  %v4777_v8 = vadd.f32 %v4699_v35, %v11729_v21  ;;  %9902 = vmatmul.msk.f32.gmra.mxu2 %vm960_vm2, %v4161_v7  ;;  %v11949_v21 = vld [vmem:[#allocation2 + $0x1da] sm:$0xff]  ;;  %v11951_v35 = vpop.f32.mrf.mxu0  ;;  %v4162_v7 = vld [vmem:[#allocation2 + $0x223] sm:$0xff] }
 0x4c6   : > { %6828 = vmatpush.msra.mxu1 %v6581_v42 }
 0x4c7   : > { %4855 = vst.msk [vmem:[#allocation3 + $0x118] sm:$0xff] %vm1615_vm3, %v4777_v8 }
 0x4c8   : > { %v2942_v39 = vpop.f32.mrf.mxu3  ;;  %v11944_v2 = vpop.f32.mrf.mxu2 }
 0x4c9   : > { %v3178_v37 = vadd.f32 %v3100_v9, %v2942_v39  ;;  %v3749_v5 = vpop.f32.mrf.mxu1 }
 0x4ca   : > { %v3900_v60 = vld [vmem:[#allocation3 + $0x128] sm:$0xff]  ;;  %10042 = vmatmul.msk.f32.gmra.mxu0 %vm960_vm2, %v5747_v10  ;;  %v11966_v10 = vld [vmem:[#allocation2 + $0x1e2] sm:$0xff] }
 0x4cb   : > { %v3978_v6 = vadd.f32 %v3900_v60, %v11888_v56  ;;  %3256 = vst.msk [vmem:[#allocation3 + $0x130] sm:$0xff] %vm1615_vm3, %v3178_v37  ;;  %v5748_v60 = vld [vmem:[#allocation2 + $0x1bc] sm:$0xff] }
 0x4cc   : > { %v4700_v55 = vld [vmem:[#allocation3 + $0x120] sm:$0xff]  ;;  %9816 = vmatmul.msk.f32.gmra.mxu1 %vm960_vm2, %v11949_v21 }
 0x4cd   : > { %4056 = vst.msk [vmem:[#allocation3 + $0x128] sm:$0xff] %vm1615_vm3, %v3978_v6  ;;  %9737 = vmatmul.msk.f32.gmra.mxu3 %vm960_vm2, %v11874_v4  ;;  %v4778_v56 = vadd.f32 %v4700_v55, %v11744_v3  ;;  %9903 = vmatmul.msk.f32.gmra.mxu2 %vm960_vm2, %v4162_v7  ;;  %v4163_v6 = vld [vmem:[#allocation2 + $0x22b] sm:$0xff] }
 0x4cf   : > { %4856 = vst.msk [vmem:[#allocation3 + $0x120] sm:$0xff] %vm1615_vm3, %v4778_v56  ;;  %v3102_v56 = vld [vmem:[#allocation3 + $0x140] sm:$0xff] }
 0x4d0   : > { %v2945_v42 = vpop.f32.mrf.mxu3  ;;  %v11961_v39 = vpop.f32.mrf.mxu2 }
 0x4d1   : > { %v3179_v8 = vadd.f32 %v3101_v36, %v2945_v42  ;;  %v3752_v37 = vpop.f32.mrf.mxu1 }
 0x4d2   : > { %v3901_v9 = vld [vmem:[#allocation3 + $0x130] sm:$0xff]  ;;  %10043 = vmatmul.msk.f32.gmra.mxu0 %vm960_vm2, %v5748_v60 }
 0x4d3   : > { %v3979_v4 = vadd.f32 %v3901_v9, %v11906_v29  ;;  %3257 = vst.msk [vmem:[#allocation3 + $0x138] sm:$0xff] %vm1615_vm3, %v3179_v8  ;;  %v11975_v29 = vpop.f32.mrf.mxu0 }
 0x4d4   : > { %v4701_v3 = vld [vmem:[#allocation3 + $0x128] sm:$0xff]  ;;  %9817 = vmatmul.msk.f32.gmra.mxu1 %vm960_vm2, %v11966_v10  ;;  %14124 = vst [vmem:[#allocation5_spill] sm:$0xff] %v11975_v29 }
 0x4d5   : > { %4057 = vst.msk [vmem:[#allocation3 + $0x130] sm:$0xff] %vm1615_vm3, %v3979_v4  ;;  %9738 = vmatmul.msk.f32.gmra.mxu3 %vm960_vm2, %v11892_v12  ;;  %v4779_v55 = vadd.f32 %v4701_v3, %v11760_v52  ;;  %9904 = vmatmul.msk.f32.gmra.mxu2 %vm960_vm2, %v4163_v6  ;;  %v5749_v12 = vld [vmem:[#allocation2 + $0x1c4] sm:$0xff]  ;;  %v4164_v3 = vld [vmem:[#allocation2 + $0x233] sm:$0xff] }
 0x4d6   : > { %v11985_v52 = vld [vmem:[#allocation2 + $0x1ea] sm:$0xff] }
 0x4d7   : > { %4857 = vst.msk [vmem:[#allocation3 + $0x128] sm:$0xff] %vm1615_vm3, %v4779_v55  ;;  %v3103_v55 = vld [vmem:[#allocation3 + $0x148] sm:$0xff] }
 0x4d8   : > { %v2948_v7 = vpop.f32.mrf.mxu3  ;;  %v11978_v36 = vpop.f32.mrf.mxu2 }
 0x4d9   : > { %v3180_v42 = vadd.f32 %v3102_v56, %v2948_v7  ;;  %v11980_v9 = vpop.f32.mrf.mxu1 }
 0x4da   : > { %v3902_v8 = vld [vmem:[#allocation3 + $0x138] sm:$0xff]  ;;  %10044 = vmatmul.msk.f32.gmra.mxu0 %vm960_vm2, %v5749_v12 }
 0x4db   : > { %v3980_v60 = vadd.f32 %v3902_v8, %v11922_v20  ;;  %3258 = vst.msk [vmem:[#allocation3 + $0x140] sm:$0xff] %vm1615_vm3, %v3180_v42  ;;  %v11995_v7 = vpop.f32.mrf.mxu0 }
 0x4dc   : > { %v4702_v4 = vld [vmem:[#allocation3 + $0x130] sm:$0xff]  ;;  %9818 = vmatmul.msk.f32.gmra.mxu1 %vm960_vm2, %v11985_v52  ;;  %14125 = vst [vmem:[#allocation6_spill] sm:$0xff] %v11995_v7 }
 0x4dd   : > { %4058 = vst.msk [vmem:[#allocation3 + $0x138] sm:$0xff] %vm1615_vm3, %v3980_v60  ;;  %9739 = vmatmul.msk.f32.gmra.mxu3 %vm960_vm2, %v11910_v22  ;;  %v4780_v6 = vadd.f32 %v4702_v4, %v11776_v38  ;;  %9905 = vmatmul.msk.f32.gmra.mxu2 %vm960_vm2, %v4164_v3  ;;  %v5750_v22 = vld [vmem:[#allocation2 + $0x1cc] sm:$0xff]  ;;  %v4165_v3 = vld [vmem:[#allocation2 + $0x23b] sm:$0xff] }
 0x4de   : > { %v12003_v38 = vld [vmem:[#allocation2 + $0x1f2] sm:$0xff] }
 0x4df   : > { %4858 = vst.msk [vmem:[#allocation3 + $0x130] sm:$0xff] %vm1615_vm3, %v4780_v6 }
 0x4e0   : > { %v2951_v20 = vpop.f32.mrf.mxu3  ;;  %v11997_v42 = vpop.f32.mrf.mxu2 }
 0x4e1   : > { %v3181_v56 = vadd.f32 %v3103_v55, %v2951_v20  ;;  %v11999_v12 = vpop.f32.mrf.mxu1  ;;  %v3104_v20 = vld [vmem:[#allocation3 + $0x150] sm:$0xff] }
 0x4e2   : > { %v3903_v8 = vld [vmem:[#allocation3 + $0x140] sm:$0xff]  ;;  %10045 = vmatmul.msk.f32.gmra.mxu0 %vm960_vm2, %v5750_v22 }
 0x4e3   : > { %v3981_v60 = vadd.f32 %v3903_v8, %v3749_v5  ;;  %3259 = vst.msk [vmem:[#allocation3 + $0x148] sm:$0xff] %vm1615_vm3, %v3181_v56 }
 0x4e4   : > { %v4703_v4 = vld [vmem:[#allocation3 + $0x138] sm:$0xff]  ;;  %9819 = vmatmul.msk.f32.gmra.mxu1 %vm960_vm2, %v12003_v38 }
 0x4e5   : > { %4059 = vst.msk [vmem:[#allocation3 + $0x140] sm:$0xff] %vm1615_vm3, %v3981_v60  ;;  %9740 = vmatmul.msk.f32.gmra.mxu3 %vm960_vm2, %v11928_v13  ;;  %v4781_v6 = vadd.f32 %v4703_v4, %v11792_v14  ;;  %9906 = vmatmul.msk.f32.gmra.mxu2 %vm960_vm2, %v4165_v3  ;;  %v5751_v60 = vld [vmem:[#allocation2 + $0x1d4] sm:$0xff]  ;;  %v12017_v13 = vpop.f32.mrf.mxu0  ;;  %v4166_v3 = vld [vmem:[#allocation2 + $0x243] sm:$0xff] }
 0x4e6   : > { %14126 = vst [vmem:[#allocation7_spill] sm:$0xff] %v12017_v13  ;;  %v12021_v14 = vld [vmem:[#allocation2 + $0x1fa] sm:$0xff] }
 0x4e7   : > { %4859 = vst.msk [vmem:[#allocation3 + $0x138] sm:$0xff] %vm1615_vm3, %v4781_v6 }
 0x4e8   : > { %v2954_v5 = vpop.f32.mrf.mxu3  ;;  %v12013_v56 = vpop.f32.mrf.mxu2 }
 0x4e9   : > { %v3182_v55 = vadd.f32 %v3104_v20, %v2954_v5  ;;  %v12015_v22 = vpop.f32.mrf.mxu1 }
 0x4ea   : > { %v3904_v8 = vld [vmem:[#allocation3 + $0x148] sm:$0xff]  ;;  %10046 = vmatmul.msk.f32.gmra.mxu0 %vm960_vm2, %v5751_v60  ;;  %v5752_v60 = vld [vmem:[#allocation2 + $0x1dc] sm:$0xff] }
 0x4eb   : > { %v3982_v7 = vadd.f32 %v3904_v8, %v3752_v37  ;;  %3260 = vst.msk [vmem:[#allocation3 + $0x150] sm:$0xff] %vm1615_vm3, %v3182_v55  ;;  %v4978_v37 = vld [vmem:[%s14120_s3 + $0xb0] sm:$0xff] }
 0x4ec   : > { %v4704_v4 = vld [vmem:[#allocation3 + $0x140] sm:$0xff]  ;;  %9820 = vmatmul.msk.f32.gmra.mxu1 %vm960_vm2, %v12021_v14  ;;  %5227 = vmatpush.msra.mxu3 %v4978_v37 }
 0x4ed   : > { %4060 = vst.msk [vmem:[#allocation3 + $0x148] sm:$0xff] %vm1615_vm3, %v3982_v7  ;;  %9741 = vmatmul.msk.f32.gmra.mxu3 %vm960_vm2, %v11949_v21  ;;  %v4782_v6 = vadd.f32 %v4704_v4, %v11808_v63  ;;  %9907 = vmatmul.msk.f32.gmra.mxu2 %vm960_vm2, %v4166_v3  ;;  %v3105_v7 = vld [vmem:[#allocation3 + $0x158] sm:$0xff]  ;;  %v12041_v3 = vpop.f32.mrf.mxu0  ;;  %v4167_v37 = vld [vmem:[#allocation2 + $0x24b] sm:$0xff] }
 0x4ee   : > { %v12039_v63 = vld [vmem:[#allocation2 + $0x202] sm:$0xff]  ;;  %14127 = vst [vmem:[#allocation8_spill] sm:$0xff] %v12041_v3 }
 0x4ef   : > { %4860 = vst.msk [vmem:[#allocation3 + $0x140] sm:$0xff] %vm1615_vm3, %v4782_v6 }
 0x4f0   : > { %v2957_v5 = vpop.f32.mrf.mxu3  ;;  %v12034_v55 = vpop.f32.mrf.mxu2 }
 0x4f1   : > { %v3183_v20 = vadd.f32 %v3105_v7, %v2957_v5  ;;  %v3764_v8 = vpop.f32.mrf.mxu1  ;;  %v3106_v5 = vld [vmem:[#allocation3 + $0x160] sm:$0xff] }
 0x4f2   : > { %v3905_v21 = vld [vmem:[#allocation3 + $0x150] sm:$0xff]  ;;  %10047 = vmatmul.msk.f32.gmra.mxu0 %vm960_vm2, %v5752_v60  ;;  %v5753_v60 = vld [vmem:[#allocation2 + $0x1e4] sm:$0xff] }
 0x4f3   : > { %v3983_v13 = vadd.f32 %v3905_v21, %v11980_v9  ;;  %3261 = vst.msk [vmem:[#allocation3 + $0x158] sm:$0xff] %vm1615_vm3, %v3183_v20 }
 0x4f4   : > { %v4705_v4 = vld [vmem:[#allocation3 + $0x148] sm:$0xff]  ;;  %9821 = vmatmul.msk.f32.gmra.mxu1 %vm960_vm2, %v12039_v63 }
 0x4f5   : > { %4061 = vst.msk [vmem:[#allocation3 + $0x150] sm:$0xff] %vm1615_vm3, %v3983_v13  ;;  %9742 = vmatmul.msk.f32.gmra.mxu3 %vm960_vm2, %v11966_v10  ;;  %v4783_v9 = vadd.f32 %v4705_v4, %v11824_v46  ;;  %9908 = vmatmul.msk.f32.gmra.mxu2 %vm960_vm2, %v4167_v37  ;;  %v12058_v46 = vld [vmem:[#allocation2 + $0x20a] sm:$0xff]  ;;  %v4168_v37 = vld [vmem:[#allocation2 + $0x253] sm:$0xff] }
 0x4f7   : > { %4861 = vst.msk [vmem:[#allocation3 + $0x148] sm:$0xff] %vm1615_vm3, %v4783_v9 }
 0x4f8   : > { %v2960_v6 = vpop.f32.mrf.mxu3  ;;  %v12051_v20 = vpop.f32.mrf.mxu2 }
 0x4f9   : > { %v3184_v7 = vadd.f32 %v3106_v5, %v2960_v6  ;;  %v12053_v13 = vpop.f32.mrf.mxu1  ;;  %v3107_v5 = vld [vmem:[#allocation3 + $0x168] sm:$0xff] }
 0x4fa   : > { %v3906_v21 = vld [vmem:[#allocation3 + $0x158] sm:$0xff]  ;;  %10048 = vmatmul.msk.f32.gmra.mxu0 %vm960_vm2, %v5753_v60 }
 0x4fb   : > { %v3984_v10 = vadd.f32 %v3906_v21, %v11999_v12  ;;  %3262 = vst.msk [vmem:[#allocation3 + $0x160] sm:$0xff] %vm1615_vm3, %v3184_v7  ;;  %v12067_v12 = vpop.f32.mrf.mxu0 }
 0x4fc   : > { %v4706_v4 = vld [vmem:[#allocation3 + $0x150] sm:$0xff]  ;;  %9822 = vmatmul.msk.f32.gmra.mxu1 %vm960_vm2, %v12058_v46  ;;  %14128 = vst [vmem:[#allocation9_spill] sm:$0xff] %v12067_v12 }
 0x4fd   : > { %4062 = vst.msk [vmem:[#allocation3 + $0x158] sm:$0xff] %vm1615_vm3, %v3984_v10  ;;  %9743 = vmatmul.msk.f32.gmra.mxu3 %vm960_vm2, %v11985_v52  ;;  %v4784_v9 = vadd.f32 %v4706_v4, %v11838_v51  ;;  %9909 = vmatmul.msk.f32.gmra.mxu2 %vm960_vm2, %v4168_v37  ;;  %v5754_v52 = vld [vmem:[#allocation2 + $0x1ec] sm:$0xff]  ;;  %v4169_v37 = vld [vmem:[#allocation2 + $0x25b] sm:$0xff] }
 0x4fe   : > { %v12077_v51 = vld [vmem:[#allocation2 + $0x212] sm:$0xff] }
 0x4ff   : > { %4862 = vst.msk [vmem:[#allocation3 + $0x150] sm:$0xff] %vm1615_vm3, %v4784_v9 }
 0x500   : > { %v2963_v6 = vpop.f32.mrf.mxu3  ;;  %v12070_v21 = vpop.f32.mrf.mxu2 }
 0x501   : > { %v3185_v7 = vadd.f32 %v3107_v5, %v2963_v6  ;;  %v12072_v10 = vpop.f32.mrf.mxu1  ;;  %v3108_v6 = vld [vmem:[#allocation3 + $0x170] sm:$0xff] }
 0x502   : > { %v3907_v60 = vld [vmem:[#allocation3 + $0x160] sm:$0xff]  ;;  %10049 = vmatmul.msk.f32.gmra.mxu0 %vm960_vm2, %v5754_v52 }
 0x503   : > { %v3985_v3 = vadd.f32 %v3907_v60, %v12015_v22  ;;  %3263 = vst.msk [vmem:[#allocation3 + $0x168] sm:$0xff] %vm1615_vm3, %v3185_v7  ;;  %v12087_v5 = vpop.f32.mrf.mxu0 }
 0x504   : > { %v4707_v4 = vld [vmem:[#allocation3 + $0x158] sm:$0xff]  ;;  %9823 = vmatmul.msk.f32.gmra.mxu1 %vm960_vm2, %v12077_v51  ;;  %14129 = vst [vmem:[#allocation10_spill] sm:$0xff] %v12087_v5 }
 0x505   : > { %4063 = vst.msk [vmem:[#allocation3 + $0x160] sm:$0xff] %vm1615_vm3, %v3985_v3  ;;  %9744 = vmatmul.msk.f32.gmra.mxu3 %vm960_vm2, %v12003_v38  ;;  %v4785_v9 = vadd.f32 %v4707_v4, %v11854_v45  ;;  %9910 = vmatmul.msk.f32.gmra.mxu2 %vm960_vm2, %v4169_v37  ;;  %v5755_v38 = vld [vmem:[#allocation2 + $0x1f4] sm:$0xff]  ;;  %v4170_v37 = vld [vmem:[#allocation2 + $0x263] sm:$0xff] }
 0x506   : > { %v12095_v45 = vld [vmem:[#allocation2 + $0x21a] sm:$0xff] }
 0x507   : > { %4863 = vst.msk [vmem:[#allocation3 + $0x158] sm:$0xff] %vm1615_vm3, %v4785_v9 }
 0x508   : > { %v2966_v22 = vpop.f32.mrf.mxu3  ;;  %v12089_v60 = vpop.f32.mrf.mxu2 }
 0x509   : > { %v3186_v7 = vadd.f32 %v3108_v6, %v2966_v22  ;;  %v12091_v52 = vpop.f32.mrf.mxu1  ;;  %v3109_v22 = vld [vmem:[#allocation3 + $0x178] sm:$0xff] }
 0x50a   : > { %v3908_v3 = vld [vmem:[#allocation3 + $0x168] sm:$0xff]  ;;  %10050 = vmatmul.msk.f32.gmra.mxu0 %vm960_vm2, %v5755_v38  ;;  %v5756_v38 = vld [vmem:[#allocation2 + $0x1fc] sm:$0xff] }
 0x50b   : > { %v3986_v12 = vadd.f32 %v3908_v3, %v3764_v8  ;;  %3264 = vst.msk [vmem:[#allocation3 + $0x170] sm:$0xff] %vm1615_vm3, %v3186_v7  ;;  %v12112_v5 = vpop.f32.mrf.mxu0 }
 0x50c   : > { %v4708_v4 = vld [vmem:[#allocation3 + $0x160] sm:$0xff]  ;;  %9824 = vmatmul.msk.f32.gmra.mxu1 %vm960_vm2, %v12095_v45  ;;  %14130 = vst [vmem:[#allocation11_spill] sm:$0xff] %v12112_v5 }
 0x50d   : > { %4064 = vst.msk [vmem:[#allocation3 + $0x168] sm:$0xff] %vm1615_vm3, %v3986_v12  ;;  %9745 = vmatmul.msk.f32.gmra.mxu3 %vm960_vm2, %v12021_v14  ;;  %v4786_v9 = vadd.f32 %v4708_v4, %v11870_v11  ;;  %9911 = vmatmul.msk.f32.gmra.mxu2 %vm960_vm2, %v4170_v37  ;;  %v7381_v12 = vld [vmem:[%s14120_s3 + $0x110] sm:$0xff]  ;;  %v7380_v4 = vld [vmem:[%s14120_s3 + $0x108] sm:$0xff] }
 0x50e   : > { %7630 = vmatpush.msra.mxu2 %v7381_v12  ;;  %v12120_v37 = vld [vmem:[#allocation2 + $0x222] sm:$0xff] }
 0x50f   : > { %4864 = vst.msk [vmem:[#allocation3 + $0x160] sm:$0xff] %vm1615_vm3, %v4786_v9  ;;  %v3110_v12 = vld [vmem:[#allocation3 + $0x180] sm:$0xff] }
 0x510   : > { %v2969_v8 = vpop.f32.mrf.mxu3  ;;  %v12105_v7 = vpop.f32.mrf.mxu2  ;;  %7631 = vmatpush.msra.mxu2 %v7380_v4  ;;  %v5757_v4 = vld [vmem:[#allocation2 + $0x204] sm:$0xff] }
 0x511   : > { %v3187_v6 = vadd.f32 %v3109_v22, %v2969_v8  ;;  %v12110_v3 = vpop.f32.mrf.mxu1  ;;  %v7379_v8 = vld [vmem:[%s14120_s3 + $0x100] sm:$0xff] }
 0x512   : > { %v3909_v14 = vld [vmem:[#allocation3 + $0x170] sm:$0xff]  ;;  %10051 = vmatmul.msk.f32.gmra.mxu0 %vm960_vm2, %v5756_v38  ;;  %7632 = vmatpush.msra.mxu2 %v7379_v8 }
 0x513   : > { %v3987_v11 = vadd.f32 %v3909_v14, %v12053_v13  ;;  %3265 = vst.msk [vmem:[#allocation3 + $0x178] sm:$0xff] %vm1615_vm3, %v3187_v6  ;;  %v4171_v13 = vld [vmem:[#allocation2 + $0x26b] sm:$0xff]  ;;  %v4172_v8 = vld [vmem:[#allocation2 + $0x273] sm:$0xff] }
 0x514   : > { %v4709_v9 = vld [vmem:[#allocation3 + $0x168] sm:$0xff]  ;;  %9825 = vmatmul.msk.f32.gmra.mxu1 %vm960_vm2, %v12120_v37 }
 0x515   : > { %4065 = vst.msk [vmem:[#allocation3 + $0x170] sm:$0xff] %vm1615_vm3, %v3987_v11  ;;  %9746 = vmatmul.msk.f32.gmra.mxu3 %vm960_vm2, %v12039_v63  ;;  %v4787_v22 = vadd.f32 %v4709_v9, %v11886_v41  ;;  %9912 = vmatmul.msk.f32.gmra.mxu2 %vm960_vm2, %v4171_v13  ;;  %v12138_v41 = vld [vmem:[#allocation2 + $0x22a] sm:$0xff]  ;;  %v12140_v13 = vpop.f32.mrf.mxu0 }
 0x516   : > { %14131 = vst [vmem:[#allocation12_spill] sm:$0xff] %v12140_v13  ;;  %v4173_v13 = vld [vmem:[#allocation2 + $0x27b] sm:$0xff] }
 0x517   : > { %4865 = vst.msk [vmem:[#allocation3 + $0x168] sm:$0xff] %vm1615_vm3, %v4787_v22 }
 0x518   : > { %v2972_v6 = vpop.f32.mrf.mxu3  ;;  %v12133_v38 = vpop.f32.mrf.mxu2 }
 0x519   : > { %v3188_v14 = vadd.f32 %v3110_v12, %v2972_v6  ;;  %v3779_v11 = vpop.f32.mrf.mxu1  ;;  %v3111_v6 = vld [vmem:[#allocation3 + $0x188] sm:$0xff] }
 0x51a   : > { %v3910_v63 = vld [vmem:[#allocation3 + $0x178] sm:$0xff]  ;;  %10052 = vmatmul.msk.f32.gmra.mxu0 %vm960_vm2, %v5757_v4  ;;  %v5758_v4 = vld [vmem:[#allocation2 + $0x20c] sm:$0xff] }
 0x51b   : > { %v3988_v5 = vadd.f32 %v3910_v63, %v12072_v10  ;;  %3266 = vst.msk [vmem:[#allocation3 + $0x180] sm:$0xff] %vm1615_vm3, %v3188_v14 }
 0x51c   : > { %v4710_v9 = vld [vmem:[#allocation3 + $0x170] sm:$0xff]  ;;  %9826 = vmatmul.msk.f32.gmra.mxu1 %vm960_vm2, %v12138_v41 }
 0x51d   : > { %4066 = vst.msk [vmem:[#allocation3 + $0x178] sm:$0xff] %vm1615_vm3, %v3988_v5  ;;  %9747 = vmatmul.msk.f32.gmra.mxu3 %vm960_vm2, %v12058_v46  ;;  %v4788_v10 = vadd.f32 %v4710_v9, %v11904_v48  ;;  %9913 = vmatmul.msk.f32.gmra.mxu2 %vm960_vm2, %v4172_v8  ;;  %v12155_v48 = vld [vmem:[#allocation2 + $0x232] sm:$0xff] }
 0x51f   : > { %4866 = vst.msk [vmem:[#allocation3 + $0x170] sm:$0xff] %vm1615_vm3, %v4788_v10 }
 0x520   : > { %v2975_v22 = vpop.f32.mrf.mxu3  ;;  %v12150_v14 = vpop.f32.mrf.mxu2 }
 0x521   : > { %v3189_v12 = vadd.f32 %v3111_v6, %v2975_v22  ;;  %v3782_v5 = vpop.f32.mrf.mxu1  ;;  %v3112_v22 = vld [vmem:[#allocation3 + $0x190] sm:$0xff] }
 0x522   : > { %v3911_v63 = vld [vmem:[#allocation3 + $0x180] sm:$0xff]  ;;  %10053 = vmatmul.msk.f32.gmra.mxu0 %vm960_vm2, %v5758_v4 }
 0x523   : > { %v3989_v46 = vadd.f32 %v3911_v63, %v12091_v52  ;;  %3267 = vst.msk [vmem:[#allocation3 + $0x188] sm:$0xff] %vm1615_vm3, %v3189_v12  ;;  %v12164_v52 = vpop.f32.mrf.mxu0 }
 0x524   : > { %v4711_v9 = vld [vmem:[#allocation3 + $0x178] sm:$0xff]  ;;  %9827 = vmatmul.msk.f32.gmra.mxu1 %vm960_vm2, %v12155_v48  ;;  %14132 = vst [vmem:[#allocation13_spill] sm:$0xff] %v12164_v52 }
 0x525   : > { %4067 = vst.msk [vmem:[#allocation3 + $0x180] sm:$0xff] %vm1615_vm3, %v3989_v46  ;;  %9748 = vmatmul.msk.f32.gmra.mxu3 %vm960_vm2, %v12077_v51  ;;  %v4789_v8 = vadd.f32 %v4711_v9, %v11920_v33  ;;  %9914 = vmatmul.msk.f32.gmra.mxu2 %vm960_vm2, %v4173_v13  ;;  %v5759_v46 = vld [vmem:[#allocation2 + $0x214] sm:$0xff]  ;;  %v4174_v33 = vld [vmem:[#allocation2 + $0x283] sm:$0xff] }
 0x526   : > { %v12172_v13 = vld [vmem:[#allocation2 + $0x23a] sm:$0xff] }
 0x527   : > { %4867 = vst.msk [vmem:[#allocation3 + $0x178] sm:$0xff] %vm1615_vm3, %v4789_v8  ;;  %v5760_v52 = vld [vmem:[#allocation2 + $0x21c] sm:$0xff] }
 0x528   : > { %v2978_v10 = vpop.f32.mrf.mxu3  ;;  %v12167_v12 = vpop.f32.mrf.mxu2 }
 0x529   : > { %v3190_v6 = vadd.f32 %v3112_v22, %v2978_v10  ;;  %v3785_v4 = vpop.f32.mrf.mxu1  ;;  %v3113_v10 = vld [vmem:[#allocation3 + $0x198] sm:$0xff] }
 0x52a   : > { %v3912_v63 = vld [vmem:[#allocation3 + $0x188] sm:$0xff]  ;;  %10054 = vmatmul.msk.f32.gmra.mxu0 %vm960_vm2, %v5759_v46 }
 0x52b   : > { %v3990_v51 = vadd.f32 %v3912_v63, %v12110_v3  ;;  %3268 = vst.msk [vmem:[#allocation3 + $0x190] sm:$0xff] %vm1615_vm3, %v3190_v6  ;;  %v12182_v22 = vpop.f32.mrf.mxu0 }
 0x52c   : > { %v4712_v9 = vld [vmem:[#allocation3 + $0x180] sm:$0xff]  ;;  %9828 = vmatmul.msk.f32.gmra.mxu1 %vm960_vm2, %v12172_v13  ;;  %14133 = vst [vmem:[#allocation14_spill] sm:$0xff] %v12182_v22 }
 0x52d   : > { %4068 = vst.msk [vmem:[#allocation3 + $0x188] sm:$0xff] %vm1615_vm3, %v3990_v51  ;;  %9749 = vmatmul.msk.f32.gmra.mxu3 %vm960_vm2, %v12095_v45  ;;  %v4790_v8 = vadd.f32 %v4712_v9, %v11944_v2  ;;  %9915 = vmatmul.msk.f32.gmra.mxu2 %vm960_vm2, %v4174_v33  ;;  %v12188_v2 = vld [vmem:[#allocation2 + $0x242] sm:$0xff]  ;;  %v7301_v9 = vld [vmem:[#allocation2 + $0x36] sm:$0xff] }
 0x52f   : > { %4868 = vst.msk [vmem:[#allocation3 + $0x180] sm:$0xff] %vm1615_vm3, %v4790_v8 }
 0x530   : > { %v2981_v3 = vpop.f32.mrf.mxu3  ;;  %v12184_v63 = vpop.f32.mrf.mxu2 }
 0x531   : > { %v3191_v6 = vadd.f32 %v3113_v10, %v2981_v3  ;;  %v3788_v51 = vpop.f32.mrf.mxu1 }
 0x532   : > { %v3913_v46 = vld [vmem:[#allocation3 + $0x190] sm:$0xff]  ;;  %10055 = vmatmul.msk.f32.gmra.mxu0 %vm960_vm2, %v5760_v52  ;;  %v3114_v52 = vld [vmem:[#allocation3 + $0x1a0] sm:$0xff] }
 0x533   : > { %v3991_v45 = vadd.f32 %v3913_v46, %v3779_v11  ;;  %3269 = vst.msk [vmem:[#allocation3 + $0x198] sm:$0xff] %vm1615_vm3, %v3191_v6  ;;  %v12200_v22 = vpop.f32.mrf.mxu0 }
 0x534   : > { %v4713_v33 = vld [vmem:[#allocation3 + $0x188] sm:$0xff]  ;;  %9829 = vmatmul.msk.f32.gmra.mxu1 %vm960_vm2, %v12188_v2  ;;  %14134 = vst [vmem:[#allocation15_spill] sm:$0xff] %v12200_v22 }
 0x535   : > { %4069 = vst.msk [vmem:[#allocation3 + $0x190] sm:$0xff] %vm1615_vm3, %v3991_v45  ;;  %9750 = vmatmul.msk.f32.gmra.mxu3 %vm960_vm2, %v12120_v37  ;;  %v4791_v8 = vadd.f32 %v4713_v33, %v11961_v39  ;;  %10150 = vmatmul.msk.f32.vlgmr.msra.gmra.mxu2 %vm960_vm2, %v7301_v9  ;;  %v5761_v45 = vld [vmem:[#allocation2 + $0x224] sm:$0xff]  ;;  %v12220_v22 = vld [vmem:[#allocation2 + $0x252] sm:$0xff] }
 0x536   : > { %v12204_v39 = vld [vmem:[#allocation2 + $0x24a] sm:$0xff]  ;;  %v7302_v9 = vld [vmem:[#allocation2 + $0x3e] sm:$0xff] }
 0x537   : > { %4869 = vst.msk [vmem:[#allocation3 + $0x188] sm:$0xff] %vm1615_vm3, %v4791_v8 }
 0x538   : > { %v2984_v11 = vpop.f32.mrf.mxu3  ;;  %v12198_v10 = vpop.f32.mrf.mxu2 }
 0x539   : > { %v3192_v3 = vadd.f32 %v3114_v52, %v2984_v11  ;;  %v3791_v46 = vpop.f32.mrf.mxu1  ;;  %v3115_v11 = vld [vmem:[#allocation3 + $0x1a8] sm:$0xff] }
 0x53a   : > { %v3914_v6 = vld [vmem:[#allocation3 + $0x198] sm:$0xff]  ;;  %10056 = vmatmul.msk.f32.gmra.mxu0 %vm960_vm2, %v5761_v45 }
 0x53b   : > { %v3992_v37 = vadd.f32 %v3914_v6, %v3782_v5  ;;  %3270 = vst.msk [vmem:[#allocation3 + $0x1a0] sm:$0xff] %vm1615_vm3, %v3192_v3 }
 0x53c   : > { %v4714_v33 = vld [vmem:[#allocation3 + $0x190] sm:$0xff]  ;;  %9830 = vmatmul.msk.f32.gmra.mxu1 %vm960_vm2, %v12204_v39 }
 0x53d   : > { %4070 = vst.msk [vmem:[#allocation3 + $0x198] sm:$0xff] %vm1615_vm3, %v3992_v37  ;;  %9751 = vmatmul.msk.f32.gmra.mxu3 %vm960_vm2, %v12138_v41  ;;  %v4792_v8 = vadd.f32 %v4714_v33, %v11978_v36  ;;  %10151 = vmatmul.msk.f32.gmra.mxu2 %vm960_vm2, %v7302_v9  ;;  %v5762_v37 = vld [vmem:[#allocation2 + $0x22c] sm:$0xff]  ;;  %v12222_v33 = vpop.f32.mrf.mxu0 }
 0x53e   : > { %14135 = vst [vmem:[#allocation16_spill] sm:$0xff] %v12222_v33  ;;  %v7303_v9 = vld [vmem:[#allocation2 + $0x46] sm:$0xff]  ;;  %v12238_v33 = vld [vmem:[#allocation2 + $0x25a] sm:$0xff] }
 0x53f   : > { %4870 = vst.msk [vmem:[#allocation3 + $0x190] sm:$0xff] %vm1615_vm3, %v4792_v8 }
 0x540   : > { %v2987_v5 = vpop.f32.mrf.mxu3  ;;  %v12214_v3 = vpop.f32.mrf.mxu2 }
 0x541   : > { %v3193_v52 = vadd.f32 %v3115_v11, %v2987_v5  ;;  %v12216_v45 = vpop.f32.mrf.mxu1  ;;  %v3116_v5 = vld [vmem:[#allocation3 + $0x1b0] sm:$0xff] }
 0x542   : > { %v3915_v6 = vld [vmem:[#allocation3 + $0x1a0] sm:$0xff]  ;;  %10057 = vmatmul.msk.f32.gmra.mxu0 %vm960_vm2, %v5762_v37 }
 0x543   : > { %v3993_v41 = vadd.f32 %v3915_v6, %v3785_v4  ;;  %3271 = vst.msk [vmem:[#allocation3 + $0x1a8] sm:$0xff] %vm1615_vm3, %v3193_v52 }
 0x544   : > { %v4715_v36 = vld [vmem:[#allocation3 + $0x198] sm:$0xff]  ;;  %9831 = vmatmul.msk.f32.gmra.mxu1 %vm960_vm2, %v12220_v22 }
 0x545   : > { %4071 = vst.msk [vmem:[#allocation3 + $0x1a0] sm:$0xff] %vm1615_vm3, %v3993_v41  ;;  %9752 = vmatmul.msk.f32.gmra.mxu3 %vm960_vm2, %v12155_v48  ;;  %v4793_v4 = vadd.f32 %v4715_v36, %v11997_v42  ;;  %10152 = vmatmul.msk.f32.gmra.mxu2 %vm960_vm2, %v7303_v9  ;;  %v5763_v41 = vld [vmem:[#allocation2 + $0x234] sm:$0xff] }
 0x546   : > { %v7304_v36 = vld [vmem:[#allocation2 + $0x4e] sm:$0xff] }
 0x547   : > { %4871 = vst.msk [vmem:[#allocation3 + $0x198] sm:$0xff] %vm1615_vm3, %v4793_v4 }
 0x548   : > { %v2990_v8 = vpop.f32.mrf.mxu3  ;;  %v12232_v52 = vpop.f32.mrf.mxu2 }
 0x549   : > { %v3194_v11 = vadd.f32 %v3116_v5, %v2990_v8  ;;  %v12234_v37 = vpop.f32.mrf.mxu1  ;;  %v3117_v8 = vld [vmem:[#allocation3 + $0x1b8] sm:$0xff] }
 0x54a   : > { %v3916_v6 = vld [vmem:[#allocation3 + $0x1a8] sm:$0xff]  ;;  %10058 = vmatmul.msk.f32.gmra.mxu0 %vm960_vm2, %v5763_v41 }
 0x54b   : > { %v3994_v48 = vadd.f32 %v3916_v6, %v3788_v51  ;;  %3272 = vst.msk [vmem:[#allocation3 + $0x1b0] sm:$0xff] %vm1615_vm3, %v3194_v11  ;;  %v12247_v51 = vpop.f32.mrf.mxu0 }
 0x54c   : > { %v4716_v42 = vld [vmem:[#allocation3 + $0x1a0] sm:$0xff]  ;;  %9832 = vmatmul.msk.f32.gmra.mxu1 %vm960_vm2, %v12238_v33  ;;  %14136 = vst [vmem:[#allocation17_spill] sm:$0xff] %v12247_v51 }
 0x54d   : > { %4072 = vst.msk [vmem:[#allocation3 + $0x1a8] sm:$0xff] %vm1615_vm3, %v3994_v48  ;;  %9753 = vmatmul.msk.f32.gmra.mxu3 %vm960_vm2, %v12172_v13  ;;  %v4794_v9 = vadd.f32 %v4716_v42, %v12013_v56  ;;  %10153 = vmatmul.msk.f32.gmra.mxu2 %vm960_vm2, %v7304_v36  ;;  %v5764_v13 = vld [vmem:[#allocation2 + $0x23c] sm:$0xff]  ;;  %v5765_v51 = vld [vmem:[#allocation2 + $0x244] sm:$0xff] }
 0x54e   : > { %v12256_v56 = vld [vmem:[#allocation2 + $0x262] sm:$0xff]  ;;  %v7305_v36 = vld [vmem:[#allocation2 + $0x56] sm:$0xff] }
 0x54f   : > { %4872 = vst.msk [vmem:[#allocation3 + $0x1a0] sm:$0xff] %vm1615_vm3, %v4794_v9 }
 0x550   : > { %v2993_v4 = vpop.f32.mrf.mxu3  ;;  %v12250_v11 = vpop.f32.mrf.mxu2 }
 0x551   : > { %v3195_v5 = vadd.f32 %v3117_v8, %v2993_v4  ;;  %v12252_v41 = vpop.f32.mrf.mxu1  ;;  %v3118_v4 = vld [vmem:[#allocation3 + $0x1c0] sm:$0xff] }
 0x552   : > { %v3917_v6 = vld [vmem:[#allocation3 + $0x1b0] sm:$0xff]  ;;  %10059 = vmatmul.msk.f32.gmra.mxu0 %vm960_vm2, %v5764_v13 }
 0x553   : > { %v3995_v48 = vadd.f32 %v3917_v6, %v3791_v46  ;;  %3273 = vst.msk [vmem:[#allocation3 + $0x1b8] sm:$0xff] %vm1615_vm3, %v3195_v5  ;;  %v12266_v8 = vpop.f32.mrf.mxu0 }
 0x554   : > { %v4717_v42 = vld [vmem:[#allocation3 + $0x1a8] sm:$0xff]  ;;  %9833 = vmatmul.msk.f32.gmra.mxu1 %vm960_vm2, %v12256_v56  ;;  %14137 = vst [vmem:[#allocation18_spill] sm:$0xff] %v12266_v8 }
 0x555   : > { %4073 = vst.msk [vmem:[#allocation3 + $0x1b0] sm:$0xff] %vm1615_vm3, %v3995_v48  ;;  %9754 = vmatmul.msk.f32.gmra.mxu3 %vm960_vm2, %v12188_v2  ;;  %v4795_v9 = vadd.f32 %v4717_v42, %v12034_v55  ;;  %10154 = vmatmul.msk.f32.gmra.mxu2 %vm960_vm2, %v7305_v36  ;;  %v6580_v2 = vld [vmem:[%s14120_s3 + $0xf0] sm:$0xff]  ;;  %v6579_v42 = vld [vmem:[%s14120_s3 + $0xe8] sm:$0xff] }
 0x556   : > { %6829 = vmatpush.msra.mxu1 %v6580_v2  ;;  %v12281_v36 = vld [vmem:[#allocation2 + $0x26a] sm:$0xff] }
 0x557   : > { %4873 = vst.msk [vmem:[#allocation3 + $0x1a8] sm:$0xff] %vm1615_vm3, %v4795_v9 }
 0x558   : > { %v2996_v46 = vpop.f32.mrf.mxu3  ;;  %v12268_v6 = vpop.f32.mrf.mxu2  ;;  %6830 = vmatpush.msra.mxu1 %v6579_v42  ;;  %v5766_v42 = vld [vmem:[#allocation2 + $0x24c] sm:$0xff] }
 0x559   : > { %v3196_v5 = vadd.f32 %v3118_v4, %v2996_v46  ;;  %v12273_v48 = vpop.f32.mrf.mxu1 }
 0x55a   : > { %v3918_v13 = vld [vmem:[#allocation3 + $0x1b8] sm:$0xff]  ;;  %10060 = vmatmul.msk.f32.gmra.mxu0 %vm960_vm2, %v5765_v51 }
 0x55b   : > { %v3996_v55 = vadd.f32 %v3918_v13, %v12216_v45  ;;  %3274 = vst.msk [vmem:[#allocation3 + $0x1c0] sm:$0xff] %vm1615_vm3, %v3196_v5  ;;  %v7306_v45 = vld [vmem:[#allocation2 + $0x5e] sm:$0xff]  ;;  %v3119_v5 = vld [vmem:[#allocation3 + $0x1c8] sm:$0xff]  ;;  %v12298_v8 = vpop.f32.mrf.mxu0 }
 0x55c   : > { %v4718_v9 = vld [vmem:[#allocation3 + $0x1b0] sm:$0xff]  ;;  %9834 = vmatmul.msk.f32.gmra.mxu1 %vm960_vm2, %v12281_v36  ;;  %v6578_v51 = vld [vmem:[%s14120_s3 + $0xe0] sm:$0xff] }
 0x55d   : > { %4074 = vst.msk [vmem:[#allocation3 + $0x1b8] sm:$0xff] %vm1615_vm3, %v3996_v55  ;;  %9755 = vmatmul.msk.f32.gmra.mxu3 %vm960_vm2, %v12204_v39  ;;  %v4796_v46 = vadd.f32 %v4718_v9, %v12051_v20  ;;  %10155 = vmatmul.msk.f32.gmra.mxu2 %vm960_vm2, %v7306_v45  ;;  %v4977_v20 = vld [vmem:[%s14120_s3 + $0xa8] sm:$0xff]  ;;  %v3371_v9 = vld [vmem:[#allocation2 + $0x272] sm:$0xff] }
 0x55e   : > { %6831 = vmatpush.msra.mxu1 %v6578_v51  ;;  %5228 = vmatpush.msra.mxu3 %v4977_v20  ;;  %v7307_v51 = vld [vmem:[#allocation2 + $0x66] sm:$0xff]  ;;  %v3372_v20 = vld [vmem:[#allocation2 + $0x27a] sm:$0xff] }
 0x55f   : > { %4874 = vst.msk [vmem:[#allocation3 + $0x1b0] sm:$0xff] %vm1615_vm3, %v4796_v46 }
 0x560   : > { %v2999_v4 = vpop.f32.mrf.mxu3  ;;  %v12294_v13 = vpop.f32.mrf.mxu2 }
 0x561   : > { %v3197_v2 = vadd.f32 %v3119_v5, %v2999_v4  ;;  %v12296_v55 = vpop.f32.mrf.mxu1  ;;  %v3120_v5 = vld [vmem:[#allocation3 + $0x1d0] sm:$0xff] }
 0x562   : > { %v3919_v39 = vld [vmem:[#allocation3 + $0x1c0] sm:$0xff]  ;;  %10061 = vmatmul.msk.f32.gmra.mxu0 %vm960_vm2, %v5766_v42  ;;  %v5767_v42 = vld [vmem:[#allocation2 + $0x254] sm:$0xff] }
 0x563   : > { %v3997_v29 = vadd.f32 %v3919_v39, %v12234_v37  ;;  %3275 = vst.msk [vmem:[#allocation3 + $0x1c8] sm:$0xff] %vm1615_vm3, %v3197_v2  ;;  %v4976_v37 = vld [vmem:[%s14120_s3 + $0xa0] sm:$0xff] }
 0x564   : > { %v4719_v45 = vld [vmem:[#allocation3 + $0x1b8] sm:$0xff]  ;;  %9835 = vmatmul.msk.f32.gmra.mxu1 %vm960_vm2, %v3371_v9  ;;  %5229 = vmatpush.msra.mxu3 %v4976_v37 }
 0x565   : > { %4075 = vst.msk [vmem:[#allocation3 + $0x1c0] sm:$0xff] %vm1615_vm3, %v3997_v29  ;;  %9756 = vmatmul.msk.f32.gmra.mxu3 %vm960_vm2, %v12220_v22  ;;  %v4797_v46 = vadd.f32 %v4719_v45, %v12070_v21  ;;  %10156 = vmatmul.msk.f32.gmra.mxu2 %vm960_vm2, %v7307_v51  ;;  %v12321_v45 = vpop.f32.mrf.mxu0  ;;  %v7308_v51 = vld [vmem:[#allocation2 + $0x6e] sm:$0xff] }
 0x567   : > { %4875 = vst.msk [vmem:[#allocation3 + $0x1b8] sm:$0xff] %vm1615_vm3, %v4797_v46  ;;  %v3121_v46 = vld [vmem:[#allocation3 + $0x1d8] sm:$0xff] }
 0x568   : > { %v3002_v4 = vpop.f32.mrf.mxu3  ;;  %v12316_v2 = vpop.f32.mrf.mxu2 }
 0x569   : > { %v3198_v29 = vadd.f32 %v3120_v5, %v3002_v4  ;;  %v3809_v39 = vpop.f32.mrf.mxu1 }
 0x56a   : > { %v3920_v22 = vld [vmem:[#allocation3 + $0x1c8] sm:$0xff]  ;;  %10062 = vmatmul.msk.f32.gmra.mxu0 %vm960_vm2, %v5767_v42  ;;  %v5768_v42 = vld [vmem:[#allocation2 + $0x25c] sm:$0xff] }
 0x56b   : > { %v3998_v9 = vadd.f32 %v3920_v22, %v12252_v41  ;;  %3276 = vst.msk [vmem:[#allocation3 + $0x1d0] sm:$0xff] %vm1615_vm3, %v3198_v29 }
 0x56c   : > { %v4720_v21 = vld [vmem:[#allocation3 + $0x1c0] sm:$0xff]  ;;  %9836 = vmatmul.msk.f32.gmra.mxu1 %vm960_vm2, %v3372_v20  ;;  %v7309_v20 = vld [vmem:[#allocation2 + $0x76] sm:$0xff] }
 0x56d   : > { %4076 = vst.msk [vmem:[#allocation3 + $0x1c8] sm:$0xff] %vm1615_vm3, %v3998_v9  ;;  %9757 = vmatmul.msk.f32.gmra.mxu3 %vm960_vm2, %v12238_v33  ;;  %v4798_v37 = vadd.f32 %v4720_v21, %v12089_v60  ;;  %10157 = vmatmul.msk.f32.gmra.mxu2 %vm960_vm2, %v7308_v51  ;;  %v3373_v9 = vld [vmem:[#allocation2 + $0x282] sm:$0xff]  ;;  %v12343_v51 = vpop.f32.mrf.mxu0 }
 0x56f   : > { %4876 = vst.msk [vmem:[#allocation3 + $0x1c0] sm:$0xff] %vm1615_vm3, %v4798_v37  ;;  %v3122_v37 = vld [vmem:[#allocation3 + $0x1e0] sm:$0xff] }
 0x570   : > { %v3005_v41 = vpop.f32.mrf.mxu3  ;;  %v12330_v5 = vpop.f32.mrf.mxu2 }
 0x571   : > { %v3199_v4 = vadd.f32 %v3121_v46, %v3005_v41  ;;  %v12332_v22 = vpop.f32.mrf.mxu1 }
 0x572   : > { %v3921_v29 = vld [vmem:[#allocation3 + $0x1d0] sm:$0xff]  ;;  %10063 = vmatmul.msk.f32.gmra.mxu0 %vm960_vm2, %v5768_v42 }
 0x573   : > { %v3999_v33 = vadd.f32 %v3921_v29, %v12273_v48  ;;  %3277 = vst.msk [vmem:[#allocation3 + $0x1d8] sm:$0xff] %vm1615_vm3, %v3199_v4 }
 0x574   : > { %v4721_v60 = vld [vmem:[#allocation3 + $0x1c8] sm:$0xff]  ;;  %9837 = vmatmul.msk.f32.gmra.mxu1 %vm960_vm2, %v3373_v9 }
 0x575   : > { %4077 = vst.msk [vmem:[#allocation3 + $0x1d0] sm:$0xff] %vm1615_vm3, %v3999_v33  ;;  %9758 = vmatmul.msk.f32.gmra.mxu3 %vm960_vm2, %v12256_v56  ;;  %v4799_v21 = vadd.f32 %v4721_v60, %v12105_v7  ;;  %10158 = vmatmul.msk.f32.gmra.mxu2 %vm960_vm2, %v7309_v20  ;;  %v5769_v56 = vld [vmem:[#allocation2 + $0x264] sm:$0xff]  ;;  %v6500_v7 = vld [vmem:[#allocation2 + $0x35] sm:$0xff] }
 0x576   : > { %v7310_v33 = vld [vmem:[#allocation2 + $0x7e] sm:$0xff]  ;;  %v3123_v20 = vld [vmem:[#allocation3 + $0x1e8] sm:$0xff] }
 0x577   : > { %4877 = vst.msk [vmem:[#allocation3 + $0x1c8] sm:$0xff] %vm1615_vm3, %v4799_v21  ;;  %v12360_v21 = vpop.f32.mrf.mxu0 }
 0x578   : > { %v3008_v48 = vpop.f32.mrf.mxu3  ;;  %v12346_v46 = vpop.f32.mrf.mxu2 }
 0x579   : > { %v3200_v41 = vadd.f32 %v3122_v37, %v3008_v48  ;;  %v12348_v29 = vpop.f32.mrf.mxu1 }
 0x57a   : > { %v3922_v4 = vld [vmem:[#allocation3 + $0x1d8] sm:$0xff]  ;;  %10064 = vmatmul.msk.f32.gmra.mxu0 %vm960_vm2, %v5769_v56 }
 0x57b   : > { %v4000_v42 = vadd.f32 %v3922_v4, %v12296_v55  ;;  %3278 = vst.msk [vmem:[#allocation3 + $0x1e0] sm:$0xff] %vm1615_vm3, %v3200_v41 }
 0x57c   : > { %v4722_v9 = vld [vmem:[#allocation3 + $0x1d0] sm:$0xff]  ;;  %10072 = vmatmul.msk.f32.vlgmr.msra.gmra.mxu1 %vm960_vm2, %v6500_v7 }
 0x57d   : > { %4078 = vst.msk [vmem:[#allocation3 + $0x1d8] sm:$0xff] %vm1615_vm3, %v4000_v42  ;;  %9759 = vmatmul.msk.f32.gmra.mxu3 %vm960_vm2, %v12281_v36  ;;  %v4800_v60 = vadd.f32 %v4722_v9, %v12133_v38  ;;  %10159 = vmatmul.msk.f32.gmra.mxu2 %vm960_vm2, %v7310_v33  ;;  %v5770_v36 = vld [vmem:[#allocation2 + $0x26c] sm:$0xff]  ;;  %v4898_v38 = vld [vmem:[#allocation2 + $0x1c] sm:$0xff] }
 0x57e   : > { %v6501_v42 = vld [vmem:[#allocation2 + $0x3d] sm:$0xff]  ;;  %v7311_v9 = vld [vmem:[#allocation2 + $0x86] sm:$0xff] }
 0x57f   : > { %4878 = vst.msk [vmem:[#allocation3 + $0x1d0] sm:$0xff] %vm1615_vm3, %v4800_v60  ;;  %v3124_v60 = vld [vmem:[#allocation3 + $0x1f0] sm:$0xff] }
 0x580   : > { %v3011_v55 = vpop.f32.mrf.mxu3  ;;  %v12362_v37 = vpop.f32.mrf.mxu2 }
 0x581   : > { %v3201_v48 = vadd.f32 %v3123_v20, %v3011_v55  ;;  %v12364_v4 = vpop.f32.mrf.mxu1 }
 0x582   : > { %v3923_v41 = vld [vmem:[#allocation3 + $0x1e0] sm:$0xff]  ;;  %10065 = vmatmul.msk.f32.gmra.mxu0 %vm960_vm2, %v5770_v36  ;;  %v5771_v36 = vld [vmem:[#allocation2 + $0x274] sm:$0xff] }
 0x583   : > { %v4001_v56 = vadd.f32 %v3923_v41, %v3809_v39  ;;  %3279 = vst.msk [vmem:[#allocation3 + $0x1e8] sm:$0xff] %vm1615_vm3, %v3201_v48 }
 0x584   : > { %v4723_v7 = vld [vmem:[#allocation3 + $0x1d8] sm:$0xff]  ;;  %10073 = vmatmul.msk.f32.gmra.mxu1 %vm960_vm2, %v6501_v42 }
 0x585   : > { %4079 = vst.msk [vmem:[#allocation3 + $0x1e0] sm:$0xff] %vm1615_vm3, %v4001_v56  ;;  %9916 = vmatmul.msk.f32.vlgmr.msra.gmra.mxu3 %vm960_vm2, %v4898_v38  ;;  %v4801_v33 = vadd.f32 %v4723_v7, %v12150_v14  ;;  %10160 = vmatmul.msk.f32.gmra.mxu2 %vm960_vm2, %v7311_v9  ;;  %v12378_v56 = vpop.f32.mrf.mxu0  ;;  %v4899_v14 = vld [vmem:[#allocation2 + $0x24] sm:$0xff]  ;;  %v7312_v9 = vld [vmem:[#allocation2 + $0x8e] sm:$0xff] }
 0x586   : > { %14138 = vst [vmem:[#allocation19_spill] sm:$0xff] %v12378_v56  ;;  %v6502_v42 = vld [vmem:[#allocation2 + $0x45] sm:$0xff] }
 0x587   : > { %4879 = vst.msk [vmem:[#allocation3 + $0x1d8] sm:$0xff] %vm1615_vm3, %v4801_v33 }
 0x588   : > { %v3014_v39 = vpop.f32.mrf.mxu3  ;;  %v12374_v20 = vpop.f32.mrf.mxu2 }
 0x589   : > { %v3202_v55 = vadd.f32 %v3124_v60, %v3014_v39  ;;  %v12376_v41 = vpop.f32.mrf.mxu1  ;;  %v3125_v39 = vld [vmem:[#allocation3 + $0x1f8] sm:$0xff] }
 0x58a   : > { %v3924_v48 = vld [vmem:[#allocation3 + $0x1e8] sm:$0xff]  ;;  %10066 = vmatmul.msk.f32.gmra.mxu0 %vm960_vm2, %v5771_v36  ;;  %v5772_v60 = vld [vmem:[#allocation2 + $0x27c] sm:$0xff] }
 0x58b   : > { %v4002_v38 = vadd.f32 %v3924_v48, %v12332_v22  ;;  %3280 = vst.msk [vmem:[#allocation3 + $0x1f0] sm:$0xff] %vm1615_vm3, %v3202_v55 }
 0x58c   : > { %v4724_v7 = vld [vmem:[#allocation3 + $0x1e0] sm:$0xff]  ;;  %10074 = vmatmul.msk.f32.gmra.mxu1 %vm960_vm2, %v6502_v42 }
 0x58d   : > { %4080 = vst.msk [vmem:[#allocation3 + $0x1e8] sm:$0xff] %vm1615_vm3, %v4002_v38  ;;  %9917 = vmatmul.msk.f32.gmra.mxu3 %vm960_vm2, %v4899_v14  ;;  %v4802_v33 = vadd.f32 %v4724_v7, %v12167_v12  ;;  %10161 = vmatmul.msk.f32.gmra.mxu2 %vm960_vm2, %v7312_v9  ;;  %v4900_v12 = vld [vmem:[#allocation2 + $0x2c] sm:$0xff]  ;;  %v12396_v7 = vpop.f32.mrf.mxu0  ;;  %v7313_v9 = vld [vmem:[#allocation2 + $0x96] sm:$0xff] }
 0x58e   : > { %v6503_v14 = vld [vmem:[#allocation2 + $0x4d] sm:$0xff]  ;;  %14139 = vst [vmem:[#allocation20_spill] sm:$0xff] %v12396_v7 }
 0x58f   : > { %4880 = vst.msk [vmem:[#allocation3 + $0x1e0] sm:$0xff] %vm1615_vm3, %v4802_v33 }
 0x590   : > { %v3017_v22 = vpop.f32.mrf.mxu3  ;;  %v12389_v48 = vpop.f32.mrf.mxu2 }
 0x591   : > { %v3203_v55 = vadd.f32 %v3125_v39, %v3017_v22  ;;  %v12391_v56 = vpop.f32.mrf.mxu1  ;;  %v3126_v22 = vld [vmem:[#allocation3 + $0x200] sm:$0xff] }
 0x592   : > { %v3925_v36 = vld [vmem:[#allocation3 + $0x1f0] sm:$0xff]  ;;  %10067 = vmatmul.msk.f32.gmra.mxu0 %vm960_vm2, %v5772_v60  ;;  %v5773_v39 = vld [vmem:[#allocation2 + $0x284] sm:$0xff] }
 0x593   : > { %v4003_v38 = vadd.f32 %v3925_v36, %v12348_v29  ;;  %3281 = vst.msk [vmem:[#allocation3 + $0x1f8] sm:$0xff] %vm1615_vm3, %v3203_v55 }
 0x594   : > { %v4725_v42 = vld [vmem:[#allocation3 + $0x1e8] sm:$0xff]  ;;  %10075 = vmatmul.msk.f32.gmra.mxu1 %vm960_vm2, %v6503_v14 }
 0x595   : > { %4081 = vst.msk [vmem:[#allocation3 + $0x1f0] sm:$0xff] %vm1615_vm3, %v4003_v38  ;;  %9918 = vmatmul.msk.f32.gmra.mxu3 %vm960_vm2, %v4900_v12  ;;  %v4803_v33 = vadd.f32 %v4725_v42, %v12184_v63  ;;  %10162 = vmatmul.msk.f32.gmra.mxu2 %vm960_vm2, %v7313_v9  ;;  %v4901_v63 = vld [vmem:[#allocation2 + $0x34] sm:$0xff]  ;;  %v7314_v42 = vld [vmem:[#allocation2 + $0x9e] sm:$0xff] }
 0x596   : > { %v6504_v12 = vld [vmem:[#allocation2 + $0x55] sm:$0xff] }
 0x597   : > { %4881 = vst.msk [vmem:[#allocation3 + $0x1e8] sm:$0xff] %vm1615_vm3, %v4803_v33  ;;  %v12416_v33 = vpop.f32.mrf.mxu0 }
 0x598   : > { %v3020_v29 = vpop.f32.mrf.mxu3  ;;  %v12404_v55 = vpop.f32.mrf.mxu2  ;;  %14140 = vst [vmem:[#allocation21_spill] sm:$0xff] %v12416_v33 }
 0x599   : > { %v3204_v60 = vadd.f32 %v3126_v22, %v3020_v29  ;;  %v12406_v7 = vpop.f32.mrf.mxu1  ;;  %v3127_v29 = vld [vmem:[#allocation3 + $0x208] sm:$0xff] }
 0x59a   : > { %v3926_v36 = vld [vmem:[#allocation3 + $0x1f8] sm:$0xff]  ;;  %10068 = vmatmul.msk.f32.gmra.mxu0 %vm960_vm2, %v5773_v39  ;;  %v5774_v22 = vld [vmem:[#allocation2 + $0x28c] sm:$0xff] }
 0x59b   : > { %v4004_v38 = vadd.f32 %v3926_v36, %v12364_v4  ;;  %3282 = vst.msk [vmem:[#allocation3 + $0x200] sm:$0xff] %vm1615_vm3, %v3204_v60 }
 0x59c   : > { %v4726_v14 = vld [vmem:[#allocation3 + $0x1f0] sm:$0xff]  ;;  %10076 = vmatmul.msk.f32.gmra.mxu1 %vm960_vm2, %v6504_v12 }
 0x59d   : > { %4082 = vst.msk [vmem:[#allocation3 + $0x1f8] sm:$0xff] %vm1615_vm3, %v4004_v38  ;;  %9919 = vmatmul.msk.f32.gmra.mxu3 %vm960_vm2, %v4901_v63  ;;  %v4804_v9 = vadd.f32 %v4726_v14, %v12198_v10  ;;  %10163 = vmatmul.msk.f32.gmra.mxu2 %vm960_vm2, %v7314_v42  ;;  %v4902_v10 = vld [vmem:[#allocation2 + $0x3c] sm:$0xff]  ;;  %v7315_v42 = vld [vmem:[#allocation2 + $0xa6] sm:$0xff] }
 0x59e   : > { %v6505_v12 = vld [vmem:[#allocation2 + $0x5d] sm:$0xff] }
 0x59f   : > { %4882 = vst.msk [vmem:[#allocation3 + $0x1f0] sm:$0xff] %vm1615_vm3, %v4804_v9 }
 0x5a0   : > { %v3023_v4 = vpop.f32.mrf.mxu3  ;;  %v12419_v60 = vpop.f32.mrf.mxu2 }
 0x5a1   : > { %v3205_v39 = vadd.f32 %v3127_v29, %v3023_v4  ;;  %v3830_v38 = vpop.f32.mrf.mxu1  ;;  %v3128_v4 = vld [vmem:[#allocation3 + $0x210] sm:$0xff] }
 0x5a2   : > { %v3927_v36 = vld [vmem:[#allocation3 + $0x200] sm:$0xff]  ;;  %10069 = vmatmul.msk.f32.gmra.mxu0 %vm960_vm2, %v5774_v22  ;;  %v5775_v29 = vld [vmem:[#allocation2 + $0x294] sm:$0xff]  ;;  %v12430_v22 = vpop.f32.mrf.mxu0 }
 0x5a3   : > { %v4005_v63 = vadd.f32 %v3927_v36, %v12376_v41  ;;  %3283 = vst.msk [vmem:[#allocation3 + $0x208] sm:$0xff] %vm1615_vm3, %v3205_v39 }
 0x5a4   : > { %v4727_v14 = vld [vmem:[#allocation3 + $0x1f8] sm:$0xff]  ;;  %10077 = vmatmul.msk.f32.gmra.mxu1 %vm960_vm2, %v6505_v12  ;;  %14141 = vst [vmem:[#allocation22_spill] sm:$0xff] %v12430_v22 }
 0x5a5   : > { %4083 = vst.msk [vmem:[#allocation3 + $0x200] sm:$0xff] %vm1615_vm3, %v4005_v63  ;;  %9920 = vmatmul.msk.f32.gmra.mxu3 %vm960_vm2, %v4902_v10  ;;  %v4805_v9 = vadd.f32 %v4727_v14, %v12214_v3  ;;  %10164 = vmatmul.msk.f32.gmra.mxu2 %vm960_vm2, %v7315_v42  ;;  %v4903_v3 = vld [vmem:[#allocation2 + $0x44] sm:$0xff]  ;;  %v7316_v42 = vld [vmem:[#allocation2 + $0xae] sm:$0xff] }
 0x5a6   : > { %v6506_v12 = vld [vmem:[#allocation2 + $0x65] sm:$0xff] }
 0x5a7   : > { %4883 = vst.msk [vmem:[#allocation3 + $0x1f8] sm:$0xff] %vm1615_vm3, %v4805_v9 }
 0x5a8   : > { %v3026_v41 = vpop.f32.mrf.mxu3  ;;  %v12432_v36 = vpop.f32.mrf.mxu2 }
 0x5a9   : > { %v3206_v39 = vadd.f32 %v3128_v4, %v3026_v41  ;;  %v3833_v33 = vpop.f32.mrf.mxu1  ;;  %v3129_v41 = vld [vmem:[#allocation3 + $0x218] sm:$0xff] }
 0x5aa   : > { %v3928_v63 = vld [vmem:[#allocation3 + $0x208] sm:$0xff]  ;;  %10070 = vmatmul.msk.f32.gmra.mxu0 %vm960_vm2, %v5775_v29  ;;  %v5776_v4 = vld [vmem:[#allocation2 + $0x29c] sm:$0xff] }
 0x5ab   : > { %v4006_v10 = vadd.f32 %v3928_v63, %v12391_v56  ;;  %3284 = vst.msk [vmem:[#allocation3 + $0x210] sm:$0xff] %vm1615_vm3, %v3206_v39 }
 0x5ac   : > { %v4728_v14 = vld [vmem:[#allocation3 + $0x200] sm:$0xff]  ;;  %10078 = vmatmul.msk.f32.gmra.mxu1 %vm960_vm2, %v6506_v12 }
 0x5ad   : > { %4084 = vst.msk [vmem:[#allocation3 + $0x208] sm:$0xff] %vm1615_vm3, %v4006_v10  ;;  %9921 = vmatmul.msk.f32.gmra.mxu3 %vm960_vm2, %v4903_v3  ;;  %v4806_v9 = vadd.f32 %v4728_v14, %v12232_v52  ;;  %10165 = vmatmul.msk.f32.gmra.mxu2 %vm960_vm2, %v7316_v42  ;;  %v12445_v10 = vpop.f32.mrf.mxu0  ;;  %v4904_v52 = vld [vmem:[#allocation2 + $0x4c] sm:$0xff]  ;;  %v7317_v42 = vld [vmem:[#allocation2 + $0xb6] sm:$0xff] }
 0x5ae   : > { %14142 = vst [vmem:[#allocation23_spill] sm:$0xff] %v12445_v10  ;;  %v6507_v12 = vld [vmem:[#allocation2 + $0x6d] sm:$0xff] }
 0x5af   : > { %4884 = vst.msk [vmem:[#allocation3 + $0x200] sm:$0xff] %vm1615_vm3, %v4806_v9 }
 0x5b0   : > { %v3029_v56 = vpop.f32.mrf.mxu3  ;;  %v12443_v39 = vpop.f32.mrf.mxu2 }
 0x5b1   : > { %v3207_v29 = vadd.f32 %v3129_v41, %v3029_v56  ;;  %v3836_v22 = vpop.f32.mrf.mxu1  ;;  %v3130_v56 = vld [vmem:[#allocation3 + $0x220] sm:$0xff] }
 0x5b2   : > { %v3929_v63 = vld [vmem:[#allocation3 + $0x210] sm:$0xff]  ;;  %10071 = vmatmul.msk.f32.gmra.mxu0 %vm960_vm2, %v5776_v4 }
 0x5b3   : > { %v4007_v3 = vadd.f32 %v3929_v63, %v12406_v7  ;;  %3285 = vst.msk [vmem:[#allocation3 + $0x218] sm:$0xff] %vm1615_vm3, %v3207_v29 }
 0x5b4   : > { %v4729_v14 = vld [vmem:[#allocation3 + $0x208] sm:$0xff]  ;;  %10079 = vmatmul.msk.f32.gmra.mxu1 %vm960_vm2, %v6507_v12 }
 0x5b5   : > { %4085 = vst.msk [vmem:[#allocation3 + $0x210] sm:$0xff] %vm1615_vm3, %v4007_v3  ;;  %9922 = vmatmul.msk.f32.gmra.mxu3 %vm960_vm2, %v4904_v52  ;;  %v4807_v9 = vadd.f32 %v4729_v14, %v12250_v11  ;;  %10166 = vmatmul.msk.f32.gmra.mxu2 %vm960_vm2, %v7317_v42  ;;  %v4905_v3 = vld [vmem:[#allocation2 + $0x54] sm:$0xff]  ;;  %v7318_v11 = vld [vmem:[#allocation2 + $0xbe] sm:$0xff] }
 0x5b6   : > { %v6508_v52 = vld [vmem:[#allocation2 + $0x75] sm:$0xff] }
 0x5b7   : > { %4885 = vst.msk [vmem:[#allocation3 + $0x208] sm:$0xff] %vm1615_vm3, %v4807_v9 }
 0x5b8   : > { %v3032_v7 = vpop.f32.mrf.mxu3  ;;  %v12456_v4 = vpop.f32.mrf.mxu2 }
 0x5b9   : > { %v3208_v41 = vadd.f32 %v3130_v56, %v3032_v7  ;;  %v3839_v63 = vpop.f32.mrf.mxu1 }
 0x5ba   : > { %v3930_v29 = vld [vmem:[#allocation3 + $0x218] sm:$0xff] }
 0x5bb   : > { %v4008_v10 = vadd.f32 %v3930_v29, %v3830_v38  ;;  %3286 = vst.msk [vmem:[#allocation3 + $0x220] sm:$0xff] %vm1615_vm3, %v3208_v41  ;;  %v3131_v38 = vld [vmem:[#allocation3 + $0x228] sm:$0xff] }
 0x5bc   : > { %v4730_v12 = vld [vmem:[#allocation3 + $0x210] sm:$0xff]  ;;  %10080 = vmatmul.msk.f32.gmra.mxu1 %vm960_vm2, %v6508_v52 }
 0x5bd   : > { %4086 = vst.msk [vmem:[#allocation3 + $0x218] sm:$0xff] %vm1615_vm3, %v4008_v10  ;;  %9923 = vmatmul.msk.f32.gmra.mxu3 %vm960_vm2, %v4905_v3  ;;  %v4808_v14 = vadd.f32 %v4730_v12, %v12268_v6  ;;  %10167 = vmatmul.msk.f32.gmra.mxu2 %vm960_vm2, %v7318_v11  ;;  %v4906_v10 = vld [vmem:[#allocation2 + $0x5c] sm:$0xff]  ;;  %v7319_v6 = vld [vmem:[#allocation2 + $0xc6] sm:$0xff] }
 0x5be   : > { %v6509_v3 = vld [vmem:[#allocation2 + $0x7d] sm:$0xff] }
 0x5bf   : > { %4886 = vst.msk [vmem:[#allocation3 + $0x210] sm:$0xff] %vm1615_vm3, %v4808_v14 }
 0x5c0   : > { %v3035_v42 = vpop.f32.mrf.mxu3  ;;  %v12465_v7 = vpop.f32.mrf.mxu2 }
 0x5c1   : > { %v3209_v9 = vadd.f32 %v3131_v38, %v3035_v42  ;;  %v3842_v41 = vpop.f32.mrf.mxu1 }
 0x5c2   : > { %v3931_v56 = vld [vmem:[#allocation3 + $0x220] sm:$0xff] }
 0x5c3   : > { %v4009_v29 = vadd.f32 %v3931_v56, %v3833_v33  ;;  %3287 = vst.msk [vmem:[#allocation3 + $0x228] sm:$0xff] %vm1615_vm3, %v3209_v9  ;;  %v3132_v33 = vld [vmem:[#allocation3 + $0x230] sm:$0xff] }
 0x5c4   : > { %v4731_v52 = vld [vmem:[#allocation3 + $0x218] sm:$0xff]  ;;  %10081 = vmatmul.msk.f32.gmra.mxu1 %vm960_vm2, %v6509_v3 }
 0x5c5   : > { %4087 = vst.msk [vmem:[#allocation3 + $0x220] sm:$0xff] %vm1615_vm3, %v4009_v29  ;;  %9924 = vmatmul.msk.f32.gmra.mxu3 %vm960_vm2, %v4906_v10  ;;  %v4809_v12 = vadd.f32 %v4731_v52, %v12294_v13  ;;  %10168 = vmatmul.msk.f32.gmra.mxu2 %vm960_vm2, %v7319_v6  ;;  %v4907_v29 = vld [vmem:[#allocation2 + $0x64] sm:$0xff]  ;;  %v7320_v13 = vld [vmem:[#allocation2 + $0xce] sm:$0xff] }
 0x5c6   : > { %v6510_v10 = vld [vmem:[#allocation2 + $0x85] sm:$0xff] }
 0x5c7   : > { %4887 = vst.msk [vmem:[#allocation3 + $0x218] sm:$0xff] %vm1615_vm3, %v4809_v12 }
 0x5c8   : > { %v3038_v11 = vpop.f32.mrf.mxu3  ;;  %v12474_v42 = vpop.f32.mrf.mxu2 }
 0x5c9   : > { %v3210_v14 = vadd.f32 %v3132_v33, %v3038_v11  ;;  %v3845_v9 = vpop.f32.mrf.mxu1 }
 0x5ca   : > { %v3932_v38 = vld [vmem:[#allocation3 + $0x228] sm:$0xff] }
 0x5cb   : > { %v4010_v56 = vadd.f32 %v3932_v38, %v3836_v22  ;;  %3288 = vst.msk [vmem:[#allocation3 + $0x230] sm:$0xff] %vm1615_vm3, %v3210_v14  ;;  %v3133_v22 = vld [vmem:[#allocation3 + $0x238] sm:$0xff] }
 0x5cc   : > { %v4732_v3 = vld [vmem:[#allocation3 + $0x220] sm:$0xff]  ;;  %10082 = vmatmul.msk.f32.gmra.mxu1 %vm960_vm2, %v6510_v10 }
 0x5cd   : > { %4088 = vst.msk [vmem:[#allocation3 + $0x228] sm:$0xff] %vm1615_vm3, %v4010_v56  ;;  %9925 = vmatmul.msk.f32.gmra.mxu3 %vm960_vm2, %v4907_v29  ;;  %v4810_v52 = vadd.f32 %v4732_v3, %v12316_v2  ;;  %10169 = vmatmul.msk.f32.gmra.mxu2 %vm960_vm2, %v7320_v13  ;;  %v4908_v56 = vld [vmem:[#allocation2 + $0x6c] sm:$0xff]  ;;  %v7321_v2 = vld [vmem:[#allocation2 + $0xd6] sm:$0xff] }
 0x5ce   : > { %v6511_v29 = vld [vmem:[#allocation2 + $0x8d] sm:$0xff] }
 0x5cf   : > { %4888 = vst.msk [vmem:[#allocation3 + $0x220] sm:$0xff] %vm1615_vm3, %v4810_v52 }
 0x5d0   : > { %v3041_v6 = vpop.f32.mrf.mxu3  ;;  %v12483_v11 = vpop.f32.mrf.mxu2 }
 0x5d1   : > { %v3211_v12 = vadd.f32 %v3133_v22, %v3041_v6  ;;  %v3848_v14 = vpop.f32.mrf.mxu1 }
 0x5d2   : > { %v3933_v33 = vld [vmem:[#allocation3 + $0x230] sm:$0xff] }
 0x5d3   : > { %v4011_v38 = vadd.f32 %v3933_v33, %v3839_v63  ;;  %3289 = vst.msk [vmem:[#allocation3 + $0x238] sm:$0xff] %vm1615_vm3, %v3211_v12  ;;  %v3134_v63 = vld [vmem:[#allocation3 + $0x240] sm:$0xff] }
 0x5d4   : > { %v4733_v10 = vld [vmem:[#allocation3 + $0x228] sm:$0xff]  ;;  %10083 = vmatmul.msk.f32.gmra.mxu1 %vm960_vm2, %v6511_v29 }
 0x5d5   : > { %4089 = vst.msk [vmem:[#allocation3 + $0x230] sm:$0xff] %vm1615_vm3, %v4011_v38  ;;  %9926 = vmatmul.msk.f32.gmra.mxu3 %vm960_vm2, %v4908_v56  ;;  %v4811_v3 = vadd.f32 %v4733_v10, %v12330_v5  ;;  %10170 = vmatmul.msk.f32.gmra.mxu2 %vm960_vm2, %v7321_v2  ;;  %v4909_v38 = vld [vmem:[#allocation2 + $0x74] sm:$0xff]  ;;  %v7322_v5 = vld [vmem:[#allocation2 + $0xde] sm:$0xff] }
 0x5d6   : > { %v6512_v56 = vld [vmem:[#allocation2 + $0x95] sm:$0xff] }
 0x5d7   : > { %4889 = vst.msk [vmem:[#allocation3 + $0x228] sm:$0xff] %vm1615_vm3, %v4811_v3 }
 0x5d8   : > { %v3044_v13 = vpop.f32.mrf.mxu3  ;;  %v12492_v6 = vpop.f32.mrf.mxu2 }
 0x5d9   : > { %v3212_v52 = vadd.f32 %v3134_v63, %v3044_v13  ;;  %v3851_v12 = vpop.f32.mrf.mxu1 }
 0x5da   : > { %v3934_v22 = vld [vmem:[#allocation3 + $0x238] sm:$0xff] }
 0x5db   : > { %v4012_v33 = vadd.f32 %v3934_v22, %v3842_v41  ;;  %3290 = vst.msk [vmem:[#allocation3 + $0x240] sm:$0xff] %vm1615_vm3, %v3212_v52  ;;  %v3135_v41 = vld [vmem:[#allocation3 + $0x248] sm:$0xff] }
 0x5dc   : > { %v4734_v29 = vld [vmem:[#allocation3 + $0x230] sm:$0xff]  ;;  %10084 = vmatmul.msk.f32.gmra.mxu1 %vm960_vm2, %v6512_v56 }
 0x5dd   : > { %4090 = vst.msk [vmem:[#allocation3 + $0x238] sm:$0xff] %vm1615_vm3, %v4012_v33  ;;  %9927 = vmatmul.msk.f32.gmra.mxu3 %vm960_vm2, %v4909_v38  ;;  %v4812_v10 = vadd.f32 %v4734_v29, %v12346_v46  ;;  %10171 = vmatmul.msk.f32.gmra.mxu2 %vm960_vm2, %v7322_v5  ;;  %v4910_v33 = vld [vmem:[#allocation2 + $0x7c] sm:$0xff]  ;;  %v7323_v46 = vld [vmem:[#allocation2 + $0xe6] sm:$0xff] }
 0x5de   : > { %v6513_v38 = vld [vmem:[#allocation2 + $0x9d] sm:$0xff] }
 0x5df   : > { %4890 = vst.msk [vmem:[#allocation3 + $0x230] sm:$0xff] %vm1615_vm3, %v4812_v10 }
 0x5e0   : > { %v3047_v2 = vpop.f32.mrf.mxu3  ;;  %v12501_v13 = vpop.f32.mrf.mxu2 }
 0x5e1   : > { %v3213_v3 = vadd.f32 %v3135_v41, %v3047_v2  ;;  %v3854_v52 = vpop.f32.mrf.mxu1 }
 0x5e2   : > { %v3935_v63 = vld [vmem:[#allocation3 + $0x240] sm:$0xff] }
 0x5e3   : > { %v4013_v22 = vadd.f32 %v3935_v63, %v3845_v9  ;;  %3291 = vst.msk [vmem:[#allocation3 + $0x248] sm:$0xff] %vm1615_vm3, %v3213_v3  ;;  %v3136_v9 = vld [vmem:[#allocation3 + $0x250] sm:$0xff] }
 0x5e4   : > { %v4735_v56 = vld [vmem:[#allocation3 + $0x238] sm:$0xff]  ;;  %10085 = vmatmul.msk.f32.gmra.mxu1 %vm960_vm2, %v6513_v38 }
 0x5e5   : > { %4091 = vst.msk [vmem:[#allocation3 + $0x240] sm:$0xff] %vm1615_vm3, %v4013_v22  ;;  %9928 = vmatmul.msk.f32.gmra.mxu3 %vm960_vm2, %v4910_v33  ;;  %v4813_v29 = vadd.f32 %v4735_v56, %v12362_v37  ;;  %10172 = vmatmul.msk.f32.gmra.mxu2 %vm960_vm2, %v7323_v46  ;;  %v4911_v22 = vld [vmem:[#allocation2 + $0x84] sm:$0xff]  ;;  %v7324_v37 = vld [vmem:[#allocation2 + $0xee] sm:$0xff] }
 0x5e6   : > { %v6514_v33 = vld [vmem:[#allocation2 + $0xa5] sm:$0xff] }
 0x5e7   : > { %4891 = vst.msk [vmem:[#allocation3 + $0x238] sm:$0xff] %vm1615_vm3, %v4813_v29 }
 0x5e8   : > { %v3050_v5 = vpop.f32.mrf.mxu3  ;;  %v12510_v2 = vpop.f32.mrf.mxu2 }
 0x5e9   : > { %v3214_v10 = vadd.f32 %v3136_v9, %v3050_v5  ;;  %v3857_v3 = vpop.f32.mrf.mxu1 }
 0x5ea   : > { %v3936_v41 = vld [vmem:[#allocation3 + $0x248] sm:$0xff] }
 0x5eb   : > { %v4014_v63 = vadd.f32 %v3936_v41, %v3848_v14  ;;  %3292 = vst.msk [vmem:[#allocation3 + $0x250] sm:$0xff] %vm1615_vm3, %v3214_v10  ;;  %v3137_v14 = vld [vmem:[#allocation3 + $0x258] sm:$0xff] }
 0x5ec   : > { %v4736_v38 = vld [vmem:[#allocation3 + $0x240] sm:$0xff]  ;;  %10086 = vmatmul.msk.f32.gmra.mxu1 %vm960_vm2, %v6514_v33 }
 0x5ed   : > { %4092 = vst.msk [vmem:[#allocation3 + $0x248] sm:$0xff] %vm1615_vm3, %v4014_v63  ;;  %9929 = vmatmul.msk.f32.gmra.mxu3 %vm960_vm2, %v4911_v22  ;;  %v4814_v56 = vadd.f32 %v4736_v38, %v12374_v20  ;;  %10173 = vmatmul.msk.f32.gmra.mxu2 %vm960_vm2, %v7324_v37  ;;  %v4912_v63 = vld [vmem:[#allocation2 + $0x8c] sm:$0xff]  ;;  %v7325_v20 = vld [vmem:[#allocation2 + $0xf6] sm:$0xff] }
 0x5ee   : > { %v6515_v22 = vld [vmem:[#allocation2 + $0xad] sm:$0xff] }
 0x5ef   : > { %4892 = vst.msk [vmem:[#allocation3 + $0x240] sm:$0xff] %vm1615_vm3, %v4814_v56 }
 0x5f0   : > { %v3053_v46 = vpop.f32.mrf.mxu3  ;;  %v12519_v5 = vpop.f32.mrf.mxu2 }
 0x5f1   : > { %v3215_v29 = vadd.f32 %v3137_v14, %v3053_v46  ;;  %v3860_v10 = vpop.f32.mrf.mxu1 }
 0x5f2   : > { %v3937_v9 = vld [vmem:[#allocation3 + $0x250] sm:$0xff] }
 0x5f3   : > { %v4015_v41 = vadd.f32 %v3937_v9, %v3851_v12  ;;  %3293 = vst.msk [vmem:[#allocation3 + $0x258] sm:$0xff] %vm1615_vm3, %v3215_v29  ;;  %v3138_v12 = vld [vmem:[#allocation3 + $0x260] sm:$0xff] }
 0x5f4   : > { %v4737_v33 = vld [vmem:[#allocation3 + $0x248] sm:$0xff]  ;;  %10087 = vmatmul.msk.f32.gmra.mxu1 %vm960_vm2, %v6515_v22 }
 0x5f5   : > { %4093 = vst.msk [vmem:[#allocation3 + $0x250] sm:$0xff] %vm1615_vm3, %v4015_v41  ;;  %9930 = vmatmul.msk.f32.gmra.mxu3 %vm960_vm2, %v4912_v63  ;;  %v4815_v38 = vadd.f32 %v4737_v33, %v12389_v48  ;;  %10174 = vmatmul.msk.f32.gmra.mxu2 %vm960_vm2, %v7325_v20  ;;  %v4913_v41 = vld [vmem:[#allocation2 + $0x94] sm:$0xff]  ;;  %v7326_v48 = vld [vmem:[#allocation2 + $0xfe] sm:$0xff] }
 0x5f6   : > { %v6516_v63 = vld [vmem:[#allocation2 + $0xb5] sm:$0xff] }
 0x5f7   : > { %4893 = vst.msk [vmem:[#allocation3 + $0x248] sm:$0xff] %vm1615_vm3, %v4815_v38 }
 0x5f8   : > { %v3056_v37 = vpop.f32.mrf.mxu3  ;;  %v12528_v46 = vpop.f32.mrf.mxu2 }
 0x5f9   : > { %v3216_v56 = vadd.f32 %v3138_v12, %v3056_v37  ;;  %v12530_v29 = vpop.f32.mrf.mxu1 }
 0x5fa   : > { %v3938_v14 = vld [vmem:[#allocation3 + $0x258] sm:$0xff] }
 0x5fb   : > { %v4016_v9 = vadd.f32 %v3938_v14, %v3854_v52  ;;  %3294 = vst.msk [vmem:[#allocation3 + $0x260] sm:$0xff] %vm1615_vm3, %v3216_v56  ;;  %v3139_v52 = vld [vmem:[#allocation3 + $0x268] sm:$0xff] }
 0x5fc   : > { %v4738_v22 = vld [vmem:[#allocation3 + $0x250] sm:$0xff]  ;;  %10088 = vmatmul.msk.f32.gmra.mxu1 %vm960_vm2, %v6516_v63 }
 0x5fd   : > { %4094 = vst.msk [vmem:[#allocation3 + $0x258] sm:$0xff] %vm1615_vm3, %v4016_v9  ;;  %9931 = vmatmul.msk.f32.gmra.mxu3 %vm960_vm2, %v4913_v41  ;;  %v4816_v33 = vadd.f32 %v4738_v22, %v12404_v55  ;;  %10175 = vmatmul.msk.f32.gmra.mxu2 %vm960_vm2, %v7326_v48  ;;  %v4914_v9 = vld [vmem:[#allocation2 + $0x9c] sm:$0xff]  ;;  %v7327_v55 = vld [vmem:[#allocation2 + $0x106] sm:$0xff] }
 0x5fe   : > { %v6517_v41 = vld [vmem:[#allocation2 + $0xbd] sm:$0xff] }
 0x5ff   : > { %4894 = vst.msk [vmem:[#allocation3 + $0x250] sm:$0xff] %vm1615_vm3, %v4816_v33 }
 0x600   : > { %v3059_v20 = vpop.f32.mrf.mxu3  ;;  %v12539_v37 = vpop.f32.mrf.mxu2 }
 0x601   : > { %v3217_v38 = vadd.f32 %v3139_v52, %v3059_v20  ;;  %v12541_v56 = vpop.f32.mrf.mxu1 }
 0x602   : > { %v3939_v12 = vld [vmem:[#allocation3 + $0x260] sm:$0xff] }
 0x603   : > { %v4017_v14 = vadd.f32 %v3939_v12, %v3857_v3  ;;  %3295 = vst.msk [vmem:[#allocation3 + $0x268] sm:$0xff] %vm1615_vm3, %v3217_v38  ;;  %v5465_v3 = vld [vmem:[#allocation3] sm:$0xff] }
 0x604   : > { %v4739_v63 = vld [vmem:[#allocation3 + $0x258] sm:$0xff]  ;;  %10089 = vmatmul.msk.f32.gmra.mxu1 %vm960_vm2, %v6517_v41 }
 0x605   : > { %4095 = vst.msk [vmem:[#allocation3 + $0x260] sm:$0xff] %vm1615_vm3, %v4017_v14  ;;  %9932 = vmatmul.msk.f32.gmra.mxu3 %vm960_vm2, %v4914_v9  ;;  %v4817_v22 = vadd.f32 %v4739_v63, %v12419_v60  ;;  %10176 = vmatmul.msk.f32.gmra.mxu2 %vm960_vm2, %v7327_v55  ;;  %v4915_v14 = vld [vmem:[#allocation2 + $0xa4] sm:$0xff]  ;;  %v7328_v60 = vld [vmem:[#allocation2 + $0x10e] sm:$0xff] }
 0x606   : > { %v6518_v9 = vld [vmem:[#allocation2 + $0xc5] sm:$0xff] }
 0x607   : > { %4895 = vst.msk [vmem:[#allocation3 + $0x258] sm:$0xff] %vm1615_vm3, %v4817_v22 }
 0x608   : > { %v5231_v48 = vpop.f32.mrf.mxu3  ;;  %v12550_v20 = vpop.f32.mrf.mxu2 }
 0x609   : > { %v5543_v33 = vadd.f32 %v5465_v3, %v5231_v48  ;;  %v12552_v38 = vpop.f32.mrf.mxu1 }
 0x60a   : > { %v3940_v52 = vld [vmem:[#allocation3 + $0x268] sm:$0xff] }
 0x60b   : > { %v4018_v12 = vadd.f32 %v3940_v52, %v3860_v10  ;;  %5621 = vst.msk [vmem:[#allocation3] sm:$0xff] %vm1615_vm3, %v5543_v33  ;;  %v5466_v10 = vld [vmem:[#allocation3 + $0x8] sm:$0xff] }
 0x60c   : > { %v4740_v41 = vld [vmem:[#allocation3 + $0x260] sm:$0xff]  ;;  %10090 = vmatmul.msk.f32.gmra.mxu1 %vm960_vm2, %v6518_v9 }
 0x60d   : > { %4096 = vst.msk [vmem:[#allocation3 + $0x268] sm:$0xff] %vm1615_vm3, %v4018_v12  ;;  %9933 = vmatmul.msk.f32.gmra.mxu3 %vm960_vm2, %v4915_v14  ;;  %v4818_v63 = vadd.f32 %v4740_v41, %v12432_v36  ;;  %10177 = vmatmul.msk.f32.gmra.mxu2 %vm960_vm2, %v7328_v60  ;;  %v4916_v12 = vld [vmem:[#allocation2 + $0xac] sm:$0xff]  ;;  %v7329_v36 = vld [vmem:[#allocation2 + $0x116] sm:$0xff] }
 0x60e   : > { %v6519_v14 = vld [vmem:[#allocation2 + $0xcd] sm:$0xff] }
 0x60f   : > { %4896 = vst.msk [vmem:[#allocation3 + $0x260] sm:$0xff] %vm1615_vm3, %v4818_v63 }
 0x610   : > { %v5234_v55 = vpop.f32.mrf.mxu3  ;;  %v12561_v48 = vpop.f32.mrf.mxu2 }
 0x611   : > { %v5544_v22 = vadd.f32 %v5466_v10, %v5234_v55  ;;  %v12563_v33 = vpop.f32.mrf.mxu1 }
 0x612   : > { %v6266_v3 = vld [vmem:[#allocation3] sm:$0xff] }
 0x613   : > { %v6344_v52 = vadd.f32 %v6266_v3, %v11386_v31  ;;  %5622 = vst.msk [vmem:[#allocation3 + $0x8] sm:$0xff] %vm1615_vm3, %v5544_v22  ;;  %v5467_v31 = vld [vmem:[#allocation3 + $0x10] sm:$0xff] }
 0x614   : > { %v4741_v9 = vld [vmem:[#allocation3 + $0x268] sm:$0xff]  ;;  %10091 = vmatmul.msk.f32.gmra.mxu1 %vm960_vm2, %v6519_v14 }
 0x615   : > { %6422 = vst.msk [vmem:[#allocation3] sm:$0xff] %vm1615_vm3, %v6344_v52  ;;  %9934 = vmatmul.msk.f32.gmra.mxu3 %vm960_vm2, %v4916_v12  ;;  %v4819_v41 = vadd.f32 %v4741_v9, %v12443_v39  ;;  %10178 = vmatmul.msk.f32.gmra.mxu2 %vm960_vm2, %v7329_v36  ;;  %v4917_v12 = vld [vmem:[#allocation2 + $0xb4] sm:$0xff]  ;;  %v7330_v9 = vld [vmem:[#allocation2 + $0x11e] sm:$0xff] }
 0x616   : > { %v6520_v14 = vld [vmem:[#allocation2 + $0xd5] sm:$0xff] }
 0x617   : > { %4897 = vst.msk [vmem:[#allocation3 + $0x268] sm:$0xff] %vm1615_vm3, %v4819_v41 }
 0x618   : > { %v5237_v60 = vpop.f32.mrf.mxu3  ;;  %v12573_v55 = vpop.f32.mrf.mxu2 }
 0x619   : > { %v5545_v63 = vadd.f32 %v5467_v31, %v5237_v60  ;;  %v12575_v22 = vpop.f32.mrf.mxu1 }
 0x61a   : > { %v6267_v10 = vld [vmem:[#allocation3 + $0x8] sm:$0xff] }
 0x61b   : > { %v6345_v3 = vadd.f32 %v6267_v10, %v11411_v59  ;;  %5623 = vst.msk [vmem:[#allocation3 + $0x10] sm:$0xff] %vm1615_vm3, %v5545_v63  ;;  %v5468_v59 = vld [vmem:[#allocation3 + $0x18] sm:$0xff] }
 0x61c   : > { %v7067_v52 = vld [vmem:[#allocation3] sm:$0xff]  ;;  %10092 = vmatmul.msk.f32.gmra.mxu1 %vm960_vm2, %v6520_v14 }
 0x61d   : > { %v7145_v39 = vadd.f32 %v7067_v52, %v12530_v29  ;;  %6423 = vst.msk [vmem:[#allocation3 + $0x8] sm:$0xff] %vm1615_vm3, %v6345_v3  ;;  %9935 = vmatmul.msk.f32.gmra.mxu3 %vm960_vm2, %v4917_v12  ;;  %10179 = vmatmul.msk.f32.gmra.mxu2 %vm960_vm2, %v7330_v9  ;;  %v4918_v3 = vld [vmem:[#allocation2 + $0xbc] sm:$0xff]  ;;  %v7331_v14 = vld [vmem:[#allocation2 + $0x126] sm:$0xff] }
 0x61e   : > { %v6521_v52 = vld [vmem:[#allocation2 + $0xdd] sm:$0xff] }
 0x61f   : > { %7223 = vst.msk [vmem:[#allocation3] sm:$0xff] %vm1615_vm3, %v7145_v39 }
 0x620   : > { %v5240_v36 = vpop.f32.mrf.mxu3  ;;  %v12585_v60 = vpop.f32.mrf.mxu2 }
 0x621   : > { %v5546_v41 = vadd.f32 %v5468_v59, %v5240_v36  ;;  %v12587_v63 = vpop.f32.mrf.mxu1  ;;  %v5469_v36 = vld [vmem:[#allocation3 + $0x20] sm:$0xff] }
 0x622   : > { %v6268_v31 = vld [vmem:[#allocation3 + $0x10] sm:$0xff] }
 0x623   : > { %v6346_v29 = vadd.f32 %v6268_v31, %v11434_v16  ;;  %5624 = vst.msk [vmem:[#allocation3 + $0x18] sm:$0xff] %vm1615_vm3, %v5546_v41 }
 0x624   : > { %v7068_v10 = vld [vmem:[#allocation3 + $0x8] sm:$0xff]  ;;  %10093 = vmatmul.msk.f32.gmra.mxu1 %vm960_vm2, %v6521_v52  ;;  %v6522_v52 = vld [vmem:[#allocation2 + $0xe5] sm:$0xff] }
 0x625   : > { %v7146_v12 = vadd.f32 %v7068_v10, %v12541_v56  ;;  %6424 = vst.msk [vmem:[#allocation3 + $0x10] sm:$0xff] %vm1615_vm3, %v6346_v29  ;;  %9936 = vmatmul.msk.f32.gmra.mxu3 %vm960_vm2, %v4918_v3  ;;  %10180 = vmatmul.msk.f32.gmra.mxu2 %vm960_vm2, %v7331_v14  ;;  %v4919_v3 = vld [vmem:[#allocation2 + $0xc4] sm:$0xff] }
 0x626   : > { %v7868_v39 = vld [vmem:[#allocation3] sm:$0xff] }
 0x627   : > { %v7946_v9 = vadd.f32 %v7868_v39, %v12456_v4  ;;  %7224 = vst.msk [vmem:[#allocation3 + $0x8] sm:$0xff] %vm1615_vm3, %v7146_v12  ;;  %v7332_v12 = vld [vmem:[#allocation2 + $0x12e] sm:$0xff] }
 0x628   : > { %v5243_v16 = vpop.f32.mrf.mxu3  ;;  %v12599_v56 = vpop.f32.mrf.mxu2 }
 0x629   : > { %8024 = vst.msk [vmem:[#allocation3] sm:$0xff] %vm1615_vm3, %v7946_v9  ;;  %v5547_v59 = vadd.f32 %v5469_v36, %v5243_v16  ;;  %v12601_v31 = vpop.f32.mrf.mxu1  ;;  %v5470_v9 = vld [vmem:[#allocation3 + $0x28] sm:$0xff] }
 0x62a   : > { %v6269_v41 = vld [vmem:[#allocation3 + $0x18] sm:$0xff] }
 0x62b   : > { %v6347_v29 = vadd.f32 %v6269_v41, %v11456_v15  ;;  %5625 = vst.msk [vmem:[#allocation3 + $0x20] sm:$0xff] %vm1615_vm3, %v5547_v59 }
 0x62c   : > { %v7069_v10 = vld [vmem:[#allocation3 + $0x10] sm:$0xff]  ;;  %10094 = vmatmul.msk.f32.gmra.mxu1 %vm960_vm2, %v6522_v52 }
 0x62d   : > { %v7147_v4 = vadd.f32 %v7069_v10, %v12552_v38  ;;  %6425 = vst.msk [vmem:[#allocation3 + $0x18] sm:$0xff] %vm1615_vm3, %v6347_v29  ;;  %9937 = vmatmul.msk.f32.gmra.mxu3 %vm960_vm2, %v4919_v3  ;;  %10181 = vmatmul.msk.f32.gmra.mxu2 %vm960_vm2, %v7332_v12  ;;  %v4920_v10 = vld [vmem:[#allocation2 + $0xcc] sm:$0xff]  ;;  %v7333_v52 = vld [vmem:[#allocation2 + $0x136] sm:$0xff] }
 0x62e   : > { %v7869_v14 = vld [vmem:[#allocation3 + $0x8] sm:$0xff] }
 0x62f   : > { %v7947_v39 = vadd.f32 %v7869_v14, %v12465_v7  ;;  %7225 = vst.msk [vmem:[#allocation3 + $0x10] sm:$0xff] %vm1615_vm3, %v7147_v4  ;;  %v6523_v3 = vld [vmem:[#allocation2 + $0xed] sm:$0xff]  ;;  %v5471_v14 = vld [vmem:[#allocation3 + $0x30] sm:$0xff] }
 0x630   : > { %v5246_v15 = vpop.f32.mrf.mxu3  ;;  %v12613_v38 = vpop.f32.mrf.mxu2 }
 0x631   : > { %8025 = vst.msk [vmem:[#allocation3 + $0x8] sm:$0xff] %vm1615_vm3, %v7947_v39  ;;  %v5548_v16 = vadd.f32 %v5470_v9, %v5246_v15  ;;  %v12615_v59 = vpop.f32.mrf.mxu1 }
 0x632   : > { %v6270_v36 = vld [vmem:[#allocation3 + $0x20] sm:$0xff] }
 0x633   : > { %v6348_v41 = vadd.f32 %v6270_v36, %v11474_v19  ;;  %5626 = vst.msk [vmem:[#allocation3 + $0x28] sm:$0xff] %vm1615_vm3, %v5548_v16 }
 0x634   : > { %v7070_v29 = vld [vmem:[#allocation3 + $0x18] sm:$0xff]  ;;  %10095 = vmatmul.msk.f32.gmra.mxu1 %vm960_vm2, %v6523_v3 }
 0x635   : > { %v7148_v7 = vadd.f32 %v7070_v29, %v12563_v33  ;;  %6426 = vst.msk [vmem:[#allocation3 + $0x20] sm:$0xff] %vm1615_vm3, %v6348_v41  ;;  %9938 = vmatmul.msk.f32.gmra.mxu3 %vm960_vm2, %v4920_v10  ;;  %10182 = vmatmul.msk.f32.gmra.mxu2 %vm960_vm2, %v7333_v52  ;;  %v4921_v41 = vld [vmem:[#allocation2 + $0xd4] sm:$0xff]  ;;  %v7334_v10 = vld [vmem:[#allocation2 + $0x13e] sm:$0xff] }
 0x636   : > { %v7870_v4 = vld [vmem:[#allocation3 + $0x10] sm:$0xff]  ;;  %v5472_v52 = vld [vmem:[#allocation3 + $0x38] sm:$0xff] }
 0x637   : > { %v7948_v12 = vadd.f32 %v7870_v4, %v12474_v42  ;;  %7226 = vst.msk [vmem:[#allocation3 + $0x18] sm:$0xff] %vm1615_vm3, %v7148_v7  ;;  %v6524_v29 = vld [vmem:[#allocation2 + $0xf5] sm:$0xff] }
 0x638   : > { %v5249_v19 = vpop.f32.mrf.mxu3  ;;  %v12627_v33 = vpop.f32.mrf.mxu2 }
 0x639   : > { %8026 = vst.msk [vmem:[#allocation3 + $0x10] sm:$0xff] %vm1615_vm3, %v7948_v12  ;;  %v5549_v39 = vadd.f32 %v5471_v14, %v5249_v19  ;;  %v12629_v9 = vpop.f32.mrf.mxu1 }
 0x63a   : > { %v6271_v15 = vld [vmem:[#allocation3 + $0x28] sm:$0xff] }
 0x63b   : > { %v6349_v16 = vadd.f32 %v6271_v15, %v11491_v0  ;;  %5627 = vst.msk [vmem:[#allocation3 + $0x30] sm:$0xff] %vm1615_vm3, %v5549_v39  ;;  %v4922_v15 = vld [vmem:[#allocation2 + $0xdc] sm:$0xff] }
 0x63c   : > { %v7071_v36 = vld [vmem:[#allocation3 + $0x20] sm:$0xff]  ;;  %10096 = vmatmul.msk.f32.gmra.mxu1 %vm960_vm2, %v6524_v29 }
 0x63d   : > { %v7149_v42 = vadd.f32 %v7071_v36, %v12575_v22  ;;  %6427 = vst.msk [vmem:[#allocation3 + $0x28] sm:$0xff] %vm1615_vm3, %v6349_v16  ;;  %9939 = vmatmul.msk.f32.gmra.mxu3 %vm960_vm2, %v4921_v41  ;;  %10183 = vmatmul.msk.f32.gmra.mxu2 %vm960_vm2, %v7334_v10  ;;  %v6525_v16 = vld [vmem:[#allocation2 + $0xfd] sm:$0xff]  ;;  %v7335_v36 = vld [vmem:[#allocation2 + $0x146] sm:$0xff] }
 0x63e   : > { %v7871_v3 = vld [vmem:[#allocation3 + $0x18] sm:$0xff] }
 0x63f   : > { %v7949_v7 = vadd.f32 %v7871_v3, %v12483_v11  ;;  %7227 = vst.msk [vmem:[#allocation3 + $0x20] sm:$0xff] %vm1615_vm3, %v7149_v42  ;;  %v5473_v42 = vld [vmem:[#allocation3 + $0x40] sm:$0xff] }
 0x640   : > { %v5252_v0 = vpop.f32.mrf.mxu3  ;;  %v12641_v22 = vpop.f32.mrf.mxu2 }
 0x641   : > { %8027 = vst.msk [vmem:[#allocation3 + $0x18] sm:$0xff] %vm1615_vm3, %v7949_v7  ;;  %v5550_v4 = vadd.f32 %v5472_v52, %v5252_v0  ;;  %v12643_v19 = vpop.f32.mrf.mxu1 }
 0x642   : > { %v6272_v12 = vld [vmem:[#allocation3 + $0x30] sm:$0xff] }
 0x643   : > { %v6350_v14 = vadd.f32 %v6272_v12, %v11508_v49  ;;  %5628 = vst.msk [vmem:[#allocation3 + $0x38] sm:$0xff] %vm1615_vm3, %v5550_v4  ;;  %v4923_v4 = vld [vmem:[#allocation2 + $0xe4] sm:$0xff] }
 0x644   : > { %v7072_v39 = vld [vmem:[#allocation3 + $0x28] sm:$0xff]  ;;  %10097 = vmatmul.msk.f32.gmra.mxu1 %vm960_vm2, %v6525_v16  ;;  %v6526_v12 = vld [vmem:[#allocation2 + $0x105] sm:$0xff] }
 0x645   : > { %v7150_v11 = vadd.f32 %v7072_v39, %v12587_v63  ;;  %6428 = vst.msk [vmem:[#allocation3 + $0x30] sm:$0xff] %vm1615_vm3, %v6350_v14  ;;  %9940 = vmatmul.msk.f32.gmra.mxu3 %vm960_vm2, %v4922_v15  ;;  %10184 = vmatmul.msk.f32.gmra.mxu2 %vm960_vm2, %v7335_v36  ;;  %v7336_v14 = vld [vmem:[#allocation2 + $0x14e] sm:$0xff] }
 0x646   : > { %v7872_v41 = vld [vmem:[#allocation3 + $0x20] sm:$0xff] }
 0x647   : > { %v7950_v29 = vadd.f32 %v7872_v41, %v12492_v6  ;;  %7228 = vst.msk [vmem:[#allocation3 + $0x28] sm:$0xff] %vm1615_vm3, %v7150_v11  ;;  %v5474_v11 = vld [vmem:[#allocation3 + $0x48] sm:$0xff] }
 0x648   : > { %v5255_v49 = vpop.f32.mrf.mxu3  ;;  %v12655_v63 = vpop.f32.mrf.mxu2 }
 0x649   : > { %8028 = vst.msk [vmem:[#allocation3 + $0x20] sm:$0xff] %vm1615_vm3, %v7950_v29  ;;  %v5551_v10 = vadd.f32 %v5473_v42, %v5255_v49  ;;  %v12657_v7 = vpop.f32.mrf.mxu1  ;;  %v8102_v29 = vld [vmem:[#allocation3] sm:$0xff] }
 0x64a   : > { %v6273_v3 = vld [vmem:[#allocation3 + $0x38] sm:$0xff] }
 0x64b   : > { %v6351_v0 = vadd.f32 %v6273_v3, %v11524_v61  ;;  %5629 = vst.msk [vmem:[#allocation3 + $0x40] sm:$0xff] %vm1615_vm3, %v5551_v10  ;;  %v8177_v61 = vld [vmem:[#allocation3 + $0x1] sm:$0xff] }
 0x64c   : > { %v7073_v52 = vld [vmem:[#allocation3 + $0x30] sm:$0xff]  ;;  %10098 = vmatmul.msk.f32.gmra.mxu1 %vm960_vm2, %v6526_v12  ;;  %v8252_v3 = vmax.f32 %v8102_v29, %v8177_v61  ;;  %v6527_v12 = vld [vmem:[#allocation2 + $0x10d] sm:$0xff] }
 0x64d   : > { %v7151_v6 = vadd.f32 %v7073_v52, %v12601_v31  ;;  %6429 = vst.msk [vmem:[#allocation3 + $0x38] sm:$0xff] %vm1615_vm3, %v6351_v0  ;;  %9941 = vmatmul.msk.f32.gmra.mxu3 %vm960_vm2, %v4923_v4  ;;  %10185 = vmatmul.msk.f32.gmra.mxu2 %vm960_vm2, %v7336_v14  ;;  %v4924_v4 = vld [vmem:[#allocation2 + $0xec] sm:$0xff] }
 0x64e   : > { %v7873_v39 = vld [vmem:[#allocation3 + $0x28] sm:$0xff] }
 0x64f   : > { %v7951_v15 = vadd.f32 %v7873_v39, %v12501_v13  ;;  %7229 = vst.msk [vmem:[#allocation3 + $0x30] sm:$0xff] %vm1615_vm3, %v7151_v6  ;;  %v7337_v39 = vld [vmem:[#allocation2 + $0x156] sm:$0xff] }
 0x650   : > { %v5258_v16 = vpop.f32.mrf.mxu3  ;;  %v8327_v36 = vld [vmem:[#allocation3 + $0x1a] sm:$0xff]  ;;  %v12669_v41 = vpop.f32.mrf.mxu2  ;;  %v8178_v61 = vld [vmem:[#allocation3 + $0x9] sm:$0xff] }
 0x651   : > { %8029 = vst.msk [vmem:[#allocation3 + $0x28] sm:$0xff] %vm1615_vm3, %v7951_v15  ;;  %v5552_v31 = vadd.f32 %v5474_v11, %v5258_v16  ;;  %v8402_v49 = vld [vmem:[#allocation3 + $0x1b] sm:$0xff]  ;;  %v12671_v10 = vpop.f32.mrf.mxu1  ;;  %v5475_v11 = vld [vmem:[#allocation3 + $0x50] sm:$0xff]  ;;  %v8103_v29 = vld [vmem:[#allocation3 + $0x8] sm:$0xff] }
 0x652   : > { %v6274_v42 = vld [vmem:[#allocation3 + $0x40] sm:$0xff]  ;;  %v8477_v0 = vmax.f32 %v8327_v36, %v8402_v49 }
 0x653   : > { %v6352_v13 = vadd.f32 %v6274_v42, %v11540_v53  ;;  %5630 = vst.msk [vmem:[#allocation3 + $0x48] sm:$0xff] %vm1615_vm3, %v5552_v31 }
 0x654   : > { %v7074_v52 = vld [vmem:[#allocation3 + $0x38] sm:$0xff]  ;;  %v8552_v6 = vmax.f32 %v8252_v3, %v8477_v0  ;;  %10099 = vmatmul.msk.f32.gmra.mxu1 %vm960_vm2, %v6527_v12  ;;  %v8253_v0 = vmax.f32 %v8103_v29, %v8178_v61  ;;  %v6528_v12 = vld [vmem:[#allocation2 + $0x115] sm:$0xff] }
 0x655   : > { %v7152_v14 = vadd.f32 %v7074_v52, %v12615_v59  ;;  %6430 = vst.msk [vmem:[#allocation3 + $0x40] sm:$0xff] %vm1615_vm3, %v6352_v13  ;;  %9942 = vmatmul.msk.f32.gmra.mxu3 %vm960_vm2, %v4924_v4  ;;  %10186 = vmatmul.msk.f32.gmra.mxu2 %vm960_vm2, %v7337_v39  ;;  %v4925_v4 = vld [vmem:[#allocation2 + $0xf4] sm:$0xff]  ;;  %v7338_v39 = vld [vmem:[#allocation2 + $0x15e] sm:$0xff] }
 0x656   : > { %v7874_v15 = vld [vmem:[#allocation3 + $0x30] sm:$0xff]  ;;  %8627 = vst.msk [vmem:[#allocation4] sm:$0xff] %vm1615_vm3, %v8552_v6 }
 0x657   : > { %v7952_v53 = vadd.f32 %v7874_v15, %v12510_v2  ;;  %7230 = vst.msk [vmem:[#allocation3 + $0x38] sm:$0xff] %vm1615_vm3, %v7152_v14 }
 0x658   : > { %v5261_v16 = vpop.f32.mrf.mxu3  ;;  %v8328_v59 = vld [vmem:[#allocation3 + $0x22] sm:$0xff]  ;;  %v12684_v31 = vpop.f32.mrf.mxu2 }
 0x659   : > { %8030 = vst.msk [vmem:[#allocation3 + $0x30] sm:$0xff] %vm1615_vm3, %v7952_v53  ;;  %v5553_v36 = vadd.f32 %v5475_v11, %v5261_v16  ;;  %v8403_v49 = vld [vmem:[#allocation3 + $0x23] sm:$0xff]  ;;  %v12686_v3 = vpop.f32.mrf.mxu1  ;;  %v8179_v53 = vld [vmem:[#allocation3 + $0x11] sm:$0xff] }
 0x65a   : > { %v6275_v42 = vld [vmem:[#allocation3 + $0x48] sm:$0xff]  ;;  %v8478_v13 = vmax.f32 %v8328_v59, %v8403_v49  ;;  %v5476_v16 = vld [vmem:[#allocation3 + $0x58] sm:$0xff] }
 0x65b   : > { %v6353_v2 = vadd.f32 %v6275_v42, %v11556_v44  ;;  %5631 = vst.msk [vmem:[#allocation3 + $0x50] sm:$0xff] %vm1615_vm3, %v5553_v36  ;;  %v8104_v36 = vld [vmem:[#allocation3 + $0x10] sm:$0xff] }
 0x65c   : > { %v7075_v52 = vld [vmem:[#allocation3 + $0x40] sm:$0xff]  ;;  %v8553_v6 = vmax.f32 %v8253_v0, %v8478_v13  ;;  %10100 = vmatmul.msk.f32.gmra.mxu1 %vm960_vm2, %v6528_v12  ;;  %v8254_v0 = vmax.f32 %v8104_v36, %v8179_v53 }
 0x65d   : > { %v7153_v14 = vadd.f32 %v7075_v52, %v12629_v9  ;;  %6431 = vst.msk [vmem:[#allocation3 + $0x48] sm:$0xff] %vm1615_vm3, %v6353_v2  ;;  %9943 = vmatmul.msk.f32.gmra.mxu3 %vm960_vm2, %v4925_v4  ;;  %10187 = vmatmul.msk.f32.gmra.mxu2 %vm960_vm2, %v7338_v39  ;;  %v4926_v52 = vld [vmem:[#allocation2 + $0xfc] sm:$0xff]  ;;  %v5477_v53 = vld [vmem:[#allocation3 + $0x60] sm:$0xff] }
 0x65e   : > { %v7875_v15 = vld [vmem:[#allocation3 + $0x38] sm:$0xff]  ;;  %8628 = vst.msk [vmem:[#allocation4 + $0x8] sm:$0xff] %vm1615_vm3, %v8553_v6 }
 0x65f   : > { %v7953_v44 = vadd.f32 %v7875_v15, %v12519_v5  ;;  %7231 = vst.msk [vmem:[#allocation3 + $0x40] sm:$0xff] %vm1615_vm3, %v7153_v14  ;;  %v6529_v4 = vld [vmem:[#allocation2 + $0x11d] sm:$0xff]  ;;  %v7339_v14 = vld [vmem:[#allocation2 + $0x166] sm:$0xff] }
 0x660   : > { %v5264_v61 = vpop.f32.mrf.mxu3  ;;  %v8329_v9 = vld [vmem:[#allocation3 + $0x2a] sm:$0xff]  ;;  %v12699_v59 = vpop.f32.mrf.mxu2  ;;  %v8180_v15 = vld [vmem:[#allocation3 + $0x19] sm:$0xff] }
 0x661   : > { %8031 = vst.msk [vmem:[#allocation3 + $0x38] sm:$0xff] %vm1615_vm3, %v7953_v44  ;;  %v5554_v11 = vadd.f32 %v5476_v16, %v5264_v61  ;;  %v8404_v29 = vld [vmem:[#allocation3 + $0x2b] sm:$0xff]  ;;  %v12701_v42 = vpop.f32.mrf.mxu1 }
 0x662   : > { %v6276_v49 = vld [vmem:[#allocation3 + $0x50] sm:$0xff]  ;;  %v8479_v13 = vmax.f32 %v8329_v9, %v8404_v29  ;;  %v8105_v9 = vld [vmem:[#allocation3 + $0x18] sm:$0xff] }
 0x663   : > { %v6354_v5 = vadd.f32 %v6276_v49, %v11572_v28  ;;  %5632 = vst.msk [vmem:[#allocation3 + $0x58] sm:$0xff] %vm1615_vm3, %v5554_v11  ;;  %v8255_v49 = vmax.f32 %v8105_v9, %v8180_v15 }
 0x664   : > { %v7076_v2 = vld [vmem:[#allocation3 + $0x48] sm:$0xff]  ;;  %v8554_v12 = vmax.f32 %v8254_v0, %v8479_v13  ;;  %10101 = vmatmul.msk.f32.gmra.mxu1 %vm960_vm2, %v6529_v4 }
 0x665   : > { %v7154_v6 = vadd.f32 %v7076_v2, %v12643_v19  ;;  %6432 = vst.msk [vmem:[#allocation3 + $0x50] sm:$0xff] %vm1615_vm3, %v6354_v5  ;;  %9944 = vmatmul.msk.f32.gmra.mxu3 %vm960_vm2, %v4926_v52  ;;  %10188 = vmatmul.msk.f32.gmra.mxu2 %vm960_vm2, %v7339_v14  ;;  %v4927_v5 = vld [vmem:[#allocation2 + $0x104] sm:$0xff] }
 0x666   : > { %v7876_v39 = vld [vmem:[#allocation3 + $0x40] sm:$0xff]  ;;  %8629 = vst.msk [vmem:[#allocation4 + $0x10] sm:$0xff] %vm1615_vm3, %v8554_v12 }
 0x667   : > { %v7954_v28 = vadd.f32 %v7876_v39, %v12528_v46  ;;  %7232 = vst.msk [vmem:[#allocation3 + $0x48] sm:$0xff] %vm1615_vm3, %v7154_v6  ;;  %v6530_v2 = vld [vmem:[#allocation2 + $0x125] sm:$0xff]  ;;  %v7340_v12 = vld [vmem:[#allocation2 + $0x16e] sm:$0xff] }
 0x668   : > { %v5267_v44 = vpop.f32.mrf.mxu3  ;;  %v8330_v19 = vld [vmem:[#allocation3 + $0x32] sm:$0xff]  ;;  %v12714_v16 = vpop.f32.mrf.mxu2  ;;  %v8181_v14 = vld [vmem:[#allocation3 + $0x21] sm:$0xff] }
 0x669   : > { %8032 = vst.msk [vmem:[#allocation3 + $0x40] sm:$0xff] %vm1615_vm3, %v7954_v28  ;;  %v5555_v61 = vadd.f32 %v5477_v53, %v5267_v44  ;;  %v8405_v11 = vld [vmem:[#allocation3 + $0x33] sm:$0xff]  ;;  %v12716_v29 = vpop.f32.mrf.mxu1  ;;  %v5478_v28 = vld [vmem:[#allocation3 + $0x68] sm:$0xff]  ;;  %v8106_v53 = vld [vmem:[#allocation3 + $0x20] sm:$0xff] }
 0x66a   : > { %v6277_v36 = vld [vmem:[#allocation3 + $0x58] sm:$0xff]  ;;  %v8480_v0 = vmax.f32 %v8330_v19, %v8405_v11  ;;  %v8256_v11 = vmax.f32 %v8106_v53, %v8181_v14  ;;  %v8107_v14 = vld [vmem:[#allocation3 + $0x28] sm:$0xff] }
 0x66b   : > { %v6355_v46 = vadd.f32 %v6277_v36, %v11588_v54  ;;  %5633 = vst.msk [vmem:[#allocation3 + $0x60] sm:$0xff] %vm1615_vm3, %v5555_v61 }
 0x66c   : > { %v7077_v13 = vld [vmem:[#allocation3 + $0x50] sm:$0xff]  ;;  %v8555_v52 = vmax.f32 %v8255_v49, %v8480_v0  ;;  %10102 = vmatmul.msk.f32.gmra.mxu1 %vm960_vm2, %v6530_v2  ;;  %v4928_v0 = vld [vmem:[#allocation2 + $0x10c] sm:$0xff] }
 0x66d   : > { %v7155_v4 = vadd.f32 %v7077_v13, %v12657_v7  ;;  %6433 = vst.msk [vmem:[#allocation3 + $0x58] sm:$0xff] %vm1615_vm3, %v6355_v46  ;;  %9945 = vmatmul.msk.f32.gmra.mxu3 %vm960_vm2, %v4927_v5  ;;  %10189 = vmatmul.msk.f32.gmra.mxu2 %vm960_vm2, %v7340_v12  ;;  %v6531_v46 = vld [vmem:[#allocation2 + $0x12d] sm:$0xff]  ;;  %v7341_v2 = vld [vmem:[#allocation2 + $0x176] sm:$0xff] }
 0x66e   : > { %v7877_v6 = vld [vmem:[#allocation3 + $0x48] sm:$0xff]  ;;  %8630 = vst.msk [vmem:[#allocation4 + $0x18] sm:$0xff] %vm1615_vm3, %v8555_v52 }
 0x66f   : > { %v7955_v54 = vadd.f32 %v7877_v6, %v12539_v37  ;;  %7233 = vst.msk [vmem:[#allocation3 + $0x50] sm:$0xff] %vm1615_vm3, %v7155_v4  ;;  %v8182_v4 = vld [vmem:[#allocation3 + $0x29] sm:$0xff] }
 0x670   : > { %v5270_v39 = vpop.f32.mrf.mxu3  ;;  %v8331_v7 = vld [vmem:[#allocation3 + $0x3a] sm:$0xff]  ;;  %v12729_v44 = vpop.f32.mrf.mxu2  ;;  %v5479_v6 = vld [vmem:[#allocation3 + $0x70] sm:$0xff] }
 0x671   : > { %8033 = vst.msk [vmem:[#allocation3 + $0x48] sm:$0xff] %vm1615_vm3, %v7955_v54  ;;  %v5556_v15 = vadd.f32 %v5478_v28, %v5270_v39  ;;  %v8406_v19 = vld [vmem:[#allocation3 + $0x3b] sm:$0xff]  ;;  %v12731_v9 = vpop.f32.mrf.mxu1 }
 0x672   : > { %v6278_v61 = vld [vmem:[#allocation3 + $0x60] sm:$0xff]  ;;  %v8481_v36 = vmax.f32 %v8331_v7, %v8406_v19 }
 0x673   : > { %v6356_v37 = vadd.f32 %v6278_v61, %v11604_v58  ;;  %5634 = vst.msk [vmem:[#allocation3 + $0x68] sm:$0xff] %vm1615_vm3, %v5556_v15  ;;  %v8257_v15 = vmax.f32 %v8107_v14, %v8182_v4 }
 0x674   : > { %v7078_v49 = vld [vmem:[#allocation3 + $0x58] sm:$0xff]  ;;  %v8556_v13 = vmax.f32 %v8256_v11, %v8481_v36  ;;  %10103 = vmatmul.msk.f32.gmra.mxu1 %vm960_vm2, %v6531_v46  ;;  %v4929_v11 = vld [vmem:[#allocation2 + $0x114] sm:$0xff] }
 0x675   : > { %v7156_v5 = vadd.f32 %v7078_v49, %v12671_v10  ;;  %6434 = vst.msk [vmem:[#allocation3 + $0x60] sm:$0xff] %vm1615_vm3, %v6356_v37  ;;  %9946 = vmatmul.msk.f32.gmra.mxu3 %vm960_vm2, %v4928_v0  ;;  %10190 = vmatmul.msk.f32.gmra.mxu2 %vm960_vm2, %v7341_v2  ;;  %v6532_v36 = vld [vmem:[#allocation2 + $0x135] sm:$0xff]  ;;  %v7342_v0 = vld [vmem:[#allocation2 + $0x17e] sm:$0xff] }
 0x676   : > { %v7878_v52 = vld [vmem:[#allocation3 + $0x50] sm:$0xff]  ;;  %8631 = vst.msk [vmem:[#allocation4 + $0x20] sm:$0xff] %vm1615_vm3, %v8556_v13  ;;  %v5480_v2 = vld [vmem:[#allocation3 + $0x78] sm:$0xff] }
 0x677   : > { %v7956_v58 = vadd.f32 %v7878_v52, %v12550_v20  ;;  %7234 = vst.msk [vmem:[#allocation3 + $0x58] sm:$0xff] %vm1615_vm3, %v7156_v5  ;;  %v8183_v13 = vld [vmem:[#allocation3 + $0x31] sm:$0xff] }
 0x678   : > { %v5273_v12 = vpop.f32.mrf.mxu3  ;;  %v8332_v10 = vld [vmem:[#allocation3 + $0x42] sm:$0xff]  ;;  %v12748_v20 = vpop.f32.mrf.mxu2 }
 0x679   : > { %8034 = vst.msk [vmem:[#allocation3 + $0x50] sm:$0xff] %vm1615_vm3, %v7956_v58  ;;  %v5557_v54 = vadd.f32 %v5479_v6, %v5273_v12  ;;  %v8407_v39 = vld [vmem:[#allocation3 + $0x43] sm:$0xff]  ;;  %v12744_v7 = vpop.f32.mrf.mxu1  ;;  %v8108_v58 = vld [vmem:[#allocation3 + $0x30] sm:$0xff] }
 0x67a   : > { %v6279_v28 = vld [vmem:[#allocation3 + $0x68] sm:$0xff]  ;;  %v8482_v53 = vmax.f32 %v8332_v10, %v8407_v39  ;;  %v8258_v10 = vmax.f32 %v8108_v58, %v8183_v13  ;;  %v4930_v39 = vld [vmem:[#allocation2 + $0x11c] sm:$0xff]  ;;  %v4931_v58 = vld [vmem:[#allocation2 + $0x124] sm:$0xff] }
 0x67b   : > { %v6357_v19 = vadd.f32 %v6279_v28, %v11620_v24  ;;  %5635 = vst.msk [vmem:[#allocation3 + $0x70] sm:$0xff] %vm1615_vm3, %v5557_v54  ;;  %v6533_v28 = vld [vmem:[#allocation2 + $0x13d] sm:$0xff] }
 0x67c   : > { %v7079_v61 = vld [vmem:[#allocation3 + $0x60] sm:$0xff]  ;;  %v8557_v37 = vmax.f32 %v8257_v15, %v8482_v53  ;;  %10104 = vmatmul.msk.f32.gmra.mxu1 %vm960_vm2, %v6532_v36 }
 0x67d   : > { %v7157_v49 = vadd.f32 %v7079_v61, %v12686_v3  ;;  %6435 = vst.msk [vmem:[#allocation3 + $0x68] sm:$0xff] %vm1615_vm3, %v6357_v19  ;;  %9947 = vmatmul.msk.f32.gmra.mxu3 %vm960_vm2, %v4929_v11  ;;  %10191 = vmatmul.msk.f32.gmra.mxu2 %vm960_vm2, %v7342_v0  ;;  %v7343_v61 = vld [vmem:[#allocation2 + $0x186] sm:$0xff] }
 0x67e   : > { %v7879_v46 = vld [vmem:[#allocation3 + $0x58] sm:$0xff]  ;;  %8632 = vst.msk [vmem:[#allocation4 + $0x28] sm:$0xff] %vm1615_vm3, %v8557_v37  ;;  %v5481_v37 = vld [vmem:[#allocation3 + $0x80] sm:$0xff] }
 0x67f   : > { %v7957_v24 = vadd.f32 %v7879_v46, %v12561_v48  ;;  %7235 = vst.msk [vmem:[#allocation3 + $0x60] sm:$0xff] %vm1615_vm3, %v7157_v49  ;;  %v8184_v36 = vld [vmem:[#allocation3 + $0x39] sm:$0xff] }
 0x680   : > { %v5276_v5 = vpop.f32.mrf.mxu3  ;;  %v8333_v3 = vld [vmem:[#allocation3 + $0x4a] sm:$0xff]  ;;  %v12765_v19 = vpop.f32.mrf.mxu2  ;;  %v8109_v46 = vld [vmem:[#allocation3 + $0x38] sm:$0xff] }
 0x681   : > { %8035 = vst.msk [vmem:[#allocation3 + $0x58] sm:$0xff] %vm1615_vm3, %v7957_v24  ;;  %v5558_v52 = vadd.f32 %v5480_v2, %v5276_v5  ;;  %v8408_v4 = vld [vmem:[#allocation3 + $0x4b] sm:$0xff]  ;;  %v12759_v6 = vpop.f32.mrf.mxu1  ;;  %v8259_v2 = vmax.f32 %v8109_v46, %v8184_v36 }
 0x682   : > { %v6280_v12 = vld [vmem:[#allocation3 + $0x70] sm:$0xff]  ;;  %v8483_v54 = vmax.f32 %v8333_v3, %v8408_v4  ;;  %v6534_v4 = vld [vmem:[#allocation2 + $0x145] sm:$0xff]  ;;  %v6535_v46 = vld [vmem:[#allocation2 + $0x14d] sm:$0xff] }
 0x683   : > { %v6358_v14 = vadd.f32 %v6280_v12, %v11636_v50  ;;  %5636 = vst.msk [vmem:[#allocation3 + $0x78] sm:$0xff] %vm1615_vm3, %v5558_v52 }
 0x684   : > { %v7080_v48 = vld [vmem:[#allocation3 + $0x68] sm:$0xff]  ;;  %v8558_v15 = vmax.f32 %v8258_v10, %v8483_v54  ;;  %10105 = vmatmul.msk.f32.gmra.mxu1 %vm960_vm2, %v6533_v28 }
 0x685   : > { %v7158_v53 = vadd.f32 %v7080_v48, %v12701_v42  ;;  %6436 = vst.msk [vmem:[#allocation3 + $0x70] sm:$0xff] %vm1615_vm3, %v6358_v14  ;;  %9948 = vmatmul.msk.f32.gmra.mxu3 %vm960_vm2, %v4930_v39  ;;  %10192 = vmatmul.msk.f32.gmra.mxu2 %vm960_vm2, %v7343_v61  ;;  %v7344_v54 = vld [vmem:[#allocation2 + $0x18e] sm:$0xff] }
 0x686   : > { %v7880_v11 = vld [vmem:[#allocation3 + $0x60] sm:$0xff]  ;;  %8633 = vst.msk [vmem:[#allocation4 + $0x30] sm:$0xff] %vm1615_vm3, %v8558_v15  ;;  %v5482_v28 = vld [vmem:[#allocation3 + $0x88] sm:$0xff] }
 0x687   : > { %v7958_v50 = vadd.f32 %v7880_v11, %v12573_v55  ;;  %7236 = vst.msk [vmem:[#allocation3 + $0x68] sm:$0xff] %vm1615_vm3, %v7158_v53  ;;  %v8185_v39 = vld [vmem:[#allocation3 + $0x41] sm:$0xff] }
 0x688   : > { %v5279_v42 = vpop.f32.mrf.mxu3  ;;  %v8334_v49 = vld [vmem:[#allocation3 + $0x52] sm:$0xff]  ;;  %v12786_v48 = vpop.f32.mrf.mxu2  ;;  %v8110_v61 = vld [vmem:[#allocation3 + $0x40] sm:$0xff] }
 0x689   : > { %8036 = vst.msk [vmem:[#allocation3 + $0x60] sm:$0xff] %vm1615_vm3, %v7958_v50  ;;  %v5559_v0 = vadd.f32 %v5481_v37, %v5279_v42  ;;  %v8409_v24 = vld [vmem:[#allocation3 + $0x53] sm:$0xff]  ;;  %v12774_v5 = vpop.f32.mrf.mxu1  ;;  %v8260_v42 = vmax.f32 %v8110_v61, %v8185_v39 }
 0x68a   : > { %v6281_v13 = vld [vmem:[#allocation3 + $0x78] sm:$0xff]  ;;  %v8484_v3 = vmax.f32 %v8334_v49, %v8409_v24 }
 0x68b   : > { %v6359_v52 = vadd.f32 %v6281_v13, %v11654_v62  ;;  %5637 = vst.msk [vmem:[#allocation3 + $0x80] sm:$0xff] %vm1615_vm3, %v5559_v0  ;;  %v4932_v0 = vld [vmem:[#allocation2 + $0x12c] sm:$0xff] }
 0x68c   : > { %v7081_v55 = vld [vmem:[#allocation3 + $0x70] sm:$0xff]  ;;  %v8559_v12 = vmax.f32 %v8259_v2, %v8484_v3  ;;  %10106 = vmatmul.msk.f32.gmra.mxu1 %vm960_vm2, %v6534_v4 }
 0x68d   : > { %v7159_v10 = vadd.f32 %v7081_v55, %v12716_v29  ;;  %6437 = vst.msk [vmem:[#allocation3 + $0x78] sm:$0xff] %vm1615_vm3, %v6359_v52  ;;  %9949 = vmatmul.msk.f32.gmra.mxu3 %vm960_vm2, %v4931_v58  ;;  %10193 = vmatmul.msk.f32.gmra.mxu2 %vm960_vm2, %v7344_v54  ;;  %v7345_v2 = vld [vmem:[#allocation2 + $0x196] sm:$0xff] }
 0x68e   : > { %v7881_v14 = vld [vmem:[#allocation3 + $0x68] sm:$0xff]  ;;  %8634 = vst.msk [vmem:[#allocation4 + $0x38] sm:$0xff] %vm1615_vm3, %v8559_v12  ;;  %v5483_v58 = vld [vmem:[#allocation3 + $0x90] sm:$0xff] }
 0x68f   : > { %v7959_v62 = vadd.f32 %v7881_v14, %v12585_v60  ;;  %7237 = vst.msk [vmem:[#allocation3 + $0x70] sm:$0xff] %vm1615_vm3, %v7159_v10  ;;  %v8186_v52 = vld [vmem:[#allocation3 + $0x49] sm:$0xff] }
 0x690   : > { %v5282_v29 = vpop.f32.mrf.mxu3  ;;  %v8335_v15 = vld [vmem:[#allocation3 + $0x5a] sm:$0xff]  ;;  %v12802_v4 = vpop.f32.mrf.mxu2  ;;  %v8111_v10 = vld [vmem:[#allocation3 + $0x48] sm:$0xff] }
 0x691   : > { %8037 = vst.msk [vmem:[#allocation3 + $0x68] sm:$0xff] %vm1615_vm3, %v7959_v62  ;;  %v5560_v53 = vadd.f32 %v5482_v28, %v5282_v29  ;;  %v8410_v11 = vld [vmem:[#allocation3 + $0x5b] sm:$0xff]  ;;  %v12789_v36 = vpop.f32.mrf.mxu1  ;;  %v8261_v39 = vmax.f32 %v8111_v10, %v8186_v52 }
 0x692   : > { %v6282_v50 = vld [vmem:[#allocation3 + $0x80] sm:$0xff]  ;;  %v8485_v37 = vmax.f32 %v8335_v15, %v8410_v11  ;;  %v4933_v15 = vld [vmem:[#allocation2 + $0x134] sm:$0xff] }
 0x693   : > { %v6360_v60 = vadd.f32 %v6282_v50, %v11672_v25  ;;  %5638 = vst.msk [vmem:[#allocation3 + $0x88] sm:$0xff] %vm1615_vm3, %v5560_v53  ;;  %v6536_v53 = vld [vmem:[#allocation2 + $0x155] sm:$0xff]  ;;  %v7346_v50 = vld [vmem:[#allocation2 + $0x19e] sm:$0xff] }
 0x694   : > { %v7082_v49 = vld [vmem:[#allocation3 + $0x78] sm:$0xff]  ;;  %v8560_v24 = vmax.f32 %v8260_v42, %v8485_v37  ;;  %10107 = vmatmul.msk.f32.gmra.mxu1 %vm960_vm2, %v6535_v46  ;;  %v8112_v46 = vld [vmem:[#allocation3 + $0x50] sm:$0xff] }
 0x695   : > { %v7160_v13 = vadd.f32 %v7082_v49, %v12731_v9  ;;  %6438 = vst.msk [vmem:[#allocation3 + $0x80] sm:$0xff] %vm1615_vm3, %v6360_v60  ;;  %9950 = vmatmul.msk.f32.gmra.mxu3 %vm960_vm2, %v4932_v0  ;;  %10194 = vmatmul.msk.f32.gmra.mxu2 %vm960_vm2, %v7345_v2  ;;  %v8187_v37 = vld [vmem:[#allocation3 + $0x51] sm:$0xff] }
 0x696   : > { %v7882_v3 = vld [vmem:[#allocation3 + $0x70] sm:$0xff]  ;;  %8635 = vst.msk [vmem:[#allocation4 + $0x40] sm:$0xff] %vm1615_vm3, %v8560_v24  ;;  %v5484_v49 = vld [vmem:[#allocation3 + $0x98] sm:$0xff] }
 0x697   : > { %v7960_v25 = vadd.f32 %v7882_v3, %v12599_v56  ;;  %7238 = vst.msk [vmem:[#allocation3 + $0x78] sm:$0xff] %vm1615_vm3, %v7160_v13  ;;  %v8262_v3 = vmax.f32 %v8112_v46, %v8187_v37  ;;  %v4935_v37 = vld [vmem:[#allocation2 + $0x144] sm:$0xff]  ;;  %v7348_v46 = vld [vmem:[#allocation2 + $0x1ae] sm:$0xff] }
 0x698   : > { %v5285_v55 = vpop.f32.mrf.mxu3  ;;  %v8336_v9 = vld [vmem:[#allocation3 + $0x62] sm:$0xff] }
 0x699   : > { %8038 = vst.msk [vmem:[#allocation3 + $0x70] sm:$0xff] %vm1615_vm3, %v7960_v25  ;;  %v5561_v12 = vadd.f32 %v5483_v58, %v5285_v55  ;;  %v8411_v54 = vld [vmem:[#allocation3 + $0x63] sm:$0xff]  ;;  %v12804_v62 = vpop.f32.mrf.mxu1  ;;  %v12820_v55 = vpop.f32.mrf.mxu2  ;;  %v4934_v58 = vld [vmem:[#allocation2 + $0x13c] sm:$0xff] }
 0x69a   : > { %v6283_v14 = vld [vmem:[#allocation3 + $0x88] sm:$0xff]  ;;  %v8486_v29 = vmax.f32 %v8336_v9, %v8411_v54  ;;  %v6537_v9 = vld [vmem:[#allocation2 + $0x15d] sm:$0xff]  ;;  %v7347_v54 = vld [vmem:[#allocation2 + $0x1a6] sm:$0xff] }
 0x69b   : > { %v6361_v56 = vadd.f32 %v6283_v14, %v11693_v27  ;;  %5639 = vst.msk [vmem:[#allocation3 + $0x90] sm:$0xff] %vm1615_vm3, %v5561_v12 }
 0x69c   : > { %v7083_v28 = vld [vmem:[#allocation3 + $0x80] sm:$0xff]  ;;  %v8561_v61 = vmax.f32 %v8261_v39, %v8486_v29  ;;  %10108 = vmatmul.msk.f32.gmra.mxu1 %vm960_vm2, %v6536_v53 }
 0x69d   : > { %v7161_v11 = vadd.f32 %v7083_v28, %v12744_v7  ;;  %6439 = vst.msk [vmem:[#allocation3 + $0x88] sm:$0xff] %vm1615_vm3, %v6361_v56  ;;  %9951 = vmatmul.msk.f32.gmra.mxu3 %vm960_vm2, %v4933_v15  ;;  %10195 = vmatmul.msk.f32.gmra.mxu2 %vm960_vm2, %v7346_v50  ;;  %v8188_v39 = vld [vmem:[#allocation3 + $0x59] sm:$0xff] }
 0x69e   : > { %v7883_v42 = vld [vmem:[#allocation3 + $0x78] sm:$0xff]  ;;  %8636 = vst.msk [vmem:[#allocation4 + $0x48] sm:$0xff] %vm1615_vm3, %v8561_v61  ;;  %v5485_v56 = vld [vmem:[#allocation3 + $0xa0] sm:$0xff] }
 0x69f   : > { %v7961_v27 = vadd.f32 %v7883_v42, %v12613_v38  ;;  %7239 = vst.msk [vmem:[#allocation3 + $0x80] sm:$0xff] %vm1615_vm3, %v7161_v11  ;;  %v8113_v15 = vld [vmem:[#allocation3 + $0x58] sm:$0xff] }
 0x6a0   : > { %v5288_v60 = vpop.f32.mrf.mxu3  ;;  %v8337_v7 = vld [vmem:[#allocation3 + $0x6a] sm:$0xff]  ;;  %v8263_v50 = vmax.f32 %v8113_v15, %v8188_v39 }
 0x6a1   : > { %8039 = vst.msk [vmem:[#allocation3 + $0x78] sm:$0xff] %vm1615_vm3, %v7961_v27  ;;  %v5562_v0 = vadd.f32 %v5484_v49, %v5288_v60  ;;  %v8412_v24 = vld [vmem:[#allocation3 + $0x6b] sm:$0xff]  ;;  %v12817_v2 = vpop.f32.mrf.mxu1  ;;  %v6538_v60 = vld [vmem:[#allocation2 + $0x165] sm:$0xff] }
 0x6a2   : > { %v6284_v13 = vld [vmem:[#allocation3 + $0x90] sm:$0xff]  ;;  %v8487_v25 = vmax.f32 %v8337_v7, %v8412_v24  ;;  %v4936_v39 = vld [vmem:[#allocation2 + $0x14c] sm:$0xff] }
 0x6a3   : > { %v6362_v52 = vadd.f32 %v6284_v13, %v11710_v32  ;;  %5640 = vst.msk [vmem:[#allocation3 + $0x98] sm:$0xff] %vm1615_vm3, %v5562_v0  ;;  %v12838_v0 = vpop.f32.mrf.mxu2  ;;  %v8190_v15 = vld [vmem:[#allocation3 + $0x69] sm:$0xff] }
 0x6a4   : > { %v7084_v38 = vld [vmem:[#allocation3 + $0x88] sm:$0xff]  ;;  %v8562_v12 = vmax.f32 %v8262_v3, %v8487_v25  ;;  %10109 = vmatmul.msk.f32.gmra.mxu1 %vm960_vm2, %v6537_v9  ;;  %v8114_v25 = vld [vmem:[#allocation3 + $0x60] sm:$0xff] }
 0x6a5   : > { %v7162_v10 = vadd.f32 %v7084_v38, %v12759_v6  ;;  %6440 = vst.msk [vmem:[#allocation3 + $0x90] sm:$0xff] %vm1615_vm3, %v6362_v52  ;;  %9952 = vmatmul.msk.f32.gmra.mxu3 %vm960_vm2, %v4934_v58  ;;  %10196 = vmatmul.msk.f32.gmra.mxu2 %vm960_vm2, %v7347_v54 }
 0x6a6   : > { %v7884_v14 = vld [vmem:[#allocation3 + $0x80] sm:$0xff]  ;;  %8637 = vst.msk [vmem:[#allocation4 + $0x50] sm:$0xff] %vm1615_vm3, %v8562_v12 }
 0x6a7   : > { %v7962_v32 = vadd.f32 %v7884_v14, %v12627_v33  ;;  %7240 = vst.msk [vmem:[#allocation3 + $0x88] sm:$0xff] %vm1615_vm3, %v7162_v10 }
 0x6a8   : > { %v5291_v29 = vpop.f32.mrf.mxu3  ;;  %v8338_v6 = vld [vmem:[#allocation3 + $0x72] sm:$0xff] }
 0x6a9   : > { %8040 = vst.msk [vmem:[#allocation3 + $0x80] sm:$0xff] %vm1615_vm3, %v7962_v32  ;;  %v5563_v28 = vadd.f32 %v5485_v56, %v5291_v29  ;;  %v8413_v53 = vld [vmem:[#allocation3 + $0x73] sm:$0xff]  ;;  %v12832_v11 = vpop.f32.mrf.mxu1  ;;  %v6539_v29 = vld [vmem:[#allocation2 + $0x16d] sm:$0xff] }
 0x6aa   : > { %v6285_v61 = vld [vmem:[#allocation3 + $0x98] sm:$0xff]  ;;  %v8488_v42 = vmax.f32 %v8338_v6, %v8413_v53  ;;  %v7349_v6 = vld [vmem:[#allocation2 + $0x1b6] sm:$0xff] }
 0x6ab   : > { %v6363_v27 = vadd.f32 %v6285_v61, %v11727_v17  ;;  %5641 = vst.msk [vmem:[#allocation3 + $0xa0] sm:$0xff] %vm1615_vm3, %v5563_v28  ;;  %v8189_v17 = vld [vmem:[#allocation3 + $0x61] sm:$0xff]  ;;  %v12859_v53 = vpop.f32.mrf.mxu2 }
 0x6ac   : > { %v7085_v33 = vld [vmem:[#allocation3 + $0x90] sm:$0xff]  ;;  %v8563_v49 = vmax.f32 %v8263_v50, %v8488_v42  ;;  %10110 = vmatmul.msk.f32.gmra.mxu1 %vm960_vm2, %v6538_v60  ;;  %v8264_v9 = vmax.f32 %v8114_v25, %v8189_v17  ;;  %v8115_v50 = vld [vmem:[#allocation3 + $0x68] sm:$0xff] }
 0x6ad   : > { %v7163_v7 = vadd.f32 %v7085_v33, %v12774_v5  ;;  %6441 = vst.msk [vmem:[#allocation3 + $0x98] sm:$0xff] %vm1615_vm3, %v6363_v27  ;;  %9953 = vmatmul.msk.f32.gmra.mxu3 %vm960_vm2, %v4935_v37  ;;  %10197 = vmatmul.msk.f32.gmra.mxu2 %vm960_vm2, %v7348_v46  ;;  %v5486_v5 = vld [vmem:[#allocation3 + $0xa8] sm:$0xff]  ;;  %v8265_v37 = vmax.f32 %v8115_v50, %v8190_v15  ;;  %v6541_v15 = vld [vmem:[#allocation2 + $0x17d] sm:$0xff] }
 0x6ae   : > { %v7885_v24 = vld [vmem:[#allocation3 + $0x88] sm:$0xff]  ;;  %8638 = vst.msk [vmem:[#allocation4 + $0x58] sm:$0xff] %vm1615_vm3, %v8563_v49 }
 0x6af   : > { %v7963_v13 = vadd.f32 %v7885_v24, %v12641_v22  ;;  %7241 = vst.msk [vmem:[#allocation3 + $0x90] sm:$0xff] %vm1615_vm3, %v7163_v7  ;;  %v4937_v17 = vld [vmem:[#allocation2 + $0x154] sm:$0xff] }
 0x6b0   : > { %v5294_v3 = vpop.f32.mrf.mxu3  ;;  %v8339_v52 = vld [vmem:[#allocation3 + $0x7a] sm:$0xff] }
 0x6b1   : > { %v8414_v38 = vld [vmem:[#allocation3 + $0x7b] sm:$0xff]  ;;  %8041 = vst.msk [vmem:[#allocation3 + $0x88] sm:$0xff] %vm1615_vm3, %v7963_v13  ;;  %v5564_v58 = vadd.f32 %v5486_v5, %v5294_v3  ;;  %v12847_v54 = vpop.f32.mrf.mxu1  ;;  %v6540_v13 = vld [vmem:[#allocation2 + $0x175] sm:$0xff] }
 0x6b2   : > { %v8489_v12 = vmax.f32 %v8339_v52, %v8414_v38  ;;  %v6286_v10 = vld [vmem:[#allocation3 + $0xa0] sm:$0xff]  ;;  %v7350_v3 = vld [vmem:[#allocation2 + $0x1be] sm:$0xff] }
 0x6b3   : > { %v6364_v14 = vadd.f32 %v6286_v10, %v11746_v1  ;;  %5642 = vst.msk [vmem:[#allocation3 + $0xa8] sm:$0xff] %vm1615_vm3, %v5564_v58  ;;  %v8191_v52 = vld [vmem:[#allocation3 + $0x71] sm:$0xff]  ;;  %v12875_v10 = vpop.f32.mrf.mxu2  ;;  %v8192_v50 = vld [vmem:[#allocation3 + $0x79] sm:$0xff] }
 0x6b4   : > { %v8564_v22 = vmax.f32 %v8264_v9, %v8489_v12  ;;  %v7086_v32 = vld [vmem:[#allocation3 + $0x98] sm:$0xff]  ;;  %10111 = vmatmul.msk.f32.gmra.mxu1 %vm960_vm2, %v6539_v29 }
 0x6b5   : > { %v7164_v56 = vadd.f32 %v7086_v32, %v12789_v36  ;;  %6442 = vst.msk [vmem:[#allocation3 + $0xa0] sm:$0xff] %vm1615_vm3, %v6364_v14  ;;  %9954 = vmatmul.msk.f32.gmra.mxu3 %vm960_vm2, %v4936_v39  ;;  %10198 = vmatmul.msk.f32.gmra.mxu2 %vm960_vm2, %v7349_v6  ;;  %v5487_v36 = vld [vmem:[#allocation3 + $0xb0] sm:$0xff]  ;;  %v5488_v38 = vld [vmem:[#allocation3 + $0xb8] sm:$0xff] }
 0x6b6   : > { %v7886_v28 = vld [vmem:[#allocation3 + $0x90] sm:$0xff]  ;;  %8639 = vst.msk [vmem:[#allocation4 + $0x60] sm:$0xff] %vm1615_vm3, %v8564_v22 }
 0x6b7   : > { %v7964_v1 = vadd.f32 %v7886_v28, %v12655_v63  ;;  %7242 = vst.msk [vmem:[#allocation3 + $0x98] sm:$0xff] %vm1615_vm3, %v7164_v56  ;;  %v4938_v28 = vld [vmem:[#allocation2 + $0x15c] sm:$0xff] }
 0x6b8   : > { %v5297_v61 = vpop.f32.mrf.mxu3  ;;  %v8340_v42 = vld [vmem:[#allocation3 + $0x82] sm:$0xff] }
 0x6b9   : > { %v8415_v27 = vld [vmem:[#allocation3 + $0x83] sm:$0xff]  ;;  %8042 = vst.msk [vmem:[#allocation3 + $0x90] sm:$0xff] %vm1615_vm3, %v7964_v1  ;;  %v5565_v33 = vadd.f32 %v5487_v36, %v5297_v61  ;;  %v12862_v7 = vpop.f32.mrf.mxu1 }
 0x6ba   : > { %v8490_v60 = vmax.f32 %v8340_v42, %v8415_v27  ;;  %v6287_v49 = vld [vmem:[#allocation3 + $0xa8] sm:$0xff]  ;;  %v7351_v36 = vld [vmem:[#allocation2 + $0x1c6] sm:$0xff] }
 0x6bb   : > { %v6365_v46 = vadd.f32 %v6287_v49, %v11763_v57  ;;  %5643 = vst.msk [vmem:[#allocation3 + $0xb0] sm:$0xff] %vm1615_vm3, %v5565_v33  ;;  %v5489_v42 = vld [vmem:[#allocation3 + $0xc0] sm:$0xff] }
 0x6bc   : > { %v8565_v63 = vmax.f32 %v8265_v37, %v8490_v60  ;;  %v7087_v24 = vld [vmem:[#allocation3 + $0xa0] sm:$0xff]  ;;  %10112 = vmatmul.msk.f32.gmra.mxu1 %vm960_vm2, %v6540_v13 }
 0x6bd   : > { %v7165_v5 = vadd.f32 %v7087_v24, %v12804_v62  ;;  %6443 = vst.msk [vmem:[#allocation3 + $0xa8] sm:$0xff] %vm1615_vm3, %v6365_v46  ;;  %9955 = vmatmul.msk.f32.gmra.mxu3 %vm960_vm2, %v4937_v17  ;;  %10199 = vmatmul.msk.f32.gmra.mxu2 %vm960_vm2, %v7350_v3  ;;  %v8116_v62 = vld [vmem:[#allocation3 + $0x70] sm:$0xff]  ;;  %v12892_v17 = vpop.f32.mrf.mxu2  ;;  %v4939_v3 = vld [vmem:[#allocation2 + $0x164] sm:$0xff] }
 0x6be   : > { %v7887_v25 = vld [vmem:[#allocation3 + $0x98] sm:$0xff]  ;;  %8640 = vst.msk [vmem:[#allocation4 + $0x68] sm:$0xff] %vm1615_vm3, %v8565_v63  ;;  %v8266_v22 = vmax.f32 %v8116_v62, %v8191_v52 }
 0x6bf   : > { %v7965_v57 = vadd.f32 %v7887_v25, %v12669_v41  ;;  %7243 = vst.msk [vmem:[#allocation3 + $0xa0] sm:$0xff] %vm1615_vm3, %v7165_v5  ;;  %v6542_v25 = vld [vmem:[#allocation2 + $0x185] sm:$0xff] }
 0x6c0   : > { %v5300_v58 = vpop.f32.mrf.mxu3  ;;  %v8341_v9 = vld [vmem:[#allocation3 + $0x8a] sm:$0xff] }
 0x6c1   : > { %v8416_v12 = vld [vmem:[#allocation3 + $0x8b] sm:$0xff]  ;;  %8043 = vst.msk [vmem:[#allocation3 + $0x98] sm:$0xff] %vm1615_vm3, %v7965_v57  ;;  %v5566_v14 = vadd.f32 %v5488_v38, %v5300_v58  ;;  %v12877_v29 = vpop.f32.mrf.mxu1  ;;  %v8193_v58 = vld [vmem:[#allocation3 + $0x81] sm:$0xff] }
 0x6c2   : > { %v8491_v32 = vmax.f32 %v8341_v9, %v8416_v12  ;;  %v6288_v39 = vld [vmem:[#allocation3 + $0xb0] sm:$0xff]  ;;  %v7352_v57 = vld [vmem:[#allocation2 + $0x1ce] sm:$0xff] }
 0x6c3   : > { %v6366_v56 = vadd.f32 %v6288_v39, %v11783_v43  ;;  %5644 = vst.msk [vmem:[#allocation3 + $0xb8] sm:$0xff] %vm1615_vm3, %v5566_v14  ;;  %v5490_v9 = vld [vmem:[#allocation3 + $0xc8] sm:$0xff]  ;;  %v8118_v14 = vld [vmem:[#allocation3 + $0x80] sm:$0xff] }
 0x6c4   : > { %v8566_v41 = vmax.f32 %v8266_v22, %v8491_v32  ;;  %v7088_v6 = vld [vmem:[#allocation3 + $0xa8] sm:$0xff]  ;;  %10113 = vmatmul.msk.f32.gmra.mxu1 %vm960_vm2, %v6541_v15 }
 0x6c5   : > { %v7166_v1 = vadd.f32 %v7088_v6, %v12817_v2  ;;  %6444 = vst.msk [vmem:[#allocation3 + $0xb0] sm:$0xff] %vm1615_vm3, %v6366_v56  ;;  %9956 = vmatmul.msk.f32.gmra.mxu3 %vm960_vm2, %v4938_v28  ;;  %10200 = vmatmul.msk.f32.gmra.mxu2 %vm960_vm2, %v7351_v36  ;;  %v8117_v2 = vld [vmem:[#allocation3 + $0x78] sm:$0xff]  ;;  %v8268_v56 = vmax.f32 %v8118_v14, %v8193_v58  ;;  %v4940_v28 = vld [vmem:[#allocation2 + $0x16c] sm:$0xff] }
 0x6c6   : > { %v7888_v61 = vld [vmem:[#allocation3 + $0xa0] sm:$0xff]  ;;  %8641 = vst.msk [vmem:[#allocation4 + $0x70] sm:$0xff] %vm1615_vm3, %v8566_v41  ;;  %v8267_v49 = vmax.f32 %v8117_v2, %v8192_v50  ;;  %v7353_v50 = vld [vmem:[#allocation2 + $0x1d6] sm:$0xff] }
 0x6c7   : > { %v7966_v43 = vadd.f32 %v7888_v61, %v12684_v31  ;;  %7244 = vst.msk [vmem:[#allocation3 + $0xa8] sm:$0xff] %vm1615_vm3, %v7166_v1  ;;  %v6543_v15 = vld [vmem:[#allocation2 + $0x18d] sm:$0xff]  ;;  %v12910_v61 = vpop.f32.mrf.mxu2 }
 0x6c8   : > { %v5303_v27 = vpop.f32.mrf.mxu3  ;;  %v8342_v33 = vld [vmem:[#allocation3 + $0x92] sm:$0xff] }
 0x6c9   : > { %v8417_v37 = vld [vmem:[#allocation3 + $0x93] sm:$0xff]  ;;  %8044 = vst.msk [vmem:[#allocation3 + $0xa0] sm:$0xff] %vm1615_vm3, %v7966_v43  ;;  %v5567_v60 = vadd.f32 %v5489_v42, %v5303_v27  ;;  %v12890_v24 = vpop.f32.mrf.mxu1  ;;  %v8194_v27 = vld [vmem:[#allocation3 + $0x89] sm:$0xff] }
 0x6ca   : > { %v8492_v46 = vmax.f32 %v8342_v33, %v8417_v37  ;;  %v6289_v63 = vld [vmem:[#allocation3 + $0xb8] sm:$0xff]  ;;  %v5491_v33 = vld [vmem:[#allocation3 + $0xd0] sm:$0xff] }
 0x6cb   : > { %v6367_v13 = vadd.f32 %v6289_v63, %v11805_v47  ;;  %5645 = vst.msk [vmem:[#allocation3 + $0xc0] sm:$0xff] %vm1615_vm3, %v5567_v60  ;;  %v8195_v14 = vld [vmem:[#allocation3 + $0x91] sm:$0xff] }
 0x6cc   : > { %v8567_v31 = vmax.f32 %v8267_v49, %v8492_v46  ;;  %v7089_v5 = vld [vmem:[#allocation3 + $0xb0] sm:$0xff]  ;;  %10114 = vmatmul.msk.f32.gmra.mxu1 %vm960_vm2, %v6542_v25  ;;  %v8806_v49 = vld [vmem:[#allocation4 + $0x68] sm:$0xff]  ;;  %v8119_v46 = vld [vmem:[#allocation3 + $0x88] sm:$0xff] }
 0x6cd   : > { %v7167_v52 = vadd.f32 %v7089_v5, %v12832_v11  ;;  %6445 = vst.msk [vmem:[#allocation3 + $0xb8] sm:$0xff] %vm1615_vm3, %v6367_v13  ;;  %9957 = vmatmul.msk.f32.gmra.mxu3 %vm960_vm2, %v4939_v3  ;;  %10201 = vmatmul.msk.f32.gmra.mxu2 %vm960_vm2, %v7352_v57  ;;  %v8269_v5 = vmax.f32 %v8119_v46, %v8194_v27  ;;  %v8805_v25 = vld [vmem:[#allocation4 + $0x60] sm:$0xff] }
 0x6ce   : > { %v7889_v38 = vld [vmem:[#allocation3 + $0xa8] sm:$0xff]  ;;  %8642 = vst.msk [vmem:[#allocation4 + $0x78] sm:$0xff] %vm1615_vm3, %v8567_v31 }
 0x6cf   : > { %v7967_v47 = vadd.f32 %v7889_v38, %v12699_v59  ;;  %7245 = vst.msk [vmem:[#allocation3 + $0xb0] sm:$0xff] %vm1615_vm3, %v7167_v52  ;;  %v4941_v57 = vld [vmem:[#allocation2 + $0x174] sm:$0xff] }
 0x6d0   : > { %v5306_v62 = vpop.f32.mrf.mxu3  ;;  %v8343_v11 = vld [vmem:[#allocation3 + $0x9a] sm:$0xff]  ;;  %v6544_v38 = vld [vmem:[#allocation2 + $0x195] sm:$0xff] }
 0x6d1   : > { %8045 = vst.msk [vmem:[#allocation3 + $0xa8] sm:$0xff] %vm1615_vm3, %v7967_v47  ;;  %v5568_v12 = vadd.f32 %v5490_v9, %v5306_v62  ;;  %v8418_v22 = vld [vmem:[#allocation3 + $0x9b] sm:$0xff]  ;;  %v12905_v39 = vpop.f32.mrf.mxu1  ;;  %v8804_v9 = vld [vmem:[#allocation4 + $0x58] sm:$0xff] }
 0x6d2   : > { %v6290_v32 = vld [vmem:[#allocation3 + $0xc0] sm:$0xff]  ;;  %v8493_v41 = vmax.f32 %v8343_v11, %v8418_v22  ;;  %v7354_v62 = vld [vmem:[#allocation2 + $0x1de] sm:$0xff] }
 0x6d3   : > { %v6368_v6 = vadd.f32 %v6290_v32, %v11822_v40  ;;  %5646 = vst.msk [vmem:[#allocation3 + $0xc8] sm:$0xff] %vm1615_vm3, %v5568_v12  ;;  %v12932_v12 = vpop.f32.mrf.mxu2  ;;  %v5492_v32 = vld [vmem:[#allocation3 + $0xd8] sm:$0xff] }
 0x6d4   : > { %v7090_v59 = vld [vmem:[#allocation3 + $0xb8] sm:$0xff]  ;;  %v8568_v1 = vmax.f32 %v8268_v56, %v8493_v41  ;;  %10115 = vmatmul.msk.f32.gmra.mxu1 %vm960_vm2, %v6543_v15 }
 0x6d5   : > { %v7168_v36 = vadd.f32 %v7090_v59, %v12847_v54  ;;  %6446 = vst.msk [vmem:[#allocation3 + $0xc0] sm:$0xff] %vm1615_vm3, %v6368_v6  ;;  %9958 = vmatmul.msk.f32.gmra.mxu3 %vm960_vm2, %v4940_v28  ;;  %v8808_v43 = vld [vmem:[#allocation4 + $0x78] sm:$0xff]  ;;  %10202 = vmatmul.msk.f32.gmra.mxu2 %vm960_vm2, %v7353_v50  ;;  %v8807_v54 = vld [vmem:[#allocation4 + $0x70] sm:$0xff]  ;;  %v8802_v6 = vld [vmem:[#allocation4 + $0x48] sm:$0xff] }
 0x6d6   : > { %v7890_v42 = vld [vmem:[#allocation3 + $0xb0] sm:$0xff]  ;;  %8931 = vmatpush.msrb.mxu3 %v8808_v43  ;;  %8643 = vst.msk [vmem:[#allocation4 + $0x80] sm:$0xff] %vm1615_vm3, %v8568_v1 }
 0x6d7   : > { %v7968_v40 = vadd.f32 %v7890_v42, %v12714_v16  ;;  %7246 = vst.msk [vmem:[#allocation3 + $0xb8] sm:$0xff] %vm1615_vm3, %v7168_v36  ;;  %v8120_v59 = vld [vmem:[#allocation3 + $0x90] sm:$0xff] }
 0x6d8   : > { %8932 = vmatpush.msrb.mxu3 %v8807_v54  ;;  %v5309_v2 = vpop.f32.mrf.mxu3  ;;  %v8344_v37 = vld [vmem:[#allocation3 + $0xa2] sm:$0xff]  ;;  %v8801_v43 = vld [vmem:[#allocation4 + $0x40] sm:$0xff] }
 0x6d9   : > { %8046 = vst.msk [vmem:[#allocation3 + $0xb0] sm:$0xff] %vm1615_vm3, %v7968_v40  ;;  %v5569_v60 = vadd.f32 %v5491_v33, %v5309_v2  ;;  %v8419_v63 = vld [vmem:[#allocation3 + $0xa3] sm:$0xff]  ;;  %v12920_v31 = vpop.f32.mrf.mxu1  ;;  %v4942_v40 = vld [vmem:[#allocation2 + $0x17c] sm:$0xff] }
 0x6da   : > { %v6291_v13 = vld [vmem:[#allocation3 + $0xc8] sm:$0xff]  ;;  %8933 = vmatpush.msrb.mxu3 %v8806_v49  ;;  %v8494_v16 = vmax.f32 %v8344_v37, %v8419_v63  ;;  %v6545_v54 = vld [vmem:[#allocation2 + $0x19d] sm:$0xff]  ;;  %v7355_v33 = vld [vmem:[#allocation2 + $0x1e6] sm:$0xff] }
 0x6db   : > { %v6369_v3 = vadd.f32 %v6291_v13, %v11840_v30  ;;  %5647 = vst.msk [vmem:[#allocation3 + $0xd0] sm:$0xff] %vm1615_vm3, %v5569_v60  ;;  %v8800_v37 = vld [vmem:[#allocation4 + $0x38] sm:$0xff]  ;;  %v8799_v49 = vld [vmem:[#allocation4 + $0x30] sm:$0xff] }
 0x6dc   : > { %v7091_v52 = vld [vmem:[#allocation3 + $0xc0] sm:$0xff]  ;;  %8934 = vmatpush.msrb.mxu3 %v8805_v25  ;;  %v8569_v47 = vmax.f32 %v8269_v5, %v8494_v16  ;;  %10116 = vmatmul.msk.f32.gmra.mxu1 %vm960_vm2, %v6544_v38  ;;  %v12948_v5 = vpop.f32.mrf.mxu2  ;;  %v8121_v25 = vld [vmem:[#allocation3 + $0x98] sm:$0xff] }
 0x6dd   : > { %v7169_v58 = vadd.f32 %v7091_v52, %v12862_v7  ;;  %6447 = vst.msk [vmem:[#allocation3 + $0xc8] sm:$0xff] %vm1615_vm3, %v6369_v3  ;;  %9959 = vmatmul.msk.f32.gmra.mxu3 %vm960_vm2, %v4941_v57  ;;  %10203 = vmatmul.msk.f32.gmra.mxu2 %vm960_vm2, %v7354_v62  ;;  %v8803_v7 = vld [vmem:[#allocation4 + $0x50] sm:$0xff]  ;;  %v8798_v3 = vld [vmem:[#allocation4 + $0x28] sm:$0xff]  ;;  %v8797_v62 = vld [vmem:[#allocation4 + $0x20] sm:$0xff] }
 0x6de   : > { %v7891_v11 = vld [vmem:[#allocation3 + $0xb8] sm:$0xff]  ;;  %8935 = vmatpush.msrb.mxu3 %v8804_v9  ;;  %8644 = vst.msk [vmem:[#allocation4 + $0x88] sm:$0xff] %vm1615_vm3, %v8569_v47  ;;  %v5493_v63 = vld [vmem:[#allocation3 + $0xe0] sm:$0xff] }
 0x6df   : > { %v7969_v30 = vadd.f32 %v7891_v11, %v12729_v44  ;;  %7247 = vst.msk [vmem:[#allocation3 + $0xc0] sm:$0xff] %vm1615_vm3, %v7169_v58  ;;  %v8270_v44 = vmax.f32 %v8120_v59, %v8195_v14  ;;  %v4943_v11 = vld [vmem:[#allocation2 + $0x184] sm:$0xff]  ;;  %v5494_v59 = vld [vmem:[#allocation3 + $0xe8] sm:$0xff] }
 0x6e0   : > { %8936 = vmatpush.msrb.mxu3 %v8803_v7  ;;  %v5312_v22 = vpop.f32.mrf.mxu3  ;;  %v8345_v56 = vld [vmem:[#allocation3 + $0xaa] sm:$0xff] }
 0x6e1   : > { %8047 = vst.msk [vmem:[#allocation3 + $0xb8] sm:$0xff] %vm1615_vm3, %v7969_v30  ;;  %v5570_v41 = vadd.f32 %v5492_v32, %v5312_v22  ;;  %v8420_v28 = vld [vmem:[#allocation3 + $0xab] sm:$0xff]  ;;  %v12935_v1 = vpop.f32.mrf.mxu1  ;;  %v6546_v30 = vld [vmem:[#allocation2 + $0x1a5] sm:$0xff] }
 0x6e2   : > { %v6292_v15 = vld [vmem:[#allocation3 + $0xd0] sm:$0xff]  ;;  %8937 = vmatpush.msrb.mxu3 %v8802_v6  ;;  %v8495_v36 = vmax.f32 %v8345_v56, %v8420_v28  ;;  %v7356_v22 = vld [vmem:[#allocation2 + $0x1ee] sm:$0xff] }
 0x6e3   : > { %v6370_v50 = vadd.f32 %v6292_v15, %v11861_v26  ;;  %5648 = vst.msk [vmem:[#allocation3 + $0xd8] sm:$0xff] %vm1615_vm3, %v5570_v41  ;;  %v8796_v32 = vld [vmem:[#allocation4 + $0x18] sm:$0xff]  ;;  %v8795_v41 = vld [vmem:[#allocation4 + $0x10] sm:$0xff] }
 0x6e4   : > { %v7092_v42 = vld [vmem:[#allocation3 + $0xc8] sm:$0xff]  ;;  %8938 = vmatpush.msrb.mxu3 %v8801_v43  ;;  %v8570_v27 = vmax.f32 %v8270_v44, %v8495_v36  ;;  %10117 = vmatmul.msk.f32.gmra.mxu1 %vm960_vm2, %v6545_v54  ;;  %v8794_v44 = vld [vmem:[#allocation4 + $0x8] sm:$0xff]  ;;  %v8122_v36 = vld [vmem:[#allocation3 + $0xa0] sm:$0xff]  ;;  %v12965_v54 = vpop.f32.mrf.mxu2 }
 0x6e5   : > { %v7170_v2 = vadd.f32 %v7092_v42, %v12877_v29  ;;  %6448 = vst.msk [vmem:[#allocation3 + $0xd0] sm:$0xff] %vm1615_vm3, %v6370_v50  ;;  %9960 = vmatmul.msk.f32.gmra.mxu3 %vm960_vm2, %v4942_v40  ;;  %10204 = vmatmul.msk.f32.gmra.mxu2 %vm960_vm2, %v7355_v33  ;;  %v8196_v29 = vld [vmem:[#allocation3 + $0x99] sm:$0xff] }
 0x6e6   : > { %v7892_v60 = vld [vmem:[#allocation3 + $0xc0] sm:$0xff]  ;;  %8939 = vmatpush.msrb.mxu3 %v8800_v37  ;;  %8645 = vst.msk [vmem:[#allocation4 + $0x90] sm:$0xff] %vm1615_vm3, %v8570_v27 }
 0x6e7   : > { %v7970_v26 = vadd.f32 %v7892_v60, %v12748_v20  ;;  %7248 = vst.msk [vmem:[#allocation3 + $0xc8] sm:$0xff] %vm1615_vm3, %v7170_v2  ;;  %v8271_v20 = vmax.f32 %v8121_v25, %v8196_v29  ;;  %v8793_v2 = vld [vmem:[#allocation4] sm:$0xff]  ;;  %v4944_v37 = vld [vmem:[#allocation2 + $0x18c] sm:$0xff] }
 0x6e8   : > { %8940 = vmatpush.msrb.mxu3 %v8799_v49  ;;  %v5315_v46 = vpop.f32.mrf.mxu3  ;;  %v8346_v13 = vld [vmem:[#allocation3 + $0xb2] sm:$0xff]  ;;  %v6547_v60 = vld [vmem:[#allocation2 + $0x1ad] sm:$0xff] }
 0x6e9   : > { %8048 = vst.msk [vmem:[#allocation3 + $0xc0] sm:$0xff] %vm1615_vm3, %v7970_v26  ;;  %v5571_v16 = vadd.f32 %v5493_v63, %v5315_v46  ;;  %v8421_v52 = vld [vmem:[#allocation3 + $0xb3] sm:$0xff]  ;;  %v12950_v38 = vpop.f32.mrf.mxu1  ;;  %v8198_v63 = vld [vmem:[#allocation3 + $0xa9] sm:$0xff] }
 0x6ea   : > { %v6293_v57 = vld [vmem:[#allocation3 + $0xd8] sm:$0xff]  ;;  %8941 = vmatpush.msrb.mxu3 %v8798_v3  ;;  %v8496_v47 = vmax.f32 %v8346_v13, %v8421_v52  ;;  %v7357_v29 = vld [vmem:[#allocation2 + $0x1f6] sm:$0xff] }
 0x6eb   : > { %v6371_v58 = vadd.f32 %v6293_v57, %v11883_v34  ;;  %5649 = vst.msk [vmem:[#allocation3 + $0xe0] sm:$0xff] %vm1615_vm3, %v5571_v16  ;;  %v5495_v16 = vld [vmem:[#allocation3 + $0xf0] sm:$0xff]  ;;  %v8123_v25 = vld [vmem:[#allocation3 + $0xa8] sm:$0xff] }
 0x6ec   : > { %v7093_v9 = vld [vmem:[#allocation3 + $0xd0] sm:$0xff]  ;;  %8942 = vmatpush.msrb.mxu3 %v8797_v62  ;;  %v8571_v7 = vmax.f32 %v8271_v20, %v8496_v47  ;;  %10118 = vmatmul.msk.f32.gmra.mxu1 %vm960_vm2, %v6546_v30  ;;  %v8273_v47 = vmax.f32 %v8123_v25, %v8198_v63 }
 0x6ed   : > { %v7171_v14 = vadd.f32 %v7093_v9, %v12890_v24  ;;  %6449 = vst.msk [vmem:[#allocation3 + $0xd8] sm:$0xff] %vm1615_vm3, %v6371_v58  ;;  %9961 = vmatmul.msk.f32.gmra.mxu3 %vm960_vm2, %v4943_v11  ;;  %10205 = vmatmul.msk.f32.gmra.mxu2 %vm960_vm2, %v7356_v22  ;;  %v8197_v24 = vld [vmem:[#allocation3 + $0xa1] sm:$0xff]  ;;  %v4945_v9 = vld [vmem:[#allocation2 + $0x194] sm:$0xff]  ;;  %v7358_v22 = vld [vmem:[#allocation2 + $0x1fe] sm:$0xff] }
 0x6ee   : > { %v7893_v56 = vld [vmem:[#allocation3 + $0xc8] sm:$0xff]  ;;  %8943 = vmatpush.msrb.mxu3 %v8796_v32  ;;  %8646 = vst.msk [vmem:[#allocation4 + $0x98] sm:$0xff] %vm1615_vm3, %v8571_v7  ;;  %v8272_v40 = vmax.f32 %v8122_v36, %v8197_v24  ;;  %v12982_v7 = vpop.f32.mrf.mxu2 }
 0x6ef   : > { %v7971_v34 = vadd.f32 %v7893_v56, %v12765_v19  ;;  %7249 = vst.msk [vmem:[#allocation3 + $0xd0] sm:$0xff] %vm1615_vm3, %v7171_v14  ;;  %v6548_v11 = vld [vmem:[#allocation2 + $0x1b5] sm:$0xff] }
 0x6f0   : > { %8944 = vmatpush.msrb.mxu3 %v8795_v41  ;;  %v5318_v6 = vpop.f32.mrf.mxu3  ;;  %v8347_v28 = vld [vmem:[#allocation3 + $0xba] sm:$0xff]  ;;  %v8199_v56 = vld [vmem:[#allocation3 + $0xb1] sm:$0xff] }
 0x6f1   : > { %8049 = vst.msk [vmem:[#allocation3 + $0xc8] sm:$0xff] %vm1615_vm3, %v7971_v34  ;;  %v5572_v15 = vadd.f32 %v5494_v59, %v5318_v6  ;;  %v8422_v50 = vld [vmem:[#allocation3 + $0xbb] sm:$0xff]  ;;  %v12963_v42 = vpop.f32.mrf.mxu1  ;;  %v8124_v6 = vld [vmem:[#allocation3 + $0xb0] sm:$0xff] }
 0x6f2   : > { %v6294_v43 = vld [vmem:[#allocation3 + $0xe0] sm:$0xff]  ;;  %8945 = vmatpush.msrb.mxu3 %v8794_v44  ;;  %v8497_v19 = vmax.f32 %v8347_v28, %v8422_v50  ;;  %v5496_v41 = vld [vmem:[#allocation3 + $0xf8] sm:$0xff]  ;;  %v8274_v44 = vmax.f32 %v8124_v6, %v8199_v56  ;;  %v14144_v6 = vld [vmem:[#allocation6_spill] sm:$0xff] }
 0x6f3   : > { %v6372_v27 = vadd.f32 %v6294_v43, %v11902_v18  ;;  %5650 = vst.msk [vmem:[#allocation3 + $0xe8] sm:$0xff] %vm1615_vm3, %v5572_v15  ;;  %v4946_v43 = vld [vmem:[#allocation2 + $0x19c] sm:$0xff] }
 0x6f4   : > { %v7094_v33 = vld [vmem:[#allocation3 + $0xd8] sm:$0xff]  ;;  %8946 = vmatpush.msrb.mxu3 %v8793_v2  ;;  %v8572_v26 = vmax.f32 %v8272_v40, %v8497_v19  ;;  %10119 = vmatmul.msk.f32.gmra.mxu1 %vm960_vm2, %v6547_v60 }
 0x6f5   : > { %v7172_v49 = vadd.f32 %v7094_v33, %v12905_v39  ;;  %6450 = vst.msk [vmem:[#allocation3 + $0xe0] sm:$0xff] %vm1615_vm3, %v6372_v27  ;;  %9962 = vmatmul.msk.f32.gmra.mxu3 %vm960_vm2, %v4944_v37  ;;  %10206 = vmatmul.msk.f32.gmra.mxu2 %vm960_vm2, %v7357_v29  ;;  %v6549_v40 = vld [vmem:[#allocation2 + $0x1bd] sm:$0xff]  ;;  %v7359_v2 = vld [vmem:[#allocation2 + $0x206] sm:$0xff] }
 0x6f6   : > { %v7894_v46 = vld [vmem:[#allocation3 + $0xd0] sm:$0xff]  ;;  %8647 = vst.msk [vmem:[#allocation4 + $0xa0] sm:$0xff] %vm1615_vm3, %v8572_v26  ;;  %v13004_v37 = vpop.f32.mrf.mxu2  ;;  %v8200_v60 = vld [vmem:[#allocation3 + $0xb9] sm:$0xff] }
 0x6f7   : > { %v7972_v18 = vadd.f32 %v7894_v46, %v12786_v48  ;;  %7250 = vst.msk [vmem:[#allocation3 + $0xd8] sm:$0xff] %vm1615_vm3, %v7172_v49  ;;  %v5497_v26 = vld [vmem:[#allocation3 + $0x100] sm:$0xff]  ;;  %v8125_v46 = vld [vmem:[#allocation3 + $0xb8] sm:$0xff] }
 0x6f8   : > { %v5321_v13 = vpop.f32.mrf.mxu3  ;;  %v8348_v39 = vld [vmem:[#allocation3 + $0xc2] sm:$0xff] }
 0x6f9   : > { %8050 = vst.msk [vmem:[#allocation3 + $0xd0] sm:$0xff] %vm1615_vm3, %v7972_v18  ;;  %v5573_v3 = vadd.f32 %v5495_v16, %v5321_v13  ;;  %v8423_v52 = vld [vmem:[#allocation3 + $0xc3] sm:$0xff]  ;;  %v12978_v20 = vpop.f32.mrf.mxu1  ;;  %v8275_v16 = vmax.f32 %v8125_v46, %v8200_v60 }
 0x6fa   : > { %v6295_v57 = vld [vmem:[#allocation3 + $0xe8] sm:$0xff]  ;;  %v8498_v58 = vmax.f32 %v8348_v39, %v8423_v52  ;;  %v4947_v52 = vld [vmem:[#allocation2 + $0x1a4] sm:$0xff] }
 0x6fb   : > { %v6373_v62 = vadd.f32 %v6295_v57, %v11924_v23  ;;  %5651 = vst.msk [vmem:[#allocation3 + $0xf0] sm:$0xff] %vm1615_vm3, %v5573_v3  ;;  %v14143_v3 = vld [vmem:[#allocation5_spill] sm:$0xff]  ;;  %v6550_v57 = vld [vmem:[#allocation2 + $0x1c5] sm:$0xff] }
 0x6fc   : > { %v7095_v48 = vld [vmem:[#allocation3 + $0xe0] sm:$0xff]  ;;  %v8573_v30 = vmax.f32 %v8273_v47, %v8498_v58  ;;  %10120 = vmatmul.msk.f32.gmra.mxu1 %vm960_vm2, %v6548_v11 }
 0x6fd   : > { %v7173_v14 = vadd.f32 %v7095_v48, %v12920_v31  ;;  %6451 = vst.msk [vmem:[#allocation3 + $0xe8] sm:$0xff] %vm1615_vm3, %v6373_v62  ;;  %9963 = vmatmul.msk.f32.gmra.mxu3 %vm960_vm2, %v4945_v9  ;;  %10207 = vmatmul.msk.f32.gmra.mxu2 %vm960_vm2, %v7358_v22  ;;  %v7360_v62 = vld [vmem:[#allocation2 + $0x20e] sm:$0xff] }
 0x6fe   : > { %v7895_v32 = vld [vmem:[#allocation3 + $0xd8] sm:$0xff]  ;;  %8648 = vst.msk [vmem:[#allocation4 + $0xa8] sm:$0xff] %vm1615_vm3, %v8573_v30  ;;  %v8201_v11 = vld [vmem:[#allocation3 + $0xc1] sm:$0xff]  ;;  %v13021_v22 = vpop.f32.mrf.mxu2 }
 0x6ff   : > { %v7973_v23 = vadd.f32 %v7895_v32, %v12802_v4  ;;  %7251 = vst.msk [vmem:[#allocation3 + $0xe0] sm:$0xff] %vm1615_vm3, %v7173_v14  ;;  %v5498_v14 = vld [vmem:[#allocation3 + $0x108] sm:$0xff] }
 0x700   : > { %v5324_v34 = vpop.f32.mrf.mxu3  ;;  %v8349_v31 = vld [vmem:[#allocation3 + $0xca] sm:$0xff] }
 0x701   : > { %8051 = vst.msk [vmem:[#allocation3 + $0xd8] sm:$0xff] %vm1615_vm3, %v7973_v23  ;;  %v5574_v24 = vadd.f32 %v5496_v41, %v5324_v34  ;;  %v8424_v59 = vld [vmem:[#allocation3 + $0xcb] sm:$0xff]  ;;  %v12993_v15 = vpop.f32.mrf.mxu1  ;;  %v8126_v23 = vld [vmem:[#allocation3 + $0xc0] sm:$0xff] }
 0x702   : > { %v6296_v28 = vld [vmem:[#allocation3 + $0xf0] sm:$0xff]  ;;  %v8499_v36 = vmax.f32 %v8349_v31, %v8424_v59  ;;  %v8276_v31 = vmax.f32 %v8126_v23, %v8201_v11  ;;  %v14146_v23 = vld [vmem:[#allocation8_spill] sm:$0xff] }
 0x703   : > { %v6374_v50 = vadd.f32 %v6296_v28, %v11951_v35  ;;  %5652 = vst.msk [vmem:[#allocation3 + $0xf8] sm:$0xff] %vm1615_vm3, %v5574_v24  ;;  %v4948_v28 = vld [vmem:[#allocation2 + $0x1ac] sm:$0xff] }
 0x704   : > { %v7096_v4 = vld [vmem:[#allocation3 + $0xe8] sm:$0xff]  ;;  %v8574_v19 = vmax.f32 %v8274_v44, %v8499_v36  ;;  %10121 = vmatmul.msk.f32.gmra.mxu1 %vm960_vm2, %v6549_v40 }
 0x705   : > { %v7174_v27 = vadd.f32 %v7096_v4, %v12935_v1  ;;  %6452 = vst.msk [vmem:[#allocation3 + $0xf0] sm:$0xff] %vm1615_vm3, %v6374_v50  ;;  %9964 = vmatmul.msk.f32.gmra.mxu3 %vm960_vm2, %v4946_v43  ;;  %10208 = vmatmul.msk.f32.gmra.mxu2 %vm960_vm2, %v7359_v2  ;;  %v6551_v44 = vld [vmem:[#allocation2 + $0x1cd] sm:$0xff]  ;;  %v7361_v4 = vld [vmem:[#allocation2 + $0x216] sm:$0xff] }
 0x706   : > { %v7896_v33 = vld [vmem:[#allocation3 + $0xe0] sm:$0xff]  ;;  %8649 = vst.msk [vmem:[#allocation4 + $0xb0] sm:$0xff] %vm1615_vm3, %v8574_v19  ;;  %v8202_v19 = vld [vmem:[#allocation3 + $0xc9] sm:$0xff]  ;;  %v13038_v46 = vpop.f32.mrf.mxu2 }
 0x707   : > { %v7974_v35 = vadd.f32 %v7896_v33, %v12820_v55  ;;  %7252 = vst.msk [vmem:[#allocation3 + $0xe8] sm:$0xff] %vm1615_vm3, %v7174_v27  ;;  %v5499_v2 = vld [vmem:[#allocation3 + $0x110] sm:$0xff] }
 0x708   : > { %v5327_v1 = vpop.f32.mrf.mxu3  ;;  %v8350_v49 = vld [vmem:[#allocation3 + $0xd2] sm:$0xff] }
 0x709   : > { %8052 = vst.msk [vmem:[#allocation3 + $0xe0] sm:$0xff] %vm1615_vm3, %v7974_v35  ;;  %v5575_v29 = vadd.f32 %v5497_v26, %v5327_v1  ;;  %v8425_v18 = vld [vmem:[#allocation3 + $0xd3] sm:$0xff]  ;;  %v13008_v13 = vpop.f32.mrf.mxu1  ;;  %v8127_v35 = vld [vmem:[#allocation3 + $0xc8] sm:$0xff] }
 0x70a   : > { %v6297_v63 = vld [vmem:[#allocation3 + $0xf8] sm:$0xff]  ;;  %v8500_v39 = vmax.f32 %v8350_v49, %v8425_v18  ;;  %v8277_v49 = vmax.f32 %v8127_v35, %v8202_v19  ;;  %v14147_v35 = vld [vmem:[#allocation9_spill] sm:$0xff] }
 0x70b   : > { %v6375_v55 = vadd.f32 %v6297_v63, %v14143_v3  ;;  %5653 = vst.msk [vmem:[#allocation3 + $0x100] sm:$0xff] %vm1615_vm3, %v5575_v29  ;;  %v14145_v18 = vld [vmem:[#allocation7_spill] sm:$0xff] }
 0x70c   : > { %v7097_v25 = vld [vmem:[#allocation3 + $0xf0] sm:$0xff]  ;;  %v8575_v47 = vmax.f32 %v8275_v16, %v8500_v39  ;;  %10122 = vmatmul.msk.f32.gmra.mxu1 %vm960_vm2, %v6550_v57 }
 0x70d   : > { %v7175_v58 = vadd.f32 %v7097_v25, %v12950_v38  ;;  %6453 = vst.msk [vmem:[#allocation3 + $0xf8] sm:$0xff] %vm1615_vm3, %v6375_v55  ;;  %9965 = vmatmul.msk.f32.gmra.mxu3 %vm960_vm2, %v4947_v52  ;;  %10209 = vmatmul.msk.f32.gmra.mxu2 %vm960_vm2, %v7360_v62  ;;  %v4949_v16 = vld [vmem:[#allocation2 + $0x1b4] sm:$0xff]  ;;  %v7362_v25 = vld [vmem:[#allocation2 + $0x21e] sm:$0xff] }
 0x70e   : > { %v7897_v48 = vld [vmem:[#allocation3 + $0xe8] sm:$0xff]  ;;  %8650 = vst.msk [vmem:[#allocation4 + $0xb8] sm:$0xff] %vm1615_vm3, %v8575_v47  ;;  %v8203_v47 = vld [vmem:[#allocation3 + $0xd1] sm:$0xff] }
 0x70f   : > { %v7975_v9 = vadd.f32 %v7897_v48, %v12838_v0  ;;  %7253 = vst.msk [vmem:[#allocation3 + $0xf0] sm:$0xff] %vm1615_vm3, %v7175_v58  ;;  %v6552_v39 = vld [vmem:[#allocation2 + $0x1d5] sm:$0xff]  ;;  %v5500_v62 = vld [vmem:[#allocation3 + $0x118] sm:$0xff] }
 0x710   : > { %v5330_v30 = vpop.f32.mrf.mxu3  ;;  %v8351_v38 = vld [vmem:[#allocation3 + $0xda] sm:$0xff] }
 0x711   : > { %8053 = vst.msk [vmem:[#allocation3 + $0xe8] sm:$0xff] %vm1615_vm3, %v7975_v9  ;;  %v5576_v32 = vadd.f32 %v5498_v14, %v5330_v30  ;;  %v8426_v56 = vld [vmem:[#allocation3 + $0xdb] sm:$0xff]  ;;  %v13023_v41 = vpop.f32.mrf.mxu1  ;;  %v8128_v9 = vld [vmem:[#allocation3 + $0xd0] sm:$0xff] }
 0x712   : > { %v6298_v34 = vld [vmem:[#allocation3 + $0x100] sm:$0xff]  ;;  %v8501_v24 = vmax.f32 %v8351_v38, %v8426_v56  ;;  %v8278_v38 = vmax.f32 %v8128_v9, %v8203_v47  ;;  %v14148_v9 = vld [vmem:[#allocation10_spill] sm:$0xff] }
 0x713   : > { %v6376_v0 = vadd.f32 %v6298_v34, %v14144_v6  ;;  %5654 = vst.msk [vmem:[#allocation3 + $0x108] sm:$0xff] %vm1615_vm3, %v5576_v32  ;;  %v4950_v34 = vld [vmem:[#allocation2 + $0x1bc] sm:$0xff]  ;;  %v13055_v6 = vpop.f32.mrf.mxu2 }
 0x714   : > { %v7098_v59 = vld [vmem:[#allocation3 + $0xf8] sm:$0xff]  ;;  %v8576_v36 = vmax.f32 %v8276_v31, %v8501_v24  ;;  %10123 = vmatmul.msk.f32.gmra.mxu1 %vm960_vm2, %v6551_v44 }
 0x715   : > { %v7176_v50 = vadd.f32 %v7098_v59, %v12963_v42  ;;  %6454 = vst.msk [vmem:[#allocation3 + $0x100] sm:$0xff] %vm1615_vm3, %v6376_v0  ;;  %9966 = vmatmul.msk.f32.gmra.mxu3 %vm960_vm2, %v4948_v28  ;;  %10210 = vmatmul.msk.f32.gmra.mxu2 %vm960_vm2, %v7361_v4  ;;  %v6553_v31 = vld [vmem:[#allocation2 + $0x1dd] sm:$0xff]  ;;  %v7363_v59 = vld [vmem:[#allocation2 + $0x226] sm:$0xff] }
 0x716   : > { %v7898_v43 = vld [vmem:[#allocation3 + $0xf0] sm:$0xff]  ;;  %8651 = vst.msk [vmem:[#allocation4 + $0xc0] sm:$0xff] %vm1615_vm3, %v8576_v36  ;;  %v8204_v36 = vld [vmem:[#allocation3 + $0xd9] sm:$0xff] }
 0x717   : > { %v7976_v40 = vadd.f32 %v7898_v43, %v12859_v53  ;;  %7254 = vst.msk [vmem:[#allocation3 + $0xf8] sm:$0xff] %vm1615_vm3, %v7176_v50  ;;  %v5501_v4 = vld [vmem:[#allocation3 + $0x120] sm:$0xff] }
 0x718   : > { %v5333_v27 = vpop.f32.mrf.mxu3  ;;  %v8352_v42 = vld [vmem:[#allocation3 + $0xe2] sm:$0xff] }
 0x719   : > { %8054 = vst.msk [vmem:[#allocation3 + $0xf0] sm:$0xff] %vm1615_vm3, %v7976_v40  ;;  %v5577_v33 = vadd.f32 %v5499_v2, %v5333_v27  ;;  %v8427_v60 = vld [vmem:[#allocation3 + $0xe3] sm:$0xff]  ;;  %v13036_v26 = vpop.f32.mrf.mxu1  ;;  %v8129_v40 = vld [vmem:[#allocation3 + $0xd8] sm:$0xff] }
 0x71a   : > { %v6299_v1 = vld [vmem:[#allocation3 + $0x108] sm:$0xff]  ;;  %v8502_v29 = vmax.f32 %v8352_v42, %v8427_v60  ;;  %v8279_v42 = vmax.f32 %v8129_v40, %v8204_v36  ;;  %v14149_v40 = vld [vmem:[#allocation11_spill] sm:$0xff] }
 0x71b   : > { %v6377_v53 = vadd.f32 %v6299_v1, %v14145_v18  ;;  %5655 = vst.msk [vmem:[#allocation3 + $0x110] sm:$0xff] %vm1615_vm3, %v5577_v33  ;;  %v4951_v1 = vld [vmem:[#allocation2 + $0x1c4] sm:$0xff] }
 0x71c   : > { %v7099_v63 = vld [vmem:[#allocation3 + $0x100] sm:$0xff]  ;;  %v8577_v3 = vmax.f32 %v8277_v49, %v8502_v29  ;;  %10124 = vmatmul.msk.f32.gmra.mxu1 %vm960_vm2, %v6552_v39  ;;  %v13076_v39 = vpop.f32.mrf.mxu2 }
 0x71d   : > { %v7177_v55 = vadd.f32 %v7099_v63, %v12978_v20  ;;  %6455 = vst.msk [vmem:[#allocation3 + $0x108] sm:$0xff] %vm1615_vm3, %v6377_v53  ;;  %9967 = vmatmul.msk.f32.gmra.mxu3 %vm960_vm2, %v4949_v16  ;;  %10211 = vmatmul.msk.f32.gmra.mxu2 %vm960_vm2, %v7362_v25  ;;  %v6554_v49 = vld [vmem:[#allocation2 + $0x1e5] sm:$0xff]  ;;  %v7364_v53 = vld [vmem:[#allocation2 + $0x22e] sm:$0xff] }
 0x71e   : > { %v7899_v52 = vld [vmem:[#allocation3 + $0xf8] sm:$0xff]  ;;  %8652 = vst.msk [vmem:[#allocation4 + $0xc8] sm:$0xff] %vm1615_vm3, %v8577_v3  ;;  %v8205_v16 = vld [vmem:[#allocation3 + $0xe1] sm:$0xff] }
 0x71f   : > { %v7977_v57 = vadd.f32 %v7899_v52, %v12875_v10  ;;  %7255 = vst.msk [vmem:[#allocation3 + $0x100] sm:$0xff] %vm1615_vm3, %v7177_v55  ;;  %v8130_v25 = vld [vmem:[#allocation3 + $0xe0] sm:$0xff] }
 0x720   : > { %v5336_v58 = vpop.f32.mrf.mxu3  ;;  %v8353_v20 = vld [vmem:[#allocation3 + $0xea] sm:$0xff] }
 0x721   : > { %8055 = vst.msk [vmem:[#allocation3 + $0xf8] sm:$0xff] %vm1615_vm3, %v7977_v57  ;;  %v5578_v48 = vadd.f32 %v5500_v62, %v5336_v58  ;;  %v8428_v11 = vld [vmem:[#allocation3 + $0xeb] sm:$0xff]  ;;  %v13051_v14 = vpop.f32.mrf.mxu1  ;;  %v8280_v58 = vmax.f32 %v8130_v25, %v8205_v16 }
 0x722   : > { %v6300_v30 = vld [vmem:[#allocation3 + $0x110] sm:$0xff]  ;;  %v8503_v32 = vmax.f32 %v8353_v20, %v8428_v11 }
 0x723   : > { %v6378_v56 = vadd.f32 %v6300_v30, %v14146_v23  ;;  %5656 = vst.msk [vmem:[#allocation3 + $0x118] sm:$0xff] %vm1615_vm3, %v5578_v48 }
 0x724   : > { %v7100_v10 = vld [vmem:[#allocation3 + $0x108] sm:$0xff]  ;;  %v8578_v24 = vmax.f32 %v8278_v38, %v8503_v32  ;;  %10125 = vmatmul.msk.f32.gmra.mxu1 %vm960_vm2, %v6553_v31 }
 0x725   : > { %v7178_v0 = vadd.f32 %v7100_v10, %v12993_v15  ;;  %6456 = vst.msk [vmem:[#allocation3 + $0x110] sm:$0xff] %vm1615_vm3, %v6378_v56  ;;  %9968 = vmatmul.msk.f32.gmra.mxu3 %vm960_vm2, %v4950_v34  ;;  %10212 = vmatmul.msk.f32.gmra.mxu2 %vm960_vm2, %v7363_v59  ;;  %v4952_v38 = vld [vmem:[#allocation2 + $0x1cc] sm:$0xff]  ;;  %v7365_v56 = vld [vmem:[#allocation2 + $0x236] sm:$0xff] }
 0x726   : > { %v7900_v28 = vld [vmem:[#allocation3 + $0x100] sm:$0xff]  ;;  %8653 = vst.msk [vmem:[#allocation4 + $0xd0] sm:$0xff] %vm1615_vm3, %v8578_v24  ;;  %v8206_v34 = vld [vmem:[#allocation3 + $0xe9] sm:$0xff] }
 0x727   : > { %v7978_v44 = vadd.f32 %v7900_v28, %v12892_v17  ;;  %7256 = vst.msk [vmem:[#allocation3 + $0x108] sm:$0xff] %vm1615_vm3, %v7178_v0  ;;  %v6555_v32 = vld [vmem:[#allocation2 + $0x1ed] sm:$0xff]  ;;  %v5503_v24 = vld [vmem:[#allocation3 + $0x130] sm:$0xff] }
 0x728   : > { %v5339_v50 = vpop.f32.mrf.mxu3  ;;  %v8354_v15 = vld [vmem:[#allocation3 + $0xf2] sm:$0xff] }
 0x729   : > { %8056 = vst.msk [vmem:[#allocation3 + $0x100] sm:$0xff] %vm1615_vm3, %v7978_v44  ;;  %v5579_v43 = vadd.f32 %v5501_v4, %v5339_v50  ;;  %v8429_v19 = vld [vmem:[#allocation3 + $0xf3] sm:$0xff]  ;;  %v13066_v2 = vpop.f32.mrf.mxu1  ;;  %v13093_v44 = vpop.f32.mrf.mxu2 }
 0x72a   : > { %v6301_v27 = vld [vmem:[#allocation3 + $0x118] sm:$0xff]  ;;  %v8504_v33 = vmax.f32 %v8354_v15, %v8429_v19 }
 0x72b   : > { %v6379_v60 = vadd.f32 %v6301_v27, %v14147_v35  ;;  %5657 = vst.msk [vmem:[#allocation3 + $0x120] sm:$0xff] %vm1615_vm3, %v5579_v43 }
 0x72c   : > { %v7101_v17 = vld [vmem:[#allocation3 + $0x110] sm:$0xff]  ;;  %v8579_v29 = vmax.f32 %v8279_v42, %v8504_v33  ;;  %10126 = vmatmul.msk.f32.gmra.mxu1 %vm960_vm2, %v6554_v49 }
 0x72d   : > { %v7179_v18 = vadd.f32 %v7101_v17, %v13008_v13  ;;  %6457 = vst.msk [vmem:[#allocation3 + $0x118] sm:$0xff] %vm1615_vm3, %v6379_v60  ;;  %9969 = vmatmul.msk.f32.gmra.mxu3 %vm960_vm2, %v4951_v1  ;;  %10213 = vmatmul.msk.f32.gmra.mxu2 %vm960_vm2, %v7364_v53  ;;  %v5502_v13 = vld [vmem:[#allocation3 + $0x128] sm:$0xff]  ;;  %v7366_v60 = vld [vmem:[#allocation2 + $0x23e] sm:$0xff] }
 0x72e   : > { %v7901_v63 = vld [vmem:[#allocation3 + $0x108] sm:$0xff]  ;;  %8654 = vst.msk [vmem:[#allocation4 + $0xd8] sm:$0xff] %vm1615_vm3, %v8579_v29  ;;  %v8207_v1 = vld [vmem:[#allocation3 + $0xf1] sm:$0xff] }
 0x72f   : > { %v7979_v3 = vadd.f32 %v7901_v63, %v12910_v61  ;;  %7257 = vst.msk [vmem:[#allocation3 + $0x110] sm:$0xff] %vm1615_vm3, %v7179_v18  ;;  %v4953_v42 = vld [vmem:[#allocation2 + $0x1d4] sm:$0xff]  ;;  %v5504_v29 = vld [vmem:[#allocation3 + $0x138] sm:$0xff] }
 0x730   : > { %v5342_v55 = vpop.f32.mrf.mxu3  ;;  %v8355_v52 = vld [vmem:[#allocation3 + $0xfa] sm:$0xff]  ;;  %v6556_v33 = vld [vmem:[#allocation2 + $0x1f5] sm:$0xff] }
 0x731   : > { %v8430_v57 = vld [vmem:[#allocation3 + $0xfb] sm:$0xff]  ;;  %8057 = vst.msk [vmem:[#allocation3 + $0x108] sm:$0xff] %vm1615_vm3, %v7979_v3  ;;  %v5580_v47 = vadd.f32 %v5502_v13, %v5342_v55  ;;  %v13081_v48 = vpop.f32.mrf.mxu1 }
 0x732   : > { %v8505_v62 = vmax.f32 %v8355_v52, %v8430_v57  ;;  %v6302_v20 = vld [vmem:[#allocation3 + $0x120] sm:$0xff]  ;;  %v13111_v52 = vpop.f32.mrf.mxu2 }
 0x733   : > { %v6380_v11 = vadd.f32 %v6302_v20, %v14148_v9  ;;  %5658 = vst.msk [vmem:[#allocation3 + $0x128] sm:$0xff] %vm1615_vm3, %v5580_v47  ;;  %v14150_v57 = vld [vmem:[#allocation12_spill] sm:$0xff]  ;;  %v6557_v20 = vld [vmem:[#allocation2 + $0x1fd] sm:$0xff] }
 0x734   : > { %v8580_v61 = vmax.f32 %v8280_v58, %v8505_v62  ;;  %v7102_v30 = vld [vmem:[#allocation3 + $0x118] sm:$0xff]  ;;  %10127 = vmatmul.msk.f32.gmra.mxu1 %vm960_vm2, %v6555_v32  ;;  %v5505_v32 = vld [vmem:[#allocation3 + $0x140] sm:$0xff] }
 0x735   : > { %v7180_v23 = vadd.f32 %v7102_v30, %v13023_v41  ;;  %6458 = vst.msk [vmem:[#allocation3 + $0x120] sm:$0xff] %vm1615_vm3, %v6380_v11  ;;  %9970 = vmatmul.msk.f32.gmra.mxu3 %vm960_vm2, %v4952_v38  ;;  %10214 = vmatmul.msk.f32.gmra.mxu2 %vm960_vm2, %v7365_v56  ;;  %v8131_v41 = vld [vmem:[#allocation3 + $0xe8] sm:$0xff]  ;;  %v4954_v62 = vld [vmem:[#allocation2 + $0x1dc] sm:$0xff]  ;;  %v7367_v11 = vld [vmem:[#allocation2 + $0x246] sm:$0xff] }
 0x736   : > { %v7902_v10 = vld [vmem:[#allocation3 + $0x110] sm:$0xff]  ;;  %8655 = vst.msk [vmem:[#allocation4 + $0xe0] sm:$0xff] %vm1615_vm3, %v8580_v61  ;;  %v8281_v50 = vmax.f32 %v8131_v41, %v8206_v34  ;;  %v8208_v30 = vld [vmem:[#allocation3 + $0xf9] sm:$0xff] }
 0x737   : > { %v7980_v31 = vadd.f32 %v7902_v10, %v12932_v12  ;;  %7258 = vst.msk [vmem:[#allocation3 + $0x118] sm:$0xff] %vm1615_vm3, %v7180_v23 }
 0x738   : > { %v5345_v0 = vpop.f32.mrf.mxu3  ;;  %v8356_v59 = vld [vmem:[#allocation3 + $0x102] sm:$0xff] }
 0x739   : > { %v8431_v28 = vld [vmem:[#allocation3 + $0x103] sm:$0xff]  ;;  %8058 = vst.msk [vmem:[#allocation3 + $0x110] sm:$0xff] %vm1615_vm3, %v7980_v31  ;;  %v5581_v36 = vadd.f32 %v5503_v24, %v5345_v0  ;;  %v13096_v43 = vpop.f32.mrf.mxu1 }
 0x73a   : > { %v8506_v4 = vmax.f32 %v8356_v59, %v8431_v28  ;;  %v6303_v15 = vld [vmem:[#allocation3 + $0x128] sm:$0xff] }
 0x73b   : > { %v6381_v19 = vadd.f32 %v6303_v15, %v14149_v40  ;;  %5659 = vst.msk [vmem:[#allocation3 + $0x130] sm:$0xff] %vm1615_vm3, %v5581_v36  ;;  %v14151_v59 = vld [vmem:[#allocation13_spill] sm:$0xff]  ;;  %v13128_v15 = vpop.f32.mrf.mxu2 }
 0x73c   : > { %v8581_v12 = vmax.f32 %v8281_v50, %v8506_v4  ;;  %v7103_v27 = vld [vmem:[#allocation3 + $0x120] sm:$0xff]  ;;  %10128 = vmatmul.msk.f32.gmra.mxu1 %vm960_vm2, %v6556_v33 }
 0x73d   : > { %v7181_v35 = vadd.f32 %v7103_v27, %v13036_v26  ;;  %6459 = vst.msk [vmem:[#allocation3 + $0x128] sm:$0xff] %vm1615_vm3, %v6381_v19  ;;  %9971 = vmatmul.msk.f32.gmra.mxu3 %vm960_vm2, %v4953_v42  ;;  %10215 = vmatmul.msk.f32.gmra.mxu2 %vm960_vm2, %v7366_v60  ;;  %v8132_v26 = vld [vmem:[#allocation3 + $0xf0] sm:$0xff]  ;;  %v4955_v50 = vld [vmem:[#allocation2 + $0x1e4] sm:$0xff]  ;;  %v7368_v19 = vld [vmem:[#allocation2 + $0x24e] sm:$0xff] }
 0x73e   : > { %v7903_v17 = vld [vmem:[#allocation3 + $0x118] sm:$0xff]  ;;  %8656 = vst.msk [vmem:[#allocation4 + $0xe8] sm:$0xff] %vm1615_vm3, %v8581_v12  ;;  %v8282_v3 = vmax.f32 %v8132_v26, %v8207_v1  ;;  %v8209_v42 = vld [vmem:[#allocation3 + $0x101] sm:$0xff] }
 0x73f   : > { %v7981_v49 = vadd.f32 %v7903_v17, %v12948_v5  ;;  %7259 = vst.msk [vmem:[#allocation3 + $0x120] sm:$0xff] %vm1615_vm3, %v7181_v35  ;;  %v6558_v4 = vld [vmem:[#allocation2 + $0x205] sm:$0xff]  ;;  %v5506_v35 = vld [vmem:[#allocation3 + $0x148] sm:$0xff] }
 0x740   : > { %v5348_v18 = vpop.f32.mrf.mxu3  ;;  %v8357_v53 = vld [vmem:[#allocation3 + $0x10a] sm:$0xff]  ;;  %v8134_v17 = vld [vmem:[#allocation3 + $0x100] sm:$0xff] }
 0x741   : > { %v8432_v63 = vld [vmem:[#allocation3 + $0x10b] sm:$0xff]  ;;  %8059 = vst.msk [vmem:[#allocation3 + $0x118] sm:$0xff] %vm1615_vm3, %v7981_v49  ;;  %v5582_v16 = vadd.f32 %v5504_v29, %v5348_v18  ;;  %v13109_v25 = vpop.f32.mrf.mxu1  ;;  %v8284_v18 = vmax.f32 %v8134_v17, %v8209_v42  ;;  %v5508_v42 = vld [vmem:[#allocation3 + $0x158] sm:$0xff] }
 0x742   : > { %v8507_v13 = vmax.f32 %v8357_v53, %v8432_v63  ;;  %v6304_v55 = vld [vmem:[#allocation3 + $0x130] sm:$0xff] }
 0x743   : > { %v6382_v47 = vadd.f32 %v6304_v55, %v14150_v57  ;;  %5660 = vst.msk [vmem:[#allocation3 + $0x138] sm:$0xff] %vm1615_vm3, %v5582_v16  ;;  %v14152_v53 = vld [vmem:[#allocation14_spill] sm:$0xff]  ;;  %v4956_v16 = vld [vmem:[#allocation2 + $0x1ec] sm:$0xff] }
 0x744   : > { %v8582_v5 = vmax.f32 %v8282_v3, %v8507_v13  ;;  %v7104_v58 = vld [vmem:[#allocation3 + $0x128] sm:$0xff]  ;;  %10129 = vmatmul.msk.f32.gmra.mxu1 %vm960_vm2, %v6557_v20  ;;  %v8136_v17 = vld [vmem:[#allocation3 + $0x110] sm:$0xff] }
 0x745   : > { %v7182_v9 = vadd.f32 %v7104_v58, %v13051_v14  ;;  %6460 = vst.msk [vmem:[#allocation3 + $0x130] sm:$0xff] %vm1615_vm3, %v6382_v47  ;;  %9972 = vmatmul.msk.f32.gmra.mxu3 %vm960_vm2, %v4954_v62  ;;  %10216 = vmatmul.msk.f32.gmra.mxu2 %vm960_vm2, %v7367_v11  ;;  %v8133_v14 = vld [vmem:[#allocation3 + $0xf8] sm:$0xff]  ;;  %v6559_v3 = vld [vmem:[#allocation2 + $0x20d] sm:$0xff]  ;;  %v7369_v57 = vld [vmem:[#allocation2 + $0x256] sm:$0xff]  ;;  %v13149_v58 = vpop.f32.mrf.mxu2 }
 0x746   : > { %v7904_v61 = vld [vmem:[#allocation3 + $0x120] sm:$0xff]  ;;  %8657 = vst.msk [vmem:[#allocation4 + $0xf0] sm:$0xff] %vm1615_vm3, %v8582_v5  ;;  %v8283_v31 = vmax.f32 %v8133_v14, %v8208_v30  ;;  %v8210_v20 = vld [vmem:[#allocation3 + $0x109] sm:$0xff] }
 0x747   : > { %v7982_v38 = vadd.f32 %v7904_v61, %v12965_v54  ;;  %7260 = vst.msk [vmem:[#allocation3 + $0x128] sm:$0xff] %vm1615_vm3, %v7182_v9  ;;  %v5507_v11 = vld [vmem:[#allocation3 + $0x150] sm:$0xff] }
 0x748   : > { %v5351_v23 = vpop.f32.mrf.mxu3  ;;  %v8358_v56 = vld [vmem:[#allocation3 + $0x112] sm:$0xff] }
 0x749   : > { %v8433_v10 = vld [vmem:[#allocation3 + $0x113] sm:$0xff]  ;;  %8060 = vst.msk [vmem:[#allocation3 + $0x120] sm:$0xff] %vm1615_vm3, %v7982_v38  ;;  %v5583_v34 = vadd.f32 %v5505_v32, %v5351_v23  ;;  %v13124_v41 = vpop.f32.mrf.mxu1  ;;  %v8135_v32 = vld [vmem:[#allocation3 + $0x108] sm:$0xff] }
 0x74a   : > { %v8508_v24 = vmax.f32 %v8358_v56, %v8433_v10  ;;  %v6305_v0 = vld [vmem:[#allocation3 + $0x138] sm:$0xff]  ;;  %v8285_v10 = vmax.f32 %v8135_v32, %v8210_v20  ;;  %v8815_v20 = vld [vmem:[#allocation4 + $0xb0] sm:$0xff] }
 0x74b   : > { %v6383_v28 = vadd.f32 %v6305_v0, %v14151_v59  ;;  %5661 = vst.msk [vmem:[#allocation3 + $0x140] sm:$0xff] %vm1615_vm3, %v5583_v34  ;;  %v8822_v38 = vld [vmem:[#allocation4 + $0xe8] sm:$0xff]  ;;  %v4957_v59 = vld [vmem:[#allocation2 + $0x1f4] sm:$0xff] }
 0x74c   : > { %v8583_v54 = vmax.f32 %v8283_v31, %v8508_v24  ;;  %v7105_v36 = vld [vmem:[#allocation3 + $0x130] sm:$0xff]  ;;  %10130 = vmatmul.msk.f32.gmra.mxu1 %vm960_vm2, %v6558_v4  ;;  %v14153_v34 = vld [vmem:[#allocation15_spill] sm:$0xff]  ;;  %v8820_v4 = vld [vmem:[#allocation4 + $0xd8] sm:$0xff] }
 0x74d   : > { %v7183_v40 = vadd.f32 %v7105_v36, %v13066_v2  ;;  %6461 = vst.msk [vmem:[#allocation3 + $0x138] sm:$0xff] %vm1615_vm3, %v6383_v28  ;;  %9973 = vmatmul.msk.f32.gmra.mxu3 %vm960_vm2, %v4955_v50  ;;  %10217 = vmatmul.msk.f32.gmra.mxu2 %vm960_vm2, %v7368_v19  ;;  %v8821_v24 = vld [vmem:[#allocation4 + $0xe0] sm:$0xff]  ;;  %v8137_v32 = vld [vmem:[#allocation3 + $0x118] sm:$0xff] }
 0x74e   : > { %v7905_v12 = vld [vmem:[#allocation3 + $0x128] sm:$0xff]  ;;  %8658 = vst.msk [vmem:[#allocation4 + $0xf8] sm:$0xff] %vm1615_vm3, %v8583_v54  ;;  %v7370_v50 = vld [vmem:[#allocation2 + $0x25e] sm:$0xff] }
 0x74f   : > { %v7983_v27 = vadd.f32 %v7905_v12, %v12982_v7  ;;  %7261 = vst.msk [vmem:[#allocation3 + $0x130] sm:$0xff] %vm1615_vm3, %v7183_v40  ;;  %v6560_v28 = vld [vmem:[#allocation2 + $0x215] sm:$0xff]  ;;  %v8819_v12 = vld [vmem:[#allocation4 + $0xd0] sm:$0xff] }
 0x750   : > { %v5354_v33 = vpop.f32.mrf.mxu3  ;;  %v8359_v2 = vld [vmem:[#allocation3 + $0x11a] sm:$0xff] }
 0x751   : > { %8061 = vst.msk [vmem:[#allocation3 + $0x128] sm:$0xff] %vm1615_vm3, %v7983_v27  ;;  %v5584_v60 = vadd.f32 %v5506_v35, %v5354_v33  ;;  %v8434_v1 = vld [vmem:[#allocation3 + $0x11b] sm:$0xff]  ;;  %v13139_v29 = vpop.f32.mrf.mxu1  ;;  %v13166_v35 = vpop.f32.mrf.mxu2 }
 0x752   : > { %v6306_v49 = vld [vmem:[#allocation3 + $0x140] sm:$0xff]  ;;  %v8509_v26 = vmax.f32 %v8359_v2, %v8434_v1 }
 0x753   : > { %v6384_v63 = vadd.f32 %v6306_v49, %v14152_v53  ;;  %5662 = vst.msk [vmem:[#allocation3 + $0x148] sm:$0xff] %vm1615_vm3, %v5584_v60  ;;  %v8818_v60 = vld [vmem:[#allocation4 + $0xc8] sm:$0xff]  ;;  %v14154_v53 = vld [vmem:[#allocation16_spill] sm:$0xff] }
 0x754   : > { %v7106_v7 = vld [vmem:[#allocation3 + $0x138] sm:$0xff]  ;;  %v8584_v13 = vmax.f32 %v8284_v18, %v8509_v26  ;;  %10131 = vmatmul.msk.f32.gmra.mxu1 %vm960_vm2, %v6559_v3 }
 0x755   : > { %v7184_v55 = vadd.f32 %v7106_v7, %v13081_v48  ;;  %6462 = vst.msk [vmem:[#allocation3 + $0x140] sm:$0xff] %vm1615_vm3, %v6384_v63  ;;  %9974 = vmatmul.msk.f32.gmra.mxu3 %vm960_vm2, %v4956_v16  ;;  %v8824_v47 = vld [vmem:[#allocation4 + $0xf8] sm:$0xff]  ;;  %10218 = vmatmul.msk.f32.gmra.mxu2 %vm960_vm2, %v7369_v57  ;;  %v8823_v48 = vld [vmem:[#allocation4 + $0xf0] sm:$0xff]  ;;  %v8817_v7 = vld [vmem:[#allocation4 + $0xc0] sm:$0xff] }
 0x756   : > { %v7906_v5 = vld [vmem:[#allocation3 + $0x130] sm:$0xff]  ;;  %9002 = vmatpush.msra.mxu0 %v8824_v47  ;;  %8659 = vst.msk [vmem:[#allocation4 + $0x100] sm:$0xff] %vm1615_vm3, %v8584_v13  ;;  %v7371_v47 = vld [vmem:[#allocation2 + $0x266] sm:$0xff] }
 0x757   : > { %v7984_v62 = vadd.f32 %v7906_v5, %v13004_v37  ;;  %7262 = vst.msk [vmem:[#allocation3 + $0x138] sm:$0xff] %vm1615_vm3, %v7184_v55  ;;  %v4958_v3 = vld [vmem:[#allocation2 + $0x1fc] sm:$0xff]  ;;  %v8816_v5 = vld [vmem:[#allocation4 + $0xb8] sm:$0xff] }
 0x758   : > { %9003 = vmatpush.msra.mxu0 %v8823_v48  ;;  %v5357_v9 = vpop.f32.mrf.mxu3  ;;  %v8360_v61 = vld [vmem:[#allocation3 + $0x122] sm:$0xff]  ;;  %v6561_v13 = vld [vmem:[#allocation2 + $0x21d] sm:$0xff] }
 0x759   : > { %8062 = vst.msk [vmem:[#allocation3 + $0x130] sm:$0xff] %vm1615_vm3, %v7984_v62  ;;  %v5585_v30 = vadd.f32 %v5507_v11, %v5357_v9  ;;  %v8435_v23 = vld [vmem:[#allocation3 + $0x123] sm:$0xff]  ;;  %v13154_v56 = vpop.f32.mrf.mxu1 }
 0x75a   : > { %v6307_v14 = vld [vmem:[#allocation3 + $0x148] sm:$0xff]  ;;  %9004 = vmatpush.msra.mxu0 %v8822_v38  ;;  %v8510_v37 = vmax.f32 %v8360_v61, %v8435_v23  ;;  %v5509_v11 = vld [vmem:[#allocation3 + $0x160] sm:$0xff]  ;;  %v8814_v38 = vld [vmem:[#allocation4 + $0xa8] sm:$0xff] }
 0x75b   : > { %v6385_v31 = vadd.f32 %v6307_v14, %v14153_v34  ;;  %5663 = vst.msk [vmem:[#allocation3 + $0x150] sm:$0xff] %vm1615_vm3, %v5585_v30  ;;  %v13184_v34 = vpop.f32.mrf.mxu2 }
 0x75c   : > { %v7107_v0 = vld [vmem:[#allocation3 + $0x140] sm:$0xff]  ;;  %9005 = vmatpush.msra.mxu0 %v8821_v24  ;;  %v8585_v54 = vmax.f32 %v8285_v10, %v8510_v37  ;;  %10132 = vmatmul.msk.f32.gmra.mxu1 %vm960_vm2, %v6560_v28 }
 0x75d   : > { %v7185_v36 = vadd.f32 %v7107_v0, %v13096_v43  ;;  %6463 = vst.msk [vmem:[#allocation3 + $0x148] sm:$0xff] %vm1615_vm3, %v6385_v31  ;;  %9975 = vmatmul.msk.f32.gmra.mxu3 %vm960_vm2, %v4957_v59  ;;  %10219 = vmatmul.msk.f32.gmra.mxu2 %vm960_vm2, %v7370_v50  ;;  %v8211_v43 = vld [vmem:[#allocation3 + $0x111] sm:$0xff]  ;;  %v14155_v31 = vld [vmem:[#allocation17_spill] sm:$0xff]  ;;  %v4959_v28 = vld [vmem:[#allocation2 + $0x204] sm:$0xff] }
 0x75e   : > { %v7907_v40 = vld [vmem:[#allocation3 + $0x138] sm:$0xff]  ;;  %9006 = vmatpush.msra.mxu0 %v8820_v4  ;;  %8660 = vst.msk [vmem:[#allocation4 + $0x108] sm:$0xff] %vm1615_vm3, %v8585_v54  ;;  %v8813_v0 = vld [vmem:[#allocation4 + $0xa0] sm:$0xff]  ;;  %v7372_v4 = vld [vmem:[#allocation2 + $0x26e] sm:$0xff] }
 0x75f   : > { %v7985_v19 = vadd.f32 %v7907_v40, %v13021_v22  ;;  %7263 = vst.msk [vmem:[#allocation3 + $0x140] sm:$0xff] %vm1615_vm3, %v7185_v36  ;;  %v8286_v22 = vmax.f32 %v8136_v17, %v8211_v43  ;;  %v6562_v54 = vld [vmem:[#allocation2 + $0x225] sm:$0xff]  ;;  %v8812_v40 = vld [vmem:[#allocation4 + $0x98] sm:$0xff] }
 0x760   : > { %9007 = vmatpush.msra.mxu0 %v8819_v12  ;;  %v5360_v27 = vpop.f32.mrf.mxu3  ;;  %v8361_v33 = vld [vmem:[#allocation3 + $0x12a] sm:$0xff]  ;;  %v8811_v43 = vld [vmem:[#allocation4 + $0x90] sm:$0xff]  ;;  %v8810_v17 = vld [vmem:[#allocation4 + $0x88] sm:$0xff] }
 0x761   : > { %8063 = vst.msk [vmem:[#allocation3 + $0x138] sm:$0xff] %vm1615_vm3, %v7985_v19  ;;  %v5586_v2 = vadd.f32 %v5508_v42, %v5360_v27  ;;  %v8436_v1 = vld [vmem:[#allocation3 + $0x12b] sm:$0xff]  ;;  %v13169_v18 = vpop.f32.mrf.mxu1 }
 0x762   : > { %v6308_v49 = vld [vmem:[#allocation3 + $0x150] sm:$0xff]  ;;  %9008 = vmatpush.msra.mxu0 %v8818_v60  ;;  %v8511_v26 = vmax.f32 %v8361_v33, %v8436_v1  ;;  %v5510_v42 = vld [vmem:[#allocation3 + $0x168] sm:$0xff]  ;;  %v8138_v1 = vld [vmem:[#allocation3 + $0x120] sm:$0xff] }
 0x763   : > { %v6386_v63 = vadd.f32 %v6308_v49, %v14154_v53  ;;  %5664 = vst.msk [vmem:[#allocation3 + $0x158] sm:$0xff] %vm1615_vm3, %v5586_v2  ;;  %v13196_v2 = vpop.f32.mrf.mxu0 }
 0x764   : > { %v7108_v16 = vld [vmem:[#allocation3 + $0x148] sm:$0xff]  ;;  %9009 = vmatpush.msra.mxu0 %v8817_v7  ;;  %v8586_v55 = vmax.f32 %v8286_v22, %v8511_v26  ;;  %10133 = vmatmul.msk.f32.gmra.mxu1 %vm960_vm2, %v6561_v13 }
 0x765   : > { %v7186_v57 = vadd.f32 %v7108_v16, %v13109_v25  ;;  %6464 = vst.msk [vmem:[#allocation3 + $0x150] sm:$0xff] %vm1615_vm3, %v6386_v63  ;;  %9976 = vmatmul.msk.f32.gmra.mxu3 %vm960_vm2, %v4958_v3  ;;  %10220 = vmatmul.msk.f32.gmra.mxu2 %vm960_vm2, %v7371_v47  ;;  %v8212_v25 = vld [vmem:[#allocation3 + $0x119] sm:$0xff]  ;;  %v14156_v63 = vld [vmem:[#allocation18_spill] sm:$0xff]  ;;  %v4960_v13 = vld [vmem:[#allocation2 + $0x20c] sm:$0xff]  ;;  %v13203_v47 = vpop.f32.mrf.mxu2 }
 0x766   : > { %v7908_v62 = vld [vmem:[#allocation3 + $0x140] sm:$0xff]  ;;  %9010 = vmatpush.msra.mxu0 %v8816_v5  ;;  %8661 = vst.msk [vmem:[#allocation4 + $0x110] sm:$0xff] %vm1615_vm3, %v8586_v55  ;;  %v8287_v37 = vmax.f32 %v8137_v32, %v8212_v25  ;;  %v8809_v16 = vld [vmem:[#allocation4 + $0x80] sm:$0xff] }
 0x767   : > { %v7986_v48 = vadd.f32 %v7908_v62, %v13038_v46  ;;  %7264 = vst.msk [vmem:[#allocation3 + $0x148] sm:$0xff] %vm1615_vm3, %v7186_v57  ;;  %v6563_v55 = vld [vmem:[#allocation2 + $0x22d] sm:$0xff]  ;;  %v7373_v62 = vld [vmem:[#allocation2 + $0x276] sm:$0xff] }
 0x768   : > { %9011 = vmatpush.msra.mxu0 %v8815_v20  ;;  %v5363_v9 = vpop.f32.mrf.mxu3  ;;  %v8362_v61 = vld [vmem:[#allocation3 + $0x132] sm:$0xff]  ;;  %v8214_v25 = vld [vmem:[#allocation3 + $0x129] sm:$0xff] }
 0x769   : > { %8064 = vst.msk [vmem:[#allocation3 + $0x140] sm:$0xff] %vm1615_vm3, %v7986_v48  ;;  %v5587_v30 = vadd.f32 %v5509_v11, %v5363_v9  ;;  %v8437_v23 = vld [vmem:[#allocation3 + $0x133] sm:$0xff]  ;;  %v13182_v10 = vpop.f32.mrf.mxu1 }
 0x76a   : > { %v6309_v14 = vld [vmem:[#allocation3 + $0x158] sm:$0xff]  ;;  %9012 = vmatpush.msra.mxu0 %v8814_v38  ;;  %v8512_v46 = vmax.f32 %v8362_v61, %v8437_v23  ;;  %v5511_v11 = vld [vmem:[#allocation3 + $0x170] sm:$0xff] }
 0x76b   : > { %v6387_v24 = vadd.f32 %v6309_v14, %v14155_v31  ;;  %5665 = vst.msk [vmem:[#allocation3 + $0x160] sm:$0xff] %vm1615_vm3, %v5587_v30  ;;  %v8139_v30 = vld [vmem:[#allocation3 + $0x128] sm:$0xff] }
 0x76c   : > { %v7109_v59 = vld [vmem:[#allocation3 + $0x150] sm:$0xff]  ;;  %9013 = vmatpush.msra.mxu0 %v8813_v0  ;;  %v8587_v36 = vmax.f32 %v8287_v37, %v8512_v46  ;;  %10134 = vmatmul.msk.f32.gmra.mxu1 %vm960_vm2, %v6562_v54  ;;  %v8289_v14 = vmax.f32 %v8139_v30, %v8214_v25  ;;  %v13216_v46 = vpop.f32.mrf.mxu0 }
 0x76d   : > { %v7187_v50 = vadd.f32 %v7109_v59, %v13124_v41  ;;  %6465 = vst.msk [vmem:[#allocation3 + $0x158] sm:$0xff] %vm1615_vm3, %v6387_v24  ;;  %9977 = vmatmul.msk.f32.gmra.mxu3 %vm960_vm2, %v4959_v28  ;;  %10221 = vmatmul.msk.f32.gmra.mxu2 %vm960_vm2, %v7372_v4  ;;  %v8213_v41 = vld [vmem:[#allocation3 + $0x121] sm:$0xff]  ;;  %v4961_v24 = vld [vmem:[#allocation2 + $0x214] sm:$0xff]  ;;  %v7374_v54 = vld [vmem:[#allocation2 + $0x27e] sm:$0xff] }
 0x76e   : > { %v7909_v19 = vld [vmem:[#allocation3 + $0x148] sm:$0xff]  ;;  %9014 = vmatpush.msra.mxu0 %v8812_v40  ;;  %8662 = vst.msk [vmem:[#allocation4 + $0x118] sm:$0xff] %vm1615_vm3, %v8587_v36  ;;  %v8215_v4 = vld [vmem:[#allocation3 + $0x131] sm:$0xff] }
 0x76f   : > { %v7987_v12 = vadd.f32 %v7909_v19, %v13055_v6  ;;  %7265 = vst.msk [vmem:[#allocation3 + $0x150] sm:$0xff] %vm1615_vm3, %v7187_v50  ;;  %v8288_v6 = vmax.f32 %v8138_v1, %v8213_v41  ;;  %v6564_v0 = vld [vmem:[#allocation2 + $0x235] sm:$0xff]  ;;  %v5512_v40 = vld [vmem:[#allocation3 + $0x178] sm:$0xff] }
 0x770   : > { %9015 = vmatpush.msra.mxu0 %v8811_v43  ;;  %v5366_v27 = vpop.f32.mrf.mxu3  ;;  %v8363_v33 = vld [vmem:[#allocation3 + $0x13a] sm:$0xff]  ;;  %v8140_v43 = vld [vmem:[#allocation3 + $0x130] sm:$0xff] }
 0x771   : > { %8065 = vst.msk [vmem:[#allocation3 + $0x148] sm:$0xff] %vm1615_vm3, %v7987_v12  ;;  %v5588_v60 = vadd.f32 %v5510_v42, %v5366_v27  ;;  %v8438_v49 = vld [vmem:[#allocation3 + $0x13b] sm:$0xff]  ;;  %v13199_v26 = vpop.f32.mrf.mxu1 }
 0x772   : > { %v6310_v22 = vld [vmem:[#allocation3 + $0x160] sm:$0xff]  ;;  %9016 = vmatpush.msra.mxu0 %v8810_v17  ;;  %v8513_v53 = vmax.f32 %v8363_v33, %v8438_v49  ;;  %v8290_v33 = vmax.f32 %v8140_v43, %v8215_v4  ;;  %v4962_v1 = vld [vmem:[#allocation2 + $0x21c] sm:$0xff] }
 0x773   : > { %v6388_v7 = vadd.f32 %v6310_v22, %v14156_v63  ;;  %5666 = vst.msk [vmem:[#allocation3 + $0x168] sm:$0xff] %vm1615_vm3, %v5588_v60  ;;  %v6565_v49 = vld [vmem:[#allocation2 + $0x23d] sm:$0xff]  ;;  %v7375_v63 = vld [vmem:[#allocation2 + $0x286] sm:$0xff] }
 0x774   : > { %v7110_v3 = vld [vmem:[#allocation3 + $0x158] sm:$0xff]  ;;  %9017 = vmatpush.msra.mxu0 %v8809_v16  ;;  %v8588_v57 = vmax.f32 %v8288_v6, %v8513_v53  ;;  %10135 = vmatmul.msk.f32.gmra.mxu1 %vm960_vm2, %v6563_v55  ;;  %v13235_v6 = vpop.f32.mrf.mxu0 }
 0x775   : > { %v7188_v5 = vadd.f32 %v7110_v3, %v13139_v29  ;;  %6466 = vst.msk [vmem:[#allocation3 + $0x160] sm:$0xff] %vm1615_vm3, %v6388_v7  ;;  %9978 = vmatmul.msk.f32.gmra.mxu3 %vm960_vm2, %v4960_v13  ;;  %10222 = vmatmul.msk.f32.gmra.mxu2 %vm960_vm2, %v7373_v62  ;;  %v8216_v16 = vld [vmem:[#allocation3 + $0x139] sm:$0xff] }
 0x776   : > { %v7910_v48 = vld [vmem:[#allocation3 + $0x150] sm:$0xff]  ;;  %8663 = vst.msk [vmem:[#allocation4 + $0x120] sm:$0xff] %vm1615_vm3, %v8588_v57  ;;  %v5513_v13 = vld [vmem:[#allocation3 + $0x180] sm:$0xff] }
 0x777   : > { %v7988_v20 = vadd.f32 %v7910_v48, %v13076_v39  ;;  %7266 = vst.msk [vmem:[#allocation3 + $0x158] sm:$0xff] %vm1615_vm3, %v7188_v5  ;;  %v8141_v5 = vld [vmem:[#allocation3 + $0x138] sm:$0xff] }
 0x778   : > { %v5369_v9 = vpop.f32.mrf.mxu3  ;;  %v8364_v29 = vld [vmem:[#allocation3 + $0x142] sm:$0xff]  ;;  %v8291_v25 = vmax.f32 %v8141_v5, %v8216_v16 }
 0x779   : > { %8066 = vst.msk [vmem:[#allocation3 + $0x150] sm:$0xff] %vm1615_vm3, %v7988_v20  ;;  %v5589_v61 = vadd.f32 %v5511_v11, %v5369_v9  ;;  %v8439_v38 = vld [vmem:[#allocation3 + $0x143] sm:$0xff]  ;;  %v13214_v23 = vpop.f32.mrf.mxu1 }
 0x77a   : > { %v6311_v32 = vld [vmem:[#allocation3 + $0x168] sm:$0xff]  ;;  %v8514_v37 = vmax.f32 %v8364_v29, %v8439_v38  ;;  %v4963_v29 = vld [vmem:[#allocation2 + $0x224] sm:$0xff] }
 0x77b   : > { %v6389_v39 = vadd.f32 %v6311_v32, %v12298_v8  ;;  %5667 = vst.msk [vmem:[#allocation3 + $0x170] sm:$0xff] %vm1615_vm3, %v5589_v61  ;;  %v13226_v8 = vpop.f32.mrf.mxu2  ;;  %v6566_v61 = vld [vmem:[#allocation2 + $0x245] sm:$0xff]  ;;  %v7376_v32 = vld [vmem:[#allocation2 + $0x28e] sm:$0xff] }
 0x77c   : > { %v7111_v31 = vld [vmem:[#allocation3 + $0x160] sm:$0xff]  ;;  %v8589_v59 = vmax.f32 %v8289_v14, %v8514_v37  ;;  %10136 = vmatmul.msk.f32.gmra.mxu1 %vm960_vm2, %v6564_v0 }
 0x77d   : > { %v7189_v28 = vadd.f32 %v7111_v31, %v13154_v56  ;;  %6467 = vst.msk [vmem:[#allocation3 + $0x168] sm:$0xff] %vm1615_vm3, %v6389_v39  ;;  %9979 = vmatmul.msk.f32.gmra.mxu3 %vm960_vm2, %v4961_v24  ;;  %10223 = vmatmul.msk.f32.gmra.mxu2 %vm960_vm2, %v7374_v54  ;;  %v8217_v39 = vld [vmem:[#allocation3 + $0x141] sm:$0xff] }
 0x77e   : > { %v7911_v36 = vld [vmem:[#allocation3 + $0x158] sm:$0xff]  ;;  %8664 = vst.msk [vmem:[#allocation4 + $0x128] sm:$0xff] %vm1615_vm3, %v8589_v59  ;;  %v5514_v31 = vld [vmem:[#allocation3 + $0x188] sm:$0xff]  ;;  %v8142_v59 = vld [vmem:[#allocation3 + $0x140] sm:$0xff] }
 0x77f   : > { %v7989_v50 = vadd.f32 %v7911_v36, %v13093_v44  ;;  %7267 = vst.msk [vmem:[#allocation3 + $0x160] sm:$0xff] %vm1615_vm3, %v7189_v28 }
 0x780   : > { %v5372_v56 = vpop.f32.mrf.mxu3  ;;  %v8365_v19 = vld [vmem:[#allocation3 + $0x14a] sm:$0xff] }
 0x781   : > { %8067 = vst.msk [vmem:[#allocation3 + $0x158] sm:$0xff] %vm1615_vm3, %v7989_v50  ;;  %v5590_v12 = vadd.f32 %v5512_v40, %v5372_v56  ;;  %v8440_v41 = vld [vmem:[#allocation3 + $0x14b] sm:$0xff]  ;;  %v13231_v42 = vpop.f32.mrf.mxu1  ;;  %v8292_v50 = vmax.f32 %v8142_v59, %v8217_v39  ;;  %v4966_v59 = vld [vmem:[#allocation2 + $0x23c] sm:$0xff] }
 0x782   : > { %v6312_v27 = vld [vmem:[#allocation3 + $0x170] sm:$0xff]  ;;  %v8515_v60 = vmax.f32 %v8365_v19, %v8440_v41  ;;  %v4964_v19 = vld [vmem:[#allocation2 + $0x22c] sm:$0xff] }
 0x783   : > { %v6390_v17 = vadd.f32 %v6312_v27, %v12321_v45  ;;  %5668 = vst.msk [vmem:[#allocation3 + $0x178] sm:$0xff] %vm1615_vm3, %v5590_v12  ;;  %v13245_v55 = vpop.f32.mrf.mxu2  ;;  %v6567_v12 = vld [vmem:[#allocation2 + $0x24d] sm:$0xff]  ;;  %v7377_v27 = vld [vmem:[#allocation2 + $0x296] sm:$0xff] }
 0x784   : > { %v7112_v44 = vld [vmem:[#allocation3 + $0x168] sm:$0xff]  ;;  %v8590_v22 = vmax.f32 %v8290_v33, %v8515_v60  ;;  %10137 = vmatmul.msk.f32.gmra.mxu1 %vm960_vm2, %v6565_v49 }
 0x785   : > { %v7190_v53 = vadd.f32 %v7112_v44, %v13169_v18  ;;  %6468 = vst.msk [vmem:[#allocation3 + $0x170] sm:$0xff] %vm1615_vm3, %v6390_v17  ;;  %9980 = vmatmul.msk.f32.gmra.mxu3 %vm960_vm2, %v4962_v1  ;;  %10224 = vmatmul.msk.f32.gmra.mxu2 %vm960_vm2, %v7375_v63  ;;  %v8218_v60 = vld [vmem:[#allocation3 + $0x149] sm:$0xff] }
 0x786   : > { %v7912_v7 = vld [vmem:[#allocation3 + $0x160] sm:$0xff]  ;;  %8665 = vst.msk [vmem:[#allocation4 + $0x130] sm:$0xff] %vm1615_vm3, %v8590_v22  ;;  %v5515_v44 = vld [vmem:[#allocation3 + $0x190] sm:$0xff]  ;;  %v8143_v22 = vld [vmem:[#allocation3 + $0x148] sm:$0xff] }
 0x787   : > { %v7990_v45 = vadd.f32 %v7912_v7, %v13111_v52  ;;  %7268 = vst.msk [vmem:[#allocation3 + $0x168] sm:$0xff] %vm1615_vm3, %v7190_v53 }
 0x788   : > { %v5375_v3 = vpop.f32.mrf.mxu3  ;;  %v8366_v18 = vld [vmem:[#allocation3 + $0x152] sm:$0xff] }
 0x789   : > { %8068 = vst.msk [vmem:[#allocation3 + $0x160] sm:$0xff] %vm1615_vm3, %v7990_v45  ;;  %v5591_v57 = vadd.f32 %v5513_v13, %v5375_v3  ;;  %v8441_v62 = vld [vmem:[#allocation3 + $0x153] sm:$0xff]  ;;  %v13248_v20 = vpop.f32.mrf.mxu1  ;;  %v8293_v45 = vmax.f32 %v8143_v22, %v8218_v60  ;;  %v4967_v22 = vld [vmem:[#allocation2 + $0x244] sm:$0xff] }
 0x78a   : > { %v6313_v48 = vld [vmem:[#allocation3 + $0x178] sm:$0xff]  ;;  %v8516_v9 = vmax.f32 %v8366_v18, %v8441_v62  ;;  %v4965_v18 = vld [vmem:[#allocation2 + $0x234] sm:$0xff] }
 0x78b   : > { %v6391_v52 = vadd.f32 %v6313_v48, %v12343_v51  ;;  %5669 = vst.msk [vmem:[#allocation3 + $0x180] sm:$0xff] %vm1615_vm3, %v5591_v57  ;;  %v13258_v51 = vpop.f32.mrf.mxu0  ;;  %v13265_v56 = vpop.f32.mrf.mxu2  ;;  %v14157_v3 = vld [vmem:[#allocation19_spill] sm:$0xff]  ;;  %v6568_v57 = vld [vmem:[#allocation2 + $0x255] sm:$0xff] }
 0x78c   : > { %v7113_v11 = vld [vmem:[#allocation3 + $0x170] sm:$0xff]  ;;  %v8591_v30 = vmax.f32 %v8291_v25, %v8516_v9  ;;  %10138 = vmatmul.msk.f32.gmra.mxu1 %vm960_vm2, %v6566_v61  ;;  %v5516_v61 = vld [vmem:[#allocation3 + $0x198] sm:$0xff] }
 0x78d   : > { %v7191_v38 = vadd.f32 %v7113_v11, %v13182_v10  ;;  %6469 = vst.msk [vmem:[#allocation3 + $0x178] sm:$0xff] %vm1615_vm3, %v6391_v52  ;;  %9981 = vmatmul.msk.f32.gmra.mxu3 %vm960_vm2, %v4963_v29  ;;  %10225 = vmatmul.msk.f32.gmra.mxu2 %vm960_vm2, %v7376_v32  ;;  %v7378_v25 = vld [vmem:[#allocation2 + $0x29e] sm:$0xff] }
 0x78e   : > { %v7913_v14 = vld [vmem:[#allocation3 + $0x168] sm:$0xff]  ;;  %8666 = vst.msk [vmem:[#allocation4 + $0x138] sm:$0xff] %vm1615_vm3, %v8591_v30  ;;  %v8219_v11 = vld [vmem:[#allocation3 + $0x151] sm:$0xff] }
 0x78f   : > { %v7991_v37 = vadd.f32 %v7913_v14, %v13128_v15  ;;  %7269 = vst.msk [vmem:[#allocation3 + $0x170] sm:$0xff] %vm1615_vm3, %v7191_v38  ;;  %v8144_v38 = vld [vmem:[#allocation3 + $0x150] sm:$0xff] }
 0x790   : > { %v5378_v10 = vpop.f32.mrf.mxu3  ;;  %v8367_v24 = vld [vmem:[#allocation3 + $0x15a] sm:$0xff]  ;;  %v8294_v39 = vmax.f32 %v8144_v38, %v8219_v11 }
 0x791   : > { %8069 = vst.msk [vmem:[#allocation3 + $0x168] sm:$0xff] %vm1615_vm3, %v7991_v37  ;;  %v5592_v0 = vadd.f32 %v5514_v31, %v5378_v10  ;;  %v8442_v28 = vld [vmem:[#allocation3 + $0x15b] sm:$0xff]  ;;  %v13263_v36 = vpop.f32.mrf.mxu1 }
 0x792   : > { %v6314_v54 = vld [vmem:[#allocation3 + $0x180] sm:$0xff]  ;;  %v8517_v4 = vmax.f32 %v8367_v24, %v8442_v28  ;;  %v6569_v28 = vld [vmem:[#allocation2 + $0x25d] sm:$0xff] }
 0x793   : > { %v6392_v15 = vadd.f32 %v6314_v54, %v12360_v21  ;;  %5670 = vst.msk [vmem:[#allocation3 + $0x188] sm:$0xff] %vm1615_vm3, %v5592_v0  ;;  %v13277_v1 = vpop.f32.mrf.mxu0  ;;  %v13284_v62 = vpop.f32.mrf.mxu2  ;;  %v14158_v24 = vld [vmem:[#allocation20_spill] sm:$0xff] }
 0x794   : > { %v7114_v40 = vld [vmem:[#allocation3 + $0x178] sm:$0xff]  ;;  %v8592_v43 = vmax.f32 %v8292_v50, %v8517_v4  ;;  %10139 = vmatmul.msk.f32.gmra.mxu1 %vm960_vm2, %v6567_v12 }
 0x795   : > { %v7192_v41 = vadd.f32 %v7114_v40, %v13199_v26  ;;  %6470 = vst.msk [vmem:[#allocation3 + $0x180] sm:$0xff] %vm1615_vm3, %v6392_v15  ;;  %9982 = vmatmul.msk.f32.gmra.mxu3 %vm960_vm2, %v4964_v19  ;;  %10226 = vmatmul.msk.f32.gmra.mxu2 %vm960_vm2, %v7377_v27  ;;  %v8220_v19 = vld [vmem:[#allocation3 + $0x159] sm:$0xff] }
 0x796   : > { %v7914_v33 = vld [vmem:[#allocation3 + $0x170] sm:$0xff]  ;;  %8667 = vst.msk [vmem:[#allocation4 + $0x140] sm:$0xff] %vm1615_vm3, %v8592_v43  ;;  %v5517_v43 = vld [vmem:[#allocation3 + $0x1a0] sm:$0xff]  ;;  %v8145_v27 = vld [vmem:[#allocation3 + $0x158] sm:$0xff] }
 0x797   : > { %v7992_v21 = vadd.f32 %v7914_v33, %v13149_v58  ;;  %7270 = vst.msk [vmem:[#allocation3 + $0x178] sm:$0xff] %vm1615_vm3, %v7192_v41 }
 0x798   : > { %v5381_v17 = vpop.f32.mrf.mxu3  ;;  %v8368_v26 = vld [vmem:[#allocation3 + $0x162] sm:$0xff] }
 0x799   : > { %8070 = vst.msk [vmem:[#allocation3 + $0x170] sm:$0xff] %vm1615_vm3, %v7992_v21  ;;  %v5593_v49 = vadd.f32 %v5515_v44, %v5381_v17  ;;  %v8443_v53 = vld [vmem:[#allocation3 + $0x163] sm:$0xff]  ;;  %v13280_v7 = vpop.f32.mrf.mxu1  ;;  %v8295_v17 = vmax.f32 %v8145_v27, %v8220_v19 }
 0x79a   : > { %v6315_v63 = vld [vmem:[#allocation3 + $0x188] sm:$0xff]  ;;  %v8518_v16 = vmax.f32 %v8368_v26, %v8443_v53  ;;  %v6570_v53 = vld [vmem:[#allocation2 + $0x265] sm:$0xff] }
 0x79b   : > { %v6393_v58 = vadd.f32 %v6315_v63, %v14157_v3  ;;  %5671 = vst.msk [vmem:[#allocation3 + $0x190] sm:$0xff] %vm1615_vm3, %v5593_v49  ;;  %v13297_v31 = vpop.f32.mrf.mxu0  ;;  %v13306_v15 = vpop.f32.mrf.mxu2  ;;  %v14159_v26 = vld [vmem:[#allocation21_spill] sm:$0xff] }
 0x79c   : > { %v7115_v13 = vld [vmem:[#allocation3 + $0x180] sm:$0xff]  ;;  %v8593_v5 = vmax.f32 %v8293_v45, %v8518_v16  ;;  %10140 = vmatmul.msk.f32.gmra.mxu1 %vm960_vm2, %v6568_v57 }
 0x79d   : > { %v7193_v48 = vadd.f32 %v7115_v13, %v13214_v23  ;;  %6471 = vst.msk [vmem:[#allocation3 + $0x188] sm:$0xff] %vm1615_vm3, %v6393_v58  ;;  %9983 = vmatmul.msk.f32.gmra.mxu3 %vm960_vm2, %v4965_v18  ;;  %10227 = vmatmul.msk.f32.gmra.mxu2 %vm960_vm2, %v7378_v25  ;;  %v8221_v58 = vld [vmem:[#allocation3 + $0x161] sm:$0xff] }
 0x79e   : > { %v7915_v9 = vld [vmem:[#allocation3 + $0x178] sm:$0xff]  ;;  %8668 = vst.msk [vmem:[#allocation4 + $0x148] sm:$0xff] %vm1615_vm3, %v8593_v5  ;;  %v5518_v18 = vld [vmem:[#allocation3 + $0x1a8] sm:$0xff]  ;;  %v8146_v5 = vld [vmem:[#allocation3 + $0x160] sm:$0xff] }
 0x79f   : > { %v7993_v52 = vadd.f32 %v7915_v9, %v13166_v35  ;;  %7271 = vst.msk [vmem:[#allocation3 + $0x180] sm:$0xff] %vm1615_vm3, %v7193_v48 }
 0x7a0   : > { %v5384_v29 = vpop.f32.mrf.mxu3  ;;  %v8369_v23 = vld [vmem:[#allocation3 + $0x16a] sm:$0xff] }
 0x7a1   : > { %8071 = vst.msk [vmem:[#allocation3 + $0x178] sm:$0xff] %vm1615_vm3, %v7993_v52  ;;  %v5594_v30 = vadd.f32 %v5516_v61, %v5384_v29  ;;  %v8444_v32 = vld [vmem:[#allocation3 + $0x16b] sm:$0xff]  ;;  %v13295_v37 = vpop.f32.mrf.mxu1  ;;  %v8296_v52 = vmax.f32 %v8146_v5, %v8221_v58 }
 0x7a2   : > { %v6316_v14 = vld [vmem:[#allocation3 + $0x190] sm:$0xff]  ;;  %v8519_v10 = vmax.f32 %v8369_v23, %v8444_v32  ;;  %v4968_v32 = vld [vmem:[#allocation2 + $0x24c] sm:$0xff] }
 0x7a3   : > { %v6394_v35 = vadd.f32 %v6316_v14, %v14158_v24  ;;  %5672 = vst.msk [vmem:[#allocation3 + $0x198] sm:$0xff] %vm1615_vm3, %v5594_v30  ;;  %v13315_v45 = vpop.f32.mrf.mxu0  ;;  %v14160_v23 = vld [vmem:[#allocation22_spill] sm:$0xff]  ;;  %v6571_v14 = vld [vmem:[#allocation2 + $0x26d] sm:$0xff] }
 0x7a4   : > { %v7116_v0 = vld [vmem:[#allocation3 + $0x188] sm:$0xff]  ;;  %v8594_v54 = vmax.f32 %v8294_v39, %v8519_v10  ;;  %10141 = vmatmul.msk.f32.gmra.mxu1 %vm960_vm2, %v6569_v28 }
 0x7a5   : > { %v7194_v50 = vadd.f32 %v7116_v0, %v13231_v42  ;;  %6472 = vst.msk [vmem:[#allocation3 + $0x190] sm:$0xff] %vm1615_vm3, %v6394_v35  ;;  %9984 = vmatmul.msk.f32.gmra.mxu3 %vm960_vm2, %v4966_v59  ;;  %v8222_v24 = vld [vmem:[#allocation3 + $0x169] sm:$0xff] }
 0x7a6   : > { %v7916_v4 = vld [vmem:[#allocation3 + $0x180] sm:$0xff]  ;;  %8669 = vst.msk [vmem:[#allocation4 + $0x150] sm:$0xff] %vm1615_vm3, %v8594_v54  ;;  %v5519_v59 = vld [vmem:[#allocation3 + $0x1b0] sm:$0xff]  ;;  %v8147_v54 = vld [vmem:[#allocation3 + $0x168] sm:$0xff] }
 0x7a7   : > { %v7994_v40 = vadd.f32 %v7916_v4, %v13184_v34  ;;  %7272 = vst.msk [vmem:[#allocation3 + $0x188] sm:$0xff] %vm1615_vm3, %v7194_v50 }
 0x7a8   : > { %v5387_v12 = vpop.f32.mrf.mxu3  ;;  %v8370_v41 = vld [vmem:[#allocation3 + $0x172] sm:$0xff] }
 0x7a9   : > { %8072 = vst.msk [vmem:[#allocation3 + $0x180] sm:$0xff] %vm1615_vm3, %v7994_v40  ;;  %v5595_v42 = vadd.f32 %v5517_v43, %v5387_v12  ;;  %v8445_v33 = vld [vmem:[#allocation3 + $0x173] sm:$0xff]  ;;  %v13311_v60 = vpop.f32.mrf.mxu1  ;;  %v8297_v40 = vmax.f32 %v8147_v54, %v8222_v24 }
 0x7aa   : > { %v6317_v21 = vld [vmem:[#allocation3 + $0x198] sm:$0xff]  ;;  %v8520_v44 = vmax.f32 %v8370_v41, %v8445_v33 }
 0x7ab   : > { %v6395_v49 = vadd.f32 %v6317_v21, %v14159_v26  ;;  %5673 = vst.msk [vmem:[#allocation3 + $0x1a0] sm:$0xff] %vm1615_vm3, %v5595_v42  ;;  %v13336_v35 = vpop.f32.mrf.mxu0  ;;  %v14161_v42 = vld [vmem:[#allocation23_spill] sm:$0xff]  ;;  %v4969_v21 = vld [vmem:[#allocation2 + $0x254] sm:$0xff] }
 0x7ac   : > { %v7117_v34 = vld [vmem:[#allocation3 + $0x190] sm:$0xff]  ;;  %v8595_v63 = vmax.f32 %v8295_v17, %v8520_v44  ;;  %10142 = vmatmul.msk.f32.gmra.mxu1 %vm960_vm2, %v6570_v53 }
 0x7ad   : > { %v7195_v16 = vadd.f32 %v7117_v34, %v13248_v20  ;;  %6473 = vst.msk [vmem:[#allocation3 + $0x198] sm:$0xff] %vm1615_vm3, %v6395_v49  ;;  %9985 = vmatmul.msk.f32.gmra.mxu3 %vm960_vm2, %v4967_v22  ;;  %v13324_v20 = vpop.f32.mrf.mxu2  ;;  %v6572_v17 = vld [vmem:[#allocation2 + $0x275] sm:$0xff]  ;;  %v5520_v22 = vld [vmem:[#allocation3 + $0x1b8] sm:$0xff] }
 0x7ae   : > { %v7917_v3 = vld [vmem:[#allocation3 + $0x188] sm:$0xff]  ;;  %8670 = vst.msk [vmem:[#allocation4 + $0x158] sm:$0xff] %vm1615_vm3, %v8595_v63  ;;  %v8223_v49 = vld [vmem:[#allocation3 + $0x171] sm:$0xff] }
 0x7af   : > { %v7995_v13 = vadd.f32 %v7917_v3, %v13203_v47  ;;  %7273 = vst.msk [vmem:[#allocation3 + $0x190] sm:$0xff] %vm1615_vm3, %v7195_v16  ;;  %v8148_v63 = vld [vmem:[#allocation3 + $0x170] sm:$0xff] }
 0x7b0   : > { %v5390_v57 = vpop.f32.mrf.mxu3  ;;  %v8371_v48 = vld [vmem:[#allocation3 + $0x17a] sm:$0xff] }
 0x7b1   : > { %v8446_v25 = vld [vmem:[#allocation3 + $0x17b] sm:$0xff]  ;;  %8073 = vst.msk [vmem:[#allocation3 + $0x188] sm:$0xff] %vm1615_vm3, %v7995_v13  ;;  %v5596_v9 = vadd.f32 %v5518_v18, %v5390_v57  ;;  %v13327_v61 = vpop.f32.mrf.mxu1  ;;  %v8298_v13 = vmax.f32 %v8148_v63, %v8223_v49  ;;  %v6575_v63 = vld [vmem:[#allocation2 + $0x28d] sm:$0xff] }
 0x7b2   : > { %v8521_v11 = vmax.f32 %v8371_v48, %v8446_v25  ;;  %v6318_v29 = vld [vmem:[#allocation3 + $0x1a0] sm:$0xff] }
 0x7b3   : > { %v6396_v30 = vadd.f32 %v6318_v29, %v14160_v23  ;;  %5674 = vst.msk [vmem:[#allocation3 + $0x1a8] sm:$0xff] %vm1615_vm3, %v5596_v9  ;;  %v4970_v9 = vld [vmem:[#allocation2 + $0x25c] sm:$0xff] }
 0x7b4   : > { %v8596_v47 = vmax.f32 %v8296_v52, %v8521_v11  ;;  %v7118_v38 = vld [vmem:[#allocation3 + $0x198] sm:$0xff]  ;;  %10143 = vmatmul.msk.f32.gmra.mxu1 %vm960_vm2, %v6571_v14 }
 0x7b5   : > { %v7196_v39 = vadd.f32 %v7118_v38, %v13263_v36  ;;  %6474 = vst.msk [vmem:[#allocation3 + $0x1a0] sm:$0xff] %vm1615_vm3, %v6396_v30  ;;  %9986 = vmatmul.msk.f32.gmra.mxu3 %vm960_vm2, %v4968_v32  ;;  %v13343_v41 = vpop.f32.mrf.mxu2  ;;  %v6573_v52 = vld [vmem:[#allocation2 + $0x27d] sm:$0xff] }
 0x7b6   : > { %v7918_v10 = vld [vmem:[#allocation3 + $0x190] sm:$0xff]  ;;  %8671 = vst.msk [vmem:[#allocation4 + $0x160] sm:$0xff] %vm1615_vm3, %v8596_v47  ;;  %v8224_v30 = vld [vmem:[#allocation3 + $0x179] sm:$0xff] }
 0x7b7   : > { %v7996_v0 = vadd.f32 %v7918_v10, %v13226_v8  ;;  %7274 = vst.msk [vmem:[#allocation3 + $0x198] sm:$0xff] %vm1615_vm3, %v7196_v39  ;;  %v5521_v47 = vld [vmem:[#allocation3 + $0x1c0] sm:$0xff]  ;;  %v8149_v32 = vld [vmem:[#allocation3 + $0x178] sm:$0xff] }
 0x7b8   : > { %v5393_v28 = vpop.f32.mrf.mxu3  ;;  %v8372_v36 = vld [vmem:[#allocation3 + $0x182] sm:$0xff]  ;;  %v8299_v10 = vmax.f32 %v8149_v32, %v8224_v30 }
 0x7b9   : > { %v8447_v50 = vld [vmem:[#allocation3 + $0x183] sm:$0xff]  ;;  %8074 = vst.msk [vmem:[#allocation3 + $0x190] sm:$0xff] %vm1615_vm3, %v7996_v0  ;;  %v5597_v4 = vadd.f32 %v5519_v59, %v5393_v28  ;;  %v13341_v43 = vpop.f32.mrf.mxu1 }
 0x7ba   : > { %v8522_v19 = vmax.f32 %v8372_v36, %v8447_v50  ;;  %v6319_v12 = vld [vmem:[#allocation3 + $0x1a8] sm:$0xff]  ;;  %v4971_v50 = vld [vmem:[#allocation2 + $0x264] sm:$0xff] }
 0x7bb   : > { %v6397_v27 = vadd.f32 %v6319_v12, %v14161_v42  ;;  %5675 = vst.msk [vmem:[#allocation3 + $0x1b0] sm:$0xff] %vm1615_vm3, %v5597_v4  ;;  %v6574_v4 = vld [vmem:[#allocation2 + $0x285] sm:$0xff] }
 0x7bc   : > { %v8597_v8 = vmax.f32 %v8297_v40, %v8522_v19  ;;  %v7119_v33 = vld [vmem:[#allocation3 + $0x1a0] sm:$0xff]  ;;  %10144 = vmatmul.msk.f32.gmra.mxu1 %vm960_vm2, %v6572_v17 }
 0x7bd   : > { %v7197_v44 = vadd.f32 %v7119_v33, %v13280_v7  ;;  %6475 = vst.msk [vmem:[#allocation3 + $0x1a8] sm:$0xff] %vm1615_vm3, %v6397_v27  ;;  %9987 = vmatmul.msk.f32.gmra.mxu3 %vm960_vm2, %v4969_v21  ;;  %v13354_v7 = vpop.f32.mrf.mxu0  ;;  %v13361_v11 = vpop.f32.mrf.mxu2  ;;  %v8225_v42 = vld [vmem:[#allocation3 + $0x181] sm:$0xff] }
 0x7be   : > { %v7919_v26 = vld [vmem:[#allocation3 + $0x198] sm:$0xff]  ;;  %8672 = vst.msk [vmem:[#allocation4 + $0x168] sm:$0xff] %vm1615_vm3, %v8597_v8  ;;  %v5522_v8 = vld [vmem:[#allocation3 + $0x1c8] sm:$0xff]  ;;  %v8150_v21 = vld [vmem:[#allocation3 + $0x180] sm:$0xff] }
 0x7bf   : > { %v7997_v34 = vadd.f32 %v7919_v26, %v13245_v55  ;;  %7275 = vst.msk [vmem:[#allocation3 + $0x1a0] sm:$0xff] %vm1615_vm3, %v7197_v44  ;;  %v8300_v49 = vmax.f32 %v8150_v21, %v8225_v42 }
 0x7c0   : > { %v5396_v53 = vpop.f32.mrf.mxu3  ;;  %v8373_v16 = vld [vmem:[#allocation3 + $0x18a] sm:$0xff] }
 0x7c1   : > { %v8448_v3 = vld [vmem:[#allocation3 + $0x18b] sm:$0xff]  ;;  %8075 = vst.msk [vmem:[#allocation3 + $0x198] sm:$0xff] %vm1615_vm3, %v7997_v34  ;;  %v5598_v58 = vadd.f32 %v5520_v22, %v5396_v53  ;;  %v13357_v5 = vpop.f32.mrf.mxu1 }
 0x7c2   : > { %v8523_v18 = vmax.f32 %v8373_v16, %v8448_v3  ;;  %v6320_v57 = vld [vmem:[#allocation3 + $0x1b0] sm:$0xff]  ;;  %v4972_v53 = vld [vmem:[#allocation2 + $0x26c] sm:$0xff] }
 0x7c3   : > { %v6398_v48 = vadd.f32 %v6320_v57, %v13196_v2  ;;  %5676 = vst.msk [vmem:[#allocation3 + $0x1b8] sm:$0xff] %vm1615_vm3, %v5598_v58 }
 0x7c4   : > { %v8598_v55 = vmax.f32 %v8298_v13, %v8523_v18  ;;  %v7120_v25 = vld [vmem:[#allocation3 + $0x1a8] sm:$0xff]  ;;  %10145 = vmatmul.msk.f32.gmra.mxu1 %vm960_vm2, %v6573_v52 }
 0x7c5   : > { %v7198_v29 = vadd.f32 %v7120_v25, %v13295_v37  ;;  %6476 = vst.msk [vmem:[#allocation3 + $0x1b0] sm:$0xff] %vm1615_vm3, %v6398_v48  ;;  %9988 = vmatmul.msk.f32.gmra.mxu3 %vm960_vm2, %v4970_v9  ;;  %v13373_v28 = vpop.f32.mrf.mxu0  ;;  %v13382_v12 = vpop.f32.mrf.mxu2  ;;  %v8226_v48 = vld [vmem:[#allocation3 + $0x189] sm:$0xff] }
 0x7c6   : > { %v7920_v23 = vld [vmem:[#allocation3 + $0x1a0] sm:$0xff]  ;;  %8673 = vst.msk [vmem:[#allocation4 + $0x170] sm:$0xff] %vm1615_vm3, %v8598_v55 }
 0x7c7   : > { %v7998_v2 = vadd.f32 %v7920_v23, %v13265_v56  ;;  %7276 = vst.msk [vmem:[#allocation3 + $0x1a8] sm:$0xff] %vm1615_vm3, %v7198_v29  ;;  %v8838_v29 = vld [vmem:[#allocation4 + $0x168] sm:$0xff]  ;;  %v8151_v23 = vld [vmem:[#allocation3 + $0x188] sm:$0xff] }
 0x7c8   : > { %v5399_v38 = vpop.f32.mrf.mxu3  ;;  %v8374_v14 = vld [vmem:[#allocation3 + $0x192] sm:$0xff] }
 0x7c9   : > { %v8449_v39 = vld [vmem:[#allocation3 + $0x193] sm:$0xff]  ;;  %8076 = vst.msk [vmem:[#allocation3 + $0x1a0] sm:$0xff] %vm1615_vm3, %v7998_v2  ;;  %v5599_v37 = vadd.f32 %v5521_v47, %v5399_v38  ;;  %v13371_v59 = vpop.f32.mrf.mxu1 }
 0x7ca   : > { %v8524_v24 = vmax.f32 %v8374_v14, %v8449_v39  ;;  %v6321_v0 = vld [vmem:[#allocation3 + $0x1b8] sm:$0xff]  ;;  %v8837_v14 = vld [vmem:[#allocation4 + $0x160] sm:$0xff] }
 0x7cb   : > { %v6399_v54 = vadd.f32 %v6321_v0, %v13216_v46  ;;  %5677 = vst.msk [vmem:[#allocation3 + $0x1c0] sm:$0xff] %vm1615_vm3, %v5599_v37  ;;  %v4973_v37 = vld [vmem:[#allocation2 + $0x274] sm:$0xff] }
 0x7cc   : > { %v8599_v56 = vmax.f32 %v8299_v10, %v8524_v24  ;;  %v7121_v36 = vld [vmem:[#allocation3 + $0x1b0] sm:$0xff]  ;;  %10146 = vmatmul.msk.f32.gmra.mxu1 %vm960_vm2, %v6574_v4 }
 0x7cd   : > { %v7199_v40 = vadd.f32 %v7121_v36, %v13311_v60  ;;  %6477 = vst.msk [vmem:[#allocation3 + $0x1b8] sm:$0xff] %vm1615_vm3, %v6399_v54  ;;  %9989 = vmatmul.msk.f32.gmra.mxu3 %vm960_vm2, %v4971_v50  ;;  %v13391_v3 = vpop.f32.mrf.mxu0  ;;  %v8839_v57 = vld [vmem:[#allocation4 + $0x170] sm:$0xff]  ;;  %v13400_v9 = vpop.f32.mrf.mxu2  ;;  %v6576_v10 = vld [vmem:[#allocation2 + $0x295] sm:$0xff] }
 0x7ce   : > { %v7921_v19 = vld [vmem:[#allocation3 + $0x1a8] sm:$0xff]  ;;  %8674 = vst.msk [vmem:[#allocation4 + $0x178] sm:$0xff] %vm1615_vm3, %v8599_v56  ;;  %v8835_v50 = vld [vmem:[#allocation4 + $0x150] sm:$0xff]  ;;  %v8227_v4 = vld [vmem:[#allocation3 + $0x191] sm:$0xff] }
 0x7cf   : > { %v7999_v46 = vadd.f32 %v7921_v19, %v13284_v62  ;;  %7277 = vst.msk [vmem:[#allocation3 + $0x1b0] sm:$0xff] %vm1615_vm3, %v7199_v40  ;;  %v8836_v54 = vld [vmem:[#allocation4 + $0x158] sm:$0xff]  ;;  %v5524_v19 = vld [vmem:[#allocation3 + $0x1d8] sm:$0xff] }
 0x7d0   : > { %v5402_v27 = vpop.f32.mrf.mxu3  ;;  %v8375_v33 = vld [vmem:[#allocation3 + $0x19a] sm:$0xff] }
 0x7d1   : > { %8077 = vst.msk [vmem:[#allocation3 + $0x1a8] sm:$0xff] %vm1615_vm3, %v7999_v46  ;;  %v5600_v60 = vadd.f32 %v5522_v8, %v5402_v27  ;;  %v8450_v17 = vld [vmem:[#allocation3 + $0x19b] sm:$0xff]  ;;  %v13387_v26 = vpop.f32.mrf.mxu1  ;;  %v8152_v8 = vld [vmem:[#allocation3 + $0x190] sm:$0xff] }
 0x7d2   : > { %v6322_v44 = vld [vmem:[#allocation3 + $0x1c0] sm:$0xff]  ;;  %v8525_v34 = vmax.f32 %v8375_v33, %v8450_v17  ;;  %v8834_v27 = vld [vmem:[#allocation4 + $0x148] sm:$0xff] }
 0x7d3   : > { %v6400_v22 = vadd.f32 %v6322_v44, %v13235_v6  ;;  %5678 = vst.msk [vmem:[#allocation3 + $0x1c8] sm:$0xff] %vm1615_vm3, %v5600_v60  ;;  %v8302_v60 = vmax.f32 %v8152_v8, %v8227_v4  ;;  %v5526_v4 = vld [vmem:[#allocation3 + $0x1e8] sm:$0xff] }
 0x7d4   : > { %v7122_v62 = vld [vmem:[#allocation3 + $0x1b8] sm:$0xff]  ;;  %v8600_v16 = vmax.f32 %v8300_v49, %v8525_v34  ;;  %10147 = vmatmul.msk.f32.gmra.mxu1 %vm960_vm2, %v6575_v63  ;;  %v8833_v49 = vld [vmem:[#allocation4 + $0x140] sm:$0xff] }
 0x7d5   : > { %v7200_v58 = vadd.f32 %v7122_v62, %v13327_v61  ;;  %6478 = vst.msk [vmem:[#allocation3 + $0x1c0] sm:$0xff] %vm1615_vm3, %v6400_v22  ;;  %9990 = vmatmul.msk.f32.gmra.mxu3 %vm960_vm2, %v4972_v53  ;;  %v8840_v13 = vld [vmem:[#allocation4 + $0x178] sm:$0xff]  ;;  %v5523_v61 = vld [vmem:[#allocation3 + $0x1d0] sm:$0xff]  ;;  %v13420_v17 = vpop.f32.mrf.mxu2 }
 0x7d6   : > { %v7922_v18 = vld [vmem:[#allocation3 + $0x1b0] sm:$0xff]  ;;  %9073 = vmatpush.msra.mxu3 %v8840_v13  ;;  %8675 = vst.msk [vmem:[#allocation4 + $0x180] sm:$0xff] %vm1615_vm3, %v8600_v16 }
 0x7d7   : > { %v8000_v6 = vadd.f32 %v7922_v18, %v13306_v15  ;;  %7278 = vst.msk [vmem:[#allocation3 + $0x1b8] sm:$0xff] %vm1615_vm3, %v7200_v58  ;;  %v8301_v15 = vmax.f32 %v8151_v23, %v8226_v48  ;;  %v4974_v62 = vld [vmem:[#allocation2 + $0x27c] sm:$0xff]  ;;  %v8832_v58 = vld [vmem:[#allocation4 + $0x138] sm:$0xff]  ;;  %v8831_v18 = vld [vmem:[#allocation4 + $0x130] sm:$0xff] }
 0x7d8   : > { %9074 = vmatpush.msra.mxu3 %v8839_v57  ;;  %v5405_v55 = vpop.f32.mrf.mxu3  ;;  %v8376_v25 = vld [vmem:[#allocation3 + $0x1a2] sm:$0xff]  ;;  %v6577_v53 = vld [vmem:[#allocation2 + $0x29d] sm:$0xff] }
 0x7d9   : > { %8078 = vst.msk [vmem:[#allocation3 + $0x1b0] sm:$0xff] %vm1615_vm3, %v8000_v6  ;;  %v5601_v52 = vadd.f32 %v5523_v61, %v5405_v55  ;;  %v8451_v30 = vld [vmem:[#allocation3 + $0x1a3] sm:$0xff]  ;;  %v13403_v47 = vpop.f32.mrf.mxu1  ;;  %v8228_v6 = vld [vmem:[#allocation3 + $0x199] sm:$0xff] }
 0x7da   : > { %v6323_v2 = vld [vmem:[#allocation3 + $0x1c8] sm:$0xff]  ;;  %9075 = vmatpush.msra.mxu3 %v8838_v29  ;;  %v8526_v38 = vmax.f32 %v8376_v25, %v8451_v30  ;;  %v5525_v48 = vld [vmem:[#allocation3 + $0x1e0] sm:$0xff] }
 0x7db   : > { %v6401_v32 = vadd.f32 %v6323_v2, %v13258_v51  ;;  %5679 = vst.msk [vmem:[#allocation3 + $0x1d0] sm:$0xff] %vm1615_vm3, %v5601_v52  ;;  %v13412_v51 = vpop.f32.mrf.mxu0  ;;  %v8830_v52 = vld [vmem:[#allocation4 + $0x128] sm:$0xff] }
 0x7dc   : > { %v7123_v39 = vld [vmem:[#allocation3 + $0x1c0] sm:$0xff]  ;;  %9076 = vmatpush.msra.mxu3 %v8837_v14  ;;  %v8601_v24 = vmax.f32 %v8301_v15, %v8526_v38  ;;  %10148 = vmatmul.msk.f32.gmra.mxu1 %vm960_vm2, %v6576_v10  ;;  %v8829_v38 = vld [vmem:[#allocation4 + $0x120] sm:$0xff] }
 0x7dd   : > { %v7201_v0 = vadd.f32 %v7123_v39, %v13341_v43  ;;  %6479 = vst.msk [vmem:[#allocation3 + $0x1c8] sm:$0xff] %vm1615_vm3, %v6401_v32  ;;  %9991 = vmatmul.msk.f32.gmra.mxu3 %vm960_vm2, %v4973_v37  ;;  %v8704_v43 = vld [vmem:[%s14122_s5 + $0x8] sm:$0xff]  ;;  %v13441_v37 = vpop.f32.mrf.mxu2 }
 0x7de   : > { %v7923_v56 = vld [vmem:[#allocation3 + $0x1b8] sm:$0xff]  ;;  %9077 = vmatpush.msra.mxu3 %v8836_v54  ;;  %8676 = vst.msk [vmem:[#allocation4 + $0x188] sm:$0xff] %vm1615_vm3, %v8601_v24  ;;  %9018 = vmatmul.f32.vlgmr.msra.gmra.mxu0 %v8704_v43  ;;  %v8828_v24 = vld [vmem:[#allocation4 + $0x118] sm:$0xff] }
 0x7df   : > { %v8001_v36 = vadd.f32 %v7923_v56, %v13324_v20  ;;  %7279 = vst.msk [vmem:[#allocation3 + $0x1c0] sm:$0xff] %vm1615_vm3, %v7201_v0  ;;  %v4975_v14 = vld [vmem:[#allocation2 + $0x284] sm:$0xff] }
 0x7e0   : > { %9078 = vmatpush.msra.mxu3 %v8835_v50  ;;  %v5408_v40 = vpop.f32.mrf.mxu3  ;;  %v8377_v46 = vld [vmem:[#allocation3 + $0x1aa] sm:$0xff]  ;;  %v8827_v56 = vld [vmem:[#allocation4 + $0x110] sm:$0xff] }
 0x7e1   : > { %8079 = vst.msk [vmem:[#allocation3 + $0x1b8] sm:$0xff] %vm1615_vm3, %v8001_v36  ;;  %v5602_v42 = vadd.f32 %v5524_v19, %v5408_v40  ;;  %v8452_v33 = vld [vmem:[#allocation3 + $0x1ab] sm:$0xff]  ;;  %v13424_v22 = vpop.f32.mrf.mxu1  ;;  %v8229_v36 = vld [vmem:[#allocation3 + $0x1a1] sm:$0xff]  ;;  %v8826_v19 = vld [vmem:[#allocation4 + $0x108] sm:$0xff] }
 0x7e2   : > { %v6324_v20 = vld [vmem:[#allocation3 + $0x1d0] sm:$0xff]  ;;  %9079 = vmatpush.msra.mxu3 %v8834_v27  ;;  %v8527_v21 = vmax.f32 %v8377_v46, %v8452_v33  ;;  %v8154_v46 = vld [vmem:[#allocation3 + $0x1a0] sm:$0xff]  ;;  %v8703_v27 = vld [vmem:[%s14122_s5] sm:$0xff] }
 0x7e3   : > { %v6402_v44 = vadd.f32 %v6324_v20, %v13277_v1  ;;  %5680 = vst.msk [vmem:[#allocation3 + $0x1d8] sm:$0xff] %vm1615_vm3, %v5602_v42  ;;  %v13436_v61 = vpop.f32.mrf.mxu0  ;;  %v8304_v8 = vmax.f32 %v8154_v46, %v8229_v36 }
 0x7e4   : > { %v7124_v34 = vld [vmem:[#allocation3 + $0x1c8] sm:$0xff]  ;;  %9080 = vmatpush.msra.mxu3 %v8833_v49  ;;  %v8602_v63 = vmax.f32 %v8302_v60, %v8527_v21  ;;  %10149 = vmatmul.msk.f32.gmra.mxu1 %vm960_vm2, %v6577_v53  ;;  %v8825_v21 = vld [vmem:[#allocation4 + $0x100] sm:$0xff] }
 0x7e5   : > { %v7202_v16 = vadd.f32 %v7124_v34, %v13357_v5  ;;  %6480 = vst.msk [vmem:[#allocation3 + $0x1d0] sm:$0xff] %vm1615_vm3, %v6402_v44  ;;  %9992 = vmatmul.msk.f32.gmra.mxu3 %vm960_vm2, %v4974_v62  ;;  %v8709_v5 = vld [vmem:[%s14122_s5 + $0x30] sm:$0xff]  ;;  %v13465_v53 = vpop.f32.mrf.mxu2 }
 0x7e6   : > { %v7924_v1 = vld [vmem:[#allocation3 + $0x1c0] sm:$0xff]  ;;  %9081 = vmatpush.msra.mxu3 %v8832_v58  ;;  %8677 = vst.msk [vmem:[#allocation4 + $0x190] sm:$0xff] %vm1615_vm3, %v8602_v63  ;;  %9021 = vmatmul.f32.gmra.mxu0 %v8709_v5 }
 0x7e7   : > { %v8002_v13 = vadd.f32 %v7924_v1, %v13343_v41  ;;  %7280 = vst.msk [vmem:[#allocation3 + $0x1c8] sm:$0xff] %vm1615_vm3, %v7202_v16  ;;  %v8153_v41 = vld [vmem:[#allocation3 + $0x198] sm:$0xff]  ;;  %v5527_v1 = vld [vmem:[#allocation3 + $0x1f0] sm:$0xff] }
 0x7e8   : > { %9082 = vmatpush.msra.mxu3 %v8831_v18  ;;  %v5411_v57 = vpop.f32.mrf.mxu3  ;;  %v8378_v55 = vld [vmem:[#allocation3 + $0x1b2] sm:$0xff]  ;;  %v8303_v30 = vmax.f32 %v8153_v41, %v8228_v6  ;;  %v8155_v6 = vld [vmem:[#allocation3 + $0x1a8] sm:$0xff] }
 0x7e9   : > { %8080 = vst.msk [vmem:[#allocation3 + $0x1c0] sm:$0xff] %vm1615_vm3, %v8002_v13  ;;  %v5603_v25 = vadd.f32 %v5525_v48, %v5411_v57  ;;  %v8453_v29 = vld [vmem:[#allocation3 + $0x1b3] sm:$0xff]  ;;  %v13446_v54 = vpop.f32.mrf.mxu1 }
 0x7ea   : > { %v6325_v23 = vld [vmem:[#allocation3 + $0x1d8] sm:$0xff]  ;;  %9083 = vmatpush.msra.mxu3 %v8830_v52  ;;  %v8528_v2 = vmax.f32 %v8378_v55, %v8453_v29 }
 0x7eb   : > { %v6403_v15 = vadd.f32 %v6325_v23, %v13297_v31  ;;  %5681 = vst.msk [vmem:[#allocation3 + $0x1e0] sm:$0xff] %vm1615_vm3, %v5603_v25  ;;  %v13458_v20 = vpop.f32.mrf.mxu0  ;;  %v8719_v16 = vld [vmem:[%s14122_s5 + $0x80] sm:$0xff] }
 0x7ec   : > { %v7125_v32 = vld [vmem:[#allocation3 + $0x1d0] sm:$0xff]  ;;  %9084 = vmatpush.msra.mxu3 %v8829_v38  ;;  %v8603_v39 = vmax.f32 %v8303_v30, %v8528_v2 }
 0x7ed   : > { %v7203_v10 = vadd.f32 %v7125_v32, %v13371_v59  ;;  %6481 = vst.msk [vmem:[#allocation3 + $0x1d8] sm:$0xff] %vm1615_vm3, %v6403_v15  ;;  %9993 = vmatmul.msk.f32.gmra.mxu3 %vm960_vm2, %v4975_v14  ;;  %v8714_v59 = vld [vmem:[%s14122_s5 + $0x58] sm:$0xff]  ;;  %v5528_v32 = vld [vmem:[#allocation3 + $0x1f8] sm:$0xff] }
 0x7ee   : > { %v7925_v0 = vld [vmem:[#allocation3 + $0x1c8] sm:$0xff]  ;;  %9085 = vmatpush.msra.mxu3 %v8828_v24  ;;  %8678 = vst.msk [vmem:[#allocation4 + $0x198] sm:$0xff] %vm1615_vm3, %v8603_v39  ;;  %9024 = vmatmul.f32.gmra.mxu0 %v8714_v59  ;;  %v8231_v15 = vld [vmem:[#allocation3 + $0x1b1] sm:$0xff] }
 0x7ef   : > { %v8003_v31 = vadd.f32 %v7925_v0, %v13361_v11  ;;  %7281 = vst.msk [vmem:[#allocation3 + $0x1d0] sm:$0xff] %vm1615_vm3, %v7203_v10  ;;  %v8156_v10 = vld [vmem:[#allocation3 + $0x1b0] sm:$0xff] }
 0x7f0   : > { %9086 = vmatpush.msra.mxu3 %v8827_v56  ;;  %v5414_v50 = vpop.f32.mrf.mxu3  ;;  %v8379_v43 = vld [vmem:[#allocation3 + $0x1ba] sm:$0xff]  ;;  %v8306_v56 = vmax.f32 %v8156_v10, %v8231_v15 }
 0x7f1   : > { %8081 = vst.msk [vmem:[#allocation3 + $0x1c8] sm:$0xff] %vm1615_vm3, %v8003_v31  ;;  %v5604_v40 = vadd.f32 %v5526_v4, %v5414_v50  ;;  %v8454_v42 = vld [vmem:[#allocation3 + $0x1bb] sm:$0xff]  ;;  %v13472_v58 = vpop.f32.mrf.mxu1  ;;  %v8713_v31 = vld [vmem:[%s14122_s5 + $0x50] sm:$0xff] }
 0x7f2   : > { %v6326_v11 = vld [vmem:[#allocation3 + $0x1e0] sm:$0xff]  ;;  %9087 = vmatpush.msra.mxu3 %v8826_v19  ;;  %v8529_v33 = vmax.f32 %v8379_v43, %v8454_v42 }
 0x7f3   : > { %v6404_v60 = vadd.f32 %v6326_v11, %v13315_v45  ;;  %5682 = vst.msk [vmem:[#allocation3 + $0x1e8] sm:$0xff] %vm1615_vm3, %v5604_v40  ;;  %v8230_v45 = vld [vmem:[#allocation3 + $0x1a9] sm:$0xff]  ;;  %v13480_v29 = vpop.f32.mrf.mxu0  ;;  %v8232_v42 = vld [vmem:[#allocation3 + $0x1b9] sm:$0xff] }
 0x7f4   : > { %v7126_v44 = vld [vmem:[#allocation3 + $0x1d8] sm:$0xff]  ;;  %9088 = vmatpush.msra.mxu3 %v8825_v21  ;;  %v8604_v49 = vmax.f32 %v8304_v8, %v8529_v33  ;;  %v8305_v48 = vmax.f32 %v8155_v6, %v8230_v45 }
 0x7f5   : > { %v7204_v34 = vadd.f32 %v7126_v44, %v13387_v26  ;;  %6482 = vst.msk [vmem:[#allocation3 + $0x1e0] sm:$0xff] %vm1615_vm3, %v6404_v60  ;;  %8947 = vmatmul.f32.vlgmr.msrb.gmra.mxu3 %v8703_v27  ;;  %v5529_v27 = vld [vmem:[#allocation3 + $0x200] sm:$0xff]  ;;  %v8157_v33 = vld [vmem:[#allocation3 + $0x1b8] sm:$0xff] }
 0x7f6   : > { %v7926_v62 = vld [vmem:[#allocation3 + $0x1d0] sm:$0xff]  ;;  %8679 = vst.msk [vmem:[#allocation4 + $0x1a0] sm:$0xff] %vm1615_vm3, %v8604_v49  ;;  %9027 = vmatmul.f32.gmra.mxu0 %v8719_v16  ;;  %v8307_v44 = vmax.f32 %v8157_v33, %v8232_v42  ;;  %v5532_v33 = vld [vmem:[#allocation3 + $0x218] sm:$0xff] }
 0x7f7   : > { %v8004_v63 = vadd.f32 %v7926_v62, %v13382_v12  ;;  %7282 = vst.msk [vmem:[#allocation3 + $0x1d8] sm:$0xff] %vm1615_vm3, %v7204_v34  ;;  %v8708_v12 = vld [vmem:[%s14122_s5 + $0x28] sm:$0xff] }
 0x7f8   : > { %v5417_v26 = vpop.f32.mrf.mxu3  ;;  %v8380_v13 = vld [vmem:[#allocation3 + $0x1c2] sm:$0xff] }
 0x7f9   : > { %8082 = vst.msk [vmem:[#allocation3 + $0x1d0] sm:$0xff] %vm1615_vm3, %v8004_v63  ;;  %v5605_v18 = vadd.f32 %v5527_v1, %v5417_v26  ;;  %v8455_v5 = vld [vmem:[#allocation3 + $0x1c3] sm:$0xff] }
 0x7fa   : > { %v6327_v57 = vld [vmem:[#allocation3 + $0x1e8] sm:$0xff]  ;;  %v8530_v55 = vmax.f32 %v8380_v13, %v8455_v5 }
 0x7fb   : > { %v6405_v25 = vadd.f32 %v6327_v57, %v13336_v35  ;;  %5683 = vst.msk [vmem:[#allocation3 + $0x1f0] sm:$0xff] %vm1615_vm3, %v5605_v18  ;;  %v8724_v35 = vld [vmem:[%s14122_s5 + $0xa8] sm:$0xff]  ;;  %v13503_v19 = vpop.f32.mrf.mxu0  ;;  %v5530_v5 = vld [vmem:[#allocation3 + $0x208] sm:$0xff] }
 0x7fc   : > { %v7127_v52 = vld [vmem:[#allocation3 + $0x1e0] sm:$0xff]  ;;  %v8605_v41 = vmax.f32 %v8305_v48, %v8530_v55 }
 0x7fd   : > { %v7205_v23 = vadd.f32 %v7127_v52, %v13403_v47  ;;  %6483 = vst.msk [vmem:[#allocation3 + $0x1e8] sm:$0xff] %vm1615_vm3, %v6405_v25  ;;  %8950 = vmatmul.f32.gmra.mxu3 %v8708_v12  ;;  %v13490_v47 = vpop.f32.mrf.mxu2  ;;  %v8233_v18 = vld [vmem:[#allocation3 + $0x1c1] sm:$0xff] }
 0x7fe   : > { %v7927_v30 = vld [vmem:[#allocation3 + $0x1d8] sm:$0xff]  ;;  %8680 = vst.msk [vmem:[#allocation4 + $0x1a8] sm:$0xff] %vm1615_vm3, %v8605_v41  ;;  %9030 = vmatmul.f32.gmra.mxu0 %v8724_v35  ;;  %v8158_v48 = vld [vmem:[#allocation3 + $0x1c0] sm:$0xff] }
 0x7ff   : > { %v8005_v2 = vadd.f32 %v7927_v30, %v13400_v9  ;;  %7283 = vst.msk [vmem:[#allocation3 + $0x1e0] sm:$0xff] %vm1615_vm3, %v7205_v23  ;;  %v13493_v9 = vpop.f32.mrf.mxu1  ;;  %v8308_v52 = vmax.f32 %v8158_v48, %v8233_v18 }
 0x800   : > { %v5420_v38 = vpop.f32.mrf.mxu3  ;;  %v8381_v14 = vld [vmem:[#allocation3 + $0x1ca] sm:$0xff] }
 0x801   : > { %8083 = vst.msk [vmem:[#allocation3 + $0x1d8] sm:$0xff] %vm1615_vm3, %v8005_v2  ;;  %v5606_v39 = vadd.f32 %v5528_v32, %v5420_v38  ;;  %v8456_v24 = vld [vmem:[#allocation3 + $0x1cb] sm:$0xff] }
 0x802   : > { %v6328_v0 = vld [vmem:[#allocation3 + $0x1f0] sm:$0xff]  ;;  %v8531_v36 = vmax.f32 %v8381_v14, %v8456_v24 }
 0x803   : > { %v6406_v59 = vadd.f32 %v6328_v0, %v13354_v7  ;;  %5684 = vst.msk [vmem:[#allocation3 + $0x1f8] sm:$0xff] %vm1615_vm3, %v5606_v39  ;;  %v8729_v7 = vld [vmem:[%s14122_s5 + $0xd0] sm:$0xff]  ;;  %v8739_v39 = vld [vmem:[%s14122_s5 + $0x120] sm:$0xff]  ;;  %v5531_v24 = vld [vmem:[#allocation3 + $0x210] sm:$0xff] }
 0x804   : > { %v7128_v50 = vld [vmem:[#allocation3 + $0x1e8] sm:$0xff]  ;;  %v8606_v4 = vmax.f32 %v8306_v56, %v8531_v36 }
 0x805   : > { %v7206_v43 = vadd.f32 %v7128_v50, %v13424_v22  ;;  %6484 = vst.msk [vmem:[#allocation3 + $0x1f0] sm:$0xff] %vm1615_vm3, %v6406_v59  ;;  %8953 = vmatmul.f32.gmra.mxu3 %v8713_v31  ;;  %v13514_v34 = vpop.f32.mrf.mxu2  ;;  %v8159_v31 = vld [vmem:[#allocation3 + $0x1c8] sm:$0xff] }
 0x806   : > { %v7928_v40 = vld [vmem:[#allocation3 + $0x1e0] sm:$0xff]  ;;  %8681 = vst.msk [vmem:[#allocation4 + $0x1b0] sm:$0xff] %vm1615_vm3, %v8606_v4  ;;  %9033 = vmatmul.f32.gmra.mxu0 %v8729_v7 }
 0x807   : > { %v8006_v46 = vadd.f32 %v7928_v40, %v13420_v17  ;;  %7284 = vst.msk [vmem:[#allocation3 + $0x1e8] sm:$0xff] %vm1615_vm3, %v7206_v43  ;;  %v8718_v17 = vld [vmem:[%s14122_s5 + $0x78] sm:$0xff]  ;;  %v13518_v45 = vpop.f32.mrf.mxu1 }
 0x808   : > { %v5423_v11 = vpop.f32.mrf.mxu3  ;;  %v8382_v22 = vld [vmem:[#allocation3 + $0x1d2] sm:$0xff] }
 0x809   : > { %8084 = vst.msk [vmem:[#allocation3 + $0x1e0] sm:$0xff] %vm1615_vm3, %v8006_v46  ;;  %v5607_v8 = vadd.f32 %v5529_v27, %v5423_v11  ;;  %v8457_v60 = vld [vmem:[#allocation3 + $0x1d3] sm:$0xff] }
 0x80a   : > { %v6329_v21 = vld [vmem:[#allocation3 + $0x1f8] sm:$0xff]  ;;  %v8532_v49 = vmax.f32 %v8382_v22, %v8457_v60 }
 0x80b   : > { %v6407_v62 = vadd.f32 %v6329_v21, %v13373_v28  ;;  %5685 = vst.msk [vmem:[#allocation3 + $0x200] sm:$0xff] %vm1615_vm3, %v5607_v8  ;;  %v8734_v28 = vld [vmem:[%s14122_s5 + $0xf8] sm:$0xff] }
 0x80c   : > { %v7129_v63 = vld [vmem:[#allocation3 + $0x1f0] sm:$0xff]  ;;  %v8607_v16 = vmax.f32 %v8307_v44, %v8532_v49 }
 0x80d   : > { %v7207_v26 = vadd.f32 %v7129_v63, %v13446_v54  ;;  %6485 = vst.msk [vmem:[#allocation3 + $0x1f8] sm:$0xff] %vm1615_vm3, %v6407_v62  ;;  %8956 = vmatmul.f32.gmra.mxu3 %v8718_v17  ;;  %v13528_v54 = vpop.f32.mrf.mxu0  ;;  %v13536_v15 = vpop.f32.mrf.mxu2  ;;  %v8235_v22 = vld [vmem:[#allocation3 + $0x1d1] sm:$0xff] }
 0x80e   : > { %v7929_v1 = vld [vmem:[#allocation3 + $0x1e8] sm:$0xff]  ;;  %8682 = vst.msk [vmem:[#allocation4 + $0x1b8] sm:$0xff] %vm1615_vm3, %v8607_v16  ;;  %9036 = vmatmul.f32.gmra.mxu0 %v8734_v28  ;;  %v8160_v17 = vld [vmem:[#allocation3 + $0x1d0] sm:$0xff] }
 0x80f   : > { %v8007_v13 = vadd.f32 %v7929_v1, %v13441_v37  ;;  %7285 = vst.msk [vmem:[#allocation3 + $0x1f0] sm:$0xff] %vm1615_vm3, %v7207_v26  ;;  %v8723_v37 = vld [vmem:[%s14122_s5 + $0xa0] sm:$0xff]  ;;  %v13540_v32 = vpop.f32.mrf.mxu1  ;;  %v8310_v62 = vmax.f32 %v8160_v17, %v8235_v22 }
 0x810   : > { %v5426_v6 = vpop.f32.mrf.mxu3  ;;  %v8383_v57 = vld [vmem:[#allocation3 + $0x1da] sm:$0xff] }
 0x811   : > { %8085 = vst.msk [vmem:[#allocation3 + $0x1e8] sm:$0xff] %vm1615_vm3, %v8007_v13  ;;  %v5608_v12 = vadd.f32 %v5530_v5, %v5426_v6  ;;  %v8458_v55 = vld [vmem:[#allocation3 + $0x1db] sm:$0xff] }
 0x812   : > { %v6330_v25 = vld [vmem:[#allocation3 + $0x200] sm:$0xff]  ;;  %v8533_v41 = vmax.f32 %v8383_v57, %v8458_v55 }
 0x813   : > { %v6408_v23 = vadd.f32 %v6330_v25, %v13391_v3  ;;  %5686 = vst.msk [vmem:[#allocation3 + $0x208] sm:$0xff] %vm1615_vm3, %v5608_v12  ;;  %v8234_v3 = vld [vmem:[#allocation3 + $0x1c9] sm:$0xff]  ;;  %v8236_v5 = vld [vmem:[#allocation3 + $0x1d9] sm:$0xff] }
 0x814   : > { %v7130_v30 = vld [vmem:[#allocation3 + $0x1f8] sm:$0xff]  ;;  %v8608_v2 = vmax.f32 %v8308_v52, %v8533_v41  ;;  %v8309_v59 = vmax.f32 %v8159_v31, %v8234_v3  ;;  %v5533_v12 = vld [vmem:[#allocation3 + $0x220] sm:$0xff] }
 0x815   : > { %v7208_v35 = vadd.f32 %v7130_v30, %v13472_v58  ;;  %6486 = vst.msk [vmem:[#allocation3 + $0x200] sm:$0xff] %vm1615_vm3, %v6408_v23  ;;  %8959 = vmatmul.f32.gmra.mxu3 %v8723_v37  ;;  %v13552_v4 = vpop.f32.mrf.mxu0  ;;  %v13559_v11 = vpop.f32.mrf.mxu2  ;;  %v8161_v25 = vld [vmem:[#allocation3 + $0x1d8] sm:$0xff]  ;;  %v8738_v30 = vld [vmem:[%s14122_s5 + $0x118] sm:$0xff]  ;;  %v8162_v31 = vld [vmem:[#allocation3 + $0x1e0] sm:$0xff] }
 0x816   : > { %v7930_v38 = vld [vmem:[#allocation3 + $0x1f0] sm:$0xff]  ;;  %8683 = vst.msk [vmem:[#allocation4 + $0x1c0] sm:$0xff] %vm1615_vm3, %v8608_v2  ;;  %9039 = vmatmul.f32.gmra.mxu0 %v8739_v39  ;;  %v8311_v41 = vmax.f32 %v8161_v25, %v8236_v5 }
 0x817   : > { %v8008_v14 = vadd.f32 %v7930_v38, %v13465_v53  ;;  %7286 = vst.msk [vmem:[#allocation3 + $0x1f8] sm:$0xff] %vm1615_vm3, %v7208_v35  ;;  %v8728_v53 = vld [vmem:[%s14122_s5 + $0xc8] sm:$0xff]  ;;  %v13566_v8 = vpop.f32.mrf.mxu1 }
 0x818   : > { %v5429_v10 = vpop.f32.mrf.mxu3  ;;  %v8384_v58 = vld [vmem:[#allocation3 + $0x1e2] sm:$0xff] }
 0x819   : > { %8086 = vst.msk [vmem:[#allocation3 + $0x1f0] sm:$0xff] %vm1615_vm3, %v8008_v14  ;;  %v5609_v0 = vadd.f32 %v5531_v24, %v5429_v10  ;;  %v8459_v56 = vld [vmem:[#allocation3 + $0x1e3] sm:$0xff] }
 0x81a   : > { %v6331_v36 = vld [vmem:[#allocation3 + $0x208] sm:$0xff]  ;;  %v8534_v50 = vmax.f32 %v8384_v58, %v8459_v56  ;;  %v8754_v58 = vld [vmem:[%s14122_s5 + $0x198] sm:$0xff] }
 0x81b   : > { %v6409_v43 = vadd.f32 %v6331_v36, %v13412_v51  ;;  %5687 = vst.msk [vmem:[#allocation3 + $0x210] sm:$0xff] %vm1615_vm3, %v5609_v0  ;;  %v8744_v51 = vld [vmem:[%s14122_s5 + $0x148] sm:$0xff] }
 0x81c   : > { %v7131_v40 = vld [vmem:[#allocation3 + $0x200] sm:$0xff]  ;;  %v8609_v46 = vmax.f32 %v8309_v59, %v8534_v50 }
 0x81d   : > { %v7209_v42 = vadd.f32 %v7131_v40, %v13493_v9  ;;  %6487 = vst.msk [vmem:[#allocation3 + $0x208] sm:$0xff] %vm1615_vm3, %v6409_v43  ;;  %8962 = vmatmul.f32.gmra.mxu3 %v8728_v53  ;;  %v13574_v13 = vpop.f32.mrf.mxu0  ;;  %v8237_v10 = vld [vmem:[#allocation3 + $0x1e1] sm:$0xff] }
 0x81e   : > { %v7931_v7 = vld [vmem:[#allocation3 + $0x1f8] sm:$0xff]  ;;  %8684 = vst.msk [vmem:[#allocation4 + $0x1c8] sm:$0xff] %vm1615_vm3, %v8609_v46  ;;  %9042 = vmatmul.f32.gmra.mxu0 %v8744_v51  ;;  %v8312_v53 = vmax.f32 %v8162_v31, %v8237_v10 }
 0x81f   : > { %v8009_v27 = vadd.f32 %v7931_v7, %v13490_v47  ;;  %7287 = vst.msk [vmem:[#allocation3 + $0x200] sm:$0xff] %vm1615_vm3, %v7209_v42  ;;  %v8733_v47 = vld [vmem:[%s14122_s5 + $0xf0] sm:$0xff]  ;;  %v13587_v52 = vpop.f32.mrf.mxu1 }
 0x820   : > { %v5432_v9 = vpop.f32.mrf.mxu3  ;;  %v8385_v60 = vld [vmem:[#allocation3 + $0x1ea] sm:$0xff] }
 0x821   : > { %8087 = vst.msk [vmem:[#allocation3 + $0x1f8] sm:$0xff] %vm1615_vm3, %v8009_v27  ;;  %v5610_v21 = vadd.f32 %v5532_v33, %v5432_v9  ;;  %v8460_v44 = vld [vmem:[#allocation3 + $0x1eb] sm:$0xff] }
 0x822   : > { %v6332_v49 = vld [vmem:[#allocation3 + $0x210] sm:$0xff]  ;;  %v8535_v63 = vmax.f32 %v8385_v60, %v8460_v44  ;;  %v8759_v60 = vld [vmem:[%s14122_s5 + $0x1c0] sm:$0xff] }
 0x823   : > { %v6410_v16 = vadd.f32 %v6332_v49, %v13436_v61  ;;  %5688 = vst.msk [vmem:[#allocation3 + $0x218] sm:$0xff] %vm1615_vm3, %v5610_v21  ;;  %v8749_v61 = vld [vmem:[%s14122_s5 + $0x170] sm:$0xff] }
 0x824   : > { %v7132_v26 = vld [vmem:[#allocation3 + $0x208] sm:$0xff]  ;;  %v8610_v1 = vmax.f32 %v8310_v62, %v8535_v63 }
 0x825   : > { %v7210_v18 = vadd.f32 %v7132_v26, %v13518_v45  ;;  %6488 = vst.msk [vmem:[#allocation3 + $0x210] sm:$0xff] %vm1615_vm3, %v6410_v16  ;;  %8965 = vmatmul.f32.gmra.mxu3 %v8733_v47  ;;  %v13584_v45 = vpop.f32.mrf.mxu2  ;;  %v13594_v14 = vpop.f32.mrf.mxu0  ;;  %v8238_v51 = vld [vmem:[#allocation3 + $0x1e9] sm:$0xff] }
 0x826   : > { %v7932_v28 = vld [vmem:[#allocation3 + $0x200] sm:$0xff]  ;;  %8685 = vst.msk [vmem:[#allocation4 + $0x1d0] sm:$0xff] %vm1615_vm3, %v8610_v1  ;;  %9045 = vmatmul.f32.gmra.mxu0 %v8749_v61 }
 0x827   : > { %v8010_v6 = vadd.f32 %v7932_v28, %v13514_v34  ;;  %7288 = vst.msk [vmem:[#allocation3 + $0x208] sm:$0xff] %vm1615_vm3, %v7210_v18  ;;  %v7040_v7 = vpop.f32.mrf.mxu1 }
 0x828   : > { %v5435_v57 = vpop.f32.mrf.mxu3  ;;  %v8386_v48 = vld [vmem:[#allocation3 + $0x1f2] sm:$0xff] }
 0x829   : > { %8088 = vst.msk [vmem:[#allocation3 + $0x200] sm:$0xff] %vm1615_vm3, %v8010_v6  ;;  %v5611_v55 = vadd.f32 %v5533_v12, %v5435_v57  ;;  %v8461_v37 = vld [vmem:[#allocation3 + $0x1f3] sm:$0xff]  ;;  %v8764_v12 = vld [vmem:[%s14122_s5 + $0x1e8] sm:$0xff] }
 0x82a   : > { %v6333_v34 = vld [vmem:[#allocation3 + $0x218] sm:$0xff]  ;;  %v8536_v23 = vmax.f32 %v8386_v48, %v8461_v37 }
 0x82b   : > { %v6411_v2 = vadd.f32 %v6333_v34, %v13458_v20  ;;  %5689 = vst.msk [vmem:[#allocation3 + $0x220] sm:$0xff] %vm1615_vm3, %v5611_v55  ;;  %v5534_v20 = vld [vmem:[#allocation3 + $0x228] sm:$0xff]  ;;  %v8239_v61 = vld [vmem:[#allocation3 + $0x1f1] sm:$0xff] }
 0x82c   : > { %v7133_v35 = vld [vmem:[#allocation3 + $0x210] sm:$0xff]  ;;  %v8611_v38 = vmax.f32 %v8311_v41, %v8536_v23 }
 0x82d   : > { %v7211_v3 = vadd.f32 %v7133_v35, %v13540_v32  ;;  %6489 = vst.msk [vmem:[#allocation3 + $0x218] sm:$0xff] %vm1615_vm3, %v6411_v2  ;;  %8968 = vmatmul.f32.gmra.mxu3 %v8738_v30  ;;  %v13608_v43 = vpop.f32.mrf.mxu2  ;;  %v13615_v9 = vpop.f32.mrf.mxu0  ;;  %v8164_v55 = vld [vmem:[#allocation3 + $0x1f0] sm:$0xff]  ;;  %v8753_v30 = vld [vmem:[%s14122_s5 + $0x190] sm:$0xff] }
 0x82e   : > { %v7933_v39 = vld [vmem:[#allocation3 + $0x208] sm:$0xff]  ;;  %8686 = vst.msk [vmem:[#allocation4 + $0x1d8] sm:$0xff] %vm1615_vm3, %v8611_v38  ;;  %9048 = vmatmul.f32.gmra.mxu0 %v8754_v58  ;;  %v8314_v41 = vmax.f32 %v8164_v55, %v8239_v61  ;;  %v5537_v58 = vld [vmem:[#allocation3 + $0x240] sm:$0xff]  ;;  %v5539_v55 = vld [vmem:[#allocation3 + $0x250] sm:$0xff] }
 0x82f   : > { %v8011_v24 = vadd.f32 %v7933_v39, %v13536_v15  ;;  %7289 = vst.msk [vmem:[#allocation3 + $0x210] sm:$0xff] %vm1615_vm3, %v7211_v3  ;;  %v8743_v15 = vld [vmem:[%s14122_s5 + $0x140] sm:$0xff]  ;;  %v7043_v5 = vpop.f32.mrf.mxu1 }
 0x830   : > { %v5438_v0 = vpop.f32.mrf.mxu3  ;;  %v8387_v56 = vld [vmem:[#allocation3 + $0x1fa] sm:$0xff] }
 0x831   : > { %v8462_v32 = vld [vmem:[#allocation3 + $0x1fb] sm:$0xff]  ;;  %8089 = vst.msk [vmem:[#allocation3 + $0x208] sm:$0xff] %vm1615_vm3, %v8011_v24  ;;  %v5612_v36 = vadd.f32 %v5534_v20, %v5438_v0 }
 0x832   : > { %v8537_v59 = vmax.f32 %v8387_v56, %v8462_v32  ;;  %v6334_v50 = vld [vmem:[#allocation3 + $0x220] sm:$0xff]  ;;  %v8165_v56 = vld [vmem:[#allocation3 + $0x1f8] sm:$0xff] }
 0x833   : > { %v6412_v40 = vadd.f32 %v6334_v50, %v13480_v29  ;;  %5690 = vst.msk [vmem:[#allocation3 + $0x228] sm:$0xff] %vm1615_vm3, %v5612_v36  ;;  %v5535_v29 = vld [vmem:[#allocation3 + $0x230] sm:$0xff]  ;;  %v8240_v10 = vld [vmem:[#allocation3 + $0x1f9] sm:$0xff] }
 0x834   : > { %v8612_v46 = vmax.f32 %v8312_v53, %v8537_v59  ;;  %v7134_v42 = vld [vmem:[#allocation3 + $0x218] sm:$0xff]  ;;  %v8315_v59 = vmax.f32 %v8165_v56, %v8240_v10 }
 0x835   : > { %v7212_v27 = vadd.f32 %v7134_v42, %v13566_v8  ;;  %6490 = vst.msk [vmem:[#allocation3 + $0x220] sm:$0xff] %vm1615_vm3, %v6412_v40  ;;  %8971 = vmatmul.f32.gmra.mxu3 %v8743_v15  ;;  %v8163_v8 = vld [vmem:[#allocation3 + $0x1e8] sm:$0xff]  ;;  %v7841_v18 = vpop.f32.mrf.mxu2 }
 0x836   : > { %v7934_v22 = vld [vmem:[#allocation3 + $0x210] sm:$0xff]  ;;  %8687 = vst.msk [vmem:[#allocation4 + $0x1e0] sm:$0xff] %vm1615_vm3, %v8612_v46  ;;  %9051 = vmatmul.f32.gmra.mxu0 %v8759_v60  ;;  %v8313_v47 = vmax.f32 %v8163_v8, %v8238_v51  ;;  %v5538_v60 = vld [vmem:[#allocation3 + $0x248] sm:$0xff] }
 0x837   : > { %v8012_v33 = vadd.f32 %v7934_v22, %v13559_v11  ;;  %7290 = vst.msk [vmem:[#allocation3 + $0x218] sm:$0xff] %vm1615_vm3, %v7212_v27  ;;  %v8748_v11 = vld [vmem:[%s14122_s5 + $0x168] sm:$0xff]  ;;  %v7046_v0 = vpop.f32.mrf.mxu1 }
 0x838   : > { %v5441_v21 = vpop.f32.mrf.mxu3  ;;  %v8388_v17 = vld [vmem:[#allocation3 + $0x202] sm:$0xff] }
 0x839   : > { %v8463_v44 = vld [vmem:[#allocation3 + $0x203] sm:$0xff]  ;;  %8090 = vst.msk [vmem:[#allocation3 + $0x210] sm:$0xff] %vm1615_vm3, %v8012_v33  ;;  %v5613_v49 = vadd.f32 %v5535_v29, %v5441_v21  ;;  %v8774_v29 = vld [vmem:[%s14122_s5 + $0x238] sm:$0xff] }
 0x83a   : > { %v8538_v62 = vmax.f32 %v8388_v17, %v8463_v44  ;;  %v6335_v63 = vld [vmem:[#allocation3 + $0x228] sm:$0xff]  ;;  %v8166_v44 = vld [vmem:[#allocation3 + $0x200] sm:$0xff] }
 0x83b   : > { %v6413_v16 = vadd.f32 %v6335_v63, %v13503_v19  ;;  %5691 = vst.msk [vmem:[#allocation3 + $0x230] sm:$0xff] %vm1615_vm3, %v5613_v49  ;;  %v5536_v19 = vld [vmem:[#allocation3 + $0x238] sm:$0xff]  ;;  %v8241_v33 = vld [vmem:[#allocation3 + $0x201] sm:$0xff] }
 0x83c   : > { %v8613_v26 = vmax.f32 %v8313_v47, %v8538_v62  ;;  %v7135_v1 = vld [vmem:[#allocation3 + $0x220] sm:$0xff]  ;;  %v8763_v63 = vld [vmem:[%s14122_s5 + $0x1e0] sm:$0xff] }
 0x83d   : > { %v7213_v28 = vadd.f32 %v7135_v1, %v13587_v52  ;;  %6491 = vst.msk [vmem:[#allocation3 + $0x228] sm:$0xff] %vm1615_vm3, %v6413_v16  ;;  %8974 = vmatmul.f32.gmra.mxu3 %v8748_v11  ;;  %v13636_v52 = vpop.f32.mrf.mxu0  ;;  %v7844_v24 = vpop.f32.mrf.mxu2  ;;  %v8316_v11 = vmax.f32 %v8166_v44, %v8241_v33 }
 0x83e   : > { %v7935_v6 = vld [vmem:[#allocation3 + $0x218] sm:$0xff]  ;;  %8688 = vst.msk [vmem:[#allocation4 + $0x1e8] sm:$0xff] %vm1615_vm3, %v8613_v26  ;;  %9054 = vmatmul.f32.gmra.mxu0 %v8764_v12 }
 0x83f   : > { %v8013_v57 = vadd.f32 %v7935_v6, %v13584_v45  ;;  %7291 = vst.msk [vmem:[#allocation3 + $0x220] sm:$0xff] %vm1615_vm3, %v7213_v28  ;;  %v7049_v47 = vpop.f32.mrf.mxu1  ;;  %v8779_v12 = vld [vmem:[%s14122_s5 + $0x260] sm:$0xff] }
 0x840   : > { %v5444_v48 = vpop.f32.mrf.mxu3  ;;  %v8389_v25 = vld [vmem:[#allocation3 + $0x20a] sm:$0xff] }
 0x841   : > { %v8464_v37 = vld [vmem:[#allocation3 + $0x20b] sm:$0xff]  ;;  %8091 = vst.msk [vmem:[#allocation3 + $0x218] sm:$0xff] %vm1615_vm3, %v8013_v57  ;;  %v5614_v34 = vadd.f32 %v5536_v19, %v5444_v48 }
 0x842   : > { %v8539_v23 = vmax.f32 %v8389_v25, %v8464_v37  ;;  %v6336_v45 = vld [vmem:[#allocation3 + $0x230] sm:$0xff] }
 0x843   : > { %v6414_v2 = vadd.f32 %v6336_v45, %v13528_v54  ;;  %5692 = vst.msk [vmem:[#allocation3 + $0x238] sm:$0xff] %vm1615_vm3, %v5614_v34  ;;  %v8769_v54 = vld [vmem:[%s14122_s5 + $0x210] sm:$0xff] }
 0x844   : > { %v8614_v35 = vmax.f32 %v8314_v41, %v8539_v23  ;;  %v7136_v38 = vld [vmem:[#allocation3 + $0x228] sm:$0xff] }
 0x845   : > { %v7214_v3 = vadd.f32 %v7136_v38, %v7040_v7  ;;  %6492 = vst.msk [vmem:[#allocation3 + $0x230] sm:$0xff] %vm1615_vm3, %v6414_v2  ;;  %8977 = vmatmul.f32.gmra.mxu3 %v8753_v30  ;;  %v13655_v40 = vpop.f32.mrf.mxu0  ;;  %v7847_v8 = vpop.f32.mrf.mxu2  ;;  %v8854_v34 = vld [vmem:[#allocation4 + $0x1e8] sm:$0xff]  ;;  %v8167_v41 = vld [vmem:[#allocation3 + $0x208] sm:$0xff]  ;;  %v8768_v30 = vld [vmem:[%s14122_s5 + $0x208] sm:$0xff] }
 0x846   : > { %v7936_v39 = vld [vmem:[#allocation3 + $0x220] sm:$0xff]  ;;  %8689 = vst.msk [vmem:[#allocation4 + $0x1f0] sm:$0xff] %vm1615_vm3, %v8614_v35  ;;  %9057 = vmatmul.f32.gmra.mxu0 %v8769_v54  ;;  %v8852_v54 = vld [vmem:[#allocation4 + $0x1d8] sm:$0xff] }
 0x847   : > { %v8014_v20 = vadd.f32 %v7936_v39, %v13608_v43  ;;  %7292 = vst.msk [vmem:[#allocation3 + $0x228] sm:$0xff] %vm1615_vm3, %v7214_v3  ;;  %v8758_v43 = vld [vmem:[%s14122_s5 + $0x1b8] sm:$0xff]  ;;  %v7052_v10 = vpop.f32.mrf.mxu1 }
 0x848   : > { %v5447_v31 = vpop.f32.mrf.mxu3  ;;  %v8390_v32 = vld [vmem:[#allocation3 + $0x212] sm:$0xff] }
 0x849   : > { %v8465_v36 = vld [vmem:[#allocation3 + $0x213] sm:$0xff]  ;;  %8092 = vst.msk [vmem:[#allocation3 + $0x220] sm:$0xff] %vm1615_vm3, %v8014_v20  ;;  %v5615_v53 = vadd.f32 %v5537_v58, %v5447_v31 }
 0x84a   : > { %v8540_v50 = vmax.f32 %v8390_v32, %v8465_v36  ;;  %v6337_v15 = vld [vmem:[#allocation3 + $0x238] sm:$0xff]  ;;  %v8853_v39 = vld [vmem:[#allocation4 + $0x1e0] sm:$0xff]  ;;  %v8784_v36 = vld [vmem:[%s14122_s5 + $0x288] sm:$0xff] }
 0x84b   : > { %v6415_v46 = vadd.f32 %v6337_v15, %v13552_v4  ;;  %5693 = vst.msk [vmem:[#allocation3 + $0x240] sm:$0xff] %vm1615_vm3, %v5615_v53  ;;  %v8243_v32 = vld [vmem:[#allocation3 + $0x211] sm:$0xff] }
 0x84c   : > { %v8615_v42 = vmax.f32 %v8315_v59, %v8540_v50  ;;  %v7137_v7 = vld [vmem:[#allocation3 + $0x230] sm:$0xff]  ;;  %v5540_v59 = vld [vmem:[#allocation3 + $0x258] sm:$0xff] }
 0x84d   : > { %v7215_v27 = vadd.f32 %v7137_v7, %v7043_v5  ;;  %6493 = vst.msk [vmem:[#allocation3 + $0x238] sm:$0xff] %vm1615_vm3, %v6415_v46  ;;  %8980 = vmatmul.f32.gmra.mxu3 %v8758_v43  ;;  %v13671_v28 = vpop.f32.mrf.mxu0  ;;  %v8855_v19 = vld [vmem:[#allocation4 + $0x1f0] sm:$0xff]  ;;  %v7850_v38 = vpop.f32.mrf.mxu2  ;;  %v8850_v43 = vld [vmem:[#allocation4 + $0x1c8] sm:$0xff]  ;;  %v8168_v46 = vld [vmem:[#allocation3 + $0x210] sm:$0xff] }
 0x84e   : > { %v7937_v22 = vld [vmem:[#allocation3 + $0x228] sm:$0xff]  ;;  %8690 = vst.msk [vmem:[#allocation4 + $0x1f8] sm:$0xff] %vm1615_vm3, %v8615_v42  ;;  %9060 = vmatmul.f32.gmra.mxu0 %v8774_v29  ;;  %v8849_v29 = vld [vmem:[#allocation4 + $0x1c0] sm:$0xff] }
 0x84f   : > { %v8015_v51 = vadd.f32 %v7937_v22, %v7841_v18  ;;  %7293 = vst.msk [vmem:[#allocation3 + $0x230] sm:$0xff] %vm1615_vm3, %v7215_v27  ;;  %v8773_v27 = vld [vmem:[%s14122_s5 + $0x230] sm:$0xff]  ;;  %v8318_v22 = vmax.f32 %v8168_v46, %v8243_v32  ;;  %v13731_v46 = vld [vmem:[%s14121_s4] ss:$0 sm:$0xff] }
 0x850   : > { %v5450_v4 = vpop.f32.mrf.mxu3  ;;  %v8391_v21 = vld [vmem:[#allocation3 + $0x21a] sm:$0xff] }
 0x851   : > { %8093 = vst.msk [vmem:[#allocation3 + $0x228] sm:$0xff] %vm1615_vm3, %v8015_v51  ;;  %v5616_v17 = vadd.f32 %v5538_v60, %v5450_v4  ;;  %v8466_v49 = vld [vmem:[#allocation3 + $0x21b] sm:$0xff] }
 0x852   : > { %v6338_v62 = vld [vmem:[#allocation3 + $0x240] sm:$0xff]  ;;  %v8541_v16 = vmax.f32 %v8391_v21, %v8466_v49 }
 0x853   : > { %v6416_v26 = vadd.f32 %v6338_v62, %v13574_v13  ;;  %5694 = vst.msk [vmem:[#allocation3 + $0x248] sm:$0xff] %vm1615_vm3, %v5616_v17  ;;  %v8242_v13 = vld [vmem:[#allocation3 + $0x209] sm:$0xff]  ;;  %v8847_v62 = vld [vmem:[#allocation4 + $0x1b0] sm:$0xff] }
 0x854   : > { %v7138_v1 = vld [vmem:[#allocation3 + $0x238] sm:$0xff]  ;;  %v8616_v18 = vmax.f32 %v8316_v11, %v8541_v16  ;;  %v8317_v2 = vmax.f32 %v8167_v41, %v8242_v13  ;;  %v8848_v17 = vld [vmem:[#allocation4 + $0x1b8] sm:$0xff] }
 0x855   : > { %v7216_v6 = vadd.f32 %v7138_v1, %v7046_v0  ;;  %6494 = vst.msk [vmem:[#allocation3 + $0x240] sm:$0xff] %vm1615_vm3, %v6416_v26  ;;  %v8856_v5 = vld [vmem:[#allocation4 + $0x1f8] sm:$0xff]  ;;  %8983 = vmatmul.f32.gmra.mxu3 %v8763_v63  ;;  %v7853_v21 = vpop.f32.mrf.mxu2  ;;  %v8244_v63 = vld [vmem:[#allocation3 + $0x219] sm:$0xff] }
 0x856   : > { %v7938_v61 = vld [vmem:[#allocation3 + $0x230] sm:$0xff]  ;;  %9144 = vmatpush.msrb.mxu0 %v8856_v5  ;;  %8691 = vst.msk [vmem:[#allocation4 + $0x200] sm:$0xff] %vm1615_vm3, %v8616_v18  ;;  %v8789_v11 = vld [vmem:[%s14122_s5 + $0x2b0] sm:$0xff]  ;;  %v5541_v26 = vld [vmem:[#allocation3 + $0x260] sm:$0xff] }
 0x857   : > { %v8016_v57 = vadd.f32 %v7938_v61, %v7844_v24  ;;  %7294 = vst.msk [vmem:[#allocation3 + $0x238] sm:$0xff] %vm1615_vm3, %v7216_v6  ;;  %9063 = vmatmul.f32.gmra.mxu0 %v8779_v12  ;;  %v8846_v6 = vld [vmem:[#allocation4 + $0x1a8] sm:$0xff]  ;;  %v8844_v41 = vld [vmem:[#allocation4 + $0x198] sm:$0xff] }
 0x858   : > { %9145 = vmatpush.msrb.mxu0 %v8855_v19  ;;  %v5453_v48 = vpop.f32.mrf.mxu3  ;;  %v8392_v25 = vld [vmem:[#allocation3 + $0x222] sm:$0xff]  ;;  %v8169_v5 = vld [vmem:[#allocation3 + $0x218] sm:$0xff]  ;;  %v8778_v19 = vld [vmem:[%s14122_s5 + $0x258] sm:$0xff] }
 0x859   : > { %8094 = vst.msk [vmem:[#allocation3 + $0x230] sm:$0xff] %vm1615_vm3, %v8016_v57  ;;  %v5617_v37 = vadd.f32 %v5539_v55, %v5453_v48  ;;  %v8467_v23 = vld [vmem:[#allocation3 + $0x223] sm:$0xff]  ;;  %v8319_v13 = vmax.f32 %v8169_v5, %v8244_v63  ;;  %v8845_v55 = vld [vmem:[#allocation4 + $0x1a0] sm:$0xff] }
 0x85a   : > { %v6339_v45 = vld [vmem:[#allocation3 + $0x248] sm:$0xff]  ;;  %9146 = vmatpush.msrb.mxu0 %v8854_v34  ;;  %v8542_v35 = vmax.f32 %v8392_v25, %v8467_v23 }
 0x85b   : > { %v6417_v3 = vadd.f32 %v6339_v45, %v13594_v14  ;;  %5695 = vst.msk [vmem:[#allocation3 + $0x250] sm:$0xff] %vm1615_vm3, %v5617_v37  ;;  %v13686_v0 = vpop.f32.mrf.mxu0  ;;  %v8851_v14 = vld [vmem:[#allocation4 + $0x1d0] sm:$0xff] }
 0x85c   : > { %v7139_v24 = vld [vmem:[#allocation3 + $0x240] sm:$0xff]  ;;  %9147 = vmatpush.msrb.mxu0 %v8853_v39  ;;  %v8617_v20 = vmax.f32 %v8317_v2, %v8542_v35  ;;  %v5542_v39 = vld [vmem:[#allocation3 + $0x268] sm:$0xff] }
 0x85d   : > { %v7217_v58 = vadd.f32 %v7139_v24, %v7049_v47  ;;  %6495 = vst.msk [vmem:[#allocation3 + $0x248] sm:$0xff] %vm1615_vm3, %v6417_v3  ;;  %8986 = vmatmul.f32.gmra.mxu3 %v8768_v30  ;;  %v7055_v47 = vpop.f32.mrf.mxu1  ;;  %v7856_v30 = vpop.f32.mrf.mxu2  ;;  %v8245_v35 = vld [vmem:[#allocation3 + $0x221] sm:$0xff] }
 0x85e   : > { %v7939_v31 = vld [vmem:[#allocation3 + $0x238] sm:$0xff]  ;;  %9148 = vmatpush.msrb.mxu0 %v8852_v54  ;;  %8692 = vst.msk [vmem:[#allocation4 + $0x208] sm:$0xff] %vm1615_vm3, %v8617_v20 }
 0x85f   : > { %v8017_v56 = vadd.f32 %v7939_v31, %v7847_v8  ;;  %7295 = vst.msk [vmem:[#allocation3 + $0x240] sm:$0xff] %vm1615_vm3, %v7217_v58  ;;  %9066 = vmatmul.f32.gmra.mxu0 %v8784_v36  ;;  %v8842_v20 = vld [vmem:[#allocation4 + $0x188] sm:$0xff]  ;;  %v8170_v58 = vld [vmem:[#allocation3 + $0x220] sm:$0xff]  ;;  %v8706_v36 = vld [vmem:[%s14122_s5 + $0x18] sm:$0xff] }
 0x860   : > { %9149 = vmatpush.msrb.mxu0 %v8851_v14  ;;  %v5456_v53 = vpop.f32.mrf.mxu3  ;;  %v8393_v50 = vld [vmem:[#allocation3 + $0x22a] sm:$0xff]  ;;  %v8320_v14 = vmax.f32 %v8170_v58, %v8245_v35 }
 0x861   : > { %8095 = vst.msk [vmem:[#allocation3 + $0x238] sm:$0xff] %vm1615_vm3, %v8017_v56  ;;  %v5618_v15 = vadd.f32 %v5540_v59, %v5456_v53  ;;  %v8468_v42 = vld [vmem:[#allocation3 + $0x22b] sm:$0xff]  ;;  %v8783_v56 = vld [vmem:[%s14122_s5 + $0x280] sm:$0xff] }
 0x862   : > { %v6340_v7 = vld [vmem:[#allocation3 + $0x250] sm:$0xff]  ;;  %9150 = vmatpush.msrb.mxu0 %v8850_v43  ;;  %v8543_v51 = vmax.f32 %v8393_v50, %v8468_v42 }
 0x863   : > { %v6418_v33 = vadd.f32 %v6340_v7, %v13615_v9  ;;  %5696 = vst.msk [vmem:[#allocation3 + $0x258] sm:$0xff] %vm1615_vm3, %v5618_v15  ;;  %v13700_v44 = vpop.f32.mrf.mxu0  ;;  %v8841_v59 = vld [vmem:[#allocation4 + $0x180] sm:$0xff] }
 0x864   : > { %v7140_v4 = vld [vmem:[#allocation3 + $0x248] sm:$0xff]  ;;  %9151 = vmatpush.msrb.mxu0 %v8849_v29  ;;  %v8618_v60 = vmax.f32 %v8318_v22, %v8543_v51 }
 0x865   : > { %v7218_v8 = vadd.f32 %v7140_v4, %v7052_v10  ;;  %6496 = vst.msk [vmem:[#allocation3 + $0x250] sm:$0xff] %vm1615_vm3, %v6418_v33  ;;  %8989 = vmatmul.f32.gmra.mxu3 %v8773_v27  ;;  %v8246_v27 = vld [vmem:[#allocation3 + $0x229] sm:$0xff] }
 0x866   : > { %v7940_v49 = vld [vmem:[#allocation3 + $0x240] sm:$0xff]  ;;  %9152 = vmatpush.msrb.mxu0 %v8848_v17  ;;  %8693 = vst.msk [vmem:[#allocation4 + $0x210] sm:$0xff] %vm1615_vm3, %v8618_v60  ;;  %v8171_v33 = vld [vmem:[#allocation3 + $0x228] sm:$0xff]  ;;  %v7859_v60 = vpop.f32.mrf.mxu2 }
 0x867   : > { %v8018_v9 = vadd.f32 %v7940_v49, %v7850_v38  ;;  %7296 = vst.msk [vmem:[#allocation3 + $0x248] sm:$0xff] %vm1615_vm3, %v7218_v8  ;;  %9069 = vmatmul.f32.gmra.mxu0 %v8789_v11  ;;  %v7058_v38 = vpop.f32.mrf.mxu1  ;;  %v8321_v17 = vmax.f32 %v8171_v33, %v8246_v27  ;;  %v8726_v33 = vld [vmem:[%s14122_s5 + $0xb8] sm:$0xff] }
 0x868   : > { %9153 = vmatpush.msrb.mxu0 %v8847_v62  ;;  %v5459_v16 = vpop.f32.mrf.mxu3  ;;  %v8394_v1 = vld [vmem:[#allocation3 + $0x232] sm:$0xff] }
 0x869   : > { %8096 = vst.msk [vmem:[#allocation3 + $0x240] sm:$0xff] %vm1615_vm3, %v8018_v9  ;;  %v5619_v18 = vadd.f32 %v5541_v26, %v5459_v16  ;;  %v8469_v61 = vld [vmem:[#allocation3 + $0x233] sm:$0xff] }
 0x86a   : > { %v6341_v57 = vld [vmem:[#allocation3 + $0x258] sm:$0xff]  ;;  %9154 = vmatpush.msrb.mxu0 %v8846_v6  ;;  %v8544_v12 = vmax.f32 %v8394_v1, %v8469_v61 }
 0x86b   : > { %v6419_v48 = vadd.f32 %v6341_v57, %v13636_v52  ;;  %5697 = vst.msk [vmem:[#allocation3 + $0x260] sm:$0xff] %vm1615_vm3, %v5619_v18  ;;  %v13714_v23 = vpop.f32.mrf.mxu0  ;;  %v8843_v52 = vld [vmem:[#allocation4 + $0x190] sm:$0xff]  ;;  %v8711_v9 = vld [vmem:[%s14122_s5 + $0x40] sm:$0xff] }
 0x86c   : > { %v7141_v25 = vld [vmem:[#allocation3 + $0x250] sm:$0xff]  ;;  %9155 = vmatpush.msrb.mxu0 %v8845_v55  ;;  %v8619_v37 = vmax.f32 %v8319_v13, %v8544_v12  ;;  %v8716_v55 = vld [vmem:[%s14122_s5 + $0x68] sm:$0xff] }
 0x86d   : > { %v7219_v34 = vadd.f32 %v7141_v25, %v7055_v47  ;;  %6497 = vst.msk [vmem:[#allocation3 + $0x258] sm:$0xff] %vm1615_vm3, %v6419_v48  ;;  %8992 = vmatmul.f32.gmra.mxu3 %v8778_v19  ;;  %v8788_v47 = vld [vmem:[%s14122_s5 + $0x2a8] sm:$0xff]  ;;  %v8247_v5 = vld [vmem:[#allocation3 + $0x231] sm:$0xff]  ;;  %v8705_v48 = vld [vmem:[%s14122_s5 + $0x10] sm:$0xff] }
 0x86e   : > { %v7941_v45 = vld [vmem:[#allocation3 + $0x248] sm:$0xff]  ;;  %9156 = vmatpush.msrb.mxu0 %v8844_v41  ;;  %8694 = vst.msk [vmem:[#allocation4 + $0x218] sm:$0xff] %vm1615_vm3, %v8619_v37  ;;  %v7862_v37 = vpop.f32.mrf.mxu2 }
 0x86f   : > { %v8019_v2 = vadd.f32 %v7941_v45, %v7853_v21  ;;  %7297 = vst.msk [vmem:[#allocation3 + $0x250] sm:$0xff] %vm1615_vm3, %v7219_v34  ;;  %v7061_v21 = vpop.f32.mrf.mxu1 }
 0x870   : > { %9157 = vmatpush.msrb.mxu0 %v8843_v52  ;;  %v5462_v3 = vpop.f32.mrf.mxu3  ;;  %v8395_v10 = vld [vmem:[#allocation3 + $0x23a] sm:$0xff] }
 0x871   : > { %8097 = vst.msk [vmem:[#allocation3 + $0x248] sm:$0xff] %vm1615_vm3, %v8019_v2  ;;  %v5620_v24 = vadd.f32 %v5542_v39, %v5462_v3  ;;  %v8470_v54 = vld [vmem:[#allocation3 + $0x23b] sm:$0xff] }
 0x872   : > { %v6342_v31 = vld [vmem:[#allocation3 + $0x260] sm:$0xff]  ;;  %9158 = vmatpush.msrb.mxu0 %v8842_v20  ;;  %v8545_v32 = vmax.f32 %v8395_v10, %v8470_v54  ;;  %v8710_v54 = vld [vmem:[%s14122_s5 + $0x38] sm:$0xff] }
 0x873   : > { %v6420_v53 = vadd.f32 %v6342_v31, %v13655_v40  ;;  %5698 = vst.msk [vmem:[#allocation3 + $0x268] sm:$0xff] %vm1615_vm3, %v5620_v24  ;;  %v13733_v42 = vpop.f32.mrf.mxu0  ;;  %v8248_v52 = vld [vmem:[#allocation3 + $0x239] sm:$0xff]  ;;  %v8721_v31 = vld [vmem:[%s14122_s5 + $0x90] sm:$0xff] }
 0x874   : > { %v7142_v50 = vld [vmem:[#allocation3 + $0x258] sm:$0xff]  ;;  %9159 = vmatpush.msrb.mxu0 %v8841_v59  ;;  %v8620_v15 = vmax.f32 %v8320_v14, %v8545_v32 }
 0x875   : > { %v7220_v43 = vadd.f32 %v7142_v50, %v7058_v38  ;;  %6498 = vst.msk [vmem:[#allocation3 + $0x260] sm:$0xff] %vm1615_vm3, %v6420_v53  ;;  %8995 = vmatmul.f32.gmra.mxu3 %v8783_v56  ;;  %9160 = vmatmul.f32.vlgmr.msrb.gmra.mxu0 %v8706_v36  ;;  %v8173_v38 = vld [vmem:[#allocation3 + $0x238] sm:$0xff]  ;;  %v8174_v50 = vld [vmem:[#allocation3 + $0x240] sm:$0xff] }
 0x876   : > { %v7942_v7 = vld [vmem:[#allocation3 + $0x250] sm:$0xff]  ;;  %8695 = vst.msk [vmem:[#allocation4 + $0x220] sm:$0xff] %vm1615_vm3, %v8620_v15  ;;  %v8323_v24 = vmax.f32 %v8173_v38, %v8248_v52  ;;  %v7865_v32 = vpop.f32.mrf.mxu2 }
 0x877   : > { %v8020_v40 = vadd.f32 %v7942_v7, %v7856_v30  ;;  %7298 = vst.msk [vmem:[#allocation3 + $0x258] sm:$0xff] %vm1615_vm3, %v7220_v43  ;;  %v7064_v34 = vpop.f32.mrf.mxu1  ;;  %v8730_v38 = vld [vmem:[%s14122_s5 + $0xd8] sm:$0xff] }
 0x878   : > { %v8396_v22 = vld [vmem:[#allocation3 + $0x242] sm:$0xff]  ;;  %v8948_v51 = vpop.f32.mrf.mxu3 }
 0x879   : > { %8098 = vst.msk [vmem:[#allocation3 + $0x250] sm:$0xff] %vm1615_vm3, %v8020_v40  ;;  %v8471_v29 = vld [vmem:[#allocation3 + $0x243] sm:$0xff]  ;;  %v8949_v4 = vadd.f32 %v13731_v46, %v8948_v51 }
 0x87a   : > { %v6343_v8 = vld [vmem:[#allocation3 + $0x268] sm:$0xff]  ;;  %v8546_v49 = vmax.f32 %v8396_v22, %v8471_v29 }
 0x87b   : > { %v6421_v62 = vadd.f32 %v6343_v8, %v13671_v28  ;;  %v13747_v63 = vadd.f32 %v13686_v0, %v8949_v4  ;;  %v13751_v18 = vpop.f32.mrf.mxu0  ;;  %v8172_v0 = vld [vmem:[#allocation3 + $0x230] sm:$0xff]  ;;  %v8249_v53 = vld [vmem:[#allocation3 + $0x241] sm:$0xff] }
 0x87c   : > { %v7143_v11 = vld [vmem:[#allocation3 + $0x260] sm:$0xff]  ;;  %v8621_v16 = vmax.f32 %v8321_v17, %v8546_v49  ;;  %v8322_v13 = vmax.f32 %v8172_v0, %v8247_v5  ;;  %v8324_v40 = vmax.f32 %v8174_v50, %v8249_v53  ;;  %v8858_v53 = vld [vmem:[#allocation4 + $0x208] sm:$0xff] }
 0x87d   : > { %v7221_v26 = vadd.f32 %v7143_v11, %v7061_v21  ;;  %6499 = vst.msk [vmem:[#allocation3 + $0x268] sm:$0xff] %vm1615_vm3, %v6421_v62  ;;  %8998 = vmatmul.f32.gmra.mxu3 %v8788_v47  ;;  %9163 = vmatmul.f32.gmra.mxu0 %v8711_v9  ;;  %v8720_v5 = vld [vmem:[%s14122_s5 + $0x88] sm:$0xff] }
 0x87e   : > { %v7943_v1 = vld [vmem:[#allocation3 + $0x258] sm:$0xff]  ;;  %8696 = vst.msk [vmem:[#allocation4 + $0x228] sm:$0xff] %vm1615_vm3, %v8621_v16  ;;  %v8175_v16 = vld [vmem:[#allocation3 + $0x248] sm:$0xff] }
 0x87f   : > { %v8021_v6 = vadd.f32 %v7943_v1, %v7859_v60  ;;  %7299 = vst.msk [vmem:[#allocation3 + $0x260] sm:$0xff] %vm1615_vm3, %v7221_v26 }
 0x880   : > { %v8951_v28 = vpop.f32.mrf.mxu3  ;;  %v8397_v61 = vld [vmem:[#allocation3 + $0x24a] sm:$0xff] }
 0x881   : > { %8099 = vst.msk [vmem:[#allocation3 + $0x258] sm:$0xff] %vm1615_vm3, %v8021_v6  ;;  %v8472_v57 = vld [vmem:[#allocation3 + $0x24b] sm:$0xff]  ;;  %v8952_v19 = vadd.f32 %v13731_v46, %v8951_v28  ;;  %v8731_v28 = vld [vmem:[%s14122_s5 + $0xe0] sm:$0xff] }
 0x882   : > { %v8547_v12 = vmax.f32 %v8397_v61, %v8472_v57  ;;  %v8176_v60 = vld [vmem:[#allocation3 + $0x250] sm:$0x1f] }
 0x883   : > { %v13763_v25 = vadd.f32 %v13700_v44, %v8952_v19  ;;  %v9034_v44 = vpop.f32.mrf.mxu0  ;;  %v8251_v21 = vld [vmem:[#allocation3 + $0x251] sm:$0x1f]  ;;  %v8250_v8 = vld [vmem:[#allocation3 + $0x249] sm:$0xff] }
 0x884   : > { %v7144_v41 = vld [vmem:[#allocation3 + $0x268] sm:$0xff]  ;;  %v8622_v45 = vmax.f32 %v8322_v13, %v8547_v12  ;;  %v8326_v62 = vmax.f32 %v8176_v60, %v8251_v21 }
 0x885   : > { %v7222_v30 = vadd.f32 %v7144_v41, %v7064_v34  ;;  %9089 = vmatmul.f32.vlgmr.msra.gmra.mxu3 %v8705_v48  ;;  %9166 = vmatmul.f32.gmra.mxu0 %v8716_v55  ;;  %v8736_v48 = vld [vmem:[%s14122_s5 + $0x108] sm:$0xff] }
 0x886   : > { %v7944_v2 = vld [vmem:[#allocation3 + $0x260] sm:$0xff]  ;;  %8697 = vst.msk [vmem:[#allocation4 + $0x230] sm:$0xff] %vm1615_vm3, %v8622_v45 }
 0x887   : > { %v8022_v35 = vadd.f32 %v7944_v2, %v7862_v37  ;;  %7300 = vst.msk [vmem:[#allocation3 + $0x268] sm:$0xff] %vm1615_vm3, %v7222_v30 }
 0x888   : > { %v8398_v3 = vld [vmem:[#allocation3 + $0x252] sm:$0xff]  ;;  %v8954_v10 = vpop.f32.mrf.mxu3 }
 0x889   : > { %v8473_v39 = vld [vmem:[#allocation3 + $0x253] sm:$0xff]  ;;  %8100 = vst.msk [vmem:[#allocation3 + $0x260] sm:$0xff] %vm1615_vm3, %v8022_v35  ;;  %v8955_v58 = vadd.f32 %v13731_v46, %v8954_v10  ;;  %v8741_v35 = vld [vmem:[%s14122_s5 + $0x130] sm:$0xff] }
 0x88a   : > { %v8548_v20 = vmax.f32 %v8398_v3, %v8473_v39  ;;  %v8862_v10 = vld [vmem:[#allocation4 + $0x228] sm:$0xff] }
 0x88b   : > { %v13776_v14 = vadd.f32 %v13714_v23, %v8955_v58  ;;  %v8715_v23 = vld [vmem:[%s14122_s5 + $0x60] sm:$0xff]  ;;  %v9037_v51 = vpop.f32.mrf.mxu0 }
 0x88c   : > { %v8623_v56 = vmax.f32 %v8323_v24, %v8548_v20 }
 0x88d   : > { %9092 = vmatmul.f32.gmra.mxu3 %v8710_v54  ;;  %9169 = vmatmul.f32.gmra.mxu0 %v8721_v31  ;;  %v8863_v39 = vld [vmem:[#allocation4 + $0x230] sm:$0xff]  ;;  %v8860_v54 = vld [vmem:[#allocation4 + $0x218] sm:$0xff]  ;;  %v8746_v31 = vld [vmem:[%s14122_s5 + $0x158] sm:$0xff] }
 0x88e   : > { %8698 = vst.msk [vmem:[#allocation4 + $0x238] sm:$0xff] %vm1615_vm3, %v8623_v56  ;;  %v7945_v36 = vld [vmem:[#allocation3 + $0x268] sm:$0xff]  ;;  %v8735_v56 = vld [vmem:[%s14122_s5 + $0x100] sm:$0xff] }
 0x88f   : > { %v8023_v59 = vadd.f32 %v7945_v36, %v7865_v32  ;;  %v8859_v36 = vld [vmem:[#allocation4 + $0x210] sm:$0xff] }
 0x890   : > { %v8399_v15 = vld [vmem:[#allocation3 + $0x25a] sm:$0xff]  ;;  %v8957_v7 = vpop.f32.mrf.mxu3 }
 0x891   : > { %v8474_v43 = vld [vmem:[#allocation3 + $0x25b] sm:$0xff]  ;;  %8101 = vst.msk [vmem:[#allocation3 + $0x268] sm:$0xff] %vm1615_vm3, %v8023_v59  ;;  %v8958_v22 = vadd.f32 %v13731_v46, %v8957_v7  ;;  %v8857_v59 = vld [vmem:[#allocation4 + $0x200] sm:$0xff] }
 0x892   : > { %v8549_v27 = vmax.f32 %v8399_v15, %v8474_v43  ;;  %v8751_v7 = vld [vmem:[%s14122_s5 + $0x180] sm:$0xff] }
 0x893   : > { %v13788_v4 = vadd.f32 %v13733_v42, %v8958_v22  ;;  %v8325_v42 = vmax.f32 %v8175_v16, %v8250_v8  ;;  %v9040_v19 = vpop.f32.mrf.mxu0  ;;  %v8766_v16 = vld [vmem:[%s14122_s5 + $0x1f8] sm:$0xff] }
 0x894   : > { %v8624_v29 = vmax.f32 %v8324_v40, %v8549_v27  ;;  %v8740_v40 = vld [vmem:[%s14122_s5 + $0x128] sm:$0xff] }
 0x895   : > { %9095 = vmatmul.f32.gmra.mxu3 %v8715_v23  ;;  %9172 = vmatmul.f32.gmra.mxu0 %v8726_v33  ;;  %v8864_v52 = vld [vmem:[#allocation4 + $0x238] sm:$0xff] }
 0x896   : > { %8699 = vst.msk [vmem:[#allocation4 + $0x240] sm:$0xff] %vm1615_vm3, %v8624_v29  ;;  %v8745_v33 = vld [vmem:[%s14122_s5 + $0x150] sm:$0xff] }
 0x898   : > { %v8401_v17 = vld [vmem:[#allocation3 + $0x26a] sm:$0x1f]  ;;  %v8400_v47 = vld [vmem:[#allocation3 + $0x262] sm:$0xff]  ;;  %v8960_v9 = vpop.f32.mrf.mxu3 }
 0x899   : > { %v8476_v49 = vld [vmem:[#allocation3 + $0x26b] sm:$0x1f]  ;;  %v8475_v26 = vld [vmem:[#allocation3 + $0x263] sm:$0xff]  ;;  %v8961_v1 = vadd.f32 %v13731_v46, %v8960_v9 }
 0x89a   : > { %v8551_v11 = vmax.f32 %v8401_v17, %v8476_v49  ;;  %v8550_v6 = vmax.f32 %v8400_v47, %v8475_v26  ;;  %v8761_v17 = vld [vmem:[%s14122_s5 + $0x1d0] sm:$0xff]  ;;  %v8750_v49 = vld [vmem:[%s14122_s5 + $0x178] sm:$0xff]  ;;  %v8755_v26 = vld [vmem:[%s14122_s5 + $0x1a0] sm:$0xff] }
 0x89b   : > { %v13799_v61 = vadd.f32 %v13751_v18, %v8961_v1  ;;  %v8725_v18 = vld [vmem:[%s14122_s5 + $0xb0] sm:$0xff]  ;;  %v9043_v41 = vpop.f32.mrf.mxu0 }
 0x89c   : > { %v8626_v0 = vmax.f32 %v8326_v62, %v8551_v11  ;;  %v8625_v57 = vmax.f32 %v8325_v42, %v8550_v6 }
 0x89d   : > { %9098 = vmatmul.f32.gmra.mxu3 %v8720_v5  ;;  %9175 = vmatmul.f32.gmra.mxu0 %v8731_v28  ;;  %v8865_v45 = vld [vmem:[#allocation4 + $0x240] sm:$0xff]  ;;  %v8771_v28 = vld [vmem:[%s14122_s5 + $0x220] sm:$0xff] }
 0x89e   : > { %8702 = vst.msk [vmem:[#allocation4 + $0x250] sm:$0x1f] %vm8701_vm5, %v8626_v0  ;;  %v8760_v0 = vld [vmem:[%s14122_s5 + $0x1c8] sm:$0xff] }
 0x89f   : > { %8700 = vst.msk [vmem:[#allocation4 + $0x248] sm:$0xff] %vm1615_vm3, %v8625_v57 }
 0x8a0   : > { %v8963_v13 = vpop.f32.mrf.mxu3 }
 0x8a1   : > { %v8964_v12 = vadd.f32 %v13731_v46, %v8963_v13 }
 0x8a3   : > { %v13809_v55 = vadd.f32 %v9034_v44, %v8964_v12  ;;  %v8861_v44 = vld [vmem:[#allocation4 + $0x220] sm:$0xff]  ;;  %v9046_v20 = vpop.f32.mrf.mxu0 }
 0x8a5   : > { %v8867_v37 = vld [vmem:[#allocation4 + $0x250] sm:$0x1f]  ;;  %9178 = vmatmul.f32.gmra.mxu0 %v8736_v48  ;;  %9101 = vmatmul.f32.gmra.mxu3 %v8725_v18  ;;  %v8765_v18 = vld [vmem:[%s14122_s5 + $0x1f0] sm:$0xff] }
 0x8a6   : > { %10228 = vmatpush.msk.msrb.mxu3 %vm8927_vm6, %v8867_v37  ;;  %v8866_v34 = vld [vmem:[#allocation4 + $0x248] sm:$0xff]  ;;  %v8776_v48 = vld [vmem:[%s14122_s5 + $0x248] sm:$0xff] }
 0x8a8   : > { %9221 = vmatpush.msrb.mxu3 %v8866_v34  ;;  %v8966_v30 = vpop.f32.mrf.mxu3 }
 0x8a9   : > { %v8967_v2 = vadd.f32 %v13731_v46, %v8966_v30  ;;  %v8770_v30 = vld [vmem:[%s14122_s5 + $0x218] sm:$0xff] }
 0x8aa   : > { %9222 = vmatpush.msrb.mxu3 %v8865_v45  ;;  %v8781_v45 = vld [vmem:[%s14122_s5 + $0x270] sm:$0xff] }
 0x8ab   : > { %v13818_v3 = vadd.f32 %v9037_v51, %v8967_v2  ;;  %v9049_v43 = vpop.f32.mrf.mxu0  ;;  %v8756_v51 = vld [vmem:[%s14122_s5 + $0x1a8] sm:$0xff] }
 0x8ac   : > { %9223 = vmatpush.msrb.mxu3 %v8864_v52 }
 0x8ad   : > { %9181 = vmatmul.f32.gmra.mxu0 %v8741_v35  ;;  %9104 = vmatmul.f32.gmra.mxu3 %v8730_v38 }
 0x8ae   : > { %9224 = vmatpush.msrb.mxu3 %v8863_v39  ;;  %v8786_v39 = vld [vmem:[%s14122_s5 + $0x298] sm:$0xff] }
 0x8b0   : > { %9225 = vmatpush.msrb.mxu3 %v8862_v10  ;;  %v8969_v24 = vpop.f32.mrf.mxu3  ;;  %v8775_v10 = vld [vmem:[%s14122_s5 + $0x240] sm:$0xff] }
 0x8b1   : > { %v8970_v58 = vadd.f32 %v13731_v46, %v8969_v24 }
 0x8b2   : > { %9226 = vmatpush.msrb.mxu3 %v8861_v44 }
 0x8b3   : > { %v13827_v32 = vadd.f32 %v9040_v19, %v8970_v58  ;;  %v9052_v60 = vpop.f32.mrf.mxu0 }
 0x8b4   : > { %9227 = vmatpush.msrb.mxu3 %v8860_v54  ;;  %v8791_v54 = vld [vmem:[%s14122_s5 + $0x2c0] sm:$0xff] }
 0x8b5   : > { %9184 = vmatmul.f32.gmra.mxu0 %v8746_v31  ;;  %9107 = vmatmul.f32.gmra.mxu3 %v8735_v56  ;;  %v8780_v31 = vld [vmem:[%s14122_s5 + $0x268] sm:$0xff] }
 0x8b6   : > { %9228 = vmatpush.msrb.mxu3 %v8859_v36 }
 0x8b8   : > { %9229 = vmatpush.msrb.mxu3 %v8858_v53  ;;  %v8972_v50 = vpop.f32.mrf.mxu3 }
 0x8b9   : > { %v8973_v15 = vadd.f32 %v13731_v46, %v8972_v50  ;;  %v8785_v50 = vld [vmem:[%s14122_s5 + $0x290] sm:$0xff] }
 0x8ba   : > { %9230 = vmatpush.msrb.mxu3 %v8857_v59 }
 0x8bb   : > { %v13836_v27 = vadd.f32 %v9043_v41, %v8973_v15  ;;  %v9055_v9 = vpop.f32.mrf.mxu0 }
 0x8bd   : > { %9187 = vmatmul.f32.gmra.mxu0 %v8751_v7  ;;  %9110 = vmatmul.f32.gmra.mxu3 %v8740_v40  ;;  %v8790_v40 = vld [vmem:[%s14122_s5 + $0x2b8] sm:$0xff] }
 0x8c0   : > { %v8975_v22 = vpop.f32.mrf.mxu3 }
 0x8c1   : > { %v8976_v23 = vadd.f32 %v13731_v46, %v8975_v22 }
 0x8c3   : > { %v13845_v29 = vadd.f32 %v9046_v20, %v8976_v23  ;;  %v9058_v6 = vpop.f32.mrf.mxu0 }
 0x8c5   : > { %9190 = vmatmul.f32.gmra.mxu0 %v8756_v51  ;;  %9113 = vmatmul.f32.gmra.mxu3 %v8745_v33  ;;  %v8712_v33 = vld [vmem:[%s14122_s5 + $0x48] sm:$0xff] }
 0x8c8   : > { %v8978_v21 = vpop.f32.mrf.mxu3 }
 0x8c9   : > { %v8979_v8 = vadd.f32 %v13731_v46, %v8978_v21  ;;  %v8717_v21 = vld [vmem:[%s14122_s5 + $0x70] sm:$0xff] }
 0x8cb   : > { %v13854_v47 = vadd.f32 %v9049_v43, %v8979_v8  ;;  %v9061_v12 = vpop.f32.mrf.mxu0 }
 0x8cd   : > { %9193 = vmatmul.f32.gmra.mxu0 %v8761_v17  ;;  %9116 = vmatmul.f32.gmra.mxu3 %v8750_v49  ;;  %v8722_v17 = vld [vmem:[%s14122_s5 + $0x98] sm:$0xff] }
 0x8d0   : > { %v8981_v62 = vpop.f32.mrf.mxu3 }
 0x8d1   : > { %v8982_v11 = vadd.f32 %v13731_v46, %v8981_v62 }
 0x8d3   : > { %v13863_v1 = vadd.f32 %v9052_v60, %v8982_v11  ;;  %v8732_v11 = vld [vmem:[%s14122_s5 + $0xe8] sm:$0xff] }
 0x8d4   : > { %v9064_v52 = vpop.f32.mrf.mxu0 }
 0x8d5   : > { %9196 = vmatmul.f32.gmra.mxu0 %v8766_v16  ;;  %9119 = vmatmul.f32.gmra.mxu3 %v8755_v26  ;;  %v8737_v26 = vld [vmem:[%s14122_s5 + $0x110] sm:$0xff] }
 0x8d8   : > { %v8984_v42 = vpop.f32.mrf.mxu3 }
 0x8d9   : > { %v8985_v5 = vadd.f32 %v13731_v46, %v8984_v42 }
 0x8db   : > { %v13872_v57 = vadd.f32 %v9055_v9, %v8985_v5  ;;  %v8727_v9 = vld [vmem:[%s14122_s5 + $0xc0] sm:$0xff] }
 0x8dc   : > { %v9067_v24 = vpop.f32.mrf.mxu0 }
 0x8dd   : > { %9199 = vmatmul.f32.gmra.mxu0 %v8771_v28  ;;  %9122 = vmatmul.f32.gmra.mxu3 %v8760_v0  ;;  %v8747_v28 = vld [vmem:[%s14122_s5 + $0x160] sm:$0xff] }
 0x8e0   : > { %v8987_v19 = vpop.f32.mrf.mxu3 }
 0x8e1   : > { %v8988_v13 = vadd.f32 %v13731_v46, %v8987_v19  ;;  %v8752_v19 = vld [vmem:[%s14122_s5 + $0x188] sm:$0xff] }
 0x8e3   : > { %v13881_v37 = vadd.f32 %v9058_v6, %v8988_v13  ;;  %v8742_v6 = vld [vmem:[%s14122_s5 + $0x138] sm:$0xff] }
 0x8e4   : > { %v9070_v53 = vpop.f32.mrf.mxu0 }
 0x8e5   : > { %9202 = vmatmul.f32.gmra.mxu0 %v8776_v48  ;;  %9125 = vmatmul.f32.gmra.mxu3 %v8765_v18  ;;  %v8762_v18 = vld [vmem:[%s14122_s5 + $0x1d8] sm:$0xff] }
 0x8e8   : > { %v8990_v34 = vpop.f32.mrf.mxu3 }
 0x8e9   : > { %v8991_v41 = vadd.f32 %v13731_v46, %v8990_v34 }
 0x8eb   : > { %v13890_v2 = vadd.f32 %v9061_v12, %v8991_v41  ;;  %v8757_v12 = vld [vmem:[%s14122_s5 + $0x1b0] sm:$0xff]  ;;  %v8767_v41 = vld [vmem:[%s14122_s5 + $0x200] sm:$0xff] }
 0x8ed   : > { %9205 = vmatmul.f32.gmra.mxu0 %v8781_v45  ;;  %9128 = vmatmul.f32.gmra.mxu3 %v8770_v30 }
 0x8f0   : > { %v8993_v35 = vpop.f32.mrf.mxu3 }
 0x8f1   : > { %v8994_v38 = vadd.f32 %v13731_v46, %v8993_v35 }
 0x8f2   : > { %v9161_v45 = vpop.f32.mrf.mxu0 }
 0x8f3   : > { %v13899_v44 = vadd.f32 %v9064_v52, %v8994_v38  ;;  %v8772_v52 = vld [vmem:[%s14122_s5 + $0x228] sm:$0xff] }
 0x8f5   : > { %9208 = vmatmul.f32.gmra.mxu0 %v8786_v39  ;;  %9131 = vmatmul.f32.gmra.mxu3 %v8775_v10  ;;  %v8777_v39 = vld [vmem:[%s14122_s5 + $0x250] sm:$0xff] }
 0x8f8   : > { %v8996_v20 = vpop.f32.mrf.mxu3 }
 0x8f9   : > { %v8997_v58 = vadd.f32 %v13731_v46, %v8996_v20  ;;  %v8782_v20 = vld [vmem:[%s14122_s5 + $0x278] sm:$0xff] }
 0x8fa   : > { %v9164_v35 = vpop.f32.mrf.mxu0 }
 0x8fb   : > { %v13908_v56 = vadd.f32 %v9067_v24, %v8997_v58 }
 0x8fd   : > { %9211 = vmatmul.f32.gmra.mxu0 %v8791_v54  ;;  %9134 = vmatmul.f32.gmra.mxu3 %v8780_v31  ;;  %v8787_v31 = vld [vmem:[%s14122_s5 + $0x2a0] sm:$0xff] }
 0x900   : > { %v8999_v36 = vpop.f32.mrf.mxu3 }
 0x901   : > { %v9000_v59 = vadd.f32 %v13731_v46, %v8999_v36  ;;  %v8707_v46 = vld [vmem:[%s14122_s5 + $0x20] sm:$0xff] }
 0x903   : > { %v13914_v15 = vadd.f32 %v9070_v53, %v9000_v59  ;;  %v8792_v59 = vld [vmem:[%s14122_s5 + $0x2c8] sm:$0xff] }
 0x905   : > { %9137 = vmatmul.f32.gmra.mxu3 %v8785_v50 }
 0x908   : > { %v9090_v43 = vpop.f32.mrf.mxu3 }
 0x909   : > { %v13917_v7 = vadd.f32 %v9090_v43, %v13747_v63 }
 0x90d   : > { %9140 = vmatmul.f32.gmra.mxu3 %v8790_v40 }
 0x910   : > { %v9093_v22 = vpop.f32.mrf.mxu3 }
 0x911   : > { %v13923_v23 = vadd.f32 %v9093_v22, %v13763_v25 }
 0x915   : > { %10229 = vmatmul.msk.f32.vlgmr.msrb.gmra.mxu3 %vm8872_vm7, %v8707_v46 }
 0x918   : > { %v9096_v51 = vpop.f32.mrf.mxu3 }
 0x919   : > { %v13930_v63 = vadd.f32 %v9096_v51, %v13776_v14 }
 0x91d   : > { %10230 = vmatmul.msk.f32.gmra.mxu3 %vm8872_vm7, %v8712_v33 }
 0x920   : > { %v9099_v60 = vpop.f32.mrf.mxu3 }
 0x921   : > { %v13937_v25 = vadd.f32 %v9099_v60, %v13788_v4 }
 0x925   : > { %10231 = vmatmul.msk.f32.gmra.mxu3 %vm8872_vm7, %v8717_v21 }
 0x928   : > { %v9102_v8 = vpop.f32.mrf.mxu3 }
 0x929   : > { %v13944_v14 = vadd.f32 %v9102_v8, %v13799_v61 }
 0x92d   : > { %10232 = vmatmul.msk.f32.gmra.mxu3 %vm8872_vm7, %v8722_v17 }
 0x930   : > { %v9105_v49 = vpop.f32.mrf.mxu3 }
 0x931   : > { %v13951_v4 = vadd.f32 %v9105_v49, %v13809_v55 }
 0x935   : > { %10233 = vmatmul.msk.f32.gmra.mxu3 %vm8872_vm7, %v8727_v9 }
 0x938   : > { %v9108_v62 = vpop.f32.mrf.mxu3 }
 0x939   : > { %v13958_v61 = vadd.f32 %v9108_v62, %v13818_v3 }
 0x93d   : > { %10234 = vmatmul.msk.f32.gmra.mxu3 %vm8872_vm7, %v8732_v11 }
 0x940   : > { %v9111_v16 = vpop.f32.mrf.mxu3 }
 0x941   : > { %v13965_v55 = vadd.f32 %v9111_v16, %v13827_v32 }
 0x945   : > { %10235 = vmatmul.msk.f32.gmra.mxu3 %vm8872_vm7, %v8737_v26 }
 0x948   : > { %v9114_v42 = vpop.f32.mrf.mxu3 }
 0x949   : > { %v13972_v3 = vadd.f32 %v9114_v42, %v13836_v27 }
 0x94d   : > { %10236 = vmatmul.msk.f32.gmra.mxu3 %vm8872_vm7, %v8742_v6 }
 0x950   : > { %v9117_v5 = vpop.f32.mrf.mxu3 }
 0x951   : > { %v13979_v32 = vadd.f32 %v9117_v5, %v13845_v29 }
 0x955   : > { %10237 = vmatmul.msk.f32.gmra.mxu3 %vm8872_vm7, %v8747_v28 }
 0x958   : > { %v9120_v0 = vpop.f32.mrf.mxu3 }
 0x959   : > { %v13986_v27 = vadd.f32 %v9120_v0, %v13854_v47 }
 0x95d   : > { %10238 = vmatmul.msk.f32.gmra.mxu3 %vm8872_vm7, %v8752_v19 }
 0x960   : > { %v9123_v13 = vpop.f32.mrf.mxu3 }
 0x961   : > { %v13993_v29 = vadd.f32 %v9123_v13, %v13863_v1 }
 0x965   : > { %10239 = vmatmul.msk.f32.gmra.mxu3 %vm8872_vm7, %v8757_v12 }
 0x968   : > { %v9126_v48 = vpop.f32.mrf.mxu3 }
 0x969   : > { %v14000_v47 = vadd.f32 %v9126_v48, %v13872_v57 }
 0x96d   : > { %10240 = vmatmul.msk.f32.gmra.mxu3 %vm8872_vm7, %v8762_v18 }
 0x970   : > { %v9129_v34 = vpop.f32.mrf.mxu3 }
 0x971   : > { %v14007_v1 = vadd.f32 %v9129_v34, %v13881_v37 }
 0x975   : > { %10241 = vmatmul.msk.f32.gmra.mxu3 %vm8872_vm7, %v8767_v41 }
 0x978   : > { %v9132_v30 = vpop.f32.mrf.mxu3 }
 0x979   : > { %v14014_v57 = vadd.f32 %v9132_v30, %v13890_v2  ;;  %v9167_v2 = vpop.f32.mrf.mxu0 }
 0x97a   : > { %v9168_v60 = vadd.f32 %v9167_v2, %v13930_v63 }
 0x97d   : > { %10242 = vmatmul.msk.f32.gmra.mxu3 %vm8872_vm7, %v8772_v52 }
 0x980   : > { %v9135_v37 = vpop.f32.mrf.mxu3 }
 0x981   : > { %v14021_v38 = vadd.f32 %v9135_v37, %v13899_v44  ;;  %v9170_v44 = vpop.f32.mrf.mxu0 }
 0x985   : > { %10243 = vmatmul.msk.f32.gmra.mxu3 %vm8872_vm7, %v8777_v39 }
 0x988   : > { %v9138_v10 = vpop.f32.mrf.mxu3 }
 0x989   : > { %v14028_v24 = vadd.f32 %v9138_v10, %v13908_v56  ;;  %v9162_v56 = vadd.f32 %v9161_v45, %v13917_v7  ;;  %v9173_v50 = vpop.f32.mrf.mxu0  ;;  %v9165_v7 = vadd.f32 %v9164_v35, %v13923_v23  ;;  %v9171_v23 = vadd.f32 %v9170_v44, %v13937_v25 }
 0x98a   : > { %v9174_v42 = vadd.f32 %v9173_v50, %v13944_v14 }
 0x98d   : > { %10244 = vmatmul.msk.f32.gmra.mxu3 %vm8872_vm7, %v8782_v20 }
 0x990   : > { %v9141_v58 = vpop.f32.mrf.mxu3 }
 0x991   : > { %v14035_v54 = vadd.f32 %v9141_v58, %v13914_v15  ;;  %v9176_v51 = vpop.f32.mrf.mxu0 }
 0x992   : > { %v9177_v19 = vadd.f32 %v9176_v51, %v13951_v4 }
 0x995   : > { %10245 = vmatmul.msk.f32.gmra.mxu3 %vm8872_vm7, %v8787_v31 }
 0x998   : > { %v9232_v36 = vpop.f32.mrf.mxu3 }
 0x999   : > { %v9233_v53 = vadd.f32 %v9232_v36, %v9162_v56  ;;  %v9179_v9 = vpop.f32.mrf.mxu0 }
 0x99a   : > { %v9180_v14 = vadd.f32 %v9179_v9, %v13958_v61 }
 0x99b   : > { %v9286_v43 = vmax.f32 %v9233_v53, 0.0 }
 0x99d   : > { %v9304_v15 = vpack.c.bf16 %v9286_v43, %v9286_v43  ;;  %10246 = vmatmul.msk.f32.gmra.mxu3 %vm8872_vm7, %v8792_v59 }
 0x99f   : > { %9314 = vst.msk [vmem:[%s14049_s7] sm:$0xf] %vm9313_vm8, %v9304_v15 }
 0x9a0   : > { %v9235_v40 = vpop.f32.mrf.mxu3 }
 0x9a1   : > { %v9236_v22 = vadd.f32 %v9235_v40, %v9165_v7  ;;  %v9182_v6 = vpop.f32.mrf.mxu0 }
 0x9a2   : > { %v9183_v4 = vadd.f32 %v9182_v6, %v13965_v55 }
 0x9a3   : > { %v9287_v46 = vmax.f32 %v9236_v22, 0.0 }
 0x9a5   : > { %v9305_v33 = vpack.c.bf16 %v9287_v46, %v9287_v46 }
 0x9a7   : > { %9315 = vst.msk [vmem:[%s14049_s7 + $0x4] sm:$0xf] %vm9313_vm8, %v9305_v33 }
 0x9a8   : > { %v9238_v21 = vpop.f32.mrf.mxu3 }
 0x9a9   : > { %v9239_v8 = vadd.f32 %v9238_v21, %v9168_v60  ;;  %v9185_v12 = vpop.f32.mrf.mxu0 }
 0x9aa   : > { %v9186_v20 = vadd.f32 %v9185_v12, %v13972_v3 }
 0x9ab   : > { %v9288_v17 = vmax.f32 %v9239_v8, 0.0 }
 0x9ad   : > { %v9306_v49 = vpack.c.bf16 %v9288_v17, %v9288_v17 }
 0x9af   : > { %9316 = vst.msk [vmem:[%s14049_s7 + $0x8] sm:$0xf] %vm9313_vm8, %v9306_v49 }
 0x9b0   : > { %v9241_v62 = vpop.f32.mrf.mxu3 }
 0x9b1   : > { %v9242_v11 = vadd.f32 %v9241_v62, %v9171_v23  ;;  %v9188_v30 = vpop.f32.mrf.mxu0 }
 0x9b2   : > { %v9189_v56 = vadd.f32 %v9188_v30, %v13979_v32 }
 0x9b3   : > { %v9289_v16 = vmax.f32 %v9242_v11, 0.0 }
 0x9b5   : > { %v9307_v26 = vpack.c.bf16 %v9289_v16, %v9289_v16 }
 0x9b7   : > { %9317 = vst.msk [vmem:[%s14049_s7 + $0xc] sm:$0xf] %vm9313_vm8, %v9307_v26 }
 0x9b8   : > { %v9244_v63 = vpop.f32.mrf.mxu3 }
 0x9b9   : > { %v9245_v5 = vadd.f32 %v9244_v63, %v9174_v42  ;;  %v9191_v10 = vpop.f32.mrf.mxu0 }
 0x9ba   : > { %v9192_v43 = vadd.f32 %v9191_v10, %v13986_v27 }
 0x9bb   : > { %v9290_v28 = vmax.f32 %v9245_v5, 0.0 }
 0x9bd   : > { %v9308_v0 = vpack.c.bf16 %v9290_v28, %v9290_v28 }
 0x9bf   : > { %9318 = vst.msk [vmem:[%s14049_s7 + $0x10] sm:$0xf] %vm9313_vm8, %v9308_v0 }
 0x9c0   : > { %v9247_v25 = vpop.f32.mrf.mxu3 }
 0x9c1   : > { %v9248_v13 = vadd.f32 %v9247_v25, %v9177_v19  ;;  %v9194_v53 = vpop.f32.mrf.mxu0 }
 0x9c2   : > { %v9195_v46 = vadd.f32 %v9194_v53, %v13993_v29 }
 0x9c3   : > { %v9291_v48 = vmax.f32 %v9248_v13, 0.0 }
 0x9c5   : > { %v9309_v18 = vpack.c.bf16 %v9291_v48, %v9291_v48 }
 0x9c7   : > { %9319 = vst.msk [vmem:[%s14049_s7 + $0x14] sm:$0xf] %vm9313_vm8, %v9309_v18 }
 0x9c8   : > { %v9250_v34 = vpop.f32.mrf.mxu3 }
 0x9c9   : > { %v9251_v41 = vadd.f32 %v9250_v34, %v9180_v14  ;;  %v9197_v7 = vpop.f32.mrf.mxu0 }
 0x9ca   : > { %v9198_v8 = vadd.f32 %v9197_v7, %v14000_v47 }
 0x9cb   : > { %v9292_v45 = vmax.f32 %v9251_v41, 0.0 }
 0x9cd   : > { %v9310_v52 = vpack.c.bf16 %v9292_v45, %v9292_v45 }
 0x9cf   : > { %9320 = vst.msk [vmem:[%s14049_s7 + $0x18] sm:$0xf] %vm9313_vm8, %v9310_v52 }
 0x9d0   : > { %v9253_v35 = vpop.f32.mrf.mxu3 }
 0x9d1   : > { %v9254_v37 = vadd.f32 %v9253_v35, %v9183_v4  ;;  %v9200_v60 = vpop.f32.mrf.mxu0 }
 0x9d2   : > { %v9201_v62 = vadd.f32 %v9200_v60, %v14007_v1 }
 0x9d3   : > { %v9293_v39 = vmax.f32 %v9254_v37, 0.0 }
 0x9d5   : > { %v9311_v2 = vpack.c.bf16 %v9293_v39, %v9293_v39 }
 0x9d7   : > { %9321 = vst.msk [vmem:[%s14049_s7 + $0x1c] sm:$0xf] %vm9313_vm8, %v9311_v2 }
 0x9d8   : > { %v9256_v61 = vpop.f32.mrf.mxu3 }
 0x9d9   : > { %v9257_v58 = vadd.f32 %v9256_v61, %v9186_v20  ;;  %v9203_v23 = vpop.f32.mrf.mxu0 }
 0x9da   : > { %v9204_v42 = vadd.f32 %v9203_v23, %v14014_v57 }
 0x9db   : > { %v9294_v44 = vmax.f32 %v9257_v58, 0.0 }
 0x9dd   : > { %v9312_v31 = vpack.c.bf16 %v9294_v44, %v9294_v44 }
 0x9df   : > { %9322 = vst.msk [vmem:[%s14049_s7 + $0x20] sm:$0xf] %vm9313_vm8, %v9312_v31 }
 0x9e0   : > { %v9259_v36 = vpop.f32.mrf.mxu3 }
 0x9e1   : > { %v9260_v55 = vadd.f32 %v9259_v36, %v9189_v56  ;;  %v9206_v63 = vpop.f32.mrf.mxu0 }
 0x9e2   : > { %v9207_v0 = vadd.f32 %v9206_v63, %v14021_v38 }
 0x9e3   : > { %v9295_v59 = vmax.f32 %v9260_v55, 0.0 }
 0x9e5   : > { %v9323_v50 = vpack.c.bf16 %v9295_v59, %v9295_v59 }
 0x9e7   : > { %9341 = vrot.lane.b32.xlu0 %v9323_v50, %s10286_s22 }
 0x9e8   : > { %v9262_v15 = vpop.f32.mrf.mxu3 }
 0x9e9   : > { %v9263_v3 = vadd.f32 %v9262_v15, %v9192_v43  ;;  %v9209_v25 = vpop.f32.mrf.mxu0 }
 0x9ea   : > { %v9210_v48 = vadd.f32 %v9209_v25, %v14028_v24 }
 0x9eb   : > { %v9296_v40 = vmax.f32 %v9263_v3, 0.0 }
 0x9ed   : > { %v9324_v22 = vpack.c.bf16 %v9296_v40, %v9296_v40 }
 0x9ef   : > { %9343 = vrot.lane.b32.xlu0 %v9324_v22, %s10286_s22 }
 0x9f0   : > { %v9265_v32 = vpop.f32.mrf.mxu3 }
 0x9f1   : > { %v9266_v51 = vadd.f32 %v9265_v32, %v9195_v46  ;;  %v9212_v34 = vpop.f32.mrf.mxu0 }
 0x9f2   : > { %v9213_v38 = vadd.f32 %v9212_v34, %v14035_v54 }
 0x9f3   : > { %v9297_v33 = vmax.f32 %v9266_v51, 0.0 }
 0x9f5   : > { %v9325_v21 = vpack.c.bf16 %v9297_v33, %v9297_v33 }
 0x9f7   : > { %9345 = vrot.lane.b32.xlu1 %v9325_v21, %s10286_s22 }
 0x9f8   : > { %v9268_v27 = vpop.f32.mrf.mxu3 }
 0x9f9   : > { %v9269_v17 = vadd.f32 %v9268_v27, %v9198_v8 }
 0x9fb   : > { %v9298_v49 = vmax.f32 %v9269_v17, 0.0 }
 0x9fd   : > { %v9326_v9 = vpack.c.bf16 %v9298_v49, %v9298_v49 }
 0x9ff   : > { %9347 = vrot.lane.b32.xlu1 %v9326_v9, %s10286_s22 }
 0xa00   : > { %v9271_v29 = vpop.f32.mrf.mxu3 }
 0xa01   : > { %v9272_v11 = vadd.f32 %v9271_v29, %v9201_v62 }
 0xa03   : > { %v9299_v16 = vmax.f32 %v9272_v11, 0.0 }
 0xa05   : > { %v9327_v26 = vpack.c.bf16 %v9299_v16, %v9299_v16 }
 0xa07   : > { %9349 = vrot.lane.b32.xlu2 %v9327_v26, %s10286_s22 }
 0xa08   : > { %v9274_v47 = vpop.f32.mrf.mxu3 }
 0xa09   : > { %v9275_v6 = vadd.f32 %v9274_v47, %v9204_v42 }
 0xa0b   : > { %v9300_v5 = vmax.f32 %v9275_v6, 0.0 }
 0xa0d   : > { %v9328_v28 = vpack.c.bf16 %v9300_v5, %v9300_v5 }
 0xa0f   : > { %9351 = vrot.lane.b32.xlu2 %v9328_v28, %s10286_s22 }
 0xa10   : > { %v9277_v1 = vpop.f32.mrf.mxu3 }
 0xa11   : > { %v9278_v19 = vadd.f32 %v9277_v1, %v9207_v0 }
 0xa13   : > { %v9301_v13 = vmax.f32 %v9278_v19, 0.0 }
 0xa15   : > { %v9329_v12 = vpack.c.bf16 %v9301_v13, %v9301_v13 }
 0xa17   : > { %9353 = vrot.lane.b32.xlu0 %v9329_v12, %s10286_s22 }
 0xa18   : > { %v9280_v57 = vpop.f32.mrf.mxu3 }
 0xa19   : > { %v9281_v18 = vadd.f32 %v9280_v57, %v9210_v48 }
 0xa1b   : > { %v9302_v14 = vmax.f32 %v9281_v18, 0.0 }
 0xa1d   : > { %v9330_v41 = vpack.c.bf16 %v9302_v14, %v9302_v14 }
 0xa1f   : > { %9355 = vrot.lane.b32.xlu1 %v9330_v41, %s10286_s22 }
 0xa20   : > { %v9283_v45 = vpop.f32.mrf.mxu3 }
 0xa21   : > { %v9284_v30 = vadd.f32 %v9283_v45, %v9213_v38 }
 0xa23   : > { %v9303_v24 = vmax.f32 %v9284_v30, 0.0 }
 0xa25   : > { %v9331_v52 = vpack.c.bf16 %v9303_v24, %v9303_v24 }
 0xa27   : > { %9357 = vrot.lane.b32.xlu2 %v9331_v52, %s10286_s22 }
 0xa59   : > { %v9342_v4 = vpop.permute.xlu0 %9341 }
 0xa5a   : > { %9369 = vst.msk [vmem:[%s14049_s7] sm:$0xf] %vm9368_vm9, %v9342_v4 }
 0xa61   : > { %v9350_v35 = vpop.permute.xlu2 %9349  ;;  %v9344_v54 = vpop.permute.xlu0 %9343 }
 0xa62   : > { %9373 = vst.msk [vmem:[%s14049_s7 + $0x10] sm:$0xf] %vm9368_vm9, %v9350_v35 }
 0xa63   : > { %9370 = vst.msk [vmem:[%s14049_s7 + $0x4] sm:$0xf] %vm9368_vm9, %v9344_v54 }
 0xa69   : > { %v9352_v37 = vpop.permute.xlu2 %9351  ;;  %v9346_v39 = vpop.permute.xlu1 %9345 }
 0xa6a   : > { %9374 = vst.msk [vmem:[%s14049_s7 + $0x14] sm:$0xf] %vm9368_vm9, %v9352_v37 }
 0xa6b   : > { %9371 = vst.msk [vmem:[%s14049_s7 + $0x8] sm:$0xf] %vm9368_vm9, %v9346_v39 }
 0xa71   : > { %v9348_v2 = vpop.permute.xlu1 %9347 }
 0xa72   : > { %9372 = vst.msk [vmem:[%s14049_s7 + $0xc] sm:$0xf] %vm9368_vm9, %v9348_v2 }
 0xa81   : > { %v9358_v10 = vpop.permute.xlu2 %9357 }
 0xa82   : > { %9377 = vst.msk [vmem:[%s14049_s7 + $0x20] sm:$0xf] %vm9368_vm9, %v9358_v10 }
 0xa89   : > { %v9354_v20 = vpop.permute.xlu0 %9353 }
 0xa8a   : > { %9375 = vst.msk [vmem:[%s14049_s7 + $0x18] sm:$0xf] %vm9368_vm9, %v9354_v20 }
 0xa91   : > { %v9356_v61 = vpop.permute.xlu1 %9355 }
 0xa92   : > { %9376 = vst.msk [vmem:[%s14049_s7 + $0x1c] sm:$0xf] %vm9368_vm9, %v9356_v61 }
 0xa93 PF: > { %s16_s21 = sadd.s32 1, %s10283_s21  }
 0xa94   : > { %p13_p4 = scmp.ge.s32.totalorder %s16_s21, 4  }
 0xa96   :  { %15 = sbr.rel (!%p13_p4) target bundleno = 1 (0x1), region = 74 }

</bundles_post_ra>
